<compile_context>
chip_gen: v7x
topology: tpu7x:2x2x1
jax: 0.10.0
libtpu: 0.0.40
codegen_flags: <defaults>
</compile_context>

<pallas_src>
import numpy as np
import jax
import jax.numpy as jnp
from jax import lax
from jax.experimental import pallas as pl
from jax.experimental.pallas import tpu as pltpu


# (cin, cout, groups, stride) for the 10 layers, in forward order:
#   conv11, convpool1, conv21, convpool2, conv31, convpool3,
#   conv41, convpool4, conv51, convpool5
LAYER_CFGS = (
    (3,   64,  1, 1),
    (64,  16, 16, 2),
    (16,  64,  1, 1),
    (64,  24,  8, 2),
    (24,  64,  1, 1),
    (64,  32, 32, 2),
    (32,  64,  1, 1),
    (64,  96, 32, 2),
    (96,  64,  1, 1),
    (64, 320, 64, 2),
)
NUM_LAYERS = len(LAYER_CFGS)
CPAD = 128  # every layer's input-channel count (<= 96) is padded to 128 lanes


def _round_up(x, m):
    return ((x + m - 1) // m) * m


# ---------------------------------------------------------------------------
# Static per-layer plan (which tap strategy each layer uses).
# ---------------------------------------------------------------------------
def build_plans(H0, W0):
    plans = []
    h, w = H0, W0
    for (cin, cout, groups, stride) in LAYER_CFGS:
        ho = (h - 1) // stride + 1
        wo = (w - 1) // stride + 1
        P, Po = h * w, ho * wo
        if P >= 8:
            # "shift" path: zero-padded rows + static slices + column masks.
            assert (w & (w - 1)) == 0, "shift path assumes power-of-two width"
            plans.append(dict(kind="shift", h=h, w=w, P=P, stride=stride,
                              ho=ho, wo=wo, Po=Po))
        else:
            # "tiny" path: fully unrolled single-row dots (2x2 and 1x1 layers).
            pairs, tap_ids = [], []
            for oi in range(ho):
                for oj in range(wo):
                    lst = []
                    for dh in (-1, 0, 1):
                        for dw in (-1, 0, 1):
                            ii, jj = stride * oi + dh, stride * oj + dw
                            if 0 <= ii < h and 0 <= jj < w:
                                t = (dh + 1) * 3 + (dw + 1)
                                if t not in tap_ids:
                                    tap_ids.append(t)
                                lst.append((ii * w + jj, tap_ids.index(t)))
                    pairs.append(lst)
            plans.append(dict(kind="tiny", h=h, w=w, P=P, stride=stride,
                              ho=ho, wo=wo, Po=Po, pairs=pairs, tap_ids=tap_ids))
        h, w = ho, wo
    return plans


# ---------------------------------------------------------------------------
# Fused kernel: entire DepthBranch for ONE image (grid axis = batch).
#   refs = [x, W_0..W_9, B_0..B_9, S_* (stride-2 shift layers), out_0..out_4]
# ---------------------------------------------------------------------------
def _make_kernel(plans, n_select):
    n_layers = len(plans)

    def kernel(*refs):
        x_ref = refs[0]
        w_refs = refs[1:1 + n_layers]
        b_refs = refs[1 + n_layers:1 + 2 * n_layers]
        s_refs = refs[1 + 2 * n_layers:1 + 2 * n_layers + n_select]
        out_refs = refs[1 + 2 * n_layers + n_select:]

        x = x_ref[0]                      # (P0, CPAD) f32 activations
        s_i, out_i = 0, 0
        for l, plan in enumerate(plans):
            w_ref = w_refs[l]             # (T, CPAD, cpo) bf16
            bias = b_refs[l][...]         # (1, cpo) f32
            stride = plan["stride"]

            if plan["kind"] == "shift":
                w, P = plan["w"], plan["P"]
                pad = _round_up(w + 1, 8)                 # aligned zero rows
                zrows = jnp.zeros((pad, CPAD), jnp.float32)
                xp = jnp.concatenate([zrows, x, zrows], axis=0)
                rr = lax.broadcasted_iota(jnp.int32, (P, CPAD), 0)
                jj = jnp.bitwise_and(rr, w - 1)           # column index
                acc = None
                for dh in (-1, 0, 1):
                    for dw in (-1, 0, 1):
                        t = (dh + 1) * 3 + (dw + 1)
                        off = pad + dh * w + dw
                        tap = xp[off:off + P, :]          # static row slice
                        if dw == -1:
                            tap = jnp.where(jj >= 1, tap, 0.0)
                        elif dw == 1:
                            tap = jnp.where(jj <= w - 2, tap, 0.0)
                        part = jnp.dot(tap.astype(jnp.bfloat16), w_ref[t],
                                       preferred_element_type=jnp.float32)
                        acc = part if acc is None else acc + part
                if stride == 2:
                    # 0/1 row-select downsample (exact, tiny f32 matmul).
                    acc = jnp.dot(s_refs[s_i][...], acc,
                                  preferred_element_type=jnp.float32)
                    s_i += 1
            else:
                # tiny spatial layers (2x2 / 1x1): unrolled single-row dots;
                # the 1x1 layers reduce to one center-tap matmul.
                rows = []
                for lst in plan["pairs"]:
                    row = None
                    for (r, slot) in lst:
                        part = jnp.dot(x[r:r + 1, :].astype(jnp.bfloat16),
                                       w_ref[slot],
                                       preferred_element_type=jnp.float32)
                        row = part if row is None else row + part
                    rows.append(row)
                acc = rows[0] if len(rows) == 1 else jnp.concatenate(rows, axis=0)

            y = jnp.maximum(acc + bias, 0.0)              # f32 bias + ReLU
            if stride == 2:
                out_refs[out_i][0] = y                    # lane-dense f32 store
                out_i += 1
            x = y                                          # f32 activations

    return kernel


# ---------------------------------------------------------------------------
# Forward pass (matches DepthBranch.forward; NCHW in, NCHW outs)
# ---------------------------------------------------------------------------
@jax.jit
def depth_branch_forward(d, Ws, Bs, Ss):
    N, C, H, W = d.shape
    plans = build_plans(H, W)
    P0 = H * W
    x = jnp.transpose(d, (0, 2, 3, 1)).reshape(N, P0, C)
    x = jnp.pad(x, ((0, 0), (0, 0), (0, CPAD - C))).astype(jnp.float32)

    out_shapes, out_specs, out_meta = [], [], []
    for plan, wl, (cin, cout, groups, stride) in zip(plans, Ws, LAYER_CFGS):
        if stride == 2:
            cpo = wl.shape[2]
            out_shapes.append(
                jax.ShapeDtypeStruct((N, plan["Po"], cpo), jnp.float32))
            out_specs.append(
                pl.BlockSpec((1, plan["Po"], cpo), lambda n: (n, 0, 0)))
            out_meta.append((plan["ho"], plan["wo"], cout))

    in_specs = [pl.BlockSpec((1, P0, CPAD), lambda n: (n, 0, 0))]
    in_specs += [pl.BlockSpec(wl.shape, lambda n: (0, 0, 0)) for wl in Ws]
    in_specs += [pl.BlockSpec(bl.shape, lambda n: (0, 0)) for bl in Bs]
    in_specs += [pl.BlockSpec(sl.shape, lambda n: (0, 0)) for sl in Ss]

    # VMEM budget from actual resident buffers (+ headroom for intermediates);
    # ~20 MB here, comfortably under v7x's 64 MiB.
    fixed = sum(int(np.prod(a.shape)) * a.dtype.itemsize
                for a in (*Ws, *Bs, *Ss))
    blk = int(np.prod(x.shape[1:])) * 4
    ob = sum(int(np.prod(s.shape[1:])) * 4 for s in out_shapes)
    vmem_limit = int(fixed + 2 * (blk + ob) + (16 << 20))

    outs = pl.pallas_call(
        _make_kernel(plans, len(Ss)),
        out_shape=tuple(out_shapes),
        grid=(N,),
        in_specs=in_specs,
        out_specs=tuple(out_specs),
        compiler_params=pltpu.CompilerParams(
            dimension_semantics=("parallel",),
            vmem_limit_bytes=vmem_limit),
    )(x, *Ws, *Bs, *Ss)

    results = []
    for (ho, wo, cout), o in zip(out_meta, outs):
        r = o[:, :, :cout].reshape(N, ho, wo, cout)
        results.append(jnp.transpose(r, (0, 3, 1, 2)))    # back to NCHW
    return tuple(results)


# ---------------------------------------------------------------------------
# Parameter construction (deterministic, synthetic) and packing
# ---------------------------------------------------------------------------
def init_params(key):
    """Synthetic Conv2d weights in PyTorch (O, I/g, 3, 3) layout."""
    params = []
    for (cin, cout, groups, _stride) in LAYER_CFGS:
        key, kw, kb = jax.random.split(key, 3)
        fan_in = (cin // groups) * 9
        w = jax.random.normal(kw, (cout, cin // groups, 3, 3), jnp.float32)
        w = w * np.sqrt(2.0 / fan_in)
        b = 0.1 * jax.random.normal(kb, (cout,), jnp.float32)
        params.append((w, b))
    return params


def _expand_grouped(w, cin, groups):
    """(cout, cin//groups, 3, 3) grouped -> dense block-diagonal (cout, cin, 3, 3)."""
    cout = w.shape[0]
    cin_g = cin // groups
    out_g = cout // groups
    wd = np.zeros((cout, cin, 3, 3), np.float32)
    for g in range(groups):
        wd[g * out_g:(g + 1) * out_g, g * cin_g:(g + 1) * cin_g] = \
            w[g * out_g:(g + 1) * out_g]
    return wd


def pack_params(params, plans):
    """Per-layer packed weights (T, 128, cout_pad), biases, and select matrices."""
    Ws, Bs, Ss = [], [], []
    for (tw, tb), (cin, cout, groups, stride), plan in zip(params, LAYER_CFGS, plans):
        wd = _expand_grouped(np.asarray(tw), cin, groups)   # (cout, cin, 3, 3)
        cpo = _round_up(cout, CPAD)
        tap_ids = list(range(9)) if plan["kind"] == "shift" else plan["tap_ids"]
        wm = np.zeros((len(tap_ids), CPAD, cpo), np.float32)
        for slot, t in enumerate(tap_ids):
            kh, kw = t // 3, t % 3
            wm[slot, :cin, :cout] = wd[:, :, kh, kw].T
        bm = np.zeros((1, cpo), np.float32)
        bm[0, :cout] = np.asarray(tb)
        Ws.append(jnp.asarray(wm, jnp.bfloat16))
        Bs.append(jnp.asarray(bm, jnp.float32))
        if plan["kind"] == "shift" and stride == 2:
            h, w, ho, wo = plan["h"], plan["w"], plan["ho"], plan["wo"]
            S = np.zeros((ho * wo, h * w), np.float32)
            for oi in range(ho):
                for oj in range(wo):
                    S[oi * wo + oj, (stride * oi) * w + stride * oj] = 1.0
            Ss.append(jnp.asarray(S, jnp.float32))
    return tuple(Ws), tuple(Bs), tuple(Ss)


# ---------------------------------------------------------------------------
# Pure-JAX reference (numerical sanity check)
# ---------------------------------------------------------------------------
def reference_forward(d_nchw, params):
    x = d_nchw
    outs = []
    for (w, b), (_cin, _cout, groups, stride) in zip(params, LAYER_CFGS):
        y = lax.conv_general_dilated(
            x, w, window_strides=(stride, stride), padding=((1, 1), (1, 1)),
            dimension_numbers=("NCHW", "OIHW", "NCHW"),
            feature_group_count=groups)
        x = jnp.maximum(y + b[None, :, None, None], 0.0)
        if stride == 2:
            outs.append(x)
    return tuple(outs)


if __name__ == "__main__":
    key = jax.random.PRNGKey(0)
    k_in, k_par = jax.random.split(key)

    N, H, W = 2, 16, 16
    d = jax.random.normal(k_in, (N, 3, H, W), jnp.float32)   # NCHW like PyTorch

    params = init_params(k_par)
    plans = build_plans(H, W)
    Ws, Bs, Ss = pack_params(params, plans)

    outs = depth_branch_forward(d, Ws, Bs, Ss)
    outs = jax.block_until_ready(outs)

    expected = [(N, 16, 8, 8), (N, 24, 4, 4), (N, 32, 2, 2),
                (N, 96, 1, 1), (N, 320, 1, 1)]
    got = [tuple(map(int, o.shape)) for o in outs]
    assert got == expected, (got, expected)

    refs = reference_forward(d, params)
    for o, r in zip(outs, refs):
        np.testing.assert_allclose(np.asarray(o), np.asarray(r),
                                   rtol=0.15, atol=0.15)

    print("KERNEL_OK")
</pallas_src>

<mosaic_0001>
module attributes {stable_mosaic.version = 11 : i64} {
  func.func @kernel(%arg0: i32, %arg1: memref<1x256x128xf32, #tpu.memory_space<vmem>>, %arg2: memref<9x128x128xbf16, #tpu.memory_space<vmem>>, %arg3: memref<9x128x128xbf16, #tpu.memory_space<vmem>>, %arg4: memref<9x128x128xbf16, #tpu.memory_space<vmem>>, %arg5: memref<9x128x128xbf16, #tpu.memory_space<vmem>>, %arg6: memref<9x128x128xbf16, #tpu.memory_space<vmem>>, %arg7: memref<9x128x128xbf16, #tpu.memory_space<vmem>>, %arg8: memref<9x128x128xbf16, #tpu.memory_space<vmem>>, %arg9: memref<4x128x128xbf16, #tpu.memory_space<vmem>>, %arg10: memref<1x128x128xbf16, #tpu.memory_space<vmem>>, %arg11: memref<1x128x384xbf16, #tpu.memory_space<vmem>>, %arg12: memref<1x128xf32, #tpu.memory_space<vmem>>, %arg13: memref<1x128xf32, #tpu.memory_space<vmem>>, %arg14: memref<1x128xf32, #tpu.memory_space<vmem>>, %arg15: memref<1x128xf32, #tpu.memory_space<vmem>>, %arg16: memref<1x128xf32, #tpu.memory_space<vmem>>, %arg17: memref<1x128xf32, #tpu.memory_space<vmem>>, %arg18: memref<1x128xf32, #tpu.memory_space<vmem>>, %arg19: memref<1x128xf32, #tpu.memory_space<vmem>>, %arg20: memref<1x128xf32, #tpu.memory_space<vmem>>, %arg21: memref<1x384xf32, #tpu.memory_space<vmem>>, %arg22: memref<64x256xf32, #tpu.memory_space<vmem>>, %arg23: memref<16x64xf32, #tpu.memory_space<vmem>>, %arg24: memref<4x16xf32, #tpu.memory_space<vmem>>, %arg25: memref<1x64x128xf32, #tpu.memory_space<vmem>>, %arg26: memref<1x16x128xf32, #tpu.memory_space<vmem>>, %arg27: memref<1x4x128xf32, #tpu.memory_space<vmem>>, %arg28: memref<1x1x128xf32, #tpu.memory_space<vmem>>, %arg29: memref<1x1x384xf32, #tpu.memory_space<vmem>>) attributes {dimension_semantics = [#tpu.dimension_semantics<parallel>], iteration_bounds = array<i64: 2>, scalar_prefetch = 0 : i64, scratch_operands = 0 : i64, tpu.core_type = #tpu.core_type<tc>, window_params = [{transform_indices = @transform_0, window_bounds = array<i64: 1, 256, 128>}, {pipeline_mode = #tpu.pipeline_mode<synchronous>, transform_indices = @transform_1, window_bounds = array<i64: 9, 128, 128>}, {pipeline_mode = #tpu.pipeline_mode<synchronous>, transform_indices = @transform_2, window_bounds = array<i64: 9, 128, 128>}, {pipeline_mode = #tpu.pipeline_mode<synchronous>, transform_indices = @transform_3, window_bounds = array<i64: 9, 128, 128>}, {pipeline_mode = #tpu.pipeline_mode<synchronous>, transform_indices = @transform_4, window_bounds = array<i64: 9, 128, 128>}, {pipeline_mode = #tpu.pipeline_mode<synchronous>, transform_indices = @transform_5, window_bounds = array<i64: 9, 128, 128>}, {pipeline_mode = #tpu.pipeline_mode<synchronous>, transform_indices = @transform_6, window_bounds = array<i64: 9, 128, 128>}, {pipeline_mode = #tpu.pipeline_mode<synchronous>, transform_indices = @transform_7, window_bounds = array<i64: 9, 128, 128>}, {pipeline_mode = #tpu.pipeline_mode<synchronous>, transform_indices = @transform_8, window_bounds = array<i64: 4, 128, 128>}, {pipeline_mode = #tpu.pipeline_mode<synchronous>, transform_indices = @transform_9, window_bounds = array<i64: 1, 128, 128>}, {pipeline_mode = #tpu.pipeline_mode<synchronous>, transform_indices = @transform_10, window_bounds = array<i64: 1, 128, 384>}, {pipeline_mode = #tpu.pipeline_mode<synchronous>, transform_indices = @transform_11, window_bounds = array<i64: 1, 128>}, {pipeline_mode = #tpu.pipeline_mode<synchronous>, transform_indices = @transform_12, window_bounds = array<i64: 1, 128>}, {pipeline_mode = #tpu.pipeline_mode<synchronous>, transform_indices = @transform_13, window_bounds = array<i64: 1, 128>}, {pipeline_mode = #tpu.pipeline_mode<synchronous>, transform_indices = @transform_14, window_bounds = array<i64: 1, 128>}, {pipeline_mode = #tpu.pipeline_mode<synchronous>, transform_indices = @transform_15, window_bounds = array<i64: 1, 128>}, {pipeline_mode = #tpu.pipeline_mode<synchronous>, transform_indices = @transform_16, window_bounds = array<i64: 1, 128>}, {pipeline_mode = #tpu.pipeline_mode<synchronous>, transform_indices = @transform_17, window_bounds = array<i64: 1, 128>}, {pipeline_mode = #tpu.pipeline_mode<synchronous>, transform_indices = @transform_18, window_bounds = array<i64: 1, 128>}, {pipeline_mode = #tpu.pipeline_mode<synchronous>, transform_indices = @transform_19, window_bounds = array<i64: 1, 128>}, {pipeline_mode = #tpu.pipeline_mode<synchronous>, transform_indices = @transform_20, window_bounds = array<i64: 1, 384>}, {pipeline_mode = #tpu.pipeline_mode<synchronous>, transform_indices = @transform_21, window_bounds = array<i64: 64, 256>}, {pipeline_mode = #tpu.pipeline_mode<synchronous>, transform_indices = @transform_22, window_bounds = array<i64: 16, 64>}, {pipeline_mode = #tpu.pipeline_mode<synchronous>, transform_indices = @transform_23, window_bounds = array<i64: 4, 16>}, {transform_indices = @transform_24, window_bounds = array<i64: 1, 64, 128>}, {transform_indices = @transform_25, window_bounds = array<i64: 1, 16, 128>}, {transform_indices = @transform_26, window_bounds = array<i64: 1, 4, 128>}, {transform_indices = @transform_27, window_bounds = array<i64: 1, 1, 128>}, {transform_indices = @transform_28, window_bounds = array<i64: 1, 1, 384>}]} {
    %c0 = arith.constant 0 : index
    %c0_0 = arith.constant 0 : index
    %c0_1 = arith.constant 0 : index
    %0 = vector.load %arg1[%c0, %c0_0, %c0_1] : memref<1x256x128xf32, #tpu.memory_space<vmem>>, vector<1x256x128xf32>
    %1 = vector.shape_cast %0 : vector<1x256x128xf32> to vector<256x128xf32>
    %c0_2 = arith.constant 0 : index
    %c0_3 = arith.constant 0 : index
    %2 = vector.load %arg12[%c0_2, %c0_3] : memref<1x128xf32, #tpu.memory_space<vmem>>, vector<1x128xf32>
    %cst = arith.constant 0.000000e+00 : f32
    %3 = vector.broadcast %cst : f32 to vector<24x128xf32>
    %4 = tpu.concatenate %3, %1, %3 in 0 : vector<24x128xf32>, vector<256x128xf32>, vector<24x128xf32> -> vector<304x128xf32>
    %5 = tpu.iota {dimensions = array<i32: 0>} : vector<256x128xi32>
    %c15_i32 = arith.constant 15 : i32
    %6 = vector.broadcast %c15_i32 : i32 to vector<256x128xi32>
    %7 = arith.andi %5, %6 : vector<256x128xi32>
    %8 = vector.extract_strided_slice %4 {offsets = [7, 0], sizes = [256, 128], strides = [1, 1]} : vector<304x128xf32> to vector<256x128xf32>
    %c1_i32 = arith.constant 1 : i32
    %9 = vector.broadcast %c1_i32 : i32 to vector<256x128xi32>
    %10 = arith.cmpi sge, %7, %9 : vector<256x128xi32>
    %cst_4 = arith.constant 0.000000e+00 : f32
    %11 = vector.broadcast %cst_4 : f32 to vector<256x128xf32>
    %12 = arith.select %10, %8, %11 : vector<256x128xi1>, vector<256x128xf32>
    %13 = arith.truncf %12 : vector<256x128xf32> to vector<256x128xbf16>
    %c0_5 = arith.constant 0 : index
    %c0_6 = arith.constant 0 : index
    %c0_7 = arith.constant 0 : index
    %14 = vector.load %arg2[%c0_5, %c0_6, %c0_7] : memref<9x128x128xbf16, #tpu.memory_space<vmem>>, vector<1x128x128xbf16>
    %15 = vector.shape_cast %14 : vector<1x128x128xbf16> to vector<128x128xbf16>
    %cst_8 = arith.constant dense<0.000000e+00> : vector<256x128xf32>
    %16 = tpu.matmul %13, %15, %cst_8 {dimension_numbers = #tpu.dot_dimension_numbers<[1], [0], [0], [1], [0, 0, 1, 1], [], []>} : vector<256x128xbf16>, vector<128x128xbf16>, vector<256x128xf32> -> vector<256x128xf32>
    %17 = vector.extract_strided_slice %4 {offsets = [8, 0], sizes = [256, 128], strides = [1, 1]} : vector<304x128xf32> to vector<256x128xf32>
    %18 = arith.truncf %17 : vector<256x128xf32> to vector<256x128xbf16>
    %c1 = arith.constant 1 : index
    %c0_9 = arith.constant 0 : index
    %c0_10 = arith.constant 0 : index
    %19 = vector.load %arg2[%c1, %c0_9, %c0_10] : memref<9x128x128xbf16, #tpu.memory_space<vmem>>, vector<1x128x128xbf16>
    %20 = vector.shape_cast %19 : vector<1x128x128xbf16> to vector<128x128xbf16>
    %cst_11 = arith.constant dense<0.000000e+00> : vector<256x128xf32>
    %21 = tpu.matmul %18, %20, %cst_11 {dimension_numbers = #tpu.dot_dimension_numbers<[1], [0], [0], [1], [0, 0, 1, 1], [], []>} : vector<256x128xbf16>, vector<128x128xbf16>, vector<256x128xf32> -> vector<256x128xf32>
    %22 = arith.addf %16, %21 : vector<256x128xf32>
    %23 = vector.extract_strided_slice %4 {offsets = [9, 0], sizes = [256, 128], strides = [1, 1]} : vector<304x128xf32> to vector<256x128xf32>
    %c14_i32 = arith.constant 14 : i32
    %24 = vector.broadcast %c14_i32 : i32 to vector<256x128xi32>
    %25 = arith.cmpi sle, %7, %24 : vector<256x128xi32>
    %cst_12 = arith.constant 0.000000e+00 : f32
    %26 = vector.broadcast %cst_12 : f32 to vector<256x128xf32>
    %27 = arith.select %25, %23, %26 : vector<256x128xi1>, vector<256x128xf32>
    %28 = arith.truncf %27 : vector<256x128xf32> to vector<256x128xbf16>
    %c2 = arith.constant 2 : index
    %c0_13 = arith.constant 0 : index
    %c0_14 = arith.constant 0 : index
    %29 = vector.load %arg2[%c2, %c0_13, %c0_14] : memref<9x128x128xbf16, #tpu.memory_space<vmem>>, vector<1x128x128xbf16>
    %30 = vector.shape_cast %29 : vector<1x128x128xbf16> to vector<128x128xbf16>
    %cst_15 = arith.constant dense<0.000000e+00> : vector<256x128xf32>
    %31 = tpu.matmul %28, %30, %cst_15 {dimension_numbers = #tpu.dot_dimension_numbers<[1], [0], [0], [1], [0, 0, 1, 1], [], []>} : vector<256x128xbf16>, vector<128x128xbf16>, vector<256x128xf32> -> vector<256x128xf32>
    %32 = arith.addf %22, %31 : vector<256x128xf32>
    %33 = vector.extract_strided_slice %4 {offsets = [23, 0], sizes = [256, 128], strides = [1, 1]} : vector<304x128xf32> to vector<256x128xf32>
    %c1_i32_16 = arith.constant 1 : i32
    %34 = vector.broadcast %c1_i32_16 : i32 to vector<256x128xi32>
    %35 = arith.cmpi sge, %7, %34 : vector<256x128xi32>
    %cst_17 = arith.constant 0.000000e+00 : f32
    %36 = vector.broadcast %cst_17 : f32 to vector<256x128xf32>
    %37 = arith.select %35, %33, %36 : vector<256x128xi1>, vector<256x128xf32>
    %38 = arith.truncf %37 : vector<256x128xf32> to vector<256x128xbf16>
    %c3 = arith.constant 3 : index
    %c0_18 = arith.constant 0 : index
    %c0_19 = arith.constant 0 : index
    %39 = vector.load %arg2[%c3, %c0_18, %c0_19] : memref<9x128x128xbf16, #tpu.memory_space<vmem>>, vector<1x128x128xbf16>
    %40 = vector.shape_cast %39 : vector<1x128x128xbf16> to vector<128x128xbf16>
    %cst_20 = arith.constant dense<0.000000e+00> : vector<256x128xf32>
    %41 = tpu.matmul %38, %40, %cst_20 {dimension_numbers = #tpu.dot_dimension_numbers<[1], [0], [0], [1], [0, 0, 1, 1], [], []>} : vector<256x128xbf16>, vector<128x128xbf16>, vector<256x128xf32> -> vector<256x128xf32>
    %42 = arith.addf %32, %41 : vector<256x128xf32>
    %43 = vector.extract_strided_slice %4 {offsets = [24, 0], sizes = [256, 128], strides = [1, 1]} : vector<304x128xf32> to vector<256x128xf32>
    %44 = arith.truncf %43 : vector<256x128xf32> to vector<256x128xbf16>
    %c4 = arith.constant 4 : index
    %c0_21 = arith.constant 0 : index
    %c0_22 = arith.constant 0 : index
    %45 = vector.load %arg2[%c4, %c0_21, %c0_22] : memref<9x128x128xbf16, #tpu.memory_space<vmem>>, vector<1x128x128xbf16>
    %46 = vector.shape_cast %45 : vector<1x128x128xbf16> to vector<128x128xbf16>
    %cst_23 = arith.constant dense<0.000000e+00> : vector<256x128xf32>
    %47 = tpu.matmul %44, %46, %cst_23 {dimension_numbers = #tpu.dot_dimension_numbers<[1], [0], [0], [1], [0, 0, 1, 1], [], []>} : vector<256x128xbf16>, vector<128x128xbf16>, vector<256x128xf32> -> vector<256x128xf32>
    %48 = arith.addf %42, %47 : vector<256x128xf32>
    %49 = vector.extract_strided_slice %4 {offsets = [25, 0], sizes = [256, 128], strides = [1, 1]} : vector<304x128xf32> to vector<256x128xf32>
    %c14_i32_24 = arith.constant 14 : i32
    %50 = vector.broadcast %c14_i32_24 : i32 to vector<256x128xi32>
    %51 = arith.cmpi sle, %7, %50 : vector<256x128xi32>
    %cst_25 = arith.constant 0.000000e+00 : f32
    %52 = vector.broadcast %cst_25 : f32 to vector<256x128xf32>
    %53 = arith.select %51, %49, %52 : vector<256x128xi1>, vector<256x128xf32>
    %54 = arith.truncf %53 : vector<256x128xf32> to vector<256x128xbf16>
    %c5 = arith.constant 5 : index
    %c0_26 = arith.constant 0 : index
    %c0_27 = arith.constant 0 : index
    %55 = vector.load %arg2[%c5, %c0_26, %c0_27] : memref<9x128x128xbf16, #tpu.memory_space<vmem>>, vector<1x128x128xbf16>
    %56 = vector.shape_cast %55 : vector<1x128x128xbf16> to vector<128x128xbf16>
    %cst_28 = arith.constant dense<0.000000e+00> : vector<256x128xf32>
    %57 = tpu.matmul %54, %56, %cst_28 {dimension_numbers = #tpu.dot_dimension_numbers<[1], [0], [0], [1], [0, 0, 1, 1], [], []>} : vector<256x128xbf16>, vector<128x128xbf16>, vector<256x128xf32> -> vector<256x128xf32>
    %58 = arith.addf %48, %57 : vector<256x128xf32>
    %59 = vector.extract_strided_slice %4 {offsets = [39, 0], sizes = [256, 128], strides = [1, 1]} : vector<304x128xf32> to vector<256x128xf32>
    %c1_i32_29 = arith.constant 1 : i32
    %60 = vector.broadcast %c1_i32_29 : i32 to vector<256x128xi32>
    %61 = arith.cmpi sge, %7, %60 : vector<256x128xi32>
    %cst_30 = arith.constant 0.000000e+00 : f32
    %62 = vector.broadcast %cst_30 : f32 to vector<256x128xf32>
    %63 = arith.select %61, %59, %62 : vector<256x128xi1>, vector<256x128xf32>
    %64 = arith.truncf %63 : vector<256x128xf32> to vector<256x128xbf16>
    %c6 = arith.constant 6 : index
    %c0_31 = arith.constant 0 : index
    %c0_32 = arith.constant 0 : index
    %65 = vector.load %arg2[%c6, %c0_31, %c0_32] : memref<9x128x128xbf16, #tpu.memory_space<vmem>>, vector<1x128x128xbf16>
    %66 = vector.shape_cast %65 : vector<1x128x128xbf16> to vector<128x128xbf16>
    %cst_33 = arith.constant dense<0.000000e+00> : vector<256x128xf32>
    %67 = tpu.matmul %64, %66, %cst_33 {dimension_numbers = #tpu.dot_dimension_numbers<[1], [0], [0], [1], [0, 0, 1, 1], [], []>} : vector<256x128xbf16>, vector<128x128xbf16>, vector<256x128xf32> -> vector<256x128xf32>
    %68 = arith.addf %58, %67 : vector<256x128xf32>
    %69 = vector.extract_strided_slice %4 {offsets = [40, 0], sizes = [256, 128], strides = [1, 1]} : vector<304x128xf32> to vector<256x128xf32>
    %70 = arith.truncf %69 : vector<256x128xf32> to vector<256x128xbf16>
    %c7 = arith.constant 7 : index
    %c0_34 = arith.constant 0 : index
    %c0_35 = arith.constant 0 : index
    %71 = vector.load %arg2[%c7, %c0_34, %c0_35] : memref<9x128x128xbf16, #tpu.memory_space<vmem>>, vector<1x128x128xbf16>
    %72 = vector.shape_cast %71 : vector<1x128x128xbf16> to vector<128x128xbf16>
    %cst_36 = arith.constant dense<0.000000e+00> : vector<256x128xf32>
    %73 = tpu.matmul %70, %72, %cst_36 {dimension_numbers = #tpu.dot_dimension_numbers<[1], [0], [0], [1], [0, 0, 1, 1], [], []>} : vector<256x128xbf16>, vector<128x128xbf16>, vector<256x128xf32> -> vector<256x128xf32>
    %74 = arith.addf %68, %73 : vector<256x128xf32>
    %75 = vector.extract_strided_slice %4 {offsets = [41, 0], sizes = [256, 128], strides = [1, 1]} : vector<304x128xf32> to vector<256x128xf32>
    %c14_i32_37 = arith.constant 14 : i32
    %76 = vector.broadcast %c14_i32_37 : i32 to vector<256x128xi32>
    %77 = arith.cmpi sle, %7, %76 : vector<256x128xi32>
    %cst_38 = arith.constant 0.000000e+00 : f32
    %78 = vector.broadcast %cst_38 : f32 to vector<256x128xf32>
    %79 = arith.select %77, %75, %78 : vector<256x128xi1>, vector<256x128xf32>
    %80 = arith.truncf %79 : vector<256x128xf32> to vector<256x128xbf16>
    %c8 = arith.constant 8 : index
    %c0_39 = arith.constant 0 : index
    %c0_40 = arith.constant 0 : index
    %81 = vector.load %arg2[%c8, %c0_39, %c0_40] : memref<9x128x128xbf16, #tpu.memory_space<vmem>>, vector<1x128x128xbf16>
    %82 = vector.shape_cast %81 : vector<1x128x128xbf16> to vector<128x128xbf16>
    %cst_41 = arith.constant dense<0.000000e+00> : vector<256x128xf32>
    %83 = tpu.matmul %80, %82, %cst_41 {dimension_numbers = #tpu.dot_dimension_numbers<[1], [0], [0], [1], [0, 0, 1, 1], [], []>} : vector<256x128xbf16>, vector<128x128xbf16>, vector<256x128xf32> -> vector<256x128xf32>
    %84 = arith.addf %74, %83 : vector<256x128xf32>
    %85 = vector.broadcast %2 : vector<1x128xf32> to vector<256x128xf32>
    %86 = arith.addf %84, %85 : vector<256x128xf32>
    %cst_42 = arith.constant 0.000000e+00 : f32
    %87 = vector.broadcast %cst_42 : f32 to vector<256x128xf32>
    %88 = arith.maximumf %86, %87 : vector<256x128xf32>
    %c0_43 = arith.constant 0 : index
    %c0_44 = arith.constant 0 : index
    %89 = vector.load %arg13[%c0_43, %c0_44] : memref<1x128xf32, #tpu.memory_space<vmem>>, vector<1x128xf32>
    %cst_45 = arith.constant 0.000000e+00 : f32
    %90 = vector.broadcast %cst_45 : f32 to vector<24x128xf32>
    %91 = tpu.concatenate %90, %88, %90 in 0 : vector<24x128xf32>, vector<256x128xf32>, vector<24x128xf32> -> vector<304x128xf32>
    %92 = tpu.iota {dimensions = array<i32: 0>} : vector<256x128xi32>
    %c15_i32_46 = arith.constant 15 : i32
    %93 = vector.broadcast %c15_i32_46 : i32 to vector<256x128xi32>
    %94 = arith.andi %92, %93 : vector<256x128xi32>
    %95 = vector.extract_strided_slice %91 {offsets = [7, 0], sizes = [256, 128], strides = [1, 1]} : vector<304x128xf32> to vector<256x128xf32>
    %c1_i32_47 = arith.constant 1 : i32
    %96 = vector.broadcast %c1_i32_47 : i32 to vector<256x128xi32>
    %97 = arith.cmpi sge, %94, %96 : vector<256x128xi32>
    %cst_48 = arith.constant 0.000000e+00 : f32
    %98 = vector.broadcast %cst_48 : f32 to vector<256x128xf32>
    %99 = arith.select %97, %95, %98 : vector<256x128xi1>, vector<256x128xf32>
    %100 = arith.truncf %99 : vector<256x128xf32> to vector<256x128xbf16>
    %c0_49 = arith.constant 0 : index
    %c0_50 = arith.constant 0 : index
    %c0_51 = arith.constant 0 : index
    %101 = vector.load %arg3[%c0_49, %c0_50, %c0_51] : memref<9x128x128xbf16, #tpu.memory_space<vmem>>, vector<1x128x128xbf16>
    %102 = vector.shape_cast %101 : vector<1x128x128xbf16> to vector<128x128xbf16>
    %cst_52 = arith.constant dense<0.000000e+00> : vector<256x128xf32>
    %103 = tpu.matmul %100, %102, %cst_52 {dimension_numbers = #tpu.dot_dimension_numbers<[1], [0], [0], [1], [0, 0, 1, 1], [], []>} : vector<256x128xbf16>, vector<128x128xbf16>, vector<256x128xf32> -> vector<256x128xf32>
    %104 = vector.extract_strided_slice %91 {offsets = [8, 0], sizes = [256, 128], strides = [1, 1]} : vector<304x128xf32> to vector<256x128xf32>
    %105 = arith.truncf %104 : vector<256x128xf32> to vector<256x128xbf16>
    %c1_53 = arith.constant 1 : index
    %c0_54 = arith.constant 0 : index
    %c0_55 = arith.constant 0 : index
    %106 = vector.load %arg3[%c1_53, %c0_54, %c0_55] : memref<9x128x128xbf16, #tpu.memory_space<vmem>>, vector<1x128x128xbf16>
    %107 = vector.shape_cast %106 : vector<1x128x128xbf16> to vector<128x128xbf16>
    %cst_56 = arith.constant dense<0.000000e+00> : vector<256x128xf32>
    %108 = tpu.matmul %105, %107, %cst_56 {dimension_numbers = #tpu.dot_dimension_numbers<[1], [0], [0], [1], [0, 0, 1, 1], [], []>} : vector<256x128xbf16>, vector<128x128xbf16>, vector<256x128xf32> -> vector<256x128xf32>
    %109 = arith.addf %103, %108 : vector<256x128xf32>
    %110 = vector.extract_strided_slice %91 {offsets = [9, 0], sizes = [256, 128], strides = [1, 1]} : vector<304x128xf32> to vector<256x128xf32>
    %c14_i32_57 = arith.constant 14 : i32
    %111 = vector.broadcast %c14_i32_57 : i32 to vector<256x128xi32>
    %112 = arith.cmpi sle, %94, %111 : vector<256x128xi32>
    %cst_58 = arith.constant 0.000000e+00 : f32
    %113 = vector.broadcast %cst_58 : f32 to vector<256x128xf32>
    %114 = arith.select %112, %110, %113 : vector<256x128xi1>, vector<256x128xf32>
    %115 = arith.truncf %114 : vector<256x128xf32> to vector<256x128xbf16>
    %c2_59 = arith.constant 2 : index
    %c0_60 = arith.constant 0 : index
    %c0_61 = arith.constant 0 : index
    %116 = vector.load %arg3[%c2_59, %c0_60, %c0_61] : memref<9x128x128xbf16, #tpu.memory_space<vmem>>, vector<1x128x128xbf16>
    %117 = vector.shape_cast %116 : vector<1x128x128xbf16> to vector<128x128xbf16>
    %cst_62 = arith.constant dense<0.000000e+00> : vector<256x128xf32>
    %118 = tpu.matmul %115, %117, %cst_62 {dimension_numbers = #tpu.dot_dimension_numbers<[1], [0], [0], [1], [0, 0, 1, 1], [], []>} : vector<256x128xbf16>, vector<128x128xbf16>, vector<256x128xf32> -> vector<256x128xf32>
    %119 = arith.addf %109, %118 : vector<256x128xf32>
    %120 = vector.extract_strided_slice %91 {offsets = [23, 0], sizes = [256, 128], strides = [1, 1]} : vector<304x128xf32> to vector<256x128xf32>
    %c1_i32_63 = arith.constant 1 : i32
    %121 = vector.broadcast %c1_i32_63 : i32 to vector<256x128xi32>
    %122 = arith.cmpi sge, %94, %121 : vector<256x128xi32>
    %cst_64 = arith.constant 0.000000e+00 : f32
    %123 = vector.broadcast %cst_64 : f32 to vector<256x128xf32>
    %124 = arith.select %122, %120, %123 : vector<256x128xi1>, vector<256x128xf32>
    %125 = arith.truncf %124 : vector<256x128xf32> to vector<256x128xbf16>
    %c3_65 = arith.constant 3 : index
    %c0_66 = arith.constant 0 : index
    %c0_67 = arith.constant 0 : index
    %126 = vector.load %arg3[%c3_65, %c0_66, %c0_67] : memref<9x128x128xbf16, #tpu.memory_space<vmem>>, vector<1x128x128xbf16>
    %127 = vector.shape_cast %126 : vector<1x128x128xbf16> to vector<128x128xbf16>
    %cst_68 = arith.constant dense<0.000000e+00> : vector<256x128xf32>
    %128 = tpu.matmul %125, %127, %cst_68 {dimension_numbers = #tpu.dot_dimension_numbers<[1], [0], [0], [1], [0, 0, 1, 1], [], []>} : vector<256x128xbf16>, vector<128x128xbf16>, vector<256x128xf32> -> vector<256x128xf32>
    %129 = arith.addf %119, %128 : vector<256x128xf32>
    %130 = vector.extract_strided_slice %91 {offsets = [24, 0], sizes = [256, 128], strides = [1, 1]} : vector<304x128xf32> to vector<256x128xf32>
    %131 = arith.truncf %130 : vector<256x128xf32> to vector<256x128xbf16>
    %c4_69 = arith.constant 4 : index
    %c0_70 = arith.constant 0 : index
    %c0_71 = arith.constant 0 : index
    %132 = vector.load %arg3[%c4_69, %c0_70, %c0_71] : memref<9x128x128xbf16, #tpu.memory_space<vmem>>, vector<1x128x128xbf16>
    %133 = vector.shape_cast %132 : vector<1x128x128xbf16> to vector<128x128xbf16>
    %cst_72 = arith.constant dense<0.000000e+00> : vector<256x128xf32>
    %134 = tpu.matmul %131, %133, %cst_72 {dimension_numbers = #tpu.dot_dimension_numbers<[1], [0], [0], [1], [0, 0, 1, 1], [], []>} : vector<256x128xbf16>, vector<128x128xbf16>, vector<256x128xf32> -> vector<256x128xf32>
    %135 = arith.addf %129, %134 : vector<256x128xf32>
    %136 = vector.extract_strided_slice %91 {offsets = [25, 0], sizes = [256, 128], strides = [1, 1]} : vector<304x128xf32> to vector<256x128xf32>
    %c14_i32_73 = arith.constant 14 : i32
    %137 = vector.broadcast %c14_i32_73 : i32 to vector<256x128xi32>
    %138 = arith.cmpi sle, %94, %137 : vector<256x128xi32>
    %cst_74 = arith.constant 0.000000e+00 : f32
    %139 = vector.broadcast %cst_74 : f32 to vector<256x128xf32>
    %140 = arith.select %138, %136, %139 : vector<256x128xi1>, vector<256x128xf32>
    %141 = arith.truncf %140 : vector<256x128xf32> to vector<256x128xbf16>
    %c5_75 = arith.constant 5 : index
    %c0_76 = arith.constant 0 : index
    %c0_77 = arith.constant 0 : index
    %142 = vector.load %arg3[%c5_75, %c0_76, %c0_77] : memref<9x128x128xbf16, #tpu.memory_space<vmem>>, vector<1x128x128xbf16>
    %143 = vector.shape_cast %142 : vector<1x128x128xbf16> to vector<128x128xbf16>
    %cst_78 = arith.constant dense<0.000000e+00> : vector<256x128xf32>
    %144 = tpu.matmul %141, %143, %cst_78 {dimension_numbers = #tpu.dot_dimension_numbers<[1], [0], [0], [1], [0, 0, 1, 1], [], []>} : vector<256x128xbf16>, vector<128x128xbf16>, vector<256x128xf32> -> vector<256x128xf32>
    %145 = arith.addf %135, %144 : vector<256x128xf32>
    %146 = vector.extract_strided_slice %91 {offsets = [39, 0], sizes = [256, 128], strides = [1, 1]} : vector<304x128xf32> to vector<256x128xf32>
    %c1_i32_79 = arith.constant 1 : i32
    %147 = vector.broadcast %c1_i32_79 : i32 to vector<256x128xi32>
    %148 = arith.cmpi sge, %94, %147 : vector<256x128xi32>
    %cst_80 = arith.constant 0.000000e+00 : f32
    %149 = vector.broadcast %cst_80 : f32 to vector<256x128xf32>
    %150 = arith.select %148, %146, %149 : vector<256x128xi1>, vector<256x128xf32>
    %151 = arith.truncf %150 : vector<256x128xf32> to vector<256x128xbf16>
    %c6_81 = arith.constant 6 : index
    %c0_82 = arith.constant 0 : index
    %c0_83 = arith.constant 0 : index
    %152 = vector.load %arg3[%c6_81, %c0_82, %c0_83] : memref<9x128x128xbf16, #tpu.memory_space<vmem>>, vector<1x128x128xbf16>
    %153 = vector.shape_cast %152 : vector<1x128x128xbf16> to vector<128x128xbf16>
    %cst_84 = arith.constant dense<0.000000e+00> : vector<256x128xf32>
    %154 = tpu.matmul %151, %153, %cst_84 {dimension_numbers = #tpu.dot_dimension_numbers<[1], [0], [0], [1], [0, 0, 1, 1], [], []>} : vector<256x128xbf16>, vector<128x128xbf16>, vector<256x128xf32> -> vector<256x128xf32>
    %155 = arith.addf %145, %154 : vector<256x128xf32>
    %156 = vector.extract_strided_slice %91 {offsets = [40, 0], sizes = [256, 128], strides = [1, 1]} : vector<304x128xf32> to vector<256x128xf32>
    %157 = arith.truncf %156 : vector<256x128xf32> to vector<256x128xbf16>
    %c7_85 = arith.constant 7 : index
    %c0_86 = arith.constant 0 : index
    %c0_87 = arith.constant 0 : index
    %158 = vector.load %arg3[%c7_85, %c0_86, %c0_87] : memref<9x128x128xbf16, #tpu.memory_space<vmem>>, vector<1x128x128xbf16>
    %159 = vector.shape_cast %158 : vector<1x128x128xbf16> to vector<128x128xbf16>
    %cst_88 = arith.constant dense<0.000000e+00> : vector<256x128xf32>
    %160 = tpu.matmul %157, %159, %cst_88 {dimension_numbers = #tpu.dot_dimension_numbers<[1], [0], [0], [1], [0, 0, 1, 1], [], []>} : vector<256x128xbf16>, vector<128x128xbf16>, vector<256x128xf32> -> vector<256x128xf32>
    %161 = arith.addf %155, %160 : vector<256x128xf32>
    %162 = vector.extract_strided_slice %91 {offsets = [41, 0], sizes = [256, 128], strides = [1, 1]} : vector<304x128xf32> to vector<256x128xf32>
    %c14_i32_89 = arith.constant 14 : i32
    %163 = vector.broadcast %c14_i32_89 : i32 to vector<256x128xi32>
    %164 = arith.cmpi sle, %94, %163 : vector<256x128xi32>
    %cst_90 = arith.constant 0.000000e+00 : f32
    %165 = vector.broadcast %cst_90 : f32 to vector<256x128xf32>
    %166 = arith.select %164, %162, %165 : vector<256x128xi1>, vector<256x128xf32>
    %167 = arith.truncf %166 : vector<256x128xf32> to vector<256x128xbf16>
    %c8_91 = arith.constant 8 : index
    %c0_92 = arith.constant 0 : index
    %c0_93 = arith.constant 0 : index
    %168 = vector.load %arg3[%c8_91, %c0_92, %c0_93] : memref<9x128x128xbf16, #tpu.memory_space<vmem>>, vector<1x128x128xbf16>
    %169 = vector.shape_cast %168 : vector<1x128x128xbf16> to vector<128x128xbf16>
    %cst_94 = arith.constant dense<0.000000e+00> : vector<256x128xf32>
    %170 = tpu.matmul %167, %169, %cst_94 {dimension_numbers = #tpu.dot_dimension_numbers<[1], [0], [0], [1], [0, 0, 1, 1], [], []>} : vector<256x128xbf16>, vector<128x128xbf16>, vector<256x128xf32> -> vector<256x128xf32>
    %171 = arith.addf %161, %170 : vector<256x128xf32>
    %c0_95 = arith.constant 0 : index
    %c0_96 = arith.constant 0 : index
    %172 = vector.load %arg22[%c0_95, %c0_96] : memref<64x256xf32, #tpu.memory_space<vmem>>, vector<64x256xf32>
    %cst_97 = arith.constant dense<0.000000e+00> : vector<64x128xf32>
    %173 = tpu.matmul %172, %171, %cst_97 {dimension_numbers = #tpu.dot_dimension_numbers<[1], [0], [0], [1], [0, 0, 1, 1], [], []>} : vector<64x256xf32>, vector<256x128xf32>, vector<64x128xf32> -> vector<64x128xf32>
    %174 = vector.broadcast %89 : vector<1x128xf32> to vector<64x128xf32>
    %175 = arith.addf %173, %174 : vector<64x128xf32>
    %cst_98 = arith.constant 0.000000e+00 : f32
    %176 = vector.broadcast %cst_98 : f32 to vector<64x128xf32>
    %177 = arith.maximumf %175, %176 : vector<64x128xf32>
    %c0_99 = arith.constant 0 : index
    %c0_100 = arith.constant 0 : index
    %c0_101 = arith.constant 0 : index
    %178 = vector.load %arg25[%c0_99, %c0_100, %c0_101] : memref<1x64x128xf32, #tpu.memory_space<vmem>>, vector<1x64x128xf32>
    %179 = vector.shape_cast %178 : vector<1x64x128xf32> to vector<64x128xf32>
    %180 = vector.shape_cast %177 : vector<64x128xf32> to vector<1x64x128xf32>
    tpu.vector_store %arg25[%c0_99, %c0_100, %c0_101], %180 {strides = array<i32>} : memref<1x64x128xf32, #tpu.memory_space<vmem>>, vector<1x64x128xf32>,
    %c0_102 = arith.constant 0 : index
    %c0_103 = arith.constant 0 : index
    %181 = vector.load %arg14[%c0_102, %c0_103] : memref<1x128xf32, #tpu.memory_space<vmem>>, vector<1x128xf32>
    %cst_104 = arith.constant 0.000000e+00 : f32
    %182 = vector.broadcast %cst_104 : f32 to vector<16x128xf32>
    %183 = tpu.concatenate %182, %177, %182 in 0 : vector<16x128xf32>, vector<64x128xf32>, vector<16x128xf32> -> vector<96x128xf32>
    %184 = tpu.iota {dimensions = array<i32: 0>} : vector<64x128xi32>
    %c7_i32 = arith.constant 7 : i32
    %185 = vector.broadcast %c7_i32 : i32 to vector<64x128xi32>
    %186 = arith.andi %184, %185 : vector<64x128xi32>
    %187 = vector.extract_strided_slice %183 {offsets = [7, 0], sizes = [64, 128], strides = [1, 1]} : vector<96x128xf32> to vector<64x128xf32>
    %c1_i32_105 = arith.constant 1 : i32
    %188 = vector.broadcast %c1_i32_105 : i32 to vector<64x128xi32>
    %189 = arith.cmpi sge, %186, %188 : vector<64x128xi32>
    %cst_106 = arith.constant 0.000000e+00 : f32
    %190 = vector.broadcast %cst_106 : f32 to vector<64x128xf32>
    %191 = arith.select %189, %187, %190 : vector<64x128xi1>, vector<64x128xf32>
    %192 = arith.truncf %191 : vector<64x128xf32> to vector<64x128xbf16>
    %c0_107 = arith.constant 0 : index
    %c0_108 = arith.constant 0 : index
    %c0_109 = arith.constant 0 : index
    %193 = vector.load %arg4[%c0_107, %c0_108, %c0_109] : memref<9x128x128xbf16, #tpu.memory_space<vmem>>, vector<1x128x128xbf16>
    %194 = vector.shape_cast %193 : vector<1x128x128xbf16> to vector<128x128xbf16>
    %cst_110 = arith.constant dense<0.000000e+00> : vector<64x128xf32>
    %195 = tpu.matmul %192, %194, %cst_110 {dimension_numbers = #tpu.dot_dimension_numbers<[1], [0], [0], [1], [0, 0, 1, 1], [], []>} : vector<64x128xbf16>, vector<128x128xbf16>, vector<64x128xf32> -> vector<64x128xf32>
    %196 = vector.extract_strided_slice %183 {offsets = [8, 0], sizes = [64, 128], strides = [1, 1]} : vector<96x128xf32> to vector<64x128xf32>
    %197 = arith.truncf %196 : vector<64x128xf32> to vector<64x128xbf16>
    %c1_111 = arith.constant 1 : index
    %c0_112 = arith.constant 0 : index
    %c0_113 = arith.constant 0 : index
    %198 = vector.load %arg4[%c1_111, %c0_112, %c0_113] : memref<9x128x128xbf16, #tpu.memory_space<vmem>>, vector<1x128x128xbf16>
    %199 = vector.shape_cast %198 : vector<1x128x128xbf16> to vector<128x128xbf16>
    %cst_114 = arith.constant dense<0.000000e+00> : vector<64x128xf32>
    %200 = tpu.matmul %197, %199, %cst_114 {dimension_numbers = #tpu.dot_dimension_numbers<[1], [0], [0], [1], [0, 0, 1, 1], [], []>} : vector<64x128xbf16>, vector<128x128xbf16>, vector<64x128xf32> -> vector<64x128xf32>
    %201 = arith.addf %195, %200 : vector<64x128xf32>
    %202 = vector.extract_strided_slice %183 {offsets = [9, 0], sizes = [64, 128], strides = [1, 1]} : vector<96x128xf32> to vector<64x128xf32>
    %c6_i32 = arith.constant 6 : i32
    %203 = vector.broadcast %c6_i32 : i32 to vector<64x128xi32>
    %204 = arith.cmpi sle, %186, %203 : vector<64x128xi32>
    %cst_115 = arith.constant 0.000000e+00 : f32
    %205 = vector.broadcast %cst_115 : f32 to vector<64x128xf32>
    %206 = arith.select %204, %202, %205 : vector<64x128xi1>, vector<64x128xf32>
    %207 = arith.truncf %206 : vector<64x128xf32> to vector<64x128xbf16>
    %c2_116 = arith.constant 2 : index
    %c0_117 = arith.constant 0 : index
    %c0_118 = arith.constant 0 : index
    %208 = vector.load %arg4[%c2_116, %c0_117, %c0_118] : memref<9x128x128xbf16, #tpu.memory_space<vmem>>, vector<1x128x128xbf16>
    %209 = vector.shape_cast %208 : vector<1x128x128xbf16> to vector<128x128xbf16>
    %cst_119 = arith.constant dense<0.000000e+00> : vector<64x128xf32>
    %210 = tpu.matmul %207, %209, %cst_119 {dimension_numbers = #tpu.dot_dimension_numbers<[1], [0], [0], [1], [0, 0, 1, 1], [], []>} : vector<64x128xbf16>, vector<128x128xbf16>, vector<64x128xf32> -> vector<64x128xf32>
    %211 = arith.addf %201, %210 : vector<64x128xf32>
    %212 = vector.extract_strided_slice %183 {offsets = [15, 0], sizes = [64, 128], strides = [1, 1]} : vector<96x128xf32> to vector<64x128xf32>
    %c1_i32_120 = arith.constant 1 : i32
    %213 = vector.broadcast %c1_i32_120 : i32 to vector<64x128xi32>
    %214 = arith.cmpi sge, %186, %213 : vector<64x128xi32>
    %cst_121 = arith.constant 0.000000e+00 : f32
    %215 = vector.broadcast %cst_121 : f32 to vector<64x128xf32>
    %216 = arith.select %214, %212, %215 : vector<64x128xi1>, vector<64x128xf32>
    %217 = arith.truncf %216 : vector<64x128xf32> to vector<64x128xbf16>
    %c3_122 = arith.constant 3 : index
    %c0_123 = arith.constant 0 : index
    %c0_124 = arith.constant 0 : index
    %218 = vector.load %arg4[%c3_122, %c0_123, %c0_124] : memref<9x128x128xbf16, #tpu.memory_space<vmem>>, vector<1x128x128xbf16>
    %219 = vector.shape_cast %218 : vector<1x128x128xbf16> to vector<128x128xbf16>
    %cst_125 = arith.constant dense<0.000000e+00> : vector<64x128xf32>
    %220 = tpu.matmul %217, %219, %cst_125 {dimension_numbers = #tpu.dot_dimension_numbers<[1], [0], [0], [1], [0, 0, 1, 1], [], []>} : vector<64x128xbf16>, vector<128x128xbf16>, vector<64x128xf32> -> vector<64x128xf32>
    %221 = arith.addf %211, %220 : vector<64x128xf32>
    %222 = vector.extract_strided_slice %183 {offsets = [16, 0], sizes = [64, 128], strides = [1, 1]} : vector<96x128xf32> to vector<64x128xf32>
    %223 = arith.truncf %222 : vector<64x128xf32> to vector<64x128xbf16>
    %c4_126 = arith.constant 4 : index
    %c0_127 = arith.constant 0 : index
    %c0_128 = arith.constant 0 : index
    %224 = vector.load %arg4[%c4_126, %c0_127, %c0_128] : memref<9x128x128xbf16, #tpu.memory_space<vmem>>, vector<1x128x128xbf16>
    %225 = vector.shape_cast %224 : vector<1x128x128xbf16> to vector<128x128xbf16>
    %cst_129 = arith.constant dense<0.000000e+00> : vector<64x128xf32>
    %226 = tpu.matmul %223, %225, %cst_129 {dimension_numbers = #tpu.dot_dimension_numbers<[1], [0], [0], [1], [0, 0, 1, 1], [], []>} : vector<64x128xbf16>, vector<128x128xbf16>, vector<64x128xf32> -> vector<64x128xf32>
    %227 = arith.addf %221, %226 : vector<64x128xf32>
    %228 = vector.extract_strided_slice %183 {offsets = [17, 0], sizes = [64, 128], strides = [1, 1]} : vector<96x128xf32> to vector<64x128xf32>
    %c6_i32_130 = arith.constant 6 : i32
    %229 = vector.broadcast %c6_i32_130 : i32 to vector<64x128xi32>
    %230 = arith.cmpi sle, %186, %229 : vector<64x128xi32>
    %cst_131 = arith.constant 0.000000e+00 : f32
    %231 = vector.broadcast %cst_131 : f32 to vector<64x128xf32>
    %232 = arith.select %230, %228, %231 : vector<64x128xi1>, vector<64x128xf32>
    %233 = arith.truncf %232 : vector<64x128xf32> to vector<64x128xbf16>
    %c5_132 = arith.constant 5 : index
    %c0_133 = arith.constant 0 : index
    %c0_134 = arith.constant 0 : index
    %234 = vector.load %arg4[%c5_132, %c0_133, %c0_134] : memref<9x128x128xbf16, #tpu.memory_space<vmem>>, vector<1x128x128xbf16>
    %235 = vector.shape_cast %234 : vector<1x128x128xbf16> to vector<128x128xbf16>
    %cst_135 = arith.constant dense<0.000000e+00> : vector<64x128xf32>
    %236 = tpu.matmul %233, %235, %cst_135 {dimension_numbers = #tpu.dot_dimension_numbers<[1], [0], [0], [1], [0, 0, 1, 1], [], []>} : vector<64x128xbf16>, vector<128x128xbf16>, vector<64x128xf32> -> vector<64x128xf32>
    %237 = arith.addf %227, %236 : vector<64x128xf32>
    %238 = vector.extract_strided_slice %183 {offsets = [23, 0], sizes = [64, 128], strides = [1, 1]} : vector<96x128xf32> to vector<64x128xf32>
    %c1_i32_136 = arith.constant 1 : i32
    %239 = vector.broadcast %c1_i32_136 : i32 to vector<64x128xi32>
    %240 = arith.cmpi sge, %186, %239 : vector<64x128xi32>
    %cst_137 = arith.constant 0.000000e+00 : f32
    %241 = vector.broadcast %cst_137 : f32 to vector<64x128xf32>
    %242 = arith.select %240, %238, %241 : vector<64x128xi1>, vector<64x128xf32>
    %243 = arith.truncf %242 : vector<64x128xf32> to vector<64x128xbf16>
    %c6_138 = arith.constant 6 : index
    %c0_139 = arith.constant 0 : index
    %c0_140 = arith.constant 0 : index
    %244 = vector.load %arg4[%c6_138, %c0_139, %c0_140] : memref<9x128x128xbf16, #tpu.memory_space<vmem>>, vector<1x128x128xbf16>
    %245 = vector.shape_cast %244 : vector<1x128x128xbf16> to vector<128x128xbf16>
    %cst_141 = arith.constant dense<0.000000e+00> : vector<64x128xf32>
    %246 = tpu.matmul %243, %245, %cst_141 {dimension_numbers = #tpu.dot_dimension_numbers<[1], [0], [0], [1], [0, 0, 1, 1], [], []>} : vector<64x128xbf16>, vector<128x128xbf16>, vector<64x128xf32> -> vector<64x128xf32>
    %247 = arith.addf %237, %246 : vector<64x128xf32>
    %248 = vector.extract_strided_slice %183 {offsets = [24, 0], sizes = [64, 128], strides = [1, 1]} : vector<96x128xf32> to vector<64x128xf32>
    %249 = arith.truncf %248 : vector<64x128xf32> to vector<64x128xbf16>
    %c7_142 = arith.constant 7 : index
    %c0_143 = arith.constant 0 : index
    %c0_144 = arith.constant 0 : index
    %250 = vector.load %arg4[%c7_142, %c0_143, %c0_144] : memref<9x128x128xbf16, #tpu.memory_space<vmem>>, vector<1x128x128xbf16>
    %251 = vector.shape_cast %250 : vector<1x128x128xbf16> to vector<128x128xbf16>
    %cst_145 = arith.constant dense<0.000000e+00> : vector<64x128xf32>
    %252 = tpu.matmul %249, %251, %cst_145 {dimension_numbers = #tpu.dot_dimension_numbers<[1], [0], [0], [1], [0, 0, 1, 1], [], []>} : vector<64x128xbf16>, vector<128x128xbf16>, vector<64x128xf32> -> vector<64x128xf32>
    %253 = arith.addf %247, %252 : vector<64x128xf32>
    %254 = vector.extract_strided_slice %183 {offsets = [25, 0], sizes = [64, 128], strides = [1, 1]} : vector<96x128xf32> to vector<64x128xf32>
    %c6_i32_146 = arith.constant 6 : i32
    %255 = vector.broadcast %c6_i32_146 : i32 to vector<64x128xi32>
    %256 = arith.cmpi sle, %186, %255 : vector<64x128xi32>
    %cst_147 = arith.constant 0.000000e+00 : f32
    %257 = vector.broadcast %cst_147 : f32 to vector<64x128xf32>
    %258 = arith.select %256, %254, %257 : vector<64x128xi1>, vector<64x128xf32>
    %259 = arith.truncf %258 : vector<64x128xf32> to vector<64x128xbf16>
    %c8_148 = arith.constant 8 : index
    %c0_149 = arith.constant 0 : index
    %c0_150 = arith.constant 0 : index
    %260 = vector.load %arg4[%c8_148, %c0_149, %c0_150] : memref<9x128x128xbf16, #tpu.memory_space<vmem>>, vector<1x128x128xbf16>
    %261 = vector.shape_cast %260 : vector<1x128x128xbf16> to vector<128x128xbf16>
    %cst_151 = arith.constant dense<0.000000e+00> : vector<64x128xf32>
    %262 = tpu.matmul %259, %261, %cst_151 {dimension_numbers = #tpu.dot_dimension_numbers<[1], [0], [0], [1], [0, 0, 1, 1], [], []>} : vector<64x128xbf16>, vector<128x128xbf16>, vector<64x128xf32> -> vector<64x128xf32>
    %263 = arith.addf %253, %262 : vector<64x128xf32>
    %264 = vector.broadcast %181 : vector<1x128xf32> to vector<64x128xf32>
    %265 = arith.addf %263, %264 : vector<64x128xf32>
    %cst_152 = arith.constant 0.000000e+00 : f32
    %266 = vector.broadcast %cst_152 : f32 to vector<64x128xf32>
    %267 = arith.maximumf %265, %266 : vector<64x128xf32>
    %c0_153 = arith.constant 0 : index
    %c0_154 = arith.constant 0 : index
    %268 = vector.load %arg15[%c0_153, %c0_154] : memref<1x128xf32, #tpu.memory_space<vmem>>, vector<1x128xf32>
    %cst_155 = arith.constant 0.000000e+00 : f32
    %269 = vector.broadcast %cst_155 : f32 to vector<16x128xf32>
    %270 = tpu.concatenate %269, %267, %269 in 0 : vector<16x128xf32>, vector<64x128xf32>, vector<16x128xf32> -> vector<96x128xf32>
    %271 = tpu.iota {dimensions = array<i32: 0>} : vector<64x128xi32>
    %c7_i32_156 = arith.constant 7 : i32
    %272 = vector.broadcast %c7_i32_156 : i32 to vector<64x128xi32>
    %273 = arith.andi %271, %272 : vector<64x128xi32>
    %274 = vector.extract_strided_slice %270 {offsets = [7, 0], sizes = [64, 128], strides = [1, 1]} : vector<96x128xf32> to vector<64x128xf32>
    %c1_i32_157 = arith.constant 1 : i32
    %275 = vector.broadcast %c1_i32_157 : i32 to vector<64x128xi32>
    %276 = arith.cmpi sge, %273, %275 : vector<64x128xi32>
    %cst_158 = arith.constant 0.000000e+00 : f32
    %277 = vector.broadcast %cst_158 : f32 to vector<64x128xf32>
    %278 = arith.select %276, %274, %277 : vector<64x128xi1>, vector<64x128xf32>
    %279 = arith.truncf %278 : vector<64x128xf32> to vector<64x128xbf16>
    %c0_159 = arith.constant 0 : index
    %c0_160 = arith.constant 0 : index
    %c0_161 = arith.constant 0 : index
    %280 = vector.load %arg5[%c0_159, %c0_160, %c0_161] : memref<9x128x128xbf16, #tpu.memory_space<vmem>>, vector<1x128x128xbf16>
    %281 = vector.shape_cast %280 : vector<1x128x128xbf16> to vector<128x128xbf16>
    %cst_162 = arith.constant dense<0.000000e+00> : vector<64x128xf32>
    %282 = tpu.matmul %279, %281, %cst_162 {dimension_numbers = #tpu.dot_dimension_numbers<[1], [0], [0], [1], [0, 0, 1, 1], [], []>} : vector<64x128xbf16>, vector<128x128xbf16>, vector<64x128xf32> -> vector<64x128xf32>
    %283 = vector.extract_strided_slice %270 {offsets = [8, 0], sizes = [64, 128], strides = [1, 1]} : vector<96x128xf32> to vector<64x128xf32>
    %284 = arith.truncf %283 : vector<64x128xf32> to vector<64x128xbf16>
    %c1_163 = arith.constant 1 : index
    %c0_164 = arith.constant 0 : index
    %c0_165 = arith.constant 0 : index
    %285 = vector.load %arg5[%c1_163, %c0_164, %c0_165] : memref<9x128x128xbf16, #tpu.memory_space<vmem>>, vector<1x128x128xbf16>
    %286 = vector.shape_cast %285 : vector<1x128x128xbf16> to vector<128x128xbf16>
    %cst_166 = arith.constant dense<0.000000e+00> : vector<64x128xf32>
    %287 = tpu.matmul %284, %286, %cst_166 {dimension_numbers = #tpu.dot_dimension_numbers<[1], [0], [0], [1], [0, 0, 1, 1], [], []>} : vector<64x128xbf16>, vector<128x128xbf16>, vector<64x128xf32> -> vector<64x128xf32>
    %288 = arith.addf %282, %287 : vector<64x128xf32>
    %289 = vector.extract_strided_slice %270 {offsets = [9, 0], sizes = [64, 128], strides = [1, 1]} : vector<96x128xf32> to vector<64x128xf32>
    %c6_i32_167 = arith.constant 6 : i32
    %290 = vector.broadcast %c6_i32_167 : i32 to vector<64x128xi32>
    %291 = arith.cmpi sle, %273, %290 : vector<64x128xi32>
    %cst_168 = arith.constant 0.000000e+00 : f32
    %292 = vector.broadcast %cst_168 : f32 to vector<64x128xf32>
    %293 = arith.select %291, %289, %292 : vector<64x128xi1>, vector<64x128xf32>
    %294 = arith.truncf %293 : vector<64x128xf32> to vector<64x128xbf16>
    %c2_169 = arith.constant 2 : index
    %c0_170 = arith.constant 0 : index
    %c0_171 = arith.constant 0 : index
    %295 = vector.load %arg5[%c2_169, %c0_170, %c0_171] : memref<9x128x128xbf16, #tpu.memory_space<vmem>>, vector<1x128x128xbf16>
    %296 = vector.shape_cast %295 : vector<1x128x128xbf16> to vector<128x128xbf16>
    %cst_172 = arith.constant dense<0.000000e+00> : vector<64x128xf32>
    %297 = tpu.matmul %294, %296, %cst_172 {dimension_numbers = #tpu.dot_dimension_numbers<[1], [0], [0], [1], [0, 0, 1, 1], [], []>} : vector<64x128xbf16>, vector<128x128xbf16>, vector<64x128xf32> -> vector<64x128xf32>
    %298 = arith.addf %288, %297 : vector<64x128xf32>
    %299 = vector.extract_strided_slice %270 {offsets = [15, 0], sizes = [64, 128], strides = [1, 1]} : vector<96x128xf32> to vector<64x128xf32>
    %c1_i32_173 = arith.constant 1 : i32
    %300 = vector.broadcast %c1_i32_173 : i32 to vector<64x128xi32>
    %301 = arith.cmpi sge, %273, %300 : vector<64x128xi32>
    %cst_174 = arith.constant 0.000000e+00 : f32
    %302 = vector.broadcast %cst_174 : f32 to vector<64x128xf32>
    %303 = arith.select %301, %299, %302 : vector<64x128xi1>, vector<64x128xf32>
    %304 = arith.truncf %303 : vector<64x128xf32> to vector<64x128xbf16>
    %c3_175 = arith.constant 3 : index
    %c0_176 = arith.constant 0 : index
    %c0_177 = arith.constant 0 : index
    %305 = vector.load %arg5[%c3_175, %c0_176, %c0_177] : memref<9x128x128xbf16, #tpu.memory_space<vmem>>, vector<1x128x128xbf16>
    %306 = vector.shape_cast %305 : vector<1x128x128xbf16> to vector<128x128xbf16>
    %cst_178 = arith.constant dense<0.000000e+00> : vector<64x128xf32>
    %307 = tpu.matmul %304, %306, %cst_178 {dimension_numbers = #tpu.dot_dimension_numbers<[1], [0], [0], [1], [0, 0, 1, 1], [], []>} : vector<64x128xbf16>, vector<128x128xbf16>, vector<64x128xf32> -> vector<64x128xf32>
    %308 = arith.addf %298, %307 : vector<64x128xf32>
    %309 = vector.extract_strided_slice %270 {offsets = [16, 0], sizes = [64, 128], strides = [1, 1]} : vector<96x128xf32> to vector<64x128xf32>
    %310 = arith.truncf %309 : vector<64x128xf32> to vector<64x128xbf16>
    %c4_179 = arith.constant 4 : index
    %c0_180 = arith.constant 0 : index
    %c0_181 = arith.constant 0 : index
    %311 = vector.load %arg5[%c4_179, %c0_180, %c0_181] : memref<9x128x128xbf16, #tpu.memory_space<vmem>>, vector<1x128x128xbf16>
    %312 = vector.shape_cast %311 : vector<1x128x128xbf16> to vector<128x128xbf16>
    %cst_182 = arith.constant dense<0.000000e+00> : vector<64x128xf32>
    %313 = tpu.matmul %310, %312, %cst_182 {dimension_numbers = #tpu.dot_dimension_numbers<[1], [0], [0], [1], [0, 0, 1, 1], [], []>} : vector<64x128xbf16>, vector<128x128xbf16>, vector<64x128xf32> -> vector<64x128xf32>
    %314 = arith.addf %308, %313 : vector<64x128xf32>
    %315 = vector.extract_strided_slice %270 {offsets = [17, 0], sizes = [64, 128], strides = [1, 1]} : vector<96x128xf32> to vector<64x128xf32>
    %c6_i32_183 = arith.constant 6 : i32
    %316 = vector.broadcast %c6_i32_183 : i32 to vector<64x128xi32>
    %317 = arith.cmpi sle, %273, %316 : vector<64x128xi32>
    %cst_184 = arith.constant 0.000000e+00 : f32
    %318 = vector.broadcast %cst_184 : f32 to vector<64x128xf32>
    %319 = arith.select %317, %315, %318 : vector<64x128xi1>, vector<64x128xf32>
    %320 = arith.truncf %319 : vector<64x128xf32> to vector<64x128xbf16>
    %c5_185 = arith.constant 5 : index
    %c0_186 = arith.constant 0 : index
    %c0_187 = arith.constant 0 : index
    %321 = vector.load %arg5[%c5_185, %c0_186, %c0_187] : memref<9x128x128xbf16, #tpu.memory_space<vmem>>, vector<1x128x128xbf16>
    %322 = vector.shape_cast %321 : vector<1x128x128xbf16> to vector<128x128xbf16>
    %cst_188 = arith.constant dense<0.000000e+00> : vector<64x128xf32>
    %323 = tpu.matmul %320, %322, %cst_188 {dimension_numbers = #tpu.dot_dimension_numbers<[1], [0], [0], [1], [0, 0, 1, 1], [], []>} : vector<64x128xbf16>, vector<128x128xbf16>, vector<64x128xf32> -> vector<64x128xf32>
    %324 = arith.addf %314, %323 : vector<64x128xf32>
    %325 = vector.extract_strided_slice %270 {offsets = [23, 0], sizes = [64, 128], strides = [1, 1]} : vector<96x128xf32> to vector<64x128xf32>
    %c1_i32_189 = arith.constant 1 : i32
    %326 = vector.broadcast %c1_i32_189 : i32 to vector<64x128xi32>
    %327 = arith.cmpi sge, %273, %326 : vector<64x128xi32>
    %cst_190 = arith.constant 0.000000e+00 : f32
    %328 = vector.broadcast %cst_190 : f32 to vector<64x128xf32>
    %329 = arith.select %327, %325, %328 : vector<64x128xi1>, vector<64x128xf32>
    %330 = arith.truncf %329 : vector<64x128xf32> to vector<64x128xbf16>
    %c6_191 = arith.constant 6 : index
    %c0_192 = arith.constant 0 : index
    %c0_193 = arith.constant 0 : index
    %331 = vector.load %arg5[%c6_191, %c0_192, %c0_193] : memref<9x128x128xbf16, #tpu.memory_space<vmem>>, vector<1x128x128xbf16>
    %332 = vector.shape_cast %331 : vector<1x128x128xbf16> to vector<128x128xbf16>
    %cst_194 = arith.constant dense<0.000000e+00> : vector<64x128xf32>
    %333 = tpu.matmul %330, %332, %cst_194 {dimension_numbers = #tpu.dot_dimension_numbers<[1], [0], [0], [1], [0, 0, 1, 1], [], []>} : vector<64x128xbf16>, vector<128x128xbf16>, vector<64x128xf32> -> vector<64x128xf32>
    %334 = arith.addf %324, %333 : vector<64x128xf32>
    %335 = vector.extract_strided_slice %270 {offsets = [24, 0], sizes = [64, 128], strides = [1, 1]} : vector<96x128xf32> to vector<64x128xf32>
    %336 = arith.truncf %335 : vector<64x128xf32> to vector<64x128xbf16>
    %c7_195 = arith.constant 7 : index
    %c0_196 = arith.constant 0 : index
    %c0_197 = arith.constant 0 : index
    %337 = vector.load %arg5[%c7_195, %c0_196, %c0_197] : memref<9x128x128xbf16, #tpu.memory_space<vmem>>, vector<1x128x128xbf16>
    %338 = vector.shape_cast %337 : vector<1x128x128xbf16> to vector<128x128xbf16>
    %cst_198 = arith.constant dense<0.000000e+00> : vector<64x128xf32>
    %339 = tpu.matmul %336, %338, %cst_198 {dimension_numbers = #tpu.dot_dimension_numbers<[1], [0], [0], [1], [0, 0, 1, 1], [], []>} : vector<64x128xbf16>, vector<128x128xbf16>, vector<64x128xf32> -> vector<64x128xf32>
    %340 = arith.addf %334, %339 : vector<64x128xf32>
    %341 = vector.extract_strided_slice %270 {offsets = [25, 0], sizes = [64, 128], strides = [1, 1]} : vector<96x128xf32> to vector<64x128xf32>
    %c6_i32_199 = arith.constant 6 : i32
    %342 = vector.broadcast %c6_i32_199 : i32 to vector<64x128xi32>
    %343 = arith.cmpi sle, %273, %342 : vector<64x128xi32>
    %cst_200 = arith.constant 0.000000e+00 : f32
    %344 = vector.broadcast %cst_200 : f32 to vector<64x128xf32>
    %345 = arith.select %343, %341, %344 : vector<64x128xi1>, vector<64x128xf32>
    %346 = arith.truncf %345 : vector<64x128xf32> to vector<64x128xbf16>
    %c8_201 = arith.constant 8 : index
    %c0_202 = arith.constant 0 : index
    %c0_203 = arith.constant 0 : index
    %347 = vector.load %arg5[%c8_201, %c0_202, %c0_203] : memref<9x128x128xbf16, #tpu.memory_space<vmem>>, vector<1x128x128xbf16>
    %348 = vector.shape_cast %347 : vector<1x128x128xbf16> to vector<128x128xbf16>
    %cst_204 = arith.constant dense<0.000000e+00> : vector<64x128xf32>
    %349 = tpu.matmul %346, %348, %cst_204 {dimension_numbers = #tpu.dot_dimension_numbers<[1], [0], [0], [1], [0, 0, 1, 1], [], []>} : vector<64x128xbf16>, vector<128x128xbf16>, vector<64x128xf32> -> vector<64x128xf32>
    %350 = arith.addf %340, %349 : vector<64x128xf32>
    %c0_205 = arith.constant 0 : index
    %c0_206 = arith.constant 0 : index
    %351 = vector.load %arg23[%c0_205, %c0_206] : memref<16x64xf32, #tpu.memory_space<vmem>>, vector<16x64xf32>
    %cst_207 = arith.constant dense<0.000000e+00> : vector<16x128xf32>
    %352 = tpu.matmul %351, %350, %cst_207 {dimension_numbers = #tpu.dot_dimension_numbers<[1], [0], [0], [1], [0, 0, 1, 1], [], []>} : vector<16x64xf32>, vector<64x128xf32>, vector<16x128xf32> -> vector<16x128xf32>
    %353 = vector.broadcast %268 : vector<1x128xf32> to vector<16x128xf32>
    %354 = arith.addf %352, %353 : vector<16x128xf32>
    %cst_208 = arith.constant 0.000000e+00 : f32
    %355 = vector.broadcast %cst_208 : f32 to vector<16x128xf32>
    %356 = arith.maximumf %354, %355 : vector<16x128xf32>
    %c0_209 = arith.constant 0 : index
    %c0_210 = arith.constant 0 : index
    %c0_211 = arith.constant 0 : index
    %357 = vector.load %arg26[%c0_209, %c0_210, %c0_211] : memref<1x16x128xf32, #tpu.memory_space<vmem>>, vector<1x16x128xf32>
    %358 = vector.shape_cast %357 : vector<1x16x128xf32> to vector<16x128xf32>
    %359 = vector.shape_cast %356 : vector<16x128xf32> to vector<1x16x128xf32>
    tpu.vector_store %arg26[%c0_209, %c0_210, %c0_211], %359 {strides = array<i32>} : memref<1x16x128xf32, #tpu.memory_space<vmem>>, vector<1x16x128xf32>,
    %c0_212 = arith.constant 0 : index
    %c0_213 = arith.constant 0 : index
    %360 = vector.load %arg16[%c0_212, %c0_213] : memref<1x128xf32, #tpu.memory_space<vmem>>, vector<1x128xf32>
    %cst_214 = arith.constant 0.000000e+00 : f32
    %361 = vector.broadcast %cst_214 : f32 to vector<8x128xf32>
    %362 = tpu.concatenate %361, %356, %361 in 0 : vector<8x128xf32>, vector<16x128xf32>, vector<8x128xf32> -> vector<32x128xf32>
    %363 = tpu.iota {dimensions = array<i32: 0>} : vector<16x128xi32>
    %c3_i32 = arith.constant 3 : i32
    %364 = vector.broadcast %c3_i32 : i32 to vector<16x128xi32>
    %365 = arith.andi %363, %364 : vector<16x128xi32>
    %366 = vector.extract_strided_slice %362 {offsets = [3, 0], sizes = [16, 128], strides = [1, 1]} : vector<32x128xf32> to vector<16x128xf32>
    %c1_i32_215 = arith.constant 1 : i32
    %367 = vector.broadcast %c1_i32_215 : i32 to vector<16x128xi32>
    %368 = arith.cmpi sge, %365, %367 : vector<16x128xi32>
    %cst_216 = arith.constant 0.000000e+00 : f32
    %369 = vector.broadcast %cst_216 : f32 to vector<16x128xf32>
    %370 = arith.select %368, %366, %369 : vector<16x128xi1>, vector<16x128xf32>
    %371 = arith.truncf %370 : vector<16x128xf32> to vector<16x128xbf16>
    %c0_217 = arith.constant 0 : index
    %c0_218 = arith.constant 0 : index
    %c0_219 = arith.constant 0 : index
    %372 = vector.load %arg6[%c0_217, %c0_218, %c0_219] : memref<9x128x128xbf16, #tpu.memory_space<vmem>>, vector<1x128x128xbf16>
    %373 = vector.shape_cast %372 : vector<1x128x128xbf16> to vector<128x128xbf16>
    %cst_220 = arith.constant dense<0.000000e+00> : vector<16x128xf32>
    %374 = tpu.matmul %371, %373, %cst_220 {dimension_numbers = #tpu.dot_dimension_numbers<[1], [0], [0], [1], [0, 0, 1, 1], [], []>} : vector<16x128xbf16>, vector<128x128xbf16>, vector<16x128xf32> -> vector<16x128xf32>
    %375 = vector.extract_strided_slice %362 {offsets = [4, 0], sizes = [16, 128], strides = [1, 1]} : vector<32x128xf32> to vector<16x128xf32>
    %376 = arith.truncf %375 : vector<16x128xf32> to vector<16x128xbf16>
    %c1_221 = arith.constant 1 : index
    %c0_222 = arith.constant 0 : index
    %c0_223 = arith.constant 0 : index
    %377 = vector.load %arg6[%c1_221, %c0_222, %c0_223] : memref<9x128x128xbf16, #tpu.memory_space<vmem>>, vector<1x128x128xbf16>
    %378 = vector.shape_cast %377 : vector<1x128x128xbf16> to vector<128x128xbf16>
    %cst_224 = arith.constant dense<0.000000e+00> : vector<16x128xf32>
    %379 = tpu.matmul %376, %378, %cst_224 {dimension_numbers = #tpu.dot_dimension_numbers<[1], [0], [0], [1], [0, 0, 1, 1], [], []>} : vector<16x128xbf16>, vector<128x128xbf16>, vector<16x128xf32> -> vector<16x128xf32>
    %380 = arith.addf %374, %379 : vector<16x128xf32>
    %381 = vector.extract_strided_slice %362 {offsets = [5, 0], sizes = [16, 128], strides = [1, 1]} : vector<32x128xf32> to vector<16x128xf32>
    %c2_i32 = arith.constant 2 : i32
    %382 = vector.broadcast %c2_i32 : i32 to vector<16x128xi32>
    %383 = arith.cmpi sle, %365, %382 : vector<16x128xi32>
    %cst_225 = arith.constant 0.000000e+00 : f32
    %384 = vector.broadcast %cst_225 : f32 to vector<16x128xf32>
    %385 = arith.select %383, %381, %384 : vector<16x128xi1>, vector<16x128xf32>
    %386 = arith.truncf %385 : vector<16x128xf32> to vector<16x128xbf16>
    %c2_226 = arith.constant 2 : index
    %c0_227 = arith.constant 0 : index
    %c0_228 = arith.constant 0 : index
    %387 = vector.load %arg6[%c2_226, %c0_227, %c0_228] : memref<9x128x128xbf16, #tpu.memory_space<vmem>>, vector<1x128x128xbf16>
    %388 = vector.shape_cast %387 : vector<1x128x128xbf16> to vector<128x128xbf16>
    %cst_229 = arith.constant dense<0.000000e+00> : vector<16x128xf32>
    %389 = tpu.matmul %386, %388, %cst_229 {dimension_numbers = #tpu.dot_dimension_numbers<[1], [0], [0], [1], [0, 0, 1, 1], [], []>} : vector<16x128xbf16>, vector<128x128xbf16>, vector<16x128xf32> -> vector<16x128xf32>
    %390 = arith.addf %380, %389 : vector<16x128xf32>
    %391 = vector.extract_strided_slice %362 {offsets = [7, 0], sizes = [16, 128], strides = [1, 1]} : vector<32x128xf32> to vector<16x128xf32>
    %c1_i32_230 = arith.constant 1 : i32
    %392 = vector.broadcast %c1_i32_230 : i32 to vector<16x128xi32>
    %393 = arith.cmpi sge, %365, %392 : vector<16x128xi32>
    %cst_231 = arith.constant 0.000000e+00 : f32
    %394 = vector.broadcast %cst_231 : f32 to vector<16x128xf32>
    %395 = arith.select %393, %391, %394 : vector<16x128xi1>, vector<16x128xf32>
    %396 = arith.truncf %395 : vector<16x128xf32> to vector<16x128xbf16>
    %c3_232 = arith.constant 3 : index
    %c0_233 = arith.constant 0 : index
    %c0_234 = arith.constant 0 : index
    %397 = vector.load %arg6[%c3_232, %c0_233, %c0_234] : memref<9x128x128xbf16, #tpu.memory_space<vmem>>, vector<1x128x128xbf16>
    %398 = vector.shape_cast %397 : vector<1x128x128xbf16> to vector<128x128xbf16>
    %cst_235 = arith.constant dense<0.000000e+00> : vector<16x128xf32>
    %399 = tpu.matmul %396, %398, %cst_235 {dimension_numbers = #tpu.dot_dimension_numbers<[1], [0], [0], [1], [0, 0, 1, 1], [], []>} : vector<16x128xbf16>, vector<128x128xbf16>, vector<16x128xf32> -> vector<16x128xf32>
    %400 = arith.addf %390, %399 : vector<16x128xf32>
    %401 = vector.extract_strided_slice %362 {offsets = [8, 0], sizes = [16, 128], strides = [1, 1]} : vector<32x128xf32> to vector<16x128xf32>
    %402 = arith.truncf %401 : vector<16x128xf32> to vector<16x128xbf16>
    %c4_236 = arith.constant 4 : index
    %c0_237 = arith.constant 0 : index
    %c0_238 = arith.constant 0 : index
    %403 = vector.load %arg6[%c4_236, %c0_237, %c0_238] : memref<9x128x128xbf16, #tpu.memory_space<vmem>>, vector<1x128x128xbf16>
    %404 = vector.shape_cast %403 : vector<1x128x128xbf16> to vector<128x128xbf16>
    %cst_239 = arith.constant dense<0.000000e+00> : vector<16x128xf32>
    %405 = tpu.matmul %402, %404, %cst_239 {dimension_numbers = #tpu.dot_dimension_numbers<[1], [0], [0], [1], [0, 0, 1, 1], [], []>} : vector<16x128xbf16>, vector<128x128xbf16>, vector<16x128xf32> -> vector<16x128xf32>
    %406 = arith.addf %400, %405 : vector<16x128xf32>
    %407 = vector.extract_strided_slice %362 {offsets = [9, 0], sizes = [16, 128], strides = [1, 1]} : vector<32x128xf32> to vector<16x128xf32>
    %c2_i32_240 = arith.constant 2 : i32
    %408 = vector.broadcast %c2_i32_240 : i32 to vector<16x128xi32>
    %409 = arith.cmpi sle, %365, %408 : vector<16x128xi32>
    %cst_241 = arith.constant 0.000000e+00 : f32
    %410 = vector.broadcast %cst_241 : f32 to vector<16x128xf32>
    %411 = arith.select %409, %407, %410 : vector<16x128xi1>, vector<16x128xf32>
    %412 = arith.truncf %411 : vector<16x128xf32> to vector<16x128xbf16>
    %c5_242 = arith.constant 5 : index
    %c0_243 = arith.constant 0 : index
    %c0_244 = arith.constant 0 : index
    %413 = vector.load %arg6[%c5_242, %c0_243, %c0_244] : memref<9x128x128xbf16, #tpu.memory_space<vmem>>, vector<1x128x128xbf16>
    %414 = vector.shape_cast %413 : vector<1x128x128xbf16> to vector<128x128xbf16>
    %cst_245 = arith.constant dense<0.000000e+00> : vector<16x128xf32>
    %415 = tpu.matmul %412, %414, %cst_245 {dimension_numbers = #tpu.dot_dimension_numbers<[1], [0], [0], [1], [0, 0, 1, 1], [], []>} : vector<16x128xbf16>, vector<128x128xbf16>, vector<16x128xf32> -> vector<16x128xf32>
    %416 = arith.addf %406, %415 : vector<16x128xf32>
    %417 = vector.extract_strided_slice %362 {offsets = [11, 0], sizes = [16, 128], strides = [1, 1]} : vector<32x128xf32> to vector<16x128xf32>
    %c1_i32_246 = arith.constant 1 : i32
    %418 = vector.broadcast %c1_i32_246 : i32 to vector<16x128xi32>
    %419 = arith.cmpi sge, %365, %418 : vector<16x128xi32>
    %cst_247 = arith.constant 0.000000e+00 : f32
    %420 = vector.broadcast %cst_247 : f32 to vector<16x128xf32>
    %421 = arith.select %419, %417, %420 : vector<16x128xi1>, vector<16x128xf32>
    %422 = arith.truncf %421 : vector<16x128xf32> to vector<16x128xbf16>
    %c6_248 = arith.constant 6 : index
    %c0_249 = arith.constant 0 : index
    %c0_250 = arith.constant 0 : index
    %423 = vector.load %arg6[%c6_248, %c0_249, %c0_250] : memref<9x128x128xbf16, #tpu.memory_space<vmem>>, vector<1x128x128xbf16>
    %424 = vector.shape_cast %423 : vector<1x128x128xbf16> to vector<128x128xbf16>
    %cst_251 = arith.constant dense<0.000000e+00> : vector<16x128xf32>
    %425 = tpu.matmul %422, %424, %cst_251 {dimension_numbers = #tpu.dot_dimension_numbers<[1], [0], [0], [1], [0, 0, 1, 1], [], []>} : vector<16x128xbf16>, vector<128x128xbf16>, vector<16x128xf32> -> vector<16x128xf32>
    %426 = arith.addf %416, %425 : vector<16x128xf32>
    %427 = vector.extract_strided_slice %362 {offsets = [12, 0], sizes = [16, 128], strides = [1, 1]} : vector<32x128xf32> to vector<16x128xf32>
    %428 = arith.truncf %427 : vector<16x128xf32> to vector<16x128xbf16>
    %c7_252 = arith.constant 7 : index
    %c0_253 = arith.constant 0 : index
    %c0_254 = arith.constant 0 : index
    %429 = vector.load %arg6[%c7_252, %c0_253, %c0_254] : memref<9x128x128xbf16, #tpu.memory_space<vmem>>, vector<1x128x128xbf16>
    %430 = vector.shape_cast %429 : vector<1x128x128xbf16> to vector<128x128xbf16>
    %cst_255 = arith.constant dense<0.000000e+00> : vector<16x128xf32>
    %431 = tpu.matmul %428, %430, %cst_255 {dimension_numbers = #tpu.dot_dimension_numbers<[1], [0], [0], [1], [0, 0, 1, 1], [], []>} : vector<16x128xbf16>, vector<128x128xbf16>, vector<16x128xf32> -> vector<16x128xf32>
    %432 = arith.addf %426, %431 : vector<16x128xf32>
    %433 = vector.extract_strided_slice %362 {offsets = [13, 0], sizes = [16, 128], strides = [1, 1]} : vector<32x128xf32> to vector<16x128xf32>
    %c2_i32_256 = arith.constant 2 : i32
    %434 = vector.broadcast %c2_i32_256 : i32 to vector<16x128xi32>
    %435 = arith.cmpi sle, %365, %434 : vector<16x128xi32>
    %cst_257 = arith.constant 0.000000e+00 : f32
    %436 = vector.broadcast %cst_257 : f32 to vector<16x128xf32>
    %437 = arith.select %435, %433, %436 : vector<16x128xi1>, vector<16x128xf32>
    %438 = arith.truncf %437 : vector<16x128xf32> to vector<16x128xbf16>
    %c8_258 = arith.constant 8 : index
    %c0_259 = arith.constant 0 : index
    %c0_260 = arith.constant 0 : index
    %439 = vector.load %arg6[%c8_258, %c0_259, %c0_260] : memref<9x128x128xbf16, #tpu.memory_space<vmem>>, vector<1x128x128xbf16>
    %440 = vector.shape_cast %439 : vector<1x128x128xbf16> to vector<128x128xbf16>
    %cst_261 = arith.constant dense<0.000000e+00> : vector<16x128xf32>
    %441 = tpu.matmul %438, %440, %cst_261 {dimension_numbers = #tpu.dot_dimension_numbers<[1], [0], [0], [1], [0, 0, 1, 1], [], []>} : vector<16x128xbf16>, vector<128x128xbf16>, vector<16x128xf32> -> vector<16x128xf32>
    %442 = arith.addf %432, %441 : vector<16x128xf32>
    %443 = vector.broadcast %360 : vector<1x128xf32> to vector<16x128xf32>
    %444 = arith.addf %442, %443 : vector<16x128xf32>
    %cst_262 = arith.constant 0.000000e+00 : f32
    %445 = vector.broadcast %cst_262 : f32 to vector<16x128xf32>
    %446 = arith.maximumf %444, %445 : vector<16x128xf32>
    %c0_263 = arith.constant 0 : index
    %c0_264 = arith.constant 0 : index
    %447 = vector.load %arg17[%c0_263, %c0_264] : memref<1x128xf32, #tpu.memory_space<vmem>>, vector<1x128xf32>
    %cst_265 = arith.constant 0.000000e+00 : f32
    %448 = vector.broadcast %cst_265 : f32 to vector<8x128xf32>
    %449 = tpu.concatenate %448, %446, %448 in 0 : vector<8x128xf32>, vector<16x128xf32>, vector<8x128xf32> -> vector<32x128xf32>
    %450 = tpu.iota {dimensions = array<i32: 0>} : vector<16x128xi32>
    %c3_i32_266 = arith.constant 3 : i32
    %451 = vector.broadcast %c3_i32_266 : i32 to vector<16x128xi32>
    %452 = arith.andi %450, %451 : vector<16x128xi32>
    %453 = vector.extract_strided_slice %449 {offsets = [3, 0], sizes = [16, 128], strides = [1, 1]} : vector<32x128xf32> to vector<16x128xf32>
    %c1_i32_267 = arith.constant 1 : i32
    %454 = vector.broadcast %c1_i32_267 : i32 to vector<16x128xi32>
    %455 = arith.cmpi sge, %452, %454 : vector<16x128xi32>
    %cst_268 = arith.constant 0.000000e+00 : f32
    %456 = vector.broadcast %cst_268 : f32 to vector<16x128xf32>
    %457 = arith.select %455, %453, %456 : vector<16x128xi1>, vector<16x128xf32>
    %458 = arith.truncf %457 : vector<16x128xf32> to vector<16x128xbf16>
    %c0_269 = arith.constant 0 : index
    %c0_270 = arith.constant 0 : index
    %c0_271 = arith.constant 0 : index
    %459 = vector.load %arg7[%c0_269, %c0_270, %c0_271] : memref<9x128x128xbf16, #tpu.memory_space<vmem>>, vector<1x128x128xbf16>
    %460 = vector.shape_cast %459 : vector<1x128x128xbf16> to vector<128x128xbf16>
    %cst_272 = arith.constant dense<0.000000e+00> : vector<16x128xf32>
    %461 = tpu.matmul %458, %460, %cst_272 {dimension_numbers = #tpu.dot_dimension_numbers<[1], [0], [0], [1], [0, 0, 1, 1], [], []>} : vector<16x128xbf16>, vector<128x128xbf16>, vector<16x128xf32> -> vector<16x128xf32>
    %462 = vector.extract_strided_slice %449 {offsets = [4, 0], sizes = [16, 128], strides = [1, 1]} : vector<32x128xf32> to vector<16x128xf32>
    %463 = arith.truncf %462 : vector<16x128xf32> to vector<16x128xbf16>
    %c1_273 = arith.constant 1 : index
    %c0_274 = arith.constant 0 : index
    %c0_275 = arith.constant 0 : index
    %464 = vector.load %arg7[%c1_273, %c0_274, %c0_275] : memref<9x128x128xbf16, #tpu.memory_space<vmem>>, vector<1x128x128xbf16>
    %465 = vector.shape_cast %464 : vector<1x128x128xbf16> to vector<128x128xbf16>
    %cst_276 = arith.constant dense<0.000000e+00> : vector<16x128xf32>
    %466 = tpu.matmul %463, %465, %cst_276 {dimension_numbers = #tpu.dot_dimension_numbers<[1], [0], [0], [1], [0, 0, 1, 1], [], []>} : vector<16x128xbf16>, vector<128x128xbf16>, vector<16x128xf32> -> vector<16x128xf32>
    %467 = arith.addf %461, %466 : vector<16x128xf32>
    %468 = vector.extract_strided_slice %449 {offsets = [5, 0], sizes = [16, 128], strides = [1, 1]} : vector<32x128xf32> to vector<16x128xf32>
    %c2_i32_277 = arith.constant 2 : i32
    %469 = vector.broadcast %c2_i32_277 : i32 to vector<16x128xi32>
    %470 = arith.cmpi sle, %452, %469 : vector<16x128xi32>
    %cst_278 = arith.constant 0.000000e+00 : f32
    %471 = vector.broadcast %cst_278 : f32 to vector<16x128xf32>
    %472 = arith.select %470, %468, %471 : vector<16x128xi1>, vector<16x128xf32>
    %473 = arith.truncf %472 : vector<16x128xf32> to vector<16x128xbf16>
    %c2_279 = arith.constant 2 : index
    %c0_280 = arith.constant 0 : index
    %c0_281 = arith.constant 0 : index
    %474 = vector.load %arg7[%c2_279, %c0_280, %c0_281] : memref<9x128x128xbf16, #tpu.memory_space<vmem>>, vector<1x128x128xbf16>
    %475 = vector.shape_cast %474 : vector<1x128x128xbf16> to vector<128x128xbf16>
    %cst_282 = arith.constant dense<0.000000e+00> : vector<16x128xf32>
    %476 = tpu.matmul %473, %475, %cst_282 {dimension_numbers = #tpu.dot_dimension_numbers<[1], [0], [0], [1], [0, 0, 1, 1], [], []>} : vector<16x128xbf16>, vector<128x128xbf16>, vector<16x128xf32> -> vector<16x128xf32>
    %477 = arith.addf %467, %476 : vector<16x128xf32>
    %478 = vector.extract_strided_slice %449 {offsets = [7, 0], sizes = [16, 128], strides = [1, 1]} : vector<32x128xf32> to vector<16x128xf32>
    %c1_i32_283 = arith.constant 1 : i32
    %479 = vector.broadcast %c1_i32_283 : i32 to vector<16x128xi32>
    %480 = arith.cmpi sge, %452, %479 : vector<16x128xi32>
    %cst_284 = arith.constant 0.000000e+00 : f32
    %481 = vector.broadcast %cst_284 : f32 to vector<16x128xf32>
    %482 = arith.select %480, %478, %481 : vector<16x128xi1>, vector<16x128xf32>
    %483 = arith.truncf %482 : vector<16x128xf32> to vector<16x128xbf16>
    %c3_285 = arith.constant 3 : index
    %c0_286 = arith.constant 0 : index
    %c0_287 = arith.constant 0 : index
    %484 = vector.load %arg7[%c3_285, %c0_286, %c0_287] : memref<9x128x128xbf16, #tpu.memory_space<vmem>>, vector<1x128x128xbf16>
    %485 = vector.shape_cast %484 : vector<1x128x128xbf16> to vector<128x128xbf16>
    %cst_288 = arith.constant dense<0.000000e+00> : vector<16x128xf32>
    %486 = tpu.matmul %483, %485, %cst_288 {dimension_numbers = #tpu.dot_dimension_numbers<[1], [0], [0], [1], [0, 0, 1, 1], [], []>} : vector<16x128xbf16>, vector<128x128xbf16>, vector<16x128xf32> -> vector<16x128xf32>
    %487 = arith.addf %477, %486 : vector<16x128xf32>
    %488 = vector.extract_strided_slice %449 {offsets = [8, 0], sizes = [16, 128], strides = [1, 1]} : vector<32x128xf32> to vector<16x128xf32>
    %489 = arith.truncf %488 : vector<16x128xf32> to vector<16x128xbf16>
    %c4_289 = arith.constant 4 : index
    %c0_290 = arith.constant 0 : index
    %c0_291 = arith.constant 0 : index
    %490 = vector.load %arg7[%c4_289, %c0_290, %c0_291] : memref<9x128x128xbf16, #tpu.memory_space<vmem>>, vector<1x128x128xbf16>
    %491 = vector.shape_cast %490 : vector<1x128x128xbf16> to vector<128x128xbf16>
    %cst_292 = arith.constant dense<0.000000e+00> : vector<16x128xf32>
    %492 = tpu.matmul %489, %491, %cst_292 {dimension_numbers = #tpu.dot_dimension_numbers<[1], [0], [0], [1], [0, 0, 1, 1], [], []>} : vector<16x128xbf16>, vector<128x128xbf16>, vector<16x128xf32> -> vector<16x128xf32>
    %493 = arith.addf %487, %492 : vector<16x128xf32>
    %494 = vector.extract_strided_slice %449 {offsets = [9, 0], sizes = [16, 128], strides = [1, 1]} : vector<32x128xf32> to vector<16x128xf32>
    %c2_i32_293 = arith.constant 2 : i32
    %495 = vector.broadcast %c2_i32_293 : i32 to vector<16x128xi32>
    %496 = arith.cmpi sle, %452, %495 : vector<16x128xi32>
    %cst_294 = arith.constant 0.000000e+00 : f32
    %497 = vector.broadcast %cst_294 : f32 to vector<16x128xf32>
    %498 = arith.select %496, %494, %497 : vector<16x128xi1>, vector<16x128xf32>
    %499 = arith.truncf %498 : vector<16x128xf32> to vector<16x128xbf16>
    %c5_295 = arith.constant 5 : index
    %c0_296 = arith.constant 0 : index
    %c0_297 = arith.constant 0 : index
    %500 = vector.load %arg7[%c5_295, %c0_296, %c0_297] : memref<9x128x128xbf16, #tpu.memory_space<vmem>>, vector<1x128x128xbf16>
    %501 = vector.shape_cast %500 : vector<1x128x128xbf16> to vector<128x128xbf16>
    %cst_298 = arith.constant dense<0.000000e+00> : vector<16x128xf32>
    %502 = tpu.matmul %499, %501, %cst_298 {dimension_numbers = #tpu.dot_dimension_numbers<[1], [0], [0], [1], [0, 0, 1, 1], [], []>} : vector<16x128xbf16>, vector<128x128xbf16>, vector<16x128xf32> -> vector<16x128xf32>
    %503 = arith.addf %493, %502 : vector<16x128xf32>
    %504 = vector.extract_strided_slice %449 {offsets = [11, 0], sizes = [16, 128], strides = [1, 1]} : vector<32x128xf32> to vector<16x128xf32>
    %c1_i32_299 = arith.constant 1 : i32
    %505 = vector.broadcast %c1_i32_299 : i32 to vector<16x128xi32>
    %506 = arith.cmpi sge, %452, %505 : vector<16x128xi32>
    %cst_300 = arith.constant 0.000000e+00 : f32
    %507 = vector.broadcast %cst_300 : f32 to vector<16x128xf32>
    %508 = arith.select %506, %504, %507 : vector<16x128xi1>, vector<16x128xf32>
    %509 = arith.truncf %508 : vector<16x128xf32> to vector<16x128xbf16>
    %c6_301 = arith.constant 6 : index
    %c0_302 = arith.constant 0 : index
    %c0_303 = arith.constant 0 : index
    %510 = vector.load %arg7[%c6_301, %c0_302, %c0_303] : memref<9x128x128xbf16, #tpu.memory_space<vmem>>, vector<1x128x128xbf16>
    %511 = vector.shape_cast %510 : vector<1x128x128xbf16> to vector<128x128xbf16>
    %cst_304 = arith.constant dense<0.000000e+00> : vector<16x128xf32>
    %512 = tpu.matmul %509, %511, %cst_304 {dimension_numbers = #tpu.dot_dimension_numbers<[1], [0], [0], [1], [0, 0, 1, 1], [], []>} : vector<16x128xbf16>, vector<128x128xbf16>, vector<16x128xf32> -> vector<16x128xf32>
    %513 = arith.addf %503, %512 : vector<16x128xf32>
    %514 = vector.extract_strided_slice %449 {offsets = [12, 0], sizes = [16, 128], strides = [1, 1]} : vector<32x128xf32> to vector<16x128xf32>
    %515 = arith.truncf %514 : vector<16x128xf32> to vector<16x128xbf16>
    %c7_305 = arith.constant 7 : index
    %c0_306 = arith.constant 0 : index
    %c0_307 = arith.constant 0 : index
    %516 = vector.load %arg7[%c7_305, %c0_306, %c0_307] : memref<9x128x128xbf16, #tpu.memory_space<vmem>>, vector<1x128x128xbf16>
    %517 = vector.shape_cast %516 : vector<1x128x128xbf16> to vector<128x128xbf16>
    %cst_308 = arith.constant dense<0.000000e+00> : vector<16x128xf32>
    %518 = tpu.matmul %515, %517, %cst_308 {dimension_numbers = #tpu.dot_dimension_numbers<[1], [0], [0], [1], [0, 0, 1, 1], [], []>} : vector<16x128xbf16>, vector<128x128xbf16>, vector<16x128xf32> -> vector<16x128xf32>
    %519 = arith.addf %513, %518 : vector<16x128xf32>
    %520 = vector.extract_strided_slice %449 {offsets = [13, 0], sizes = [16, 128], strides = [1, 1]} : vector<32x128xf32> to vector<16x128xf32>
    %c2_i32_309 = arith.constant 2 : i32
    %521 = vector.broadcast %c2_i32_309 : i32 to vector<16x128xi32>
    %522 = arith.cmpi sle, %452, %521 : vector<16x128xi32>
    %cst_310 = arith.constant 0.000000e+00 : f32
    %523 = vector.broadcast %cst_310 : f32 to vector<16x128xf32>
    %524 = arith.select %522, %520, %523 : vector<16x128xi1>, vector<16x128xf32>
    %525 = arith.truncf %524 : vector<16x128xf32> to vector<16x128xbf16>
    %c8_311 = arith.constant 8 : index
    %c0_312 = arith.constant 0 : index
    %c0_313 = arith.constant 0 : index
    %526 = vector.load %arg7[%c8_311, %c0_312, %c0_313] : memref<9x128x128xbf16, #tpu.memory_space<vmem>>, vector<1x128x128xbf16>
    %527 = vector.shape_cast %526 : vector<1x128x128xbf16> to vector<128x128xbf16>
    %cst_314 = arith.constant dense<0.000000e+00> : vector<16x128xf32>
    %528 = tpu.matmul %525, %527, %cst_314 {dimension_numbers = #tpu.dot_dimension_numbers<[1], [0], [0], [1], [0, 0, 1, 1], [], []>} : vector<16x128xbf16>, vector<128x128xbf16>, vector<16x128xf32> -> vector<16x128xf32>
    %529 = arith.addf %519, %528 : vector<16x128xf32>
    %c0_315 = arith.constant 0 : index
    %c0_316 = arith.constant 0 : index
    %530 = vector.load %arg24[%c0_315, %c0_316] : memref<4x16xf32, #tpu.memory_space<vmem>>, vector<4x16xf32>
    %cst_317 = arith.constant dense<0.000000e+00> : vector<4x128xf32>
    %531 = tpu.matmul %530, %529, %cst_317 {dimension_numbers = #tpu.dot_dimension_numbers<[1], [0], [0], [1], [0, 0, 1, 1], [], []>} : vector<4x16xf32>, vector<16x128xf32>, vector<4x128xf32> -> vector<4x128xf32>
    %532 = vector.broadcast %447 : vector<1x128xf32> to vector<4x128xf32>
    %533 = arith.addf %531, %532 : vector<4x128xf32>
    %cst_318 = arith.constant 0.000000e+00 : f32
    %534 = vector.broadcast %cst_318 : f32 to vector<4x128xf32>
    %535 = arith.maximumf %533, %534 : vector<4x128xf32>
    %c0_319 = arith.constant 0 : index
    %c0_320 = arith.constant 0 : index
    %c0_321 = arith.constant 0 : index
    %536 = vector.load %arg27[%c0_319, %c0_320, %c0_321] : memref<1x4x128xf32, #tpu.memory_space<vmem>>, vector<1x4x128xf32>
    %537 = vector.shape_cast %536 : vector<1x4x128xf32> to vector<4x128xf32>
    %538 = vector.shape_cast %535 : vector<4x128xf32> to vector<1x4x128xf32>
    tpu.vector_store %arg27[%c0_319, %c0_320, %c0_321], %538 {strides = array<i32>} : memref<1x4x128xf32, #tpu.memory_space<vmem>>, vector<1x4x128xf32>,
    %c0_322 = arith.constant 0 : index
    %c0_323 = arith.constant 0 : index
    %539 = vector.load %arg18[%c0_322, %c0_323] : memref<1x128xf32, #tpu.memory_space<vmem>>, vector<1x128xf32>
    %540 = vector.extract_strided_slice %535 {offsets = [0, 0], sizes = [1, 128], strides = [1, 1]} : vector<4x128xf32> to vector<1x128xf32>
    %541 = arith.truncf %540 : vector<1x128xf32> to vector<1x128xbf16>
    %c0_324 = arith.constant 0 : index
    %c0_325 = arith.constant 0 : index
    %c0_326 = arith.constant 0 : index
    %542 = vector.load %arg8[%c0_324, %c0_325, %c0_326] : memref<9x128x128xbf16, #tpu.memory_space<vmem>>, vector<1x128x128xbf16>
    %543 = vector.shape_cast %542 : vector<1x128x128xbf16> to vector<128x128xbf16>
    %cst_327 = arith.constant dense<0.000000e+00> : vector<1x128xf32>
    %544 = tpu.matmul %541, %543, %cst_327 {dimension_numbers = #tpu.dot_dimension_numbers<[1], [0], [0], [1], [0, 0, 1, 1], [], []>} : vector<1x128xbf16>, vector<128x128xbf16>, vector<1x128xf32> -> vector<1x128xf32>
    %545 = vector.extract_strided_slice %535 {offsets = [1, 0], sizes = [1, 128], strides = [1, 1]} : vector<4x128xf32> to vector<1x128xf32>
    %546 = arith.truncf %545 : vector<1x128xf32> to vector<1x128xbf16>
    %c1_328 = arith.constant 1 : index
    %c0_329 = arith.constant 0 : index
    %c0_330 = arith.constant 0 : index
    %547 = vector.load %arg8[%c1_328, %c0_329, %c0_330] : memref<9x128x128xbf16, #tpu.memory_space<vmem>>, vector<1x128x128xbf16>
    %548 = vector.shape_cast %547 : vector<1x128x128xbf16> to vector<128x128xbf16>
    %cst_331 = arith.constant dense<0.000000e+00> : vector<1x128xf32>
    %549 = tpu.matmul %546, %548, %cst_331 {dimension_numbers = #tpu.dot_dimension_numbers<[1], [0], [0], [1], [0, 0, 1, 1], [], []>} : vector<1x128xbf16>, vector<128x128xbf16>, vector<1x128xf32> -> vector<1x128xf32>
    %550 = arith.addf %544, %549 : vector<1x128xf32>
    %551 = vector.extract_strided_slice %535 {offsets = [2, 0], sizes = [1, 128], strides = [1, 1]} : vector<4x128xf32> to vector<1x128xf32>
    %552 = arith.truncf %551 : vector<1x128xf32> to vector<1x128xbf16>
    %c2_332 = arith.constant 2 : index
    %c0_333 = arith.constant 0 : index
    %c0_334 = arith.constant 0 : index
    %553 = vector.load %arg8[%c2_332, %c0_333, %c0_334] : memref<9x128x128xbf16, #tpu.memory_space<vmem>>, vector<1x128x128xbf16>
    %554 = vector.shape_cast %553 : vector<1x128x128xbf16> to vector<128x128xbf16>
    %cst_335 = arith.constant dense<0.000000e+00> : vector<1x128xf32>
    %555 = tpu.matmul %552, %554, %cst_335 {dimension_numbers = #tpu.dot_dimension_numbers<[1], [0], [0], [1], [0, 0, 1, 1], [], []>} : vector<1x128xbf16>, vector<128x128xbf16>, vector<1x128xf32> -> vector<1x128xf32>
    %556 = arith.addf %550, %555 : vector<1x128xf32>
    %557 = vector.extract_strided_slice %535 {offsets = [3, 0], sizes = [1, 128], strides = [1, 1]} : vector<4x128xf32> to vector<1x128xf32>
    %558 = arith.truncf %557 : vector<1x128xf32> to vector<1x128xbf16>
    %c3_336 = arith.constant 3 : index
    %c0_337 = arith.constant 0 : index
    %c0_338 = arith.constant 0 : index
    %559 = vector.load %arg8[%c3_336, %c0_337, %c0_338] : memref<9x128x128xbf16, #tpu.memory_space<vmem>>, vector<1x128x128xbf16>
    %560 = vector.shape_cast %559 : vector<1x128x128xbf16> to vector<128x128xbf16>
    %cst_339 = arith.constant dense<0.000000e+00> : vector<1x128xf32>
    %561 = tpu.matmul %558, %560, %cst_339 {dimension_numbers = #tpu.dot_dimension_numbers<[1], [0], [0], [1], [0, 0, 1, 1], [], []>} : vector<1x128xbf16>, vector<128x128xbf16>, vector<1x128xf32> -> vector<1x128xf32>
    %562 = arith.addf %556, %561 : vector<1x128xf32>
    %563 = vector.extract_strided_slice %535 {offsets = [0, 0], sizes = [1, 128], strides = [1, 1]} : vector<4x128xf32> to vector<1x128xf32>
    %564 = arith.truncf %563 : vector<1x128xf32> to vector<1x128xbf16>
    %c4_340 = arith.constant 4 : index
    %c0_341 = arith.constant 0 : index
    %c0_342 = arith.constant 0 : index
    %565 = vector.load %arg8[%c4_340, %c0_341, %c0_342] : memref<9x128x128xbf16, #tpu.memory_space<vmem>>, vector<1x128x128xbf16>
    %566 = vector.shape_cast %565 : vector<1x128x128xbf16> to vector<128x128xbf16>
    %cst_343 = arith.constant dense<0.000000e+00> : vector<1x128xf32>
    %567 = tpu.matmul %564, %566, %cst_343 {dimension_numbers = #tpu.dot_dimension_numbers<[1], [0], [0], [1], [0, 0, 1, 1], [], []>} : vector<1x128xbf16>, vector<128x128xbf16>, vector<1x128xf32> -> vector<1x128xf32>
    %568 = vector.extract_strided_slice %535 {offsets = [1, 0], sizes = [1, 128], strides = [1, 1]} : vector<4x128xf32> to vector<1x128xf32>
    %569 = arith.truncf %568 : vector<1x128xf32> to vector<1x128xbf16>
    %c0_344 = arith.constant 0 : index
    %c0_345 = arith.constant 0 : index
    %c0_346 = arith.constant 0 : index
    %570 = vector.load %arg8[%c0_344, %c0_345, %c0_346] : memref<9x128x128xbf16, #tpu.memory_space<vmem>>, vector<1x128x128xbf16>
    %571 = vector.shape_cast %570 : vector<1x128x128xbf16> to vector<128x128xbf16>
    %cst_347 = arith.constant dense<0.000000e+00> : vector<1x128xf32>
    %572 = tpu.matmul %569, %571, %cst_347 {dimension_numbers = #tpu.dot_dimension_numbers<[1], [0], [0], [1], [0, 0, 1, 1], [], []>} : vector<1x128xbf16>, vector<128x128xbf16>, vector<1x128xf32> -> vector<1x128xf32>
    %573 = arith.addf %567, %572 : vector<1x128xf32>
    %574 = vector.extract_strided_slice %535 {offsets = [2, 0], sizes = [1, 128], strides = [1, 1]} : vector<4x128xf32> to vector<1x128xf32>
    %575 = arith.truncf %574 : vector<1x128xf32> to vector<1x128xbf16>
    %c5_348 = arith.constant 5 : index
    %c0_349 = arith.constant 0 : index
    %c0_350 = arith.constant 0 : index
    %576 = vector.load %arg8[%c5_348, %c0_349, %c0_350] : memref<9x128x128xbf16, #tpu.memory_space<vmem>>, vector<1x128x128xbf16>
    %577 = vector.shape_cast %576 : vector<1x128x128xbf16> to vector<128x128xbf16>
    %cst_351 = arith.constant dense<0.000000e+00> : vector<1x128xf32>
    %578 = tpu.matmul %575, %577, %cst_351 {dimension_numbers = #tpu.dot_dimension_numbers<[1], [0], [0], [1], [0, 0, 1, 1], [], []>} : vector<1x128xbf16>, vector<128x128xbf16>, vector<1x128xf32> -> vector<1x128xf32>
    %579 = arith.addf %573, %578 : vector<1x128xf32>
    %580 = vector.extract_strided_slice %535 {offsets = [3, 0], sizes = [1, 128], strides = [1, 1]} : vector<4x128xf32> to vector<1x128xf32>
    %581 = arith.truncf %580 : vector<1x128xf32> to vector<1x128xbf16>
    %c2_352 = arith.constant 2 : index
    %c0_353 = arith.constant 0 : index
    %c0_354 = arith.constant 0 : index
    %582 = vector.load %arg8[%c2_352, %c0_353, %c0_354] : memref<9x128x128xbf16, #tpu.memory_space<vmem>>, vector<1x128x128xbf16>
    %583 = vector.shape_cast %582 : vector<1x128x128xbf16> to vector<128x128xbf16>
    %cst_355 = arith.constant dense<0.000000e+00> : vector<1x128xf32>
    %584 = tpu.matmul %581, %583, %cst_355 {dimension_numbers = #tpu.dot_dimension_numbers<[1], [0], [0], [1], [0, 0, 1, 1], [], []>} : vector<1x128xbf16>, vector<128x128xbf16>, vector<1x128xf32> -> vector<1x128xf32>
    %585 = arith.addf %579, %584 : vector<1x128xf32>
    %586 = vector.extract_strided_slice %535 {offsets = [0, 0], sizes = [1, 128], strides = [1, 1]} : vector<4x128xf32> to vector<1x128xf32>
    %587 = arith.truncf %586 : vector<1x128xf32> to vector<1x128xbf16>
    %c6_356 = arith.constant 6 : index
    %c0_357 = arith.constant 0 : index
    %c0_358 = arith.constant 0 : index
    %588 = vector.load %arg8[%c6_356, %c0_357, %c0_358] : memref<9x128x128xbf16, #tpu.memory_space<vmem>>, vector<1x128x128xbf16>
    %589 = vector.shape_cast %588 : vector<1x128x128xbf16> to vector<128x128xbf16>
    %cst_359 = arith.constant dense<0.000000e+00> : vector<1x128xf32>
    %590 = tpu.matmul %587, %589, %cst_359 {dimension_numbers = #tpu.dot_dimension_numbers<[1], [0], [0], [1], [0, 0, 1, 1], [], []>} : vector<1x128xbf16>, vector<128x128xbf16>, vector<1x128xf32> -> vector<1x128xf32>
    %591 = vector.extract_strided_slice %535 {offsets = [1, 0], sizes = [1, 128], strides = [1, 1]} : vector<4x128xf32> to vector<1x128xf32>
    %592 = arith.truncf %591 : vector<1x128xf32> to vector<1x128xbf16>
    %c7_360 = arith.constant 7 : index
    %c0_361 = arith.constant 0 : index
    %c0_362 = arith.constant 0 : index
    %593 = vector.load %arg8[%c7_360, %c0_361, %c0_362] : memref<9x128x128xbf16, #tpu.memory_space<vmem>>, vector<1x128x128xbf16>
    %594 = vector.shape_cast %593 : vector<1x128x128xbf16> to vector<128x128xbf16>
    %cst_363 = arith.constant dense<0.000000e+00> : vector<1x128xf32>
    %595 = tpu.matmul %592, %594, %cst_363 {dimension_numbers = #tpu.dot_dimension_numbers<[1], [0], [0], [1], [0, 0, 1, 1], [], []>} : vector<1x128xbf16>, vector<128x128xbf16>, vector<1x128xf32> -> vector<1x128xf32>
    %596 = arith.addf %590, %595 : vector<1x128xf32>
    %597 = vector.extract_strided_slice %535 {offsets = [2, 0], sizes = [1, 128], strides = [1, 1]} : vector<4x128xf32> to vector<1x128xf32>
    %598 = arith.truncf %597 : vector<1x128xf32> to vector<1x128xbf16>
    %c0_364 = arith.constant 0 : index
    %c0_365 = arith.constant 0 : index
    %c0_366 = arith.constant 0 : index
    %599 = vector.load %arg8[%c0_364, %c0_365, %c0_366] : memref<9x128x128xbf16, #tpu.memory_space<vmem>>, vector<1x128x128xbf16>
    %600 = vector.shape_cast %599 : vector<1x128x128xbf16> to vector<128x128xbf16>
    %cst_367 = arith.constant dense<0.000000e+00> : vector<1x128xf32>
    %601 = tpu.matmul %598, %600, %cst_367 {dimension_numbers = #tpu.dot_dimension_numbers<[1], [0], [0], [1], [0, 0, 1, 1], [], []>} : vector<1x128xbf16>, vector<128x128xbf16>, vector<1x128xf32> -> vector<1x128xf32>
    %602 = arith.addf %596, %601 : vector<1x128xf32>
    %603 = vector.extract_strided_slice %535 {offsets = [3, 0], sizes = [1, 128], strides = [1, 1]} : vector<4x128xf32> to vector<1x128xf32>
    %604 = arith.truncf %603 : vector<1x128xf32> to vector<1x128xbf16>
    %c1_368 = arith.constant 1 : index
    %c0_369 = arith.constant 0 : index
    %c0_370 = arith.constant 0 : index
    %605 = vector.load %arg8[%c1_368, %c0_369, %c0_370] : memref<9x128x128xbf16, #tpu.memory_space<vmem>>, vector<1x128x128xbf16>
    %606 = vector.shape_cast %605 : vector<1x128x128xbf16> to vector<128x128xbf16>
    %cst_371 = arith.constant dense<0.000000e+00> : vector<1x128xf32>
    %607 = tpu.matmul %604, %606, %cst_371 {dimension_numbers = #tpu.dot_dimension_numbers<[1], [0], [0], [1], [0, 0, 1, 1], [], []>} : vector<1x128xbf16>, vector<128x128xbf16>, vector<1x128xf32> -> vector<1x128xf32>
    %608 = arith.addf %602, %607 : vector<1x128xf32>
    %609 = vector.extract_strided_slice %535 {offsets = [0, 0], sizes = [1, 128], strides = [1, 1]} : vector<4x128xf32> to vector<1x128xf32>
    %610 = arith.truncf %609 : vector<1x128xf32> to vector<1x128xbf16>
    %c8_372 = arith.constant 8 : index
    %c0_373 = arith.constant 0 : index
    %c0_374 = arith.constant 0 : index
    %611 = vector.load %arg8[%c8_372, %c0_373, %c0_374] : memref<9x128x128xbf16, #tpu.memory_space<vmem>>, vector<1x128x128xbf16>
    %612 = vector.shape_cast %611 : vector<1x128x128xbf16> to vector<128x128xbf16>
    %cst_375 = arith.constant dense<0.000000e+00> : vector<1x128xf32>
    %613 = tpu.matmul %610, %612, %cst_375 {dimension_numbers = #tpu.dot_dimension_numbers<[1], [0], [0], [1], [0, 0, 1, 1], [], []>} : vector<1x128xbf16>, vector<128x128xbf16>, vector<1x128xf32> -> vector<1x128xf32>
    %614 = vector.extract_strided_slice %535 {offsets = [1, 0], sizes = [1, 128], strides = [1, 1]} : vector<4x128xf32> to vector<1x128xf32>
    %615 = arith.truncf %614 : vector<1x128xf32> to vector<1x128xbf16>
    %c6_376 = arith.constant 6 : index
    %c0_377 = arith.constant 0 : index
    %c0_378 = arith.constant 0 : index
    %616 = vector.load %arg8[%c6_376, %c0_377, %c0_378] : memref<9x128x128xbf16, #tpu.memory_space<vmem>>, vector<1x128x128xbf16>
    %617 = vector.shape_cast %616 : vector<1x128x128xbf16> to vector<128x128xbf16>
    %cst_379 = arith.constant dense<0.000000e+00> : vector<1x128xf32>
    %618 = tpu.matmul %615, %617, %cst_379 {dimension_numbers = #tpu.dot_dimension_numbers<[1], [0], [0], [1], [0, 0, 1, 1], [], []>} : vector<1x128xbf16>, vector<128x128xbf16>, vector<1x128xf32> -> vector<1x128xf32>
    %619 = arith.addf %613, %618 : vector<1x128xf32>
    %620 = vector.extract_strided_slice %535 {offsets = [2, 0], sizes = [1, 128], strides = [1, 1]} : vector<4x128xf32> to vector<1x128xf32>
    %621 = arith.truncf %620 : vector<1x128xf32> to vector<1x128xbf16>
    %c4_380 = arith.constant 4 : index
    %c0_381 = arith.constant 0 : index
    %c0_382 = arith.constant 0 : index
    %622 = vector.load %arg8[%c4_380, %c0_381, %c0_382] : memref<9x128x128xbf16, #tpu.memory_space<vmem>>, vector<1x128x128xbf16>
    %623 = vector.shape_cast %622 : vector<1x128x128xbf16> to vector<128x128xbf16>
    %cst_383 = arith.constant dense<0.000000e+00> : vector<1x128xf32>
    %624 = tpu.matmul %621, %623, %cst_383 {dimension_numbers = #tpu.dot_dimension_numbers<[1], [0], [0], [1], [0, 0, 1, 1], [], []>} : vector<1x128xbf16>, vector<128x128xbf16>, vector<1x128xf32> -> vector<1x128xf32>
    %625 = arith.addf %619, %624 : vector<1x128xf32>
    %626 = vector.extract_strided_slice %535 {offsets = [3, 0], sizes = [1, 128], strides = [1, 1]} : vector<4x128xf32> to vector<1x128xf32>
    %627 = arith.truncf %626 : vector<1x128xf32> to vector<1x128xbf16>
    %c0_384 = arith.constant 0 : index
    %c0_385 = arith.constant 0 : index
    %c0_386 = arith.constant 0 : index
    %628 = vector.load %arg8[%c0_384, %c0_385, %c0_386] : memref<9x128x128xbf16, #tpu.memory_space<vmem>>, vector<1x128x128xbf16>
    %629 = vector.shape_cast %628 : vector<1x128x128xbf16> to vector<128x128xbf16>
    %cst_387 = arith.constant dense<0.000000e+00> : vector<1x128xf32>
    %630 = tpu.matmul %627, %629, %cst_387 {dimension_numbers = #tpu.dot_dimension_numbers<[1], [0], [0], [1], [0, 0, 1, 1], [], []>} : vector<1x128xbf16>, vector<128x128xbf16>, vector<1x128xf32> -> vector<1x128xf32>
    %631 = arith.addf %625, %630 : vector<1x128xf32>
    %632 = tpu.concatenate %562, %585, %608, %631 in 0 : vector<1x128xf32>, vector<1x128xf32>, vector<1x128xf32>, vector<1x128xf32> -> vector<4x128xf32>
    %633 = vector.broadcast %539 : vector<1x128xf32> to vector<4x128xf32>
    %634 = arith.addf %632, %633 : vector<4x128xf32>
    %cst_388 = arith.constant 0.000000e+00 : f32
    %635 = vector.broadcast %cst_388 : f32 to vector<4x128xf32>
    %636 = arith.maximumf %634, %635 : vector<4x128xf32>
    %c0_389 = arith.constant 0 : index
    %c0_390 = arith.constant 0 : index
    %637 = vector.load %arg19[%c0_389, %c0_390] : memref<1x128xf32, #tpu.memory_space<vmem>>, vector<1x128xf32>
    %638 = vector.extract_strided_slice %636 {offsets = [0, 0], sizes = [1, 128], strides = [1, 1]} : vector<4x128xf32> to vector<1x128xf32>
    %639 = arith.truncf %638 : vector<1x128xf32> to vector<1x128xbf16>
    %c0_391 = arith.constant 0 : index
    %c0_392 = arith.constant 0 : index
    %c0_393 = arith.constant 0 : index
    %640 = vector.load %arg9[%c0_391, %c0_392, %c0_393] : memref<4x128x128xbf16, #tpu.memory_space<vmem>>, vector<1x128x128xbf16>
    %641 = vector.shape_cast %640 : vector<1x128x128xbf16> to vector<128x128xbf16>
    %cst_394 = arith.constant dense<0.000000e+00> : vector<1x128xf32>
    %642 = tpu.matmul %639, %641, %cst_394 {dimension_numbers = #tpu.dot_dimension_numbers<[1], [0], [0], [1], [0, 0, 1, 1], [], []>} : vector<1x128xbf16>, vector<128x128xbf16>, vector<1x128xf32> -> vector<1x128xf32>
    %643 = vector.extract_strided_slice %636 {offsets = [1, 0], sizes = [1, 128], strides = [1, 1]} : vector<4x128xf32> to vector<1x128xf32>
    %644 = arith.truncf %643 : vector<1x128xf32> to vector<1x128xbf16>
    %c1_395 = arith.constant 1 : index
    %c0_396 = arith.constant 0 : index
    %c0_397 = arith.constant 0 : index
    %645 = vector.load %arg9[%c1_395, %c0_396, %c0_397] : memref<4x128x128xbf16, #tpu.memory_space<vmem>>, vector<1x128x128xbf16>
    %646 = vector.shape_cast %645 : vector<1x128x128xbf16> to vector<128x128xbf16>
    %cst_398 = arith.constant dense<0.000000e+00> : vector<1x128xf32>
    %647 = tpu.matmul %644, %646, %cst_398 {dimension_numbers = #tpu.dot_dimension_numbers<[1], [0], [0], [1], [0, 0, 1, 1], [], []>} : vector<1x128xbf16>, vector<128x128xbf16>, vector<1x128xf32> -> vector<1x128xf32>
    %648 = arith.addf %642, %647 : vector<1x128xf32>
    %649 = vector.extract_strided_slice %636 {offsets = [2, 0], sizes = [1, 128], strides = [1, 1]} : vector<4x128xf32> to vector<1x128xf32>
    %650 = arith.truncf %649 : vector<1x128xf32> to vector<1x128xbf16>
    %c2_399 = arith.constant 2 : index
    %c0_400 = arith.constant 0 : index
    %c0_401 = arith.constant 0 : index
    %651 = vector.load %arg9[%c2_399, %c0_400, %c0_401] : memref<4x128x128xbf16, #tpu.memory_space<vmem>>, vector<1x128x128xbf16>
    %652 = vector.shape_cast %651 : vector<1x128x128xbf16> to vector<128x128xbf16>
    %cst_402 = arith.constant dense<0.000000e+00> : vector<1x128xf32>
    %653 = tpu.matmul %650, %652, %cst_402 {dimension_numbers = #tpu.dot_dimension_numbers<[1], [0], [0], [1], [0, 0, 1, 1], [], []>} : vector<1x128xbf16>, vector<128x128xbf16>, vector<1x128xf32> -> vector<1x128xf32>
    %654 = arith.addf %648, %653 : vector<1x128xf32>
    %655 = vector.extract_strided_slice %636 {offsets = [3, 0], sizes = [1, 128], strides = [1, 1]} : vector<4x128xf32> to vector<1x128xf32>
    %656 = arith.truncf %655 : vector<1x128xf32> to vector<1x128xbf16>
    %c3_403 = arith.constant 3 : index
    %c0_404 = arith.constant 0 : index
    %c0_405 = arith.constant 0 : index
    %657 = vector.load %arg9[%c3_403, %c0_404, %c0_405] : memref<4x128x128xbf16, #tpu.memory_space<vmem>>, vector<1x128x128xbf16>
    %658 = vector.shape_cast %657 : vector<1x128x128xbf16> to vector<128x128xbf16>
    %cst_406 = arith.constant dense<0.000000e+00> : vector<1x128xf32>
    %659 = tpu.matmul %656, %658, %cst_406 {dimension_numbers = #tpu.dot_dimension_numbers<[1], [0], [0], [1], [0, 0, 1, 1], [], []>} : vector<1x128xbf16>, vector<128x128xbf16>, vector<1x128xf32> -> vector<1x128xf32>
    %660 = arith.addf %654, %659 : vector<1x128xf32>
    %661 = arith.addf %660, %637 : vector<1x128xf32>
    %cst_407 = arith.constant 0.000000e+00 : f32
    %662 = vector.broadcast %cst_407 : f32 to vector<1x128xf32>
    %663 = arith.maximumf %661, %662 : vector<1x128xf32>
    %c0_408 = arith.constant 0 : index
    %c0_409 = arith.constant 0 : index
    %c0_410 = arith.constant 0 : index
    %664 = vector.load %arg28[%c0_408, %c0_409, %c0_410] : memref<1x1x128xf32, #tpu.memory_space<vmem>>, vector<1x1x128xf32>
    %665 = vector.shape_cast %664 : vector<1x1x128xf32> to vector<1x128xf32>
    %666 = vector.shape_cast %663 : vector<1x128xf32> to vector<1x1x128xf32>
    tpu.vector_store %arg28[%c0_408, %c0_409, %c0_410], %666 {strides = array<i32>} : memref<1x1x128xf32, #tpu.memory_space<vmem>>, vector<1x1x128xf32>,
    %c0_411 = arith.constant 0 : index
    %c0_412 = arith.constant 0 : index
    %667 = vector.load %arg20[%c0_411, %c0_412] : memref<1x128xf32, #tpu.memory_space<vmem>>, vector<1x128xf32>
    %668 = arith.truncf %663 : vector<1x128xf32> to vector<1x128xbf16>
    %c0_413 = arith.constant 0 : index
    %c0_414 = arith.constant 0 : index
    %c0_415 = arith.constant 0 : index
    %669 = vector.load %arg10[%c0_413, %c0_414, %c0_415] : memref<1x128x128xbf16, #tpu.memory_space<vmem>>, vector<1x128x128xbf16>
    %670 = vector.shape_cast %669 : vector<1x128x128xbf16> to vector<128x128xbf16>
    %cst_416 = arith.constant dense<0.000000e+00> : vector<1x128xf32>
    %671 = tpu.matmul %668, %670, %cst_416 {dimension_numbers = #tpu.dot_dimension_numbers<[1], [0], [0], [1], [0, 0, 1, 1], [], []>} : vector<1x128xbf16>, vector<128x128xbf16>, vector<1x128xf32> -> vector<1x128xf32>
    %672 = arith.addf %671, %667 : vector<1x128xf32>
    %cst_417 = arith.constant 0.000000e+00 : f32
    %673 = vector.broadcast %cst_417 : f32 to vector<1x128xf32>
    %674 = arith.maximumf %672, %673 : vector<1x128xf32>
    %c0_418 = arith.constant 0 : index
    %c0_419 = arith.constant 0 : index
    %675 = vector.load %arg21[%c0_418, %c0_419] : memref<1x384xf32, #tpu.memory_space<vmem>>, vector<1x384xf32>
    %676 = arith.truncf %674 : vector<1x128xf32> to vector<1x128xbf16>
    %c0_420 = arith.constant 0 : index
    %c0_421 = arith.constant 0 : index
    %c0_422 = arith.constant 0 : index
    %677 = vector.load %arg11[%c0_420, %c0_421, %c0_422] : memref<1x128x384xbf16, #tpu.memory_space<vmem>>, vector<1x128x384xbf16>
    %678 = vector.shape_cast %677 : vector<1x128x384xbf16> to vector<128x384xbf16>
    %cst_423 = arith.constant dense<0.000000e+00> : vector<1x384xf32>
    %679 = tpu.matmul %676, %678, %cst_423 {dimension_numbers = #tpu.dot_dimension_numbers<[1], [0], [0], [1], [0, 0, 1, 1], [], []>} : vector<1x128xbf16>, vector<128x384xbf16>, vector<1x384xf32> -> vector<1x384xf32>
    %680 = arith.addf %679, %675 : vector<1x384xf32>
    %cst_424 = arith.constant 0.000000e+00 : f32
    %681 = vector.broadcast %cst_424 : f32 to vector<1x384xf32>
    %682 = arith.maximumf %680, %681 : vector<1x384xf32>
    %c0_425 = arith.constant 0 : index
    %c0_426 = arith.constant 0 : index
    %c0_427 = arith.constant 0 : index
    %683 = vector.load %arg29[%c0_425, %c0_426, %c0_427] : memref<1x1x384xf32, #tpu.memory_space<vmem>>, vector<1x1x384xf32>
    %684 = vector.shape_cast %683 : vector<1x1x384xf32> to vector<1x384xf32>
    %685 = vector.shape_cast %682 : vector<1x384xf32> to vector<1x1x384xf32>
    tpu.vector_store %arg29[%c0_425, %c0_426, %c0_427], %685 {strides = array<i32>} : memref<1x1x384xf32, #tpu.memory_space<vmem>>, vector<1x1x384xf32>,
    return
  }
  func.func @transform_0(%arg0: i32) -> (i32, i32, i32) {
    %c0_i32 = arith.constant 0 : i32
    %c0_i32_0 = arith.constant 0 : i32
    %c0_i32_1 = arith.constant 0 : i32
    return %arg0, %c0_i32, %c0_i32_0 : i32, i32, i32
  }
  func.func @transform_1(%arg0: i32) -> (i32, i32, i32) {
    %c0_i32 = arith.constant 0 : i32
    %c0_i32_0 = arith.constant 0 : i32
    %c0_i32_1 = arith.constant 0 : i32
    %c0_i32_2 = arith.constant 0 : i32
    return %c0_i32, %c0_i32_0, %c0_i32_1 : i32, i32, i32
  }
  func.func @transform_2(%arg0: i32) -> (i32, i32, i32) {
    %c0_i32 = arith.constant 0 : i32
    %c0_i32_0 = arith.constant 0 : i32
    %c0_i32_1 = arith.constant 0 : i32
    %c0_i32_2 = arith.constant 0 : i32
    return %c0_i32, %c0_i32_0, %c0_i32_1 : i32, i32, i32
  }
  func.func @transform_3(%arg0: i32) -> (i32, i32, i32) {
    %c0_i32 = arith.constant 0 : i32
    %c0_i32_0 = arith.constant 0 : i32
    %c0_i32_1 = arith.constant 0 : i32
    %c0_i32_2 = arith.constant 0 : i32
    return %c0_i32, %c0_i32_0, %c0_i32_1 : i32, i32, i32
  }
  func.func @transform_4(%arg0: i32) -> (i32, i32, i32) {
    %c0_i32 = arith.constant 0 : i32
    %c0_i32_0 = arith.constant 0 : i32
    %c0_i32_1 = arith.constant 0 : i32
    %c0_i32_2 = arith.constant 0 : i32
    return %c0_i32, %c0_i32_0, %c0_i32_1 : i32, i32, i32
  }
  func.func @transform_5(%arg0: i32) -> (i32, i32, i32) {
    %c0_i32 = arith.constant 0 : i32
    %c0_i32_0 = arith.constant 0 : i32
    %c0_i32_1 = arith.constant 0 : i32
    %c0_i32_2 = arith.constant 0 : i32
    return %c0_i32, %c0_i32_0, %c0_i32_1 : i32, i32, i32
  }
  func.func @transform_6(%arg0: i32) -> (i32, i32, i32) {
    %c0_i32 = arith.constant 0 : i32
    %c0_i32_0 = arith.constant 0 : i32
    %c0_i32_1 = arith.constant 0 : i32
    %c0_i32_2 = arith.constant 0 : i32
    return %c0_i32, %c0_i32_0, %c0_i32_1 : i32, i32, i32
  }
  func.func @transform_7(%arg0: i32) -> (i32, i32, i32) {
    %c0_i32 = arith.constant 0 : i32
    %c0_i32_0 = arith.constant 0 : i32
    %c0_i32_1 = arith.constant 0 : i32
    %c0_i32_2 = arith.constant 0 : i32
    return %c0_i32, %c0_i32_0, %c0_i32_1 : i32, i32, i32
  }
  func.func @transform_8(%arg0: i32) -> (i32, i32, i32) {
    %c0_i32 = arith.constant 0 : i32
    %c0_i32_0 = arith.constant 0 : i32
    %c0_i32_1 = arith.constant 0 : i32
    %c0_i32_2 = arith.constant 0 : i32
    return %c0_i32, %c0_i32_0, %c0_i32_1 : i32, i32, i32
  }
  func.func @transform_9(%arg0: i32) -> (i32, i32, i32) {
    %c0_i32 = arith.constant 0 : i32
    %c0_i32_0 = arith.constant 0 : i32
    %c0_i32_1 = arith.constant 0 : i32
    %c0_i32_2 = arith.constant 0 : i32
    return %c0_i32, %c0_i32_0, %c0_i32_1 : i32, i32, i32
  }
  func.func @transform_10(%arg0: i32) -> (i32, i32, i32) {
    %c0_i32 = arith.constant 0 : i32
    %c0_i32_0 = arith.constant 0 : i32
    %c0_i32_1 = arith.constant 0 : i32
    %c0_i32_2 = arith.constant 0 : i32
    return %c0_i32, %c0_i32_0, %c0_i32_1 : i32, i32, i32
  }
  func.func @transform_11(%arg0: i32) -> (i32, i32) {
    %c0_i32 = arith.constant 0 : i32
    %c0_i32_0 = arith.constant 0 : i32
    %c0_i32_1 = arith.constant 0 : i32
    return %c0_i32, %c0_i32_0 : i32, i32
  }
  func.func @transform_12(%arg0: i32) -> (i32, i32) {
    %c0_i32 = arith.constant 0 : i32
    %c0_i32_0 = arith.constant 0 : i32
    %c0_i32_1 = arith.constant 0 : i32
    return %c0_i32, %c0_i32_0 : i32, i32
  }
  func.func @transform_13(%arg0: i32) -> (i32, i32) {
    %c0_i32 = arith.constant 0 : i32
    %c0_i32_0 = arith.constant 0 : i32
    %c0_i32_1 = arith.constant 0 : i32
    return %c0_i32, %c0_i32_0 : i32, i32
  }
  func.func @transform_14(%arg0: i32) -> (i32, i32) {
    %c0_i32 = arith.constant 0 : i32
    %c0_i32_0 = arith.constant 0 : i32
    %c0_i32_1 = arith.constant 0 : i32
    return %c0_i32, %c0_i32_0 : i32, i32
  }
  func.func @transform_15(%arg0: i32) -> (i32, i32) {
    %c0_i32 = arith.constant 0 : i32
    %c0_i32_0 = arith.constant 0 : i32
    %c0_i32_1 = arith.constant 0 : i32
    return %c0_i32, %c0_i32_0 : i32, i32
  }
  func.func @transform_16(%arg0: i32) -> (i32, i32) {
    %c0_i32 = arith.constant 0 : i32
    %c0_i32_0 = arith.constant 0 : i32
    %c0_i32_1 = arith.constant 0 : i32
    return %c0_i32, %c0_i32_0 : i32, i32
  }
  func.func @transform_17(%arg0: i32) -> (i32, i32) {
    %c0_i32 = arith.constant 0 : i32
    %c0_i32_0 = arith.constant 0 : i32
    %c0_i32_1 = arith.constant 0 : i32
    return %c0_i32, %c0_i32_0 : i32, i32
  }
  func.func @transform_18(%arg0: i32) -> (i32, i32) {
    %c0_i32 = arith.constant 0 : i32
    %c0_i32_0 = arith.constant 0 : i32
    %c0_i32_1 = arith.constant 0 : i32
    return %c0_i32, %c0_i32_0 : i32, i32
  }
  func.func @transform_19(%arg0: i32) -> (i32, i32) {
    %c0_i32 = arith.constant 0 : i32
    %c0_i32_0 = arith.constant 0 : i32
    %c0_i32_1 = arith.constant 0 : i32
    return %c0_i32, %c0_i32_0 : i32, i32
  }
  func.func @transform_20(%arg0: i32) -> (i32, i32) {
    %c0_i32 = arith.constant 0 : i32
    %c0_i32_0 = arith.constant 0 : i32
    %c0_i32_1 = arith.constant 0 : i32
    return %c0_i32, %c0_i32_0 : i32, i32
  }
  func.func @transform_21(%arg0: i32) -> (i32, i32) {
    %c0_i32 = arith.constant 0 : i32
    %c0_i32_0 = arith.constant 0 : i32
    %c0_i32_1 = arith.constant 0 : i32
    return %c0_i32, %c0_i32_0 : i32, i32
  }
  func.func @transform_22(%arg0: i32) -> (i32, i32) {
    %c0_i32 = arith.constant 0 : i32
    %c0_i32_0 = arith.constant 0 : i32
    %c0_i32_1 = arith.constant 0 : i32
    return %c0_i32, %c0_i32_0 : i32, i32
  }
  func.func @transform_23(%arg0: i32) -> (i32, i32) {
    %c0_i32 = arith.constant 0 : i32
    %c0_i32_0 = arith.constant 0 : i32
    %c0_i32_1 = arith.constant 0 : i32
    return %c0_i32, %c0_i32_0 : i32, i32
  }
  func.func @transform_24(%arg0: i32) -> (i32, i32, i32) {
    %c0_i32 = arith.constant 0 : i32
    %c0_i32_0 = arith.constant 0 : i32
    %c0_i32_1 = arith.constant 0 : i32
    return %arg0, %c0_i32, %c0_i32_0 : i32, i32, i32
  }
  func.func @transform_25(%arg0: i32) -> (i32, i32, i32) {
    %c0_i32 = arith.constant 0 : i32
    %c0_i32_0 = arith.constant 0 : i32
    %c0_i32_1 = arith.constant 0 : i32
    return %arg0, %c0_i32, %c0_i32_0 : i32, i32, i32
  }
  func.func @transform_26(%arg0: i32) -> (i32, i32, i32) {
    %c0_i32 = arith.constant 0 : i32
    %c0_i32_0 = arith.constant 0 : i32
    %c0_i32_1 = arith.constant 0 : i32
    return %arg0, %c0_i32, %c0_i32_0 : i32, i32, i32
  }
  func.func @transform_27(%arg0: i32) -> (i32, i32, i32) {
    %c0_i32 = arith.constant 0 : i32
    %c0_i32_0 = arith.constant 0 : i32
    %c0_i32_1 = arith.constant 0 : i32
    return %arg0, %c0_i32, %c0_i32_0 : i32, i32, i32
  }
  func.func @transform_28(%arg0: i32) -> (i32, i32, i32) {
    %c0_i32 = arith.constant 0 : i32
    %c0_i32_0 = arith.constant 0 : i32
    %c0_i32_1 = arith.constant 0 : i32
    return %arg0, %c0_i32, %c0_i32_0 : i32, i32, i32
  }
}

</mosaic_0001>

<bundles_post_ra>
// kernel: depth_branch_forward.1
= control target key start
LH: loop header
LB: loop body
LE: loop exit
PB: predicated region body
PF: predicated region fallthrough
CT: control target
= control target key end

     0   :  { %s25584_s0 = inlined_call_operand.vmem [shape: f32[2,256,128], index: 0, kind: input, shape index: {}]   ;;  %s25585_s1 = inlined_call_operand.vmem [shape: bf16[9,128,128], index: 1, kind: input, shape index: {}]   ;;  %s25586_s2 = inlined_call_operand.vmem [shape: bf16[9,128,128], index: 2, kind: input, shape index: {}]   ;;  %s25587_s3 = inlined_call_operand.hbm [shape: bf16[9,128,128], index: 3, kind: input, shape index: {}]   ;;  %s25588_s4 = inlined_call_operand.hbm [shape: bf16[9,128,128], index: 4, kind: input, shape index: {}]   ;;  %s25589_s5 = inlined_call_operand.hbm [shape: bf16[9,128,128], index: 5, kind: input, shape index: {}]   ;;  %s25590_s6 = inlined_call_operand.hbm [shape: bf16[9,128,128], index: 6, kind: input, shape index: {}]   ;;  %s25591_s7 = inlined_call_operand.hbm [shape: bf16[9,128,128], index: 7, kind: input, shape index: {}]   ;;  %s25592_s8 = inlined_call_operand.vmem [shape: bf16[4,128,128], index: 8, kind: input, shape index: {}]   ;;  %s25593_s9 = inlined_call_operand.vmem [shape: bf16[1,128,128], index: 9, kind: input, shape index: {}]   ;;  %s25594_s10 = inlined_call_operand.vmem [shape: bf16[1,128,384], index: 10, kind: input, shape index: {}]   ;;  %s25595_s11 = inlined_call_operand.vmem [shape: f32[1,128], index: 11, kind: input, shape index: {}]   ;;  %s25596_s12 = inlined_call_operand.vmem [shape: f32[1,128], index: 12, kind: input, shape index: {}]   ;;  %s25597_s13 = inlined_call_operand.vmem [shape: f32[1,128], index: 13, kind: input, shape index: {}]   ;;  %s25598_s14 = inlined_call_operand.vmem [shape: f32[1,128], index: 14, kind: input, shape index: {}]   ;;  %s25599_s15 = inlined_call_operand.vmem [shape: f32[1,128], index: 15, kind: input, shape index: {}]   ;;  %s25600_s16 = inlined_call_operand.vmem [shape: f32[1,128], index: 16, kind: input, shape index: {}]   ;;  %s25601_s17 = inlined_call_operand.hbm [shape: f32[1,128], index: 17, kind: input, shape index: {}]   ;;  %s25602_s18 = inlined_call_operand.hbm [shape: f32[1,128], index: 18, kind: input, shape index: {}]   ;;  %s25603_s19 = inlined_call_operand.vmem [shape: f32[1,128], index: 19, kind: input, shape index: {}]   ;;  %s25604_s20 = inlined_call_operand.vmem [shape: f32[1,384], index: 20, kind: input, shape index: {}]   ;;  %s25605_s21 = inlined_call_operand.hbm [shape: f32[64,256], index: 21, kind: input, shape index: {}]   ;;  %s25606_s22 = inlined_call_operand.vmem [shape: f32[16,64], index: 22, kind: input, shape index: {}]   ;;  %s25607_s23 = inlined_call_operand.vmem [shape: f32[4,16], index: 23, kind: input, shape index: {}]   ;;  %s25608_s24 = inlined_call_operand.vmem [shape: f32[2,64,128], index: 24, kind: output, shape index: {0}]   ;;  %s25609_s25 = inlined_call_operand.hbm [shape: f32[2,16,128], index: 25, kind: output, shape index: {1}]   ;;  %s25610_s26 = inlined_call_operand.hbm [shape: f32[2,4,128], index: 26, kind: output, shape index: {2}]   ;;  %s25611_s27 = inlined_call_operand.vmem [shape: f32[2,1,128], index: 27, kind: output, shape index: {3}]   ;;  %s25612_s28 = inlined_call_operand.vmem [shape: f32[2,1,384], index: 28, kind: output, shape index: {4}]  }
   0x1   :  { %25896 = sst [smem:[#allocation89_spill]] %s25584_s0 }
   0x2   :  { %25897 = sst [smem:[#allocation90_spill]] %s25585_s1 }
   0x3   :  { %25898 = sst [smem:[#allocation91_spill]] %s25586_s2 }
   0x4   :  { %25899 = sst [smem:[#allocation92_spill]] %s25587_s3 }
   0x5   :  { %25900 = sst [smem:[#allocation93_spill]] %s25588_s4 }
   0x6   :  { %25901 = sst [smem:[#allocation94_spill]] %s25589_s5 }
   0x7   :  { %25902 = sst [smem:[#allocation95_spill]] %s25590_s6 }
   0x8   :  { %25903 = sst [smem:[#allocation96_spill]] %s25591_s7 }
   0x9   :  { %25904 = sst [smem:[#allocation97_spill]] %s25592_s8 }
   0xa   :  { %25905 = sst [smem:[#allocation98_spill]] %s25593_s9 }
   0xb   :  { %25906 = sst [smem:[#allocation99_spill]] %s25594_s10 }
   0xc   :  { %25907 = sst [smem:[#allocation100_spill]] %s25595_s11 }
   0xd   :  { %25908 = sst [smem:[#allocation101_spill]] %s25596_s12 }
   0xe   :  { %25909 = sst [smem:[#allocation102_spill]] %s25597_s13 }
   0xf   :  { %25910 = sst [smem:[#allocation103_spill]] %s25598_s14 }
  0x10   :  { %25911 = sst [smem:[#allocation104_spill]] %s25599_s15 }
  0x11   :  { %25912 = sst [smem:[#allocation105_spill]] %s25600_s16 }
  0x12   :  { %25913 = sst [smem:[#allocation106_spill]] %s25601_s17 }
  0x13   :  { %25914 = sst [smem:[#allocation107_spill]] %s25603_s19 }
  0x14   :  { %25915 = sst [smem:[#allocation108_spill]] %s25604_s20 }
  0x15   :  { %25916 = sst [smem:[#allocation109_spill]] %s25609_s25 }
  0x16   :  { %25917 = sst [smem:[#allocation110_spill]] %s25610_s26 }
  0x17   :  { %25918 = sst [smem:[#allocation111_spill]] %s25611_s27 }
  0x18   :  { %25919 = sst [smem:[#allocation112_spill]] %s25612_s28 }
  0x19   :  { %34 = vsyncpa [#allocation3], 0 }
  0x1a   :  { %35 = vsyncpa [#allocation6], 0 }
  0x1b   :  { %36 = vsyncpa [#allocation9], 0 }
  0x1c   :  { %37 = vsyncpa [#allocation12], 0 }
  0x1d   :  { %38 = vsyncpa [#allocation15], 0 }
  0x1e   :  { %39 = vsyncpa [#allocation4], 0 }
  0x1f   :  { %41 = vsyncpa [#allocation4 + $0x1], 0 }
  0x20   :  { %42 = vsyncpa [#allocation18], 0 }
  0x21   :  { %44 = vsyncpa [#allocation18 + $0x1], 0  ;;  %s21251_s8 = smov 0   ;;  %s21253_s5 = smov 0  }
  0x22   :  { %s21255_s9 = smov 0   ;;  %s21257_s30 = smov 0  }
  0x23 LB: > { %25920 = sst [smem:[#allocation26_spill]] %s21070_s8  ;;  %s21272_s3 = sadd.s32 4294967295, %s21082_s30   ;;  %s21082_s30 = sphi %s21257_s30, %s26654_s30   ;;  %s21078_s9 = sphi %s21255_s9, %s26656_s9   ;;  %s21074_s5 = sphi %s21253_s5, %s26658_s5   ;;  %s21070_s8 = sphi %s21251_s8, %s26657_s8  }
  0x24   : > { %25921 = sst [smem:[#allocation27_spill]] %s21078_s9  ;;  %s14385_s6 = sadd.s32 4294967294, %s21082_s30  }
  0x25   : > { %25922 = sst [smem:[#allocation28_spill]] %s21082_s30  ;;  %s21276_s10 = sadd.s32 1, %s21082_s30  }
  0x26   : > { %25923 = sst [smem:[#allocation29_spill]] %s21276_s10  ;;  %s592_s0 = sadd.s32 1, %s21078_s9 }
  0x27   : > { %s589_s11 = ssub.s32 %s21082_s30, %s21276_s10  ;;  %p602_p0 = scmp.ne.s32.totalorder %s21078_s9, %s21074_s5 }
  0x28   : > { %p590_p1 = scmp.eq.s32.totalorder %s589_s11, 0  ;;  %p603_p2 = scmp.eq.s32.totalorder %s21272_s3, 1 }
  0x29   : > { %p608_p3 = scmp.ne.s32.totalorder %s21074_s5, %s21070_s8  ;;  %p609_p4 = scmp.eq.s32.totalorder %s14385_s6, 1 }
  0x2a   : > { %s21287_s29 = scalar_select %p590_p1, %s21078_s9, %s592_s0  }
  0x2b   : > { %p21289_p5 = por %p603_p2, %p602_p0  ;;  %p21293_p6 = por %p609_p4, %p608_p3 }
  0x2c   : > { %25924 = sst [smem:[#allocation30_spill]] %s21287_s29  ;;  %p14386_p7 = scmp.ge.s32.totalorder %s21082_s30, 1 }
  0x2d   : > { %s25925_s2 = scalar_select %p21289_p5, 1, 0 }
  0x2e   : > { %s25927_s7 = scalar_select %p21293_p6, 1, 0 }
  0x2f   : > { %25926 = sst [smem:[#allocation31_spill]] %s25925_s2  ;;  %p694_p8 = scmp.lt.s32.totalorder %s21082_s30, 3 }
  0x30   : > { %25928 = sst [smem:[#allocation32_spill]] %s25927_s7  ;;  %p25630_p9 = scmp.eq.s32.totalorder %s21272_s3, 0 }
  0x31   : > { %p21300_p10 = pnand %p14386_p7, %p694_p8  ;;  %s21084_s1 = smov [#allocation5]  }
  0x32   : > { %s725_s4 = sshll.u32 %s21084_s1, 4  ;;  %s21085_s0 = smov [#allocation8]   ;;  %s21306_s4 = int_to_ptr.vmem [resolvable:$true] %s725_s4 }
  0x33   : > { %s25929_s12 = scalar_select %p21300_p10, 1, 0 }
  0x34   : > { %p20066_p11 = pneg %p21300_p10  ;;  %s751_s11 = sshll.u32 %s21085_s0, 4  ;;  %s21314_s11 = int_to_ptr.vmem [resolvable:$true] %s751_s11 }
  0x35   : > { %s21086_s29 = smov [#allocation11]   ;;  %s25931_s8 = sld [smem:[#allocation93_spill]] }
  0x36   : > { %p21310_p12 = pnand %p25630_p9, %p20066_p11  ;;  %s21316_s9 = sshll.u32 %s21086_s29, 4  ;;  %s806_s9 = int_to_ptr.vmem [resolvable:$true] %s21316_s9 }
  0x38   : > { %p21326_p0 = pneg %p21310_p12 }
  0x3b   : > { %s25932_s28 = smov %s25931_s8  ;;  %s20744_s30 = scalar_lea.hbm %s25931_s8, 9216 }
  0x3c   : > { %p20745_p13 = scmp.ne.s32.totalorder %s25932_s28, %s20744_s30  ;;  %p20751_p3 = scmp.lt.u32.totalorder %s20744_s30, %s25932_s28 }
  0x3e   : > { %p20747_p1 = pnand %p21326_p0, %p20745_p13 }
  0x40   : > { %p20748_p2 = pneg %p20747_p1 }
  0x42   : > { %p20753_p4 = pnand %p20751_p3, %p20748_p2 }
  0x44   : > { %20756 = shalt.err (!%p20753_p4)
}
  0x45   : > { %s20757_s20 = scalar_lea.vmem %s21306_s4, 9216  ;;  %p20765_p9 = scmp.lt.s32.totalorder %s21306_s4, %s21306_s4 }
  0x46   : > { %p20758_p7 = scmp.ne.s32.totalorder %s21306_s4, %s20757_s20  ;;  %p20766_p6 = scmp.lt.s32.totalorder %s20757_s20, %s20757_s20 }
  0x48   : > { %p20760_p8 = pnand %p20758_p7, %p21326_p0  ;;  %p20767_p13 = por %p20766_p6, %p20765_p9 }
  0x4a   : > { %p20761_p11 = pneg %p20760_p8 }
  0x4c   : > { %p20768_p1 = pnand %p20767_p13, %p20761_p11 }
  0x4e   : > { %20771 = shalt.err (!%p20768_p1)
}
  0x4f   : > { %s25636_s8 = smov 64   ;;  %s25638_s30 = smov 4  }
  0x50   : > { %20072 = dma.hbm_to_vmem [thread:$0]  (!%p21310_p12), %s25932_s28, 9216, %s21306_s4, [#allocation6], %s25636_s8, %s25636_s8, %s25638_s30  }
  0x51   : > { %s25934_s29 = sld [smem:[#allocation95_spill]] }
  0x57   : > { %s20772_s20 = scalar_lea.hbm %s25934_s29, 9216 }
  0x58   : > { %p20773_p6 = scmp.ne.s32.totalorder %s25934_s29, %s20772_s20  ;;  %p20779_p3 = scmp.lt.u32.totalorder %s20772_s20, %s25934_s29 }
  0x5a   : > { %p20775_p9 = pnand %p20773_p6, %p21326_p0 }
  0x5c   : > { %p20776_p2 = pneg %p20775_p9 }
  0x5e   : > { %p20781_p4 = pnand %p20779_p3, %p20776_p2 }
  0x60   : > { %20784 = shalt.err (!%p20781_p4)
}
  0x61   : > { %s20785_s4 = scalar_lea.vmem %s21314_s11, 9216  ;;  %p20793_p13 = scmp.lt.s32.totalorder %s21314_s11, %s21314_s11 }
  0x62   : > { %p20786_p7 = scmp.ne.s32.totalorder %s21314_s11, %s20785_s4  ;;  %p20794_p1 = scmp.lt.s32.totalorder %s20785_s4, %s20785_s4 }
  0x64   : > { %p20788_p8 = pnand %p20786_p7, %p21326_p0  ;;  %p20795_p6 = por %p20794_p1, %p20793_p13 }
  0x66   : > { %p20789_p11 = pneg %p20788_p8 }
  0x68   : > { %p20796_p9 = pnand %p20795_p6, %p20789_p11 }
  0x6a   : > { %20799 = shalt.err (!%p20796_p9)
}
  0x6b   : > { %20078 = dma.hbm_to_vmem [thread:$0]  (!%p21310_p12), %s25934_s29, 9216, %s21314_s11, [#allocation9], %s25636_s8, %s25636_s8, %s25638_s30  }
  0x6c   : > { %s25935_s17 = sld [smem:[#allocation106_spill]] }
  0x72   : > { %s20800_s10 = scalar_lea.hbm %s25935_s17, 16 }
  0x73   : > { %p20801_p2 = scmp.ne.s32.totalorder %s25935_s17, %s20800_s10  ;;  %p20807_p7 = scmp.lt.u32.totalorder %s20800_s10, %s25935_s17 }
  0x75   : > { %p20803_p3 = pnand %p20801_p2, %p21326_p0 }
  0x77   : > { %p20804_p4 = pneg %p20803_p3 }
  0x79   : > { %p20809_p8 = pnand %p20807_p7, %p20804_p4 }
  0x7b   : > { %20812 = shalt.err (!%p20809_p8)
}
  0x7c   : > { %s20813_s4 = scalar_lea.vmem %s806_s9, 16  ;;  %s20820_s11 = scalar_lea.vmem %s806_s9, 32 }
  0x7d   : > { %p20814_p11 = scmp.ne.s32.totalorder %s806_s9, %s20813_s4  ;;  %p20821_p6 = scmp.lt.s32.totalorder %s806_s9, %s806_s9 }
  0x7e   : > { %p20822_p9 = scmp.lt.s32.totalorder %s20820_s11, %s20813_s4 }
  0x7f   : > { %p20816_p13 = pnand %p20814_p11, %p21326_p0 }
  0x80   : > { %p20823_p5 = por %p20822_p9, %p20821_p6 }
  0x81   : > { %p20817_p1 = pneg %p20816_p13 }
  0x83   : > { %p20824_p10 = pnand %p20823_p5, %p20817_p1 }
  0x85   : > { %20827 = shalt.err (!%p20824_p10)
}
  0x86   : > { %20084 = dma.hbm_to_vmem [thread:$0]  (!%p21310_p12), %s25935_s17, 16, %s806_s9, [#allocation12]  }
  0x87   : > { %s21089_s27 = smov [#allocation2]   ;;  %s21090_s10 = smov [#allocation7]  }
  0x88   : > { %s712_s2 = sshll.u32 %s21089_s27, 4  ;;  %s738_s7 = sshll.u32 %s21090_s10, 4  ;;  %s713_s2 = int_to_ptr.vmem [resolvable:$true] %s712_s2  ;;  %s739_s7 = int_to_ptr.vmem [resolvable:$true] %s738_s7 }
  0x89   : > { %s25936_s20 = sld [smem:[#allocation92_spill]] }
  0x8f   : > { %s20828_s8 = scalar_lea.hbm %s25936_s20, 9216 }
  0x90   : > { %p20829_p5 = scmp.ne.s32.totalorder %s25936_s20, %s20828_s8  ;;  %p20835_p3 = scmp.lt.u32.totalorder %s20828_s8, %s25936_s20 }
  0x92   : > { %p20831_p10 = pnand %p20829_p5, %p21326_p0 }
  0x94   : > { %p20832_p2 = pneg %p20831_p10 }
  0x96   : > { %p20837_p4 = pnand %p20835_p3, %p20832_p2 }
  0x98   : > { %20840 = shalt.err (!%p20837_p4)
}
  0x99   : > { %s20841_s9 = scalar_lea.vmem %s713_s2, 9216  ;;  %p20849_p13 = scmp.lt.s32.totalorder %s713_s2, %s713_s2 }
  0x9a   : > { %p20842_p7 = scmp.ne.s32.totalorder %s713_s2, %s20841_s9  ;;  %p20850_p1 = scmp.lt.s32.totalorder %s20841_s9, %s20841_s9 }
  0x9c   : > { %p20844_p8 = pnand %p20842_p7, %p21326_p0  ;;  %p20851_p6 = por %p20850_p1, %p20849_p13 }
  0x9e   : > { %p20845_p11 = pneg %p20844_p8 }
  0xa0   : > { %p20852_p9 = pnand %p20851_p6, %p20845_p11 }
  0xa2   : > { %20855 = shalt.err (!%p20852_p9)
}
  0xa3   : > { %s25937_s25 = smov 4   ;;  %s25938_s27 = smov 64  }
  0xa4   : > { %20069 = dma.hbm_to_vmem [thread:$0]  (!%p21310_p12), %s25936_s20, 9216, %s713_s2, [#allocation3], %s25938_s27, %s25938_s27, %s25937_s25  }
  0xa5   : > { %s25939_s0 = sld [smem:[#allocation94_spill]] }
  0xab   : > { %s20856_s4 = scalar_lea.hbm %s25939_s0, 9216 }
  0xac   : > { %p20857_p5 = scmp.ne.s32.totalorder %s25939_s0, %s20856_s4  ;;  %p20863_p3 = scmp.lt.u32.totalorder %s20856_s4, %s25939_s0 }
  0xae   : > { %p20859_p10 = pnand %p20857_p5, %p21326_p0 }
  0xb0   : > { %p20860_p2 = pneg %p20859_p10 }
  0xb2   : > { %p20865_p4 = pnand %p20863_p3, %p20860_p2 }
  0xb4   : > { %20868 = shalt.err (!%p20865_p4)
}
  0xb5   : > { %s20869_s30 = scalar_lea.vmem %s739_s7, 9216  ;;  %p20877_p13 = scmp.lt.s32.totalorder %s739_s7, %s739_s7 }
  0xb6   : > { %p20870_p7 = scmp.ne.s32.totalorder %s739_s7, %s20869_s30  ;;  %p20878_p1 = scmp.lt.s32.totalorder %s20869_s30, %s20869_s30 }
  0xb8   : > { %p20872_p8 = pnand %p20870_p7, %p21326_p0  ;;  %p20879_p6 = por %p20878_p1, %p20877_p13 }
  0xba   : > { %p20873_p11 = pneg %p20872_p8 }
  0xbc   : > { %p20880_p9 = pnand %p20879_p6, %p20873_p11 }
  0xbe   : > { %20883 = shalt.err (!%p20880_p9)
}
  0xbf   : > { %20075 = dma.hbm_to_vmem [thread:$0]  (!%p21310_p12), %s25939_s0, 9216, %s739_s7, [#allocation6], %s25938_s27, %s25938_s27, %s25937_s25  }
  0xc0   : > { %s21091_s8 = smov [#allocation10]   ;;  %s21092_s1 = smov [#allocation13]  }
  0xc1   : > { %s764_s10 = sshll.u32 %s21091_s8, 4  ;;  %s816_s4 = sshll.u32 %s21092_s1, 4  ;;  %s765_s10 = int_to_ptr.vmem [resolvable:$true] %s764_s10  ;;  %s817_s4 = int_to_ptr.vmem [resolvable:$true] %s816_s4 }
  0xc2   : > { %s25940_s9 = sld [smem:[#allocation96_spill]] }
  0xc8   : > { %s25941_s20 = smov %s25940_s9  ;;  %s20884_s30 = scalar_lea.hbm %s25940_s9, 9216 }
  0xc9   : > { %p20885_p5 = scmp.ne.s32.totalorder %s25941_s20, %s20884_s30  ;;  %p20891_p3 = scmp.lt.u32.totalorder %s20884_s30, %s25941_s20 }
  0xcb   : > { %p20887_p10 = pnand %p20885_p5, %p21326_p0 }
  0xcd   : > { %p20888_p2 = pneg %p20887_p10 }
  0xcf   : > { %p20893_p4 = pnand %p20891_p3, %p20888_p2 }
  0xd1   : > { %20896 = shalt.err (!%p20893_p4)
}
  0xd2   : > { %s20897_s7 = scalar_lea.vmem %s765_s10, 9216  ;;  %p20905_p13 = scmp.lt.s32.totalorder %s765_s10, %s765_s10 }
  0xd3   : > { %p20898_p7 = scmp.ne.s32.totalorder %s765_s10, %s20897_s7  ;;  %p20906_p1 = scmp.lt.s32.totalorder %s20897_s7, %s20897_s7 }
  0xd5   : > { %p20900_p8 = pnand %p20898_p7, %p21326_p0  ;;  %p20907_p6 = por %p20906_p1, %p20905_p13 }
  0xd7   : > { %p20901_p11 = pneg %p20900_p8 }
  0xd9   : > { %p20908_p9 = pnand %p20907_p6, %p20901_p11 }
  0xdb   : > { %20911 = shalt.err (!%p20908_p9)
}
  0xdc   : > { %20081 = dma.hbm_to_vmem [thread:$0]  (!%p21310_p12), %s25941_s20, 9216, %s765_s10, [#allocation9], %s25938_s27, %s25938_s27, %s25937_s25  }
  0xdd   : > { %s20912_s8 = scalar_lea.hbm %s25602_s18, 16 }
  0xde   : > { %p20913_p5 = scmp.ne.s32.totalorder %s25602_s18, %s20912_s8  ;;  %p20919_p3 = scmp.lt.u32.totalorder %s20912_s8, %s25602_s18 }
  0xe0   : > { %p20915_p10 = pnand %p20913_p5, %p21326_p0 }
  0xe2   : > { %p20916_p2 = pneg %p20915_p10 }
  0xe4   : > { %p20921_p4 = pnand %p20919_p3, %p20916_p2 }
  0xe6   : > { %20924 = shalt.err (!%p20921_p4)
}
  0xe7   : > { %s20925_s30 = scalar_lea.vmem %s817_s4, 16  ;;  %s20932_s25 = scalar_lea.vmem %s817_s4, 32 }
  0xe8   : > { %p20926_p7 = scmp.ne.s32.totalorder %s817_s4, %s20925_s30  ;;  %p20933_p13 = scmp.lt.s32.totalorder %s817_s4, %s817_s4 }
  0xe9   : > { %p20934_p1 = scmp.lt.s32.totalorder %s20932_s25, %s20925_s30 }
  0xea   : > { %p20928_p8 = pnand %p20926_p7, %p21326_p0 }
  0xeb   : > { %p20935_p6 = por %p20934_p1, %p20933_p13 }
  0xec   : > { %p20929_p11 = pneg %p20928_p8 }
  0xee   : > { %p20936_p9 = pnand %p20935_p6, %p20929_p11 }
  0xf0   : > { %20939 = shalt.err (!%p20936_p9)
}
  0xf1   : > { %20087 = dma.hbm_to_vmem [thread:$0]  (!%p21310_p12), %s25602_s18, 16, %s817_s4, [#allocation12]  }
  0xf2   : > { %s21093_s17 = smov [#allocation14]   ;;  %s20940_s29 = scalar_lea.hbm %s25605_s21, 2048 }
  0xf3   : > { %s832_s7 = sshll.u32 %s21093_s17, 4  ;;  %p20941_p5 = scmp.ne.s32.totalorder %s25605_s21, %s20940_s29  ;;  %s833_s7 = int_to_ptr.vmem [resolvable:$true] %s832_s7 }
  0xf4   : > { %p20947_p3 = scmp.lt.u32.totalorder %s20940_s29, %s25605_s21 }
  0xf5   : > { %p20943_p10 = pnand %p20941_p5, %p21326_p0 }
  0xf7   : > { %p20944_p2 = pneg %p20943_p10 }
  0xf9   : > { %p20949_p4 = pnand %p20947_p3, %p20944_p2 }
  0xfb   : > { %20952 = shalt.err (!%p20949_p4)
}
  0xfc   : > { %s20953_s4 = scalar_lea.vmem %s833_s7, 2048  ;;  %p20961_p13 = scmp.lt.s32.totalorder %s833_s7, %s833_s7 }
  0xfd   : > { %p20954_p7 = scmp.ne.s32.totalorder %s833_s7, %s20953_s4  ;;  %p20962_p1 = scmp.lt.s32.totalorder %s20953_s4, %s20953_s4 }
  0xff   : > { %p20956_p8 = pnand %p20954_p7, %p21326_p0  ;;  %p20963_p6 = por %p20962_p1, %p20961_p13 }
 0x101   : > { %p20957_p11 = pneg %p20956_p8 }
 0x103   : > { %p20964_p9 = pnand %p20963_p6, %p20957_p11 }
 0x105   : > { %20967 = shalt.err (!%p20964_p9)
}
 0x106   : > { %s21094_s19 = smov 256   ;;  %s21095_s9 = smov 16  }
 0x107   : > { %20090 = dma.hbm_to_vmem [thread:$0]  (!%p21310_p12), %s25605_s21, 2048, %s833_s7, [#allocation15], %s21094_s19, %s21094_s19, %s21095_s9  }
 0x108   : > { %p25942_p5 = scmp.ne.s32.totalorder %s25929_s12, 0 }
 0x10a   : > { %862 = sbr.rel (%p25942_p5) target bundleno = 5594 (0x15da), region = 116 }
 0x111   : > { %p25943_p10 = scmp.eq.s32.totalorder %s21272_s3, 0 }
 0x113   : > { %21041 = dma.done.wait (%p25943_p10), [#allocation3], 9216   ;;  %p25944_p0 = pmov %p25943_p10 }
 0x115   : > { %21043 = vsyncadd (%p25944_p0), [#allocation3], 4294958080  ;;  %p25945_p2 = pmov %p25944_p0 }
 0x116   : > { %p25946_p3 = pmov %p25944_p0 }
 0x117   : > { %21045 = dma.done.wait (%p25945_p2), [#allocation6], 18432  }
 0x118   : > { %21047 = vsyncadd (%p25946_p3), [#allocation6], 4294948864  ;;  %p25947_p4 = pmov %p25944_p0 }
 0x119   : > { %p25948_p12 = pmov %p25944_p0 }
 0x11a   : > { %21049 = dma.done.wait (%p25947_p4), [#allocation9], 18432  }
 0x11b   : > { %21051 = vsyncadd (%p25948_p12), [#allocation9], 4294948864  ;;  %p25949_p7 = pmov %p25944_p0 }
 0x11c   : > { %p25950_p8 = pmov %p25944_p0 }
 0x11d   : > { %21053 = dma.done.wait (%p25949_p7), [#allocation12], 32  }
 0x11e   : > { %21055 = vsyncadd (%p25950_p8), [#allocation12], 4294967264  ;;  %p25951_p11 = pmov %p25944_p0 }
 0x11f   : > { %p25952_p13 = pmov %p25944_p0 }
 0x120   : > { %21057 = dma.done.wait (%p25951_p11), [#allocation15], 2048  }
 0x121   : > { %21059 = vsyncadd (%p25952_p13), [#allocation15], 4294965248  ;;  %v25644_v0 = vmov 0.0|0.0   ;;  %p981_p1 = scmp.lt.s32.totalorder %s21272_s3, 1  ;;  %s25953_s27 = sld [smem:[#allocation90_spill]]  ;;  %vm25706_vm0 = vcmask 1046528   ;;  %v25643_v17 = vlaneseq }
 0x122   : > { %17152 = vmatprep.mubr.bf16.mxu0 %v25644_v0  ;;  %17584 = vmatprep.mubr.bf16.mxu1 %v25644_v0  ;;  %s25954_s8 = sld [smem:[#allocation89_spill]]  ;;  %v25647_v23 = vmov 0.0   ;;  %vm25707_vm4 = vcmask 1040384   ;;  %vm25710_vm7 = vmmov 1   ;;  %s26307_s16 = sld [smem:[#allocation91_spill]] }
 0x123   : > { %s21520_s26 = scalar_select %p981_p1, %s21272_s3, 1  ;;  %v21573_v19 = vshrl.u32 %v25643_v17, 7  ;;  %v21586_v24 = vrot.slane %v25647_v23, 7 }
 0x124   : > { %s26545_s28 = sld [smem:[#allocation101_spill]]  ;;  %s26597_s13 = sld [smem:[#allocation102_spill]] }
 0x125   : > { %s16056_s7 = sshll.u32 %s21520_s26, 8  ;;  %25956 = vst [vmem:[#allocation34_spill] sm:$0xff] %v21573_v19  ;;  %25958 = vst [vmem:[#allocation36_spill] sm:$0xff] %v21586_v24  ;;  %v21593_v26 = vadd.s32 16, %v21573_v19  ;;  %v21599_v28 = vadd.s32 32, %v21573_v19  ;;  %v21605_v30 = vadd.s32 48, %v21573_v19 }
 0x126   : > { %v21608_v31 = vadd.s32 64, %v21573_v19  ;;  %v21611_v32 = vadd.s32 80, %v21573_v19  ;;  %v21618_v34 = vadd.s32 96, %v21573_v19  ;;  %v21625_v36 = vadd.s32 112, %v21573_v19  ;;  %s16057_s29 = sshll.u32 %s21520_s26, 6  ;;  %s24487_s6 = sand.u32 1, %s21074_s5  }
 0x127   : > { %v20167_v1 = vld [vmem:[%s25953_s27 + $0x40] sm:$0xff]   ;;  %v20168_v2 = vld [vmem:[%s25953_s27 + $0x48] sm:$0xff]   ;;  %v20169_v3 = vld [vmem:[%s25953_s27 + $0x50] sm:$0xff]   ;;  %25960 = vst [vmem:[#allocation38_spill] sm:$0xff] %v21593_v26  ;;  %v21650_v49 = vadd.s32 128, %v21573_v19  ;;  %s23843_s11 = scalar_lea.vmem %s25608_s24, %s16057_s29  ;;  %s26619_s14 = sld [smem:[#allocation103_spill]] }
 0x128   : > { %17136 = vmatprep.subr.bf16.mxu0 %v20167_v1  ;;  %s21535_s1 = scalar_lea.vmem %s25954_s8, %s16056_s7  ;;  %v20170_v4 = vld [vmem:[%s25953_s27 + $0x58] sm:$0xff]   ;;  %v20171_v11 = vld [vmem:[%s25953_s27 + $0x60] sm:$0xff]   ;;  %v20172_v15 = vld [vmem:[%s25953_s27 + $0x68] sm:$0xff]   ;;  %25961 = vst [vmem:[#allocation39_spill] sm:$0xff] %v21599_v28  ;;  %s14405_s7 = sshll.u32 %s24487_s6, 4 }
 0x129   : > { %17137 = vmatpush3.bf16.msra.mxu0 %v20167_v1  ;;  %v21541_v5 = vld [vmem:[%s21535_s1] sm:$0xff]  ;;  %v21544_v6 = vld [vmem:[%s21535_s1 + $0x8] sm:$0xff]  ;;  %v21549_v9 = vld [vmem:[%s21535_s1 + $0x10] sm:$0xff]  ;;  %25962 = vst [vmem:[#allocation40_spill] sm:$0xff] %v21605_v30  ;;  %s26632_s15 = sld [smem:[#allocation104_spill]]  ;;  %s26636_s19 = sld [smem:[#allocation105_spill]] }
 0x12a   : > { %17138 = vmatprep.subr.bf16.mxu0 %v20168_v2  ;;  %v25646_v7 = vrot.slane %v21541_v5, 1  ;;  %v1807_v8 = vrot.slane %v21544_v6, 1  ;;  %v1809_v10 = vrot.slane %v21549_v9, 1  ;;  %v20173_v16 = vld [vmem:[%s25953_s27 + $0x70] sm:$0xff]   ;;  %v20174_v18 = vld [vmem:[%s25953_s27 + $0x78] sm:$0xff]   ;;  %v20175_v21 = vld [vmem:[%s25953_s27] sm:$0xff]   ;;  %v21583_v22 = vpack.c.bf16 %v21544_v6, %v21541_v5 }
 0x12b   : > { %v21576_v20 = vld [vmem:[%s21535_s1 + $0x18] sm:$0xff]  ;;  %v20176_v27 = vld [vmem:[%s25953_s27 + $0x8] sm:$0xff]   ;;  %v21602_v29 = vld [vmem:[%s21535_s1 + $0x20] sm:$0xff]  ;;  %s14406_s9 = sshll.u32 %s24487_s6, 2  ;;  %s26637_s10 = sld [smem:[#allocation97_spill]] }
 0x12c   : > { %v1808_v12 = vsel %vm25706_vm0, %v25646_v7, %v1807_v8  ;;  %v1810_v13 = vsel %vm25706_vm0, %v1807_v8, %v1809_v10  ;;  %25957 = vst [vmem:[#allocation35_spill] sm:$0xff] %v21583_v22  ;;  %v21590_v25 = vpack.c.bf16 %v21576_v20, %v21549_v9  ;;  %v21615_v33 = vld [vmem:[%s21535_s1 + $0x28] sm:$0xff]  ;;  %v21622_v35 = vld [vmem:[%s21535_s1 + $0x30] sm:$0xff]  ;;  %v21628_v37 = vld [vmem:[%s21535_s1 + $0x38] sm:$0xff]  ;;  %v1811_v57 = vrot.slane %v21576_v20, 1  ;;  %s24934_s30 = scalar_lea.vmem [#allocation17], %s14406_s9 }
 0x12d   : > { %17139 = vmatpush3.bf16.msra.mxu0 %v20168_v2  ;;  %v21561_v14 = vpack.c.bf16 %v1810_v13, %v1808_v12  ;;  %v20177_v38 = vld [vmem:[%s25953_s27 + $0x10] sm:$0xff]   ;;  %v21639_v43 = vpack.c.bf16 %v21615_v33, %v21602_v29  ;;  %v21645_v46 = vpack.c.bf16 %v21628_v37, %v21622_v35  ;;  %v20178_v52 = vld [vmem:[%s25953_s27 + $0x18] sm:$0xff]   ;;  %v21660_v55 = vld [vmem:[%s21535_s1 + $0x40] sm:$0xff]  ;;  %v1813_v62 = vrot.slane %v21602_v29, 1  ;;  %s26639_s2 = sld [smem:[#allocation98_spill]]  ;;  %s26640_s25 = sld [smem:[#allocation99_spill]] }
 0x12e   : > { %17140 = vmatprep.subr.bf16.mxu0 %v20169_v3  ;;  %25959 = vst [vmem:[#allocation37_spill] sm:$0xff] %v21590_v25  ;;  %v21663_v56 = vld [vmem:[%s21535_s1 + $0x48] sm:$0xff]  ;;  %v21668_v58 = vld [vmem:[%s21535_s1 + $0x50] sm:$0xff]  ;;  %v21671_v59 = vld [vmem:[%s21535_s1 + $0x58] sm:$0xff]  ;;  %v1815_v63 = vrot.slane %v21615_v33, 1  ;;  %v1819_v8 = vrot.slane %v21628_v37, 1  ;;  %v1812_v13 = vsel %vm25706_vm0, %v1809_v10, %v1811_v57 }
 0x12f   : > { %25955 = vst [vmem:[#allocation33_spill] sm:$0xff] %v21561_v14  ;;  %25963 = vst [vmem:[#allocation41_spill] sm:$0xff] %v21639_v43  ;;  %v20179_v1 = vld [vmem:[%s25953_s27 + $0x20] sm:$0xff]   ;;  %v21688_v12 = vpack.c.bf16 %v21663_v56, %v21660_v55  ;;  %v1823_v17 = vrot.slane %v21663_v56, 1  ;;  %v1825_v0 = vrot.slane %v21668_v58, 1  ;;  %v21709_v10 = vld [vmem:[%s21535_s1 + $0x70] sm:$0xff] }
 0x130   : > { %25964 = vst [vmem:[#allocation42_spill] sm:$0xff] %v21645_v46  ;;  %v20180_v7 = vld [vmem:[%s25953_s27 + $0x28] sm:$0xff]   ;;  %v21824_v40 = vld [vmem:[%s21535_s1 + $0xb8] sm:$0xff]  ;;  %v20185_v14 = vld [vmem:[%s25953_s27 + $0x90] sm:$0xff]   ;;  %s16058_s29 = sshll.u32 %s21272_s3, 8  ;;  %s26644_s4 = sld [smem:[#allocation109_spill]] }
 0x131   : > { %17141 = vmatpush3.bf16.msra.mxu0 %v20169_v3  ;;  %25965 = vst [vmem:[#allocation43_spill] sm:$0xff] %v21688_v12  ;;  %v21738_v45 = vld [vmem:[%s21535_s1 + $0x88] sm:$0xff]  ;;  %v1826_v54 = vsel %vm25706_vm0, %v1823_v17, %v1825_v0  ;;  %s14097_s12 = scalar_lea.sflag [#allocation4], %s24487_s6 }
 0x132   : > { %17142 = vmatprep.subr.bf16.mxu0 %v20170_v4  ;;  %v1839_v51 = vrot.slane %v21738_v45, 1  ;;  %v21801_v44 = vld [vmem:[%s21535_s1 + $0xa8] sm:$0xff] }
 0x133   : > { %v21837_v41 = vld [vmem:[%s21535_s1 + $0xc8] sm:$0xff] }
 0x135   : > { %17143 = vmatpush3.bf16.msra.mxu0 %v20170_v4  ;;  %v1817_v4 = vrot.slane %v21622_v35, 1 }
 0x136   : > { %17144 = vmatprep.subr.bf16.mxu0 %v20171_v11 }
 0x139   : > { %17145 = vmatpush3.bf16.msra.mxu0 %v20171_v11  ;;  %v21716_v11 = vld [vmem:[%s21535_s1 + $0x78] sm:$0xff] }
 0x13a   : > { %17146 = vmatprep.subr.bf16.mxu0 %v20172_v15 }
 0x13d   : > { %17147 = vmatpush3.bf16.msra.mxu0 %v20172_v15  ;;  %v1827_v15 = vrot.slane %v21671_v59, 1 }
 0x13e   : > { %17148 = vmatprep.subr.bf16.mxu0 %v20173_v16 }
 0x13f   : > { %v1828_v53 = vsel %vm25706_vm0, %v1825_v0, %v1827_v15 }
 0x141   : > { %17149 = vmatpush3.bf16.msra.mxu0 %v20173_v16  ;;  %v1821_v16 = vrot.slane %v21660_v55, 1 }
 0x142   : > { %17150 = vmatprep.subr.bf16.mxu0 %v20174_v18 }
 0x143   : > { %v1824_v47 = vsel %vm25706_vm0, %v1821_v16, %v1823_v17 }
 0x144   : > { %v21758_v3 = vpack.c.bf16 %v1826_v54, %v1824_v47  ;;  %v20182_v54 = vld [vmem:[%s25953_s27 + $0x38] sm:$0xff]  }
 0x145   : > { %17151 = vmatpush3.bf16.msra.mxu0 %v20174_v18  ;;  %v21697_v18 = vpack.c.bf16 %v21671_v59, %v21668_v58 }
 0x146   : > { %17184 = vmatprep.subr.bf16.mxu0 %v20175_v21  ;;  %25972 = vst [vmem:[#allocation50_spill] sm:$0xff] %v21758_v3  ;;  %v21949_v3 = vadd.s32 40, %v21573_v19 }
 0x147   : > { %25966 = vst [vmem:[#allocation44_spill] sm:$0xff] %v21697_v18 }
 0x148   : > { %17153 = vmatmul.mubr.bf16.vlgmr.msra.gmra.mrb[0].mxu0 %v21583_v22  ;;  %25999 = vst [vmem:[#allocation68_spill] sm:$0xff] %v21949_v3 }
 0x149   : > { %17156 = vmatprep.mubr.bf16.mxu0 %v21590_v25  ;;  %17185 = vmatpush3.bf16.msra.mxu0 %v20175_v21  ;;  %v21700_v21 = vld [vmem:[%s21535_s1 + $0x60] sm:$0xff]  ;;  %v21871_v25 = vld [vmem:[%s21535_s1 + $0xe8] sm:$0xff] }
 0x14a   : > { %17186 = vmatprep.subr.bf16.mxu0 %v20176_v27  ;;  %v1829_v2 = vrot.slane %v21700_v21, 1  ;;  %25983 = vst [vmem:[#allocation61_spill] sm:$0xff] %v21871_v25 }
 0x14c   : > { %v1830_v17 = vsel %vm25706_vm0, %v1827_v15, %v1829_v2 }
 0x14d   : > { %17187 = vmatpush3.bf16.msra.mxu0 %v20176_v27  ;;  %v21703_v27 = vld [vmem:[%s21535_s1 + $0x68] sm:$0xff]  ;;  %v21767_v23 = vpack.c.bf16 %v1830_v17, %v1828_v53 }
 0x14e   : > { %17188 = vmatprep.subr.bf16.mxu0 %v20177_v38  ;;  %v1831_v61 = vrot.slane %v21703_v27, 1 }
 0x14f   : > { %25973 = vst [vmem:[#allocation51_spill] sm:$0xff] %v21767_v23 }
 0x150   : > { %17157 = vmatmul.mubr.bf16.gmra.mrb[4].mxu0 %v21639_v43  ;;  %v21868_v43 = vld [vmem:[%s21535_s1 + $0xe0] sm:$0xff] }
 0x151   : > { %17160 = vmatprep.mubr.bf16.mxu0 %v21645_v46  ;;  %17189 = vmatpush3.bf16.msra.mxu0 %v20177_v38  ;;  %v1814_v38 = vsel %vm25706_vm0, %v1811_v57, %v1813_v62  ;;  %v1818_v57 = vsel %vm25706_vm0, %v1815_v63, %v1817_v4 }
 0x152   : > { %17190 = vmatprep.subr.bf16.mxu0 %v20178_v52  ;;  %v21718_v48 = vpack.c.bf16 %v1814_v38, %v1812_v13  ;;  %v1833_v13 = vrot.slane %v21709_v10, 1  ;;  %v1822_v38 = vsel %vm25706_vm0, %v1819_v8, %v1821_v16 }
 0x154   : > { %25967 = vst [vmem:[#allocation45_spill] sm:$0xff] %v21718_v48  ;;  %v1834_v47 = vsel %vm25706_vm0, %v1831_v61, %v1833_v13  ;;  %v26002_v48 = vand.u32 15, %v21605_v30 }
 0x155   : > { %17191 = vmatpush3.bf16.msra.mxu0 %v20178_v52  ;;  %v1816_v52 = vsel %vm25706_vm0, %v1813_v62, %v1815_v63  ;;  %v21732_v62 = vld [vmem:[%s21535_s1 + $0x80] sm:$0xff]  ;;  %v1820_v63 = vsel %vm25706_vm0, %v1817_v4, %v1819_v8  ;;  %v21753_v4 = vpack.c.bf16 %v21716_v11, %v21709_v10  ;;  %v21756_v8 = vld [vmem:[%s21535_s1 + $0x90] sm:$0xff] }
 0x156   : > { %17192 = vmatprep.subr.bf16.mxu0 %v20179_v1  ;;  %v21726_v60 = vpack.c.bf16 %v1818_v57, %v1816_v52  ;;  %v20181_v52 = vld [vmem:[%s25953_s27 + $0x30] sm:$0xff]   ;;  %v21743_v57 = vpack.c.bf16 %v1822_v38, %v1820_v63  ;;  %v1835_v63 = vrot.slane %v21716_v11, 1  ;;  %v1837_v16 = vrot.slane %v21732_v62, 1 }
 0x157   : > { %25971 = vst [vmem:[#allocation49_spill] sm:$0xff] %v21753_v4  ;;  %v1832_v38 = vsel %vm25706_vm0, %v1829_v2, %v1831_v61  ;;  %v1841_v50 = vrot.slane %v21756_v8, 1  ;;  %v21781_v61 = vld [vmem:[%s21535_s1 + $0x98] sm:$0xff]  ;;  %v21793_v2 = vld [vmem:[%s25953_s27 + $0x80] sm:$0xff]   ;;  %vm21959_vm5 = vcmp.ge.s32.totalorder %v26002_v48, 1  ;;  %v21977_v48 = vpack.c.bf16 %v21871_v25, %v21868_v43 }
 0x158   : > { %17161 = vmatmul.mubr.bf16.gmra.mrb[8].mxu0 %v21688_v12  ;;  %25968 = vst [vmem:[#allocation46_spill] sm:$0xff] %v21726_v60  ;;  %25969 = vst [vmem:[#allocation47_spill] sm:$0xff] %v21743_v57  ;;  %v21774_v15 = vpack.c.bf16 %v1834_v47, %v1832_v38  ;;  %v1836_v17 = vsel %vm25706_vm0, %v1833_v13, %v1835_v63  ;;  %v1838_v0 = vsel %vm25706_vm0, %v1835_v63, %v1837_v16  ;;  %v21788_v47 = vld [vmem:[%s21535_s1 + $0xa0] sm:$0xff]  ;;  %v21804_v38 = vld [vmem:[%s21535_s1 + $0xb0] sm:$0xff] }
 0x159   : > { %17164 = vmatprep.mubr.bf16.mxu0 %v21697_v18  ;;  %17193 = vmatpush3.bf16.msra.mxu0 %v20179_v1  ;;  %v21749_v1 = vpack.c.bf16 %v21703_v27, %v21700_v21  ;;  %v1840_v53 = vsel %vm25706_vm0, %v1837_v16, %v1839_v51  ;;  %v1842_v13 = vsel %vm25706_vm0, %v1839_v51, %v1841_v50  ;;  %v1843_v42 = vrot.slane %v21781_v61, 1  ;;  %v21845_v12 = vld [vmem:[%s21535_s1 + $0xd0] sm:$0xff]  ;;  %vm22070_vm13 = vmpackc.low %vm25710_vm7, %vm21959_vm5 }
 0x15a   : > { %17194 = vmatprep.subr.bf16.mxu0 %v20180_v7  ;;  %25974 = vst [vmem:[#allocation52_spill] sm:$0xff] %v21774_v15  ;;  %v1845_v16 = vrot.slane %v21788_v47, 1  ;;  %v21816_v51 = vpack.c.bf16 %v21781_v61, %v21756_v8  ;;  %v1849_v63 = vrot.slane %v21804_v38, 1  ;;  %v1851_v18 = vrot.slane %v21824_v40, 1  ;;  %v21954_v60 = vld [vmem:[%s21535_s1 + $0xf0] sm:$0xff]  ;;  %26009 = vst [vmem:[#allocation72_spill] sm:$0xff] %v21977_v48 }
 0x15b   : > { %25970 = vst [vmem:[#allocation48_spill] sm:$0xff] %v21749_v1  ;;  %v25985_v15 = vand.u32 15, %v21573_v19  ;;  %26001 = vst [vmem:[#allocation70_spill] sm:$0xff] %v21954_v60 }
 0x15c   : > { %25978 = vst [vmem:[#allocation56_spill] sm:$0xff] %v21816_v51 }
 0x15d   : > { %17195 = vmatpush3.bf16.msra.mxu0 %v20180_v7  ;;  %v21795_v7 = vpack.c.bf16 %v1838_v0, %v1836_v17  ;;  %v21811_v0 = vpack.c.bf16 %v21738_v45, %v21732_v62  ;;  %v1847_v17 = vrot.slane %v21801_v44, 1  ;;  %vm21892_vm1 = vcmp.ge.s32.totalorder %v25985_v15, 1 }
 0x15e   : > { %17196 = vmatprep.subr.bf16.mxu0 %v20181_v52  ;;  %v21927_v15 = vadd.s32 192, %v21573_v19  ;;  %vm21987_vm8 = vmpackc.low %vm25710_vm7, %vm21892_vm1 }
 0x15f   : > { %25975 = vst [vmem:[#allocation53_spill] sm:$0xff] %v21795_v7  ;;  %25977 = vst [vmem:[#allocation55_spill] sm:$0xff] %v21811_v0  ;;  %v1850_v39 = vsel %vm25706_vm0, %v1847_v17, %v1849_v63  ;;  %v21930_v7 = vadd.s32 208, %v21573_v19 }
 0x160   : > { %17165 = vmatmul.mubr.bf16.gmra.mrb[12].mxu0 %v21749_v1 }
 0x161   : > { %17168 = vmatprep.mubr.bf16.mxu0 %v21753_v4  ;;  %17197 = vmatpush3.bf16.msra.mxu0 %v20181_v52  ;;  %v21806_v52 = vpack.c.bf16 %v1842_v13, %v1840_v53  ;;  %v21830_v4 = vld [vmem:[%s21535_s1 + $0xc0] sm:$0xff]  ;;  %v1846_v53 = vsel %vm25706_vm0, %v1843_v42, %v1845_v16  ;;  %v21852_v13 = vpack.c.bf16 %v21801_v44, %v21788_v47 }
 0x162   : > { %17198 = vmatprep.subr.bf16.mxu0 %v20182_v54 }
 0x163   : > { %25976 = vst [vmem:[#allocation54_spill] sm:$0xff] %v21806_v52  ;;  %25981 = vst [vmem:[#allocation59_spill] sm:$0xff] %v21852_v13 }
 0x165   : > { %17199 = vmatpush3.bf16.msra.mxu0 %v20182_v54  ;;  %v1844_v54 = vsel %vm25706_vm0, %v1841_v50, %v1843_v42  ;;  %v1853_v42 = vrot.slane %v21830_v4, 1 }
 0x166   : > { %17232 = vmatprep.subr.bf16.mxu0 %v21793_v2  ;;  %v21839_v1 = vpack.c.bf16 %v1846_v53, %v1844_v54  ;;  %v1855_v53 = vrot.slane %v21837_v41, 1  ;;  %v21860_v54 = vld [vmem:[%s21535_s1 + $0xd8] sm:$0xff] }
 0x167   : > { %v1859_v22 = vrot.slane %v21860_v54, 1 }
 0x168   : > { %17169 = vmatmul.mubr.bf16.gmra.mrb[16].mxu0 %v21811_v0  ;;  %25979 = vst [vmem:[#allocation57_spill] sm:$0xff] %v21839_v1  ;;  %v1848_v0 = vsel %vm25706_vm0, %v1845_v16, %v1847_v17  ;;  %v21857_v16 = vpack.c.bf16 %v21824_v40, %v21804_v38  ;;  %v1857_v17 = vrot.slane %v21845_v12, 1  ;;  %v1852_v1 = vsel %vm25706_vm0, %v1849_v63, %v1851_v18 }
 0x169   : > { %17172 = vmatprep.mubr.bf16.mxu0 %v21816_v51  ;;  %v21847_v50 = vpack.c.bf16 %v1850_v39, %v1848_v0  ;;  %v1854_v51 = vsel %vm25706_vm0, %v1851_v18, %v1853_v42  ;;  %v21882_v0 = vadd.s32 160, %v21573_v19  ;;  %v1856_v39 = vsel %vm25706_vm0, %v1853_v42, %v1855_v53 }
 0x16a   : > { %25982 = vst [vmem:[#allocation60_spill] sm:$0xff] %v21857_v16  ;;  %v21884_v46 = vpack.c.bf16 %v1854_v51, %v1852_v1  ;;  %v1863_v1 = vrot.slane %v21871_v25, 1  ;;  %v25989_v51 = vand.u32 15, %v21593_v26  ;;  %v21924_v26 = vadd.s32 176, %v21573_v19 }
 0x16b   : > { %25980 = vst [vmem:[#allocation58_spill] sm:$0xff] %v21847_v50  ;;  %v21876_v50 = vadd.s32 144, %v21573_v19  ;;  %v26016_v63 = vmov 0  ;;  %v26019_v42 = vmov 0  ;;  %v26022_v25 = vrot.slane %v21544_v6, 7 }
 0x16c   : > { %25984 = vst [vmem:[#allocation62_spill] sm:$0xff] %v21884_v46  ;;  %vm21902_vm2 = vcmp.ge.s32.totalorder %v25989_v51, 1  ;;  %v21940_v51 = vadd.s32 8, %v21573_v19  ;;  %v1860_v46 = vsel %vm25706_vm0, %v1857_v17, %v1859_v22 }
 0x16d   : > { %vm22004_vm9 = vmpackc.low %vm25710_vm7, %vm21902_vm2 }
 0x16e   : > { %25997 = vst [vmem:[#allocation66_spill] sm:$0xff] %v21940_v51  ;;  %v26017_v63 = vsel %vm22004_vm9, 4294967295, %v26016_v63 }
 0x16f   : > { %26018 = vst [vmem:[#allocation76_spill] sm:$0xff] %v26017_v63  ;;  %v20203_v63 = vld [vmem:[%s25953_s27 + $0x120] sm:$0xff]  }
 0x170   : > { %17173 = vmatmul.mubr.bf16.gmra.mrb[20].mxu0 %v21852_v13  ;;  %v1858_v13 = vsel %vm25706_vm0, %v1855_v53, %v1857_v17  ;;  %v21908_v53 = vpack.c.bf16 %v21837_v41, %v21830_v4  ;;  %v21964_v17 = vadd.s32 56, %v21573_v19 }
 0x171   : > { %17176 = vmatprep.mubr.bf16.mxu0 %v21857_v16  ;;  %v21896_v18 = vpack.c.bf16 %v1858_v13, %v1856_v39  ;;  %v1861_v16 = vrot.slane %v21868_v43, 1  ;;  %v21914_v13 = vpack.c.bf16 %v21860_v54, %v21845_v12  ;;  %v25994_v39 = vand.u32 15, %v21599_v28 }
 0x172   : > { %25992 = vst [vmem:[#allocation64_spill] sm:$0xff] %v21908_v53  ;;  %v21943_v28 = vadd.s32 24, %v21573_v19  ;;  %26005 = vst [vmem:[#allocation71_spill] sm:$0xff] %v21964_v17  ;;  %v26026_v17 = vrot.slane %v21576_v20, 7 }
 0x173   : > { %25988 = vst [vmem:[#allocation63_spill] sm:$0xff] %v21896_v18  ;;  %25993 = vst [vmem:[#allocation65_spill] sm:$0xff] %v21914_v13  ;;  %vm21918_vm3 = vcmp.ge.s32.totalorder %v25994_v39, 1  ;;  %v21933_v18 = vadd.s32 224, %v21573_v19  ;;  %v21936_v39 = vadd.s32 240, %v21573_v19  ;;  %v1862_v23 = vsel %vm25706_vm0, %v1859_v22, %v1861_v16 }
 0x174   : > { %25998 = vst [vmem:[#allocation67_spill] sm:$0xff] %v21943_v28  ;;  %v21951_v57 = vpack.c.bf16 %v1862_v23, %v1860_v46  ;;  %v25694_v22 = vrot.slane %v21954_v60, 1  ;;  %v26013_v46 = vmov 0.0   ;;  %vm22016_vm10 = vmpackc.low %vm25710_vm7, %vm21918_vm3 }
 0x175   : > { %v26020_v42 = vsel %vm22016_vm10, 4294967295, %v26019_v42 }
 0x176   : > { %26000 = vst [vmem:[#allocation69_spill] sm:$0xff] %v21951_v57  ;;  %v21997_v57 = vrot.slane %v26013_v46, 1  ;;  %v26024_v46 = vrot.slane %v21549_v9, 7  ;;  %v20184_v9 = vld [vmem:[%s25953_s27 + $0x88] sm:$0xff]  }
 0x178   : > { %17177 = vmatmul.mubr.bf16.gmra.mrb[24].mxu0 %v21908_v53  ;;  %v1864_v53 = vsel %vm25706_vm0, %v1861_v16, %v1863_v1  ;;  %v21993_v16 = vpack.c.bf16 %v21586_v24, %v21586_v24  ;;  %26014 = vst [vmem:[#allocation74_spill] sm:$0xff] %v21997_v57  ;;  %v26028_v57 = vand.u32 15, %v21611_v32  ;;  %v26034_v32 = vmov 0 }
 0x179   : > { %17180 = vmatprep.mubr.bf16.mxu0 %v21914_v13  ;;  %v26006_v13 = vand.u32 15, %v21608_v31  ;;  %v1866_v31 = vsel %vm25706_vm0, %v1863_v1, %v25694_v22  ;;  %v26021_v22 = vrot.slane %v21541_v5, 7  ;;  %v26035_v32 = vsel %vm22070_vm13, 4294967295, %v26034_v32 }
 0x17a   : > { %26012 = vst [vmem:[#allocation73_spill] sm:$0xff] %v21993_v16  ;;  %v21999_v60 = vpack.c.bf16 %v1866_v31, %v1864_v53  ;;  %v22021_v53 = vadd.s32 72, %v21573_v19  ;;  %v22024_v31 = vadd.s32 88, %v21573_v19  ;;  %vm22050_vm11 = vcmp.ge.s32.totalorder %v26028_v57, 1 }
 0x17b   : > { %vm21969_vm6 = vcmp.ge.s32.totalorder %v26006_v13, 1  ;;  %v1164_v30 = vsel %vm25707_vm4, %v21586_v24, %v26021_v22  ;;  %v26023_v52 = vmov %v26021_v22  ;;  %v26027_v22 = vmov %v26024_v46  ;;  %vm22133_vm2 = vmpackc.low %vm25710_vm7, %vm22050_vm11  ;;  %v20298_v13 = vld [vmem:[%s26307_s16 + $0x1d8] sm:$0xff]  }
 0x17c   : > { %26015 = vst [vmem:[#allocation75_spill] sm:$0xff] %v21999_v60  ;;  %v1166_v1 = vsel %vm25707_vm4, %v26023_v52, %v26022_v25  ;;  %v1170_v24 = vsel %vm25707_vm4, %v26027_v22, %v26026_v17  ;;  %v26031_v52 = vand.u32 15, %v21618_v34  ;;  %vm22077_vm14 = vmpackc.low %vm25710_vm7, %vm21969_vm6  ;;  %v26036_v34 = vmov 0 }
 0x17d   : > { %v22060_v6 = vpack.c.bf16 %v1166_v1, %v1164_v30  ;;  %v26037_v34 = vsel %vm22077_vm14, 4294967295, %v26036_v34  ;;  %v26039_v30 = vmov %v26026_v17  ;;  %v26040_v57 = vrot.slane %v21615_v33, 7 }
 0x17e   : > { %vm22056_vm12 = vcmp.ge.s32.totalorder %v26031_v52, 1  ;;  %v26044_v52 = vrot.slane %v21628_v37, 7 }
 0x17f   : > { %v26043_v1 = vmov %v26040_v57  ;;  %vm22140_vm3 = vmpackc.low %vm25710_vm7, %vm22056_vm12 }
 0x180   : > { %17181 = vmatmul.mubr.bf16.gmra.mrb[28].mxu0 %v21977_v48  ;;  %v26025_v48 = vmov %v26022_v25  ;;  %v20187_v25 = vld [vmem:[%s25953_s27 + $0xa0] sm:$0xff]  }
 0x181   : > { %17200 = vmatprep.mubr.msk.bf16.mxu0 %vm21987_vm8, %v21993_v16  ;;  %v1168_v60 = vsel %vm25707_vm4, %v26025_v48, %v26024_v46  ;;  %v26042_v48 = vrot.slane %v21622_v35, 7  ;;  %v20186_v35 = vld [vmem:[%s25953_s27 + $0x98] sm:$0xff]   ;;  %v26056_v16 = vrot.slane %v21660_v55, 7 }
 0x182   : > { %v22065_v46 = vpack.c.bf16 %v1170_v24, %v1168_v60  ;;  %v26038_v24 = vrot.slane %v21602_v29, 7  ;;  %v20189_v29 = vld [vmem:[%s25953_s27 + $0xb0] sm:$0xff]  }
 0x183   : > { %v1176_v22 = vsel %vm25707_vm4, %v26043_v1, %v26042_v48  ;;  %v26045_v20 = vmov %v26042_v48  ;;  %v26059_v48 = vmov %v26056_v16 }
 0x184   : > { %v1172_v60 = vsel %vm25707_vm4, %v26039_v30, %v26038_v24  ;;  %v26041_v17 = vmov %v26038_v24  ;;  %v1178_v24 = vsel %vm25707_vm4, %v26045_v20, %v26044_v52  ;;  %v26046_v30 = vand.u32 15, %v21625_v36 }
 0x185   : > { %v1174_v23 = vsel %vm25707_vm4, %v26041_v17, %v26040_v57  ;;  %v22128_v17 = vpack.c.bf16 %v1178_v24, %v1176_v22  ;;  %v26052_v36 = vmov 0  ;;  %v26060_v22 = vrot.slane %v21668_v58, 7 }
 0x186   : > { %vm22113_vm15 = vcmp.ge.s32.totalorder %v26046_v30, 1  ;;  %v22123_v33 = vpack.c.bf16 %v1174_v23, %v1172_v60  ;;  %v26053_v36 = vsel %vm22133_vm2, 4294967295, %v26052_v36  ;;  %v26058_v23 = vrot.slane %v21663_v56, 7  ;;  %v20188_v56 = vld [vmem:[%s25953_s27 + $0xa8] sm:$0xff]  }
 0x187   : > { %v26062_v24 = vrot.slane %v21671_v59, 7  ;;  %v26063_v30 = vmov %v26060_v22  ;;  %vm22189_vm6 = vmpackc.low %vm25710_vm7, %vm22113_vm15  ;;  %v26067_v58 = vmov 0  ;;  %v26072_v57 = vrot.slane %v21700_v21, 7 }
 0x188   : > { %17201 = vmatmul.mubr.msk.bf16.vlgmr.msra.gmra.mrb[0].mxu0 %vm22004_vm9, %v22060_v6  ;;  %v1182_v1 = vsel %vm25707_vm4, %v26059_v48, %v26058_v23  ;;  %v26068_v58 = vsel %vm22189_vm6, 4294967295, %v26067_v58  ;;  %v1046_v21 = vadd.s32 104, %v21573_v19 }
 0x189   : > { %17204 = vmatprep.mubr.msk.bf16.mxu0 %vm22016_vm10, %v22065_v46  ;;  %17233 = vmatpush3.bf16.msra.mxu0 %v21793_v2  ;;  %v26049_v2 = vand.u32 15, %v21650_v49  ;;  %v26054_v49 = vmov 0  ;;  %v1186_v37 = vsel %vm25707_vm4, %v26063_v30, %v26062_v24  ;;  %v26080_v30 = vand.u32 15, %v21882_v0 }
 0x18a   : > { %17234 = vmatprep.subr.bf16.mxu0 %v20184_v9  ;;  %v26055_v49 = vsel %vm22140_vm3, 4294967295, %v26054_v49  ;;  %v26085_v0 = vand.u32 15, %v21924_v26  ;;  %v26088_v26 = vrot.slane %v21732_v62, 7 }
 0x18b   : > { %vm22119_vm1 = vcmp.ge.s32.totalorder %v26049_v2, 1  ;;  %v26064_v2 = vand.u32 15, %v21876_v50  ;;  %v26069_v50 = vmov 0  ;;  %vm22231_vm12 = vcmp.ge.s32.totalorder %v26080_v30, 1 }
 0x18c   : > { %vm22196_vm11 = vmpackc.low %vm25710_vm7, %vm22119_vm1  ;;  %vm22251_vm1 = vcmp.ge.s32.totalorder %v26085_v0, 1  ;;  %v1076_v30 = vand.u32 15, %v22024_v31 }
 0x18d   : > { %17235 = vmatpush3.bf16.msra.mxu0 %v20184_v9  ;;  %v26057_v9 = vmov %v26044_v52  ;;  %v26061_v52 = vmov %v26058_v23  ;;  %vm22175_vm5 = vcmp.ge.s32.totalorder %v26064_v2, 1  ;;  %v26070_v50 = vsel %vm22196_vm11, 4294967295, %v26069_v50 }
 0x18e   : > { %17236 = vmatprep.subr.bf16.mxu0 %v20185_v14  ;;  %v1180_v60 = vsel %vm25707_vm4, %v26057_v9, %v26056_v16  ;;  %v1184_v20 = vsel %vm25707_vm4, %v26061_v52, %v26060_v22  ;;  %26071 = vst [vmem:[#allocation77_spill] sm:$0xff] %v26070_v50  ;;  %v26075_v23 = vmov %v26072_v57  ;;  %vm22245_vm15 = vmpackc.low %vm25710_vm7, %vm22175_vm5  ;;  %v22261_v16 = vld [vmem:[%s25953_s27 + $0xc0] sm:$0xff]   ;;  %v26111_v2 = vrot.slane %v21801_v44, 7 }
 0x18f   : > { %v22179_v55 = vpack.c.bf16 %v1182_v1, %v1180_v60  ;;  %v26074_v60 = vrot.slane %v21703_v27, 7  ;;  %v26076_v1 = vrot.slane %v21709_v10, 7  ;;  %v20190_v27 = vld [vmem:[%s25953_s27 + $0xb8] sm:$0xff]   ;;  %v26083_v10 = vmov 0 }
 0x190   : > { %17205 = vmatmul.mubr.msk.bf16.gmra.mrb[4].mxu0 %vm22070_vm13, %v22123_v33  ;;  %v26084_v10 = vsel %vm22245_vm15, 4294967295, %v26083_v10  ;;  %v26125_v44 = vmov 0 }
 0x191   : > { %17208 = vmatprep.mubr.msk.bf16.mxu0 %vm22077_vm14, %v22128_v17  ;;  %17237 = vmatpush3.bf16.msra.mxu0 %v20185_v14  ;;  %v22184_v14 = vpack.c.bf16 %v1186_v37, %v1184_v20  ;;  %v1190_v48 = vsel %vm25707_vm4, %v26075_v23, %v26074_v60  ;;  %v26077_v22 = vmov %v26074_v60  ;;  %v26078_v20 = vrot.slane %v21716_v11, 7 }
 0x192   : > { %17238 = vmatprep.subr.bf16.mxu0 %v20186_v35  ;;  %v1192_v52 = vsel %vm25707_vm4, %v26077_v22, %v26076_v1  ;;  %v26092_v23 = vrot.slane %v21756_v8, 7  ;;  %v26094_v22 = vrot.slane %v21781_v61, 7  ;;  %v26102_v8 = vmov 0 }
 0x194   : > { %v26109_v31 = vmov %v26094_v22 }
 0x195   : > { %17239 = vmatpush3.bf16.msra.mxu0 %v20186_v35  ;;  %v26073_v35 = vmov %v26062_v24  ;;  %v26079_v24 = vmov %v26076_v1 }
 0x196   : > { %17240 = vmatprep.subr.bf16.mxu0 %v20187_v25  ;;  %v1188_v9 = vsel %vm25707_vm4, %v26073_v35, %v26072_v57  ;;  %v1194_v59 = vsel %vm25707_vm4, %v26079_v24, %v26078_v20  ;;  %v26089_v57 = vmov %v26078_v20  ;;  %v26090_v35 = vrot.slane %v21738_v45, 7 }
 0x197   : > { %v22240_v37 = vpack.c.bf16 %v1194_v59, %v1192_v52  ;;  %v26095_v52 = vmov %v26092_v23  ;;  %v26096_v20 = vand.u32 15, %v21927_v15  ;;  %v26099_v45 = vand.u32 15, %v21930_v7 }
 0x198   : > { %17209 = vmatmul.mubr.msk.bf16.gmra.mrb[8].mxu0 %vm22133_vm2, %v22179_v55  ;;  %v1202_v11 = vsel %vm25707_vm4, %v26095_v52, %v26094_v22  ;;  %v1074_v15 = vand.u32 15, %v22021_v53  ;;  %v26105_v7 = vmov 0  ;;  %v26108_v53 = vrot.slane %v21788_v47, 7  ;;  %v26172_v52 = vld [vmem:[#allocation71_spill] sm:$0xff] }
 0x199   : > { %17212 = vmatprep.mubr.msk.bf16.mxu0 %vm22140_vm3, %v22184_v14  ;;  %17241 = vmatpush3.bf16.msra.mxu0 %v20187_v25  ;;  %v22235_v25 = vpack.c.bf16 %v1190_v48, %v1188_v9  ;;  %v26091_v9 = vmov %v26088_v26  ;;  %v26093_v48 = vmov %v26090_v35  ;;  %vm22288_vm5 = vcmp.ge.s32.totalorder %v26096_v20, 1 }
 0x19a   : > { %17242 = vmatprep.subr.bf16.mxu0 %v20188_v56  ;;  %v1198_v60 = vsel %vm25707_vm4, %v26091_v9, %v26090_v35  ;;  %v1200_v1 = vsel %vm25707_vm4, %v26093_v48, %v26092_v23  ;;  %vm22298_vm0 = vcmp.ge.s32.totalorder %v26099_v45, 1  ;;  %v26115_v35 = vmov %v26111_v2 }
 0x19b   : > { %v22294_v24 = vpack.c.bf16 %v1202_v11, %v1200_v1  ;;  %v26120_v48 = vand.u32 15, %v21933_v18  ;;  %v1050_v18 = vadd.s32 136, %v21573_v19  ;;  %v22374_v11 = vadd.s32 152, %v21573_v19 }
 0x19c   : > { %v26131_v20 = vand.u32 15, %v21940_v51  ;;  %v22393_v45 = vadd.s32 168, %v21573_v19  ;;  %v26158_v1 = vrot.slane %v21868_v43, 7  ;;  %v26170_v43 = vmov 0 }
 0x19d   : > { %17243 = vmatpush3.bf16.msra.mxu0 %v20188_v56  ;;  %v1196_v56 = vsel %vm25707_vm4, %v26089_v57, %v26088_v26  ;;  %vm22305_vm4 = vmpackc.low %vm25710_vm7, %vm22231_vm12  ;;  %vm26110_vm12 = vcmask 1040384   ;;  %v26112_v26 = vmov %v26108_v53  ;;  %v26229_v51 = vmov 0 }
 0x19e   : > { %17244 = vmatprep.subr.bf16.mxu0 %v20189_v29  ;;  %v26103_v8 = vsel %vm22305_vm4, 4294967295, %v26102_v8  ;;  %v1204_v0 = vsel %vm26110_vm12, %v26109_v31, %v26108_v53  ;;  %v22396_v53 = vadd.s32 184, %v21573_v19  ;;  %v26137_v31 = vrot.slane %v21830_v4, 7 }
 0x19f   : > { %26104 = vst [vmem:[#allocation78_spill] sm:$0xff] %v26103_v8 }
 0x1a0   : > { %17213 = vmatmul.mubr.msk.bf16.gmra.mrb[12].mxu0 %vm22189_vm6, %v22235_v25 }
 0x1a1   : > { %17216 = vmatprep.mubr.msk.bf16.mxu0 %vm22196_vm11, %v22240_v37  ;;  %17245 = vmatpush3.bf16.msra.mxu0 %v20189_v29  ;;  %v22292_v29 = vpack.c.bf16 %v1198_v60, %v1196_v56  ;;  %vm22318_vm11 = vmpackc.low %vm25710_vm7, %vm22251_vm1  ;;  %v26114_v56 = vrot.slane %v21804_v38, 7  ;;  %v26117_v60 = vrot.slane %v21824_v40, 7  ;;  %v26128_v38 = vand.u32 15, %v21936_v39 }
 0x1a2   : > { %17246 = vmatprep.subr.bf16.mxu0 %v20190_v27  ;;  %v26106_v7 = vsel %vm22318_vm11, 4294967295, %v26105_v7  ;;  %vm26113_vm1 = vmmov %vm26110_vm12  ;;  %vm22351_vm12 = vcmp.ge.s32.totalorder %v26120_v48, 1  ;;  %v26134_v39 = vmov 0  ;;  %v1064_v48 = vadd.s32 248, %v21573_v19 }
 0x1a3   : > { %26107 = vst [vmem:[#allocation79_spill] sm:$0xff] %v26106_v7  ;;  %v1206_v57 = vsel %vm26113_vm1, %v26112_v26, %v26111_v2  ;;  %vm26116_vm7 = vmmov %vm26113_vm1  ;;  %v26118_v23 = vmov %v26114_v56  ;;  %v26140_v2 = vrot.slane %v21837_v41, 7  ;;  %v26141_v26 = vmov %v26137_v31 }
 0x1a4   : > { %v1208_v9 = vsel %vm26116_vm7, %v26115_v35, %v26114_v56  ;;  %v22355_v47 = vpack.c.bf16 %v1206_v57, %v1204_v0  ;;  %v26138_v0 = vmov %v26117_v60  ;;  %v26143_v56 = vrot.slane %v21845_v12, 7 }
 0x1a5   : > { %17247 = vmatpush3.bf16.msra.mxu0 %v20190_v27  ;;  %v22324_v27 = vadd.s32 120, %v21573_v19  ;;  %v26144_v35 = vmov %v26140_v2  ;;  %v26152_v41 = vand.u32 15, %v21949_v3  ;;  %v26155_v12 = vmov 0 }
 0x1a6   : > { %17280 = vmatprep.subr.bf16.mxu0 %v22261_v16  ;;  %v26221_v3 = vmov 0 }
 0x1a8   : > { %17217 = vmatmul.mubr.msk.bf16.gmra.mrb[16].mxu0 %vm22245_vm15, %v22292_v29  ;;  %vm22378_vm15 = vcmp.le.s32.totalorder %v26131_v20, 14  ;;  %v26184_v20 = vmov 0 }
 0x1a9   : > { %17220 = vmatprep.mubr.msk.bf16.mxu0 %vm22305_vm4, %v22294_v24  ;;  %vm26119_vm4 = vmmov %vm26113_vm1  ;;  %vm26124_vm1 = vmmov 1  }
 0x1aa   : > { %v1210_v61 = vsel %vm26119_vm4, %v26118_v23, %v26117_v60  ;;  %vm22362_vm7 = vmpackc.low %vm26124_vm1, %vm22288_vm5  ;;  %vm22368_vm4 = vcmp.ge.s32.totalorder %v26128_v38, 1  ;;  %v26146_v60 = vrot.slane %v21860_v54, 7  ;;  %v26147_v23 = vmov %v26143_v56 }
 0x1ab   : > { %v22357_v22 = vpack.c.bf16 %v1210_v61, %v1208_v9  ;;  %v26126_v44 = vsel %vm22362_vm7, 4294967295, %v26125_v44  ;;  %vm22388_vm5 = vmpackc.low %vm26124_vm1, %vm22298_vm0  ;;  %v26149_v61 = vand.u32 15, %v21943_v28  ;;  %v26167_v54 = vrot.slane %v21541_v5, 1 }
 0x1ac   : > { %26127 = vst [vmem:[#allocation81_spill] sm:$0xff] %v26126_v44  ;;  %v26135_v39 = vsel %vm22388_vm5, 4294967295, %v26134_v39  ;;  %v1060_v5 = vadd.s32 216, %v21573_v19  ;;  %v1096_v28 = vand.u32 15, %v1064_v48  ;;  %v26233_v48 = vmov 0 }
 0x1ad   : > { %26123 = vst [vmem:[#allocation80_spill] sm:$0xff] %v22357_v22  ;;  %26136 = vst [vmem:[#allocation82_spill] sm:$0xff] %v26135_v39 }
 0x1b0   : > { %17221 = vmatmul.mubr.msk.bf16.gmra.mrb[20].mxu0 %vm22318_vm11, %v22355_v47  ;;  %vm26139_vm11 = vcmask 1040384  }
 0x1b1   : > { %17224 = vmatprep.mubr.msk.bf16.mxu0 %vm22362_vm7, %v22357_v22  ;;  %v1212_v59 = vsel %vm26139_vm11, %v26138_v0, %v26137_v31  ;;  %vm26142_vm0 = vmmov %vm26139_vm11  ;;  %vm22423_vm11 = vcmp.le.s32.totalorder %v26149_v61, 14  ;;  %v1078_v31 = vand.u32 15, %v1046_v21  ;;  %v1080_v0 = vand.u32 15, %v22324_v27  ;;  %v26161_v21 = vld [vmem:[#allocation61_spill] sm:$0xff]  ;;  %v20194_v61 = vld [vmem:[%s25953_s27 + $0xd8] sm:$0xff]  }
 0x1b2   : > { %v1214_v57 = vsel %vm26142_vm0, %v26141_v26, %v26140_v2  ;;  %vm26145_vm6 = vmmov %vm26142_vm0  ;;  %v1084_v2 = vand.u32 15, %v22374_v11  ;;  %v26159_v26 = vmov %v26146_v60  ;;  %v26163_v27 = vmov %v26158_v1 }
 0x1b3   : > { %v1216_v9 = vsel %vm26145_vm6, %v26144_v35, %v26143_v56  ;;  %vm26148_vm7 = vmmov %vm26142_vm0  ;;  %v22427_v4 = vpack.c.bf16 %v1214_v57, %v1212_v59  ;;  %vm22433_vm0 = vcmp.le.s32.totalorder %v26152_v41, 14  ;;  %v1082_v59 = vand.u32 15, %v1050_v18 }
 0x1b4   : > { %v1218_v40 = vsel %vm26148_vm7, %v26147_v23, %v26146_v60  ;;  %vm22440_vm6 = vmpackc.low %vm26124_vm1, %vm22351_vm12  ;;  %v26162_v56 = vrot.slane %v26161_v21, 7  ;;  %v26164_v18 = vmov 0  ;;  %v1086_v11 = vand.u32 15, %v22393_v45  ;;  %v26168_v60 = vld [vmem:[#allocation74_spill] sm:$0xff] }
 0x1b5   : > { %v22429_v38 = vpack.c.bf16 %v1218_v40, %v1216_v9  ;;  %v26156_v12 = vsel %vm22440_vm6, 4294967295, %v26155_v12  ;;  %vm26160_vm12 = vmmov %vm26148_vm7  ;;  %v1088_v9 = vand.u32 15, %v22396_v53  ;;  %v26173_v40 = vand.u32 15, %v26172_v52  ;;  %v20196_v53 = vld [vmem:[%s25953_s27 + $0xe8] sm:$0xff]  }
 0x1b6   : > { %26157 = vst [vmem:[#allocation83_spill] sm:$0xff] %v26156_v12  ;;  %v1220_v57 = vsel %vm26160_vm12, %v26159_v26, %v26158_v1  ;;  %v1222_v35 = vsel %vm26148_vm7, %v26163_v27, %v26162_v56  ;;  %vm26169_vm12 = vcmask 1046528   ;;  %vm22478_vm7 = vmpackc.low %vm22378_vm15, %vm26124_vm1  ;;  %v1058_v45 = vadd.s32 200, %v21573_v19  ;;  %v20192_v27 = vld [vmem:[%s25953_s27 + $0xc8] sm:$0xff]  }
 0x1b7   : > { %v1806_v23 = vsel %vm26169_vm12, %v26168_v60, %v26167_v54  ;;  %v26171_v43 = vsel %vm22478_vm7, 4294967295, %v26170_v43  ;;  %v22494_v41 = vpack.c.bf16 %v1222_v35, %v1220_v57  ;;  %vm22500_vm15 = vmpackc.low %vm22423_vm11, %vm26124_vm1  ;;  %v26179_v1 = vmov 0  ;;  %v26191_v54 = vld [vmem:[#allocation45_spill] sm:$0xff]  ;;  %v26215_v52 = vld [vmem:[#allocation52_spill] sm:$0xff] }
 0x1b8   : > { %17225 = vmatmul.mubr.msk.bf16.gmra.mrb[24].mxu0 %vm22388_vm5, %v22427_v4  ;;  %vm22465_vm5 = vmpackc.low %vm26124_vm1, %vm22368_vm4  ;;  %vm22484_vm4 = vcmp.le.s32.totalorder %v26173_v40, 14  ;;  %v14516_v62 = vpack.c.bf16 %v1806_v23, %v26168_v60  ;;  %v26180_v1 = vsel %vm22500_vm15, 4294967295, %v26179_v1  ;;  %v1090_v26 = vand.u32 15, %v1058_v45  ;;  %v26211_v23 = vld [vmem:[#allocation51_spill] sm:$0xff] }
 0x1b9   : > { %17228 = vmatprep.mubr.msk.bf16.mxu0 %vm22440_vm6, %v22429_v38  ;;  %v26165_v18 = vsel %vm22465_vm5, 4294967295, %v26164_v18  ;;  %vm22490_vm6 = vcmp.le.s32.totalorder %v1074_v15, 14  ;;  %26178 = vst [vmem:[#allocation84_spill] sm:$0xff] %v22494_v41  ;;  %v1092_v56 = vand.u32 15, %v1060_v5  ;;  %vm22510_vm12 = vmpackc.low %vm22433_vm0, %vm26124_vm1  ;;  %v26181_v15 = vmov 0  ;;  %v26203_v5 = vld [vmem:[#allocation47_spill] sm:$0xff] }
 0x1ba   : > { %26166 = vst [vmem:[#allocation61_spill] sm:$0xff] %v26165_v18  ;;  %v26182_v15 = vsel %vm22510_vm12, 4294967295, %v26181_v15  ;;  %v1062_v57 = vadd.s32 232, %v21573_v19  ;;  %vm1780_vm11 = vcmp.le.s32.totalorder %v1076_v30, 14  ;;  %vm1782_vm3 = vcmp.le.s32.totalorder %v1078_v31, 14  ;;  %vm22524_vm0 = vmpackc.low %vm22484_vm4, %vm26124_vm1  ;;  %v26190_v30 = vld [vmem:[#allocation33_spill] sm:$0xff] }
 0x1bb   : > { %26183 = vst [vmem:[#allocation85_spill] sm:$0xff] %v26182_v15  ;;  %v26185_v20 = vsel %vm22524_vm0, 4294967295, %v26184_v20  ;;  %v26187_v35 = vmov 0  ;;  %v20193_v31 = vld [vmem:[%s25953_s27 + $0xd0] sm:$0xff]   ;;  %vm22545_vm4 = vcmp.le.s32.totalorder %v1080_v0, 14  ;;  %v26196_v45 = vmov 0 }
 0x1bc   : > { %26186 = vst [vmem:[#allocation86_spill] sm:$0xff] %v26185_v20  ;;  %v26202_v0 = vld [vmem:[#allocation46_spill] sm:$0xff]  ;;  %v26236_v19 = vld [vmem:[#allocation63_spill] sm:$0xff]  ;;  %v26237_v60 = vmov 0 }
 0x1bd   : > { %v20198_v40 = vld [vmem:[%s25953_s27 + $0xf8] sm:$0xff]  }
 0x1c0   : > { %17229 = vmatmul.mubr.msk.bf16.gmra.mrb[28].mxu0 %vm22465_vm5, %v22494_v41  ;;  %vm22531_vm5 = vmpackc.low %vm22490_vm6, %vm26124_vm1  ;;  %vm22549_vm6 = vcmp.le.s32.totalorder %v1082_v59, 14  ;;  %v20195_v59 = vld [vmem:[%s25953_s27 + $0xe0] sm:$0xff]  }
 0x1c1   : > { %17248 = vmatprep.mubr.msk.bf16.mxu0 %vm22478_vm7, %v14516_v62  ;;  %v26188_v35 = vsel %vm22531_vm5, 4294967295, %v26187_v35  ;;  %v26204_v62 = vmov 0 }
 0x1c2   : > { %26189 = vst [vmem:[#allocation87_spill] sm:$0xff] %v26188_v35 }
 0x1c8   : > { %17249 = vmatmul.mubr.msk.bf16.vlgmr.msra.gmra.mrb[0].mxu0 %vm22500_vm15, %v26190_v30  ;;  %vm22557_vm15 = vmpackc.low %vm1780_vm11, %vm26124_vm1  ;;  %vm1788_vm11 = vcmp.le.s32.totalorder %v1084_v2, 14  ;;  %v26210_v2 = vld [vmem:[#allocation50_spill] sm:$0xff] }
 0x1c9   : > { %17252 = vmatprep.mubr.msk.bf16.mxu0 %vm22510_vm12, %v26191_v54  ;;  %17281 = vmatpush3.bf16.msra.mxu0 %v22261_v16  ;;  %v26197_v45 = vsel %vm22557_vm15, 4294967295, %v26196_v45  ;;  %vm22562_vm12 = vmpackc.low %vm1782_vm3, %vm26124_vm1  ;;  %v26199_v16 = vmov 0 }
 0x1ca   : > { %17282 = vmatprep.subr.bf16.mxu0 %v20192_v27  ;;  %26198 = vst [vmem:[#allocation33_spill] sm:$0xff] %v26197_v45  ;;  %v26200_v16 = vsel %vm22562_vm12, 4294967295, %v26199_v16  ;;  %vm22581_vm3 = vmpackc.low %vm22545_vm4, %vm26124_vm1  ;;  %vm1790_vm4 = vcmp.le.s32.totalorder %v1086_v11, 14  ;;  %v20199_v11 = vld [vmem:[%s25953_s27 + $0x100] sm:$0xff]  }
 0x1cb   : > { %26201 = vst [vmem:[#allocation45_spill] sm:$0xff] %v26200_v16  ;;  %v26205_v62 = vsel %vm22581_vm3, 4294967295, %v26204_v62 }
 0x1cc   : > { %26206 = vst [vmem:[#allocation46_spill] sm:$0xff] %v26205_v62 }
 0x1cd   : > { %17283 = vmatpush3.bf16.msra.mxu0 %v20192_v27  ;;  %v26207_v27 = vmov 0 }
 0x1ce   : > { %17284 = vmatprep.subr.bf16.mxu0 %v20193_v31 }
 0x1d0   : > { %17253 = vmatmul.mubr.msk.bf16.gmra.mrb[4].mxu0 %vm22524_vm0, %v26202_v0  ;;  %vm22588_vm0 = vmpackc.low %vm22549_vm6, %vm26124_vm1 }
 0x1d1   : > { %17256 = vmatprep.mubr.msk.bf16.mxu0 %vm22531_vm5, %v26203_v5  ;;  %17285 = vmatpush3.bf16.msra.mxu0 %v20193_v31  ;;  %v26208_v27 = vsel %vm22588_vm0, 4294967295, %v26207_v27  ;;  %v20197_v31 = vld [vmem:[%s25953_s27 + $0xf0] sm:$0xff]   ;;  %vm22605_vm6 = vmpackc.low %vm1788_vm11, %vm26124_vm1  ;;  %vm1796_vm5 = vcmp.le.s32.totalorder %v1092_v56, 14 }
 0x1d2   : > { %17286 = vmatprep.subr.bf16.mxu0 %v20194_v61  ;;  %26209 = vst [vmem:[#allocation47_spill] sm:$0xff] %v26208_v27  ;;  %vm22619_vm11 = vmpackc.low %vm1790_vm4, %vm26124_vm1  ;;  %v26228_v56 = vld [vmem:[#allocation58_spill] sm:$0xff] }
 0x1d5   : > { %17287 = vmatpush3.bf16.msra.mxu0 %v20194_v61  ;;  %v26212_v61 = vmov 0 }
 0x1d6   : > { %17288 = vmatprep.subr.bf16.mxu0 %v20195_v59  ;;  %v26213_v61 = vsel %vm22605_vm6, 4294967295, %v26212_v61 }
 0x1d7   : > { %26214 = vst [vmem:[#allocation50_spill] sm:$0xff] %v26213_v61 }
 0x1d8   : > { %17257 = vmatmul.mubr.msk.bf16.gmra.mrb[8].mxu0 %vm22557_vm15, %v26210_v2  ;;  %vm1792_vm15 = vcmp.le.s32.totalorder %v1088_v9, 14  ;;  %v26217_v9 = vmov 0 }
 0x1d9   : > { %17260 = vmatprep.mubr.msk.bf16.mxu0 %vm22562_vm12, %v26211_v23  ;;  %17289 = vmatpush3.bf16.msra.mxu0 %v20195_v59  ;;  %v26216_v59 = vld [vmem:[#allocation53_spill] sm:$0xff]  ;;  %v26218_v9 = vsel %vm22619_vm11, 4294967295, %v26217_v9  ;;  %vm1794_vm12 = vcmp.le.s32.totalorder %v1090_v26, 14  ;;  %v26225_v26 = vmov 0 }
 0x1da   : > { %17290 = vmatprep.subr.bf16.mxu0 %v20196_v53  ;;  %26219 = vst [vmem:[#allocation51_spill] sm:$0xff] %v26218_v9  ;;  %vm22635_vm4 = vmpackc.low %vm1794_vm12, %vm26124_vm1 }
 0x1db   : > { %v26226_v26 = vsel %vm22635_vm4, 4294967295, %v26225_v26 }
 0x1dc   : > { %26227 = vst [vmem:[#allocation53_spill] sm:$0xff] %v26226_v26 }
 0x1dd   : > { %17291 = vmatpush3.bf16.msra.mxu0 %v20196_v53  ;;  %v26220_v53 = vld [vmem:[#allocation54_spill] sm:$0xff] }
 0x1de   : > { %17292 = vmatprep.subr.bf16.mxu0 %v20197_v31 }
 0x1e0   : > { %17261 = vmatmul.mubr.msk.bf16.gmra.mrb[12].mxu0 %vm22581_vm3, %v26215_v52  ;;  %vm22627_vm3 = vmpackc.low %vm1792_vm15, %vm26124_vm1 }
 0x1e1   : > { %17264 = vmatprep.mubr.msk.bf16.mxu0 %vm22588_vm0, %v26216_v59  ;;  %17293 = vmatpush3.bf16.msra.mxu0 %v20197_v31  ;;  %v26222_v3 = vsel %vm22627_vm3, 4294967295, %v26221_v3  ;;  %v1094_v31 = vand.u32 15, %v1062_v57  ;;  %vm22643_vm15 = vmpackc.low %vm1796_vm5, %vm26124_vm1  ;;  %vm1800_vm0 = vcmp.le.s32.totalorder %v1096_v28, 14  ;;  %v26232_v57 = vld [vmem:[#allocation62_spill] sm:$0xff]  ;;  %v26241_v28 = vld [vmem:[#allocation75_spill] sm:$0xff] }
 0x1e2   : > { %17294 = vmatprep.subr.bf16.mxu0 %v20198_v40  ;;  %26223 = vst [vmem:[#allocation52_spill] sm:$0xff] %v26222_v3  ;;  %v26230_v51 = vsel %vm22643_vm15, 4294967295, %v26229_v51  ;;  %vm22659_vm5 = vmpackc.low %vm1800_vm0, %vm26124_vm1  ;;  %vm26243_vm0 = vnez %v26068_v58  ;;  %v26284_v3 = vld [vmem:[#allocation74_spill] sm:$0xff] }
 0x1e3   : > { %26231 = vst [vmem:[#allocation54_spill] sm:$0xff] %v26230_v51  ;;  %v26238_v60 = vsel %vm22659_vm5, 4294967295, %v26237_v60  ;;  %v20200_v51 = vld [vmem:[%s25953_s27 + $0x108] sm:$0xff]  }
 0x1e4   : > { %26239 = vst [vmem:[#allocation63_spill] sm:$0xff] %v26238_v60 }
 0x1e5   : > { %17295 = vmatpush3.bf16.msra.mxu0 %v20198_v40  ;;  %v26224_v40 = vld [vmem:[#allocation57_spill] sm:$0xff] }
 0x1e6   : > { %17328 = vmatprep.subr.bf16.mxu0 %v20199_v11 }
 0x1e8   : > { %17265 = vmatmul.mubr.msk.bf16.gmra.mrb[16].mxu0 %vm22605_vm6, %v26220_v53  ;;  %vm1798_vm6 = vcmp.le.s32.totalorder %v1094_v31, 14  ;;  %v26240_v31 = vld [vmem:[#allocation69_spill] sm:$0xff] }
 0x1e9   : > { %17268 = vmatprep.mubr.msk.bf16.mxu0 %vm22619_vm11, %v26224_v40  ;;  %vm22651_vm12 = vmpackc.low %vm1798_vm6, %vm26124_vm1  ;;  %vm26242_vm1 = vnez %v26055_v49  ;;  %vm26244_vm6 = vnez %v26070_v50 }
 0x1ea   : > { %v26234_v48 = vsel %vm22651_vm12, 4294967295, %v26233_v48 }
 0x1eb   : > { %26235 = vst [vmem:[#allocation57_spill] sm:$0xff] %v26234_v48  ;;  %v20201_v48 = vld [vmem:[%s25953_s27 + $0x110] sm:$0xff]  }
 0x1f0   : > { %17269 = vmatmul.mubr.msk.bf16.gmra.mrb[20].mxu0 %vm22627_vm3, %v26228_v56 }
 0x1f1   : > { %17272 = vmatprep.mubr.msk.bf16.mxu0 %vm22635_vm4, %v26232_v57 }
 0x1f8   : > { %17273 = vmatmul.mubr.msk.bf16.gmra.mrb[24].mxu0 %vm22643_vm15, %v26236_v19 }
 0x1f9   : > { %17276 = vmatprep.mubr.msk.bf16.mxu0 %vm22651_vm12, %v26240_v31 }
 0x200   : > { %17277 = vmatmul.mubr.msk.bf16.gmra.mrb[28].mxu0 %vm22659_vm5, %v26241_v28 }
 0x201   : > { %17296 = vmatprep.mubr.msk.bf16.mxu0 %vm21987_vm8, %v22060_v6  ;;  %v20202_v6 = vld [vmem:[%s25953_s27 + $0x118] sm:$0xff]  }
 0x208   : > { %17297 = vmatmul.mubr.msk.bf16.vlgmr.msra.gmra.mrb[0].mxu0 %vm22004_vm9, %v22065_v46 }
 0x209   : > { %17300 = vmatprep.mubr.msk.bf16.mxu0 %vm22016_vm10, %v22123_v33  ;;  %17329 = vmatpush3.bf16.msra.mxu0 %v20199_v11  ;;  %v20204_v11 = vld [vmem:[%s25953_s27 + $0x128] sm:$0xff]  }
 0x20a   : > { %17330 = vmatprep.subr.bf16.mxu0 %v20200_v51 }
 0x20d   : > { %17331 = vmatpush3.bf16.msra.mxu0 %v20200_v51  ;;  %v20205_v51 = vld [vmem:[%s25953_s27 + $0x130] sm:$0xff]  }
 0x20e   : > { %17332 = vmatprep.subr.bf16.mxu0 %v20201_v48 }
 0x210   : > { %17301 = vmatmul.mubr.msk.bf16.gmra.mrb[4].mxu0 %vm22070_vm13, %v22128_v17 }
 0x211   : > { %17304 = vmatprep.mubr.msk.bf16.mxu0 %vm22077_vm14, %v22179_v55  ;;  %17333 = vmatpush3.bf16.msra.mxu0 %v20201_v48  ;;  %v20206_v48 = vld [vmem:[%s25953_s27 + $0x138] sm:$0xff]   ;;  %vm26252_vm14 = vcmask 1040384  }
 0x212   : > { %17334 = vmatprep.subr.bf16.mxu0 %v20202_v6 }
 0x215   : > { %17335 = vmatpush3.bf16.msra.mxu0 %v20202_v6  ;;  %v20207_v6 = vld [vmem:[%s25953_s27 + $0x140] sm:$0xff]  }
 0x216   : > { %17336 = vmatprep.subr.bf16.mxu0 %v20203_v63 }
 0x218   : > { %17305 = vmatmul.mubr.msk.bf16.gmra.mrb[8].mxu0 %vm22133_vm2, %v22184_v14  ;;  %vm26246_vm2 = vnez %v26103_v8 }
 0x219   : > { %17308 = vmatprep.mubr.msk.bf16.mxu0 %vm26242_vm1, %v22235_v25  ;;  %17337 = vmatpush3.bf16.msra.mxu0 %v20203_v63  ;;  %vm26245_vm1 = vnez %v26084_v10  ;;  %v22727_v63 = vld [vmem:[%s21535_s1 + $0xf8] sm:$0xff] }
 0x21a   : > { %17338 = vmatprep.subr.bf16.mxu0 %v20204_v11 }
 0x21d   : > { %17339 = vmatpush3.bf16.msra.mxu0 %v20204_v11  ;;  %v20743_v11 = vld [vmem:[%s21535_s1 + $0xf0] sm:$0xff]  ;;  %s26332_s1 = sld [smem:[#allocation100_spill]] }
 0x21e   : > { %17340 = vmatprep.subr.bf16.mxu0 %v20205_v51  ;;  %v2206_v50 = vrot.slane %v20743_v11, 7 }
 0x220   : > { %17309 = vmatmul.mubr.msk.bf16.gmra.mrb[12].mxu0 %vm26243_vm0, %v22240_v37  ;;  %vm26247_vm0 = vnez %v26106_v7 }
 0x221   : > { %17312 = vmatprep.mubr.msk.bf16.mxu0 %vm26244_vm6, %v22292_v29  ;;  %17341 = vmatpush3.bf16.msra.mxu0 %v20205_v51  ;;  %v25777_v51 = vrot.slane %v22727_v63, 7  ;;  %vm26248_vm6 = vnez %v26126_v44 }
 0x222   : > { %17342 = vmatprep.subr.bf16.mxu0 %v20206_v48 }
 0x225   : > { %17343 = vmatpush3.bf16.msra.mxu0 %v20206_v48  ;;  %v26251_v48 = vrot.slane %v26161_v21, 7  ;;  %v20209_v21 = vld [vmem:[%s25953_s27 + $0x150] sm:$0xff]  }
 0x226   : > { %17376 = vmatprep.subr.bf16.mxu0 %v20207_v6 }
 0x227   : > { %v2207_v7 = vsel %vm26252_vm14, %v26251_v48, %v2206_v50  ;;  %v26257_v48 = vld [vmem:[#allocation41_spill] sm:$0xff] }
 0x228   : > { %17313 = vmatmul.mubr.msk.bf16.gmra.mrb[16].mxu0 %vm26245_vm1, %v22294_v24  ;;  %vm26249_vm1 = vnez %v26135_v39  ;;  %v26255_v39 = vld [vmem:[#allocation35_spill] sm:$0xff] }
 0x229   : > { %17316 = vmatprep.mubr.msk.bf16.mxu0 %vm26246_vm2, %v22355_v47  ;;  %vm26250_vm2 = vnez %v26156_v12  ;;  %v20208_v12 = vld [vmem:[%s25953_s27 + $0x148] sm:$0xff]  }
 0x230   : > { %17317 = vmatmul.mubr.msk.bf16.gmra.mrb[20].mxu0 %vm26247_vm0, %v22357_v22  ;;  %vm26253_vm0 = vmmov %vm26252_vm14  ;;  %vm26270_vm14 = vnez %v26180_v1 }
 0x231   : > { %17320 = vmatprep.mubr.msk.bf16.mxu0 %vm26248_vm6, %v22427_v4  ;;  %v2209_v8 = vsel %vm26253_vm0, %v2206_v50, %v25777_v51  ;;  %vm26254_vm6 = vnez %v26165_v18  ;;  %v20210_v50 = vld [vmem:[%s25953_s27 + $0x158] sm:$0xff]   ;;  %v26260_v51 = vld [vmem:[#allocation44_spill] sm:$0xff]  ;;  %v22794_v18 = vpack.c.bf16 %v22727_v63, %v20743_v11  ;;  %vm26271_vm0 = vnez %v26182_v15 }
 0x232   : > { %v22749_v22 = vpack.c.bf16 %v2209_v8, %v2207_v7  ;;  %v26258_v8 = vld [vmem:[#allocation42_spill] sm:$0xff]  ;;  %v20211_v7 = vld [vmem:[%s25953_s27 + $0x160] sm:$0xff]  }
 0x233   : > { %v20219_v11 = vld [vmem:[%s25953_s27 + $0x1a0] sm:$0xff]  }
 0x238   : > { %17321 = vmatmul.mubr.msk.bf16.gmra.mrb[24].mxu0 %vm26249_vm1, %v22429_v38 }
 0x239   : > { %17324 = vmatprep.mubr.msk.bf16.mxu0 %vm26250_vm2, %v22494_v41  ;;  %v26256_v41 = vld [vmem:[#allocation37_spill] sm:$0xff] }
 0x240   : > { %17325 = vmatmul.mubr.msk.bf16.gmra.mrb[28].mxu0 %vm26254_vm6, %v22749_v22 }
 0x241   : > { %17344 = vmatprep.mubr.bf16.mxu0 %v26255_v39  ;;  %v26259_v39 = vld [vmem:[#allocation43_spill] sm:$0xff] }
 0x248   : > { %17345 = vmatmul.mubr.bf16.vlgmr.msra.gmra.mrb[0].mxu0 %v26256_v41  ;;  %v26268_v41 = vld [vmem:[#allocation65_spill] sm:$0xff] }
 0x249   : > { %17348 = vmatprep.mubr.bf16.mxu0 %v26257_v48  ;;  %17377 = vmatpush3.bf16.msra.mxu0 %v20207_v6  ;;  %v20212_v6 = vld [vmem:[%s25953_s27 + $0x168] sm:$0xff]  }
 0x24a   : > { %17378 = vmatprep.subr.bf16.mxu0 %v20208_v12  ;;  %v26266_v48 = vld [vmem:[#allocation60_spill] sm:$0xff] }
 0x24d   : > { %17379 = vmatpush3.bf16.msra.mxu0 %v20208_v12  ;;  %v20213_v12 = vld [vmem:[%s25953_s27 + $0x170] sm:$0xff]  }
 0x24e   : > { %17380 = vmatprep.subr.bf16.mxu0 %v20209_v21 }
 0x250   : > { %17349 = vmatmul.mubr.bf16.gmra.mrb[4].mxu0 %v26258_v8  ;;  %v26261_v8 = vld [vmem:[#allocation48_spill] sm:$0xff] }
 0x251   : > { %17352 = vmatprep.mubr.bf16.mxu0 %v26259_v39  ;;  %17381 = vmatpush3.bf16.msra.mxu0 %v20209_v21  ;;  %v20214_v21 = vld [vmem:[%s25953_s27 + $0x178] sm:$0xff]   ;;  %v26262_v39 = vld [vmem:[#allocation49_spill] sm:$0xff] }
 0x252   : > { %17382 = vmatprep.subr.bf16.mxu0 %v20210_v50 }
 0x255   : > { %17383 = vmatpush3.bf16.msra.mxu0 %v20210_v50  ;;  %v20215_v50 = vld [vmem:[%s25953_s27 + $0x180] sm:$0xff]  }
 0x256   : > { %17384 = vmatprep.subr.bf16.mxu0 %v20211_v7 }
 0x258   : > { %17353 = vmatmul.mubr.bf16.gmra.mrb[8].mxu0 %v26260_v51  ;;  %v26263_v51 = vld [vmem:[#allocation55_spill] sm:$0xff] }
 0x259   : > { %17356 = vmatprep.mubr.bf16.mxu0 %v26261_v8  ;;  %17385 = vmatpush3.bf16.msra.mxu0 %v20211_v7  ;;  %v26264_v7 = vld [vmem:[#allocation56_spill] sm:$0xff]  ;;  %v26265_v8 = vld [vmem:[#allocation59_spill] sm:$0xff] }
 0x25a   : > { %17386 = vmatprep.subr.bf16.mxu0 %v20212_v6 }
 0x25d   : > { %17387 = vmatpush3.bf16.msra.mxu0 %v20212_v6  ;;  %v26267_v6 = vld [vmem:[#allocation64_spill] sm:$0xff] }
 0x25e   : > { %17388 = vmatprep.subr.bf16.mxu0 %v20213_v12 }
 0x260   : > { %17357 = vmatmul.mubr.bf16.gmra.mrb[12].mxu0 %v26262_v39  ;;  %v26269_v39 = vld [vmem:[#allocation72_spill] sm:$0xff] }
 0x261   : > { %17360 = vmatprep.mubr.bf16.mxu0 %v26263_v51  ;;  %17389 = vmatpush3.bf16.msra.mxu0 %v20213_v12  ;;  %v20216_v12 = vld [vmem:[%s25953_s27 + $0x188] sm:$0xff]  }
 0x262   : > { %17390 = vmatprep.subr.bf16.mxu0 %v20214_v21 }
 0x265   : > { %17391 = vmatpush3.bf16.msra.mxu0 %v20214_v21  ;;  %v20217_v21 = vld [vmem:[%s25953_s27 + $0x190] sm:$0xff]  }
 0x266   : > { %17424 = vmatprep.subr.bf16.mxu0 %v20215_v50 }
 0x268   : > { %17361 = vmatmul.mubr.bf16.gmra.mrb[16].mxu0 %v26264_v7 }
 0x269   : > { %17364 = vmatprep.mubr.bf16.mxu0 %v26265_v8 }
 0x270   : > { %17365 = vmatmul.mubr.bf16.gmra.mrb[20].mxu0 %v26266_v48 }
 0x271   : > { %17368 = vmatprep.mubr.bf16.mxu0 %v26267_v6 }
 0x278   : > { %17369 = vmatmul.mubr.bf16.gmra.mrb[24].mxu0 %v26268_v41 }
 0x279   : > { %17372 = vmatprep.mubr.bf16.mxu0 %v26269_v39 }
 0x280   : > { %17373 = vmatmul.mubr.bf16.gmra.mrb[28].mxu0 %v22794_v18 }
 0x281   : > { %17392 = vmatprep.mubr.msk.bf16.mxu0 %vm22478_vm7, %v26190_v30  ;;  %v20218_v30 = vld [vmem:[%s25953_s27 + $0x198] sm:$0xff]   ;;  %vm26272_vm7 = vnez %v26185_v20 }
 0x288   : > { %17393 = vmatmul.mubr.msk.bf16.vlgmr.msra.gmra.mrb[0].mxu0 %vm26270_vm14, %v26191_v54  ;;  %vm26273_vm14 = vnez %v26188_v35 }
 0x289   : > { %17396 = vmatprep.mubr.msk.bf16.mxu0 %vm26271_vm0, %v26202_v0  ;;  %17425 = vmatpush3.bf16.msra.mxu0 %v20215_v50  ;;  %v20220_v50 = vld [vmem:[%s25953_s27 + $0x1a8] sm:$0xff]   ;;  %vm26274_vm0 = vnez %v26197_v45 }
 0x28a   : > { %17426 = vmatprep.subr.bf16.mxu0 %v20216_v12 }
 0x28d   : > { %17427 = vmatpush3.bf16.msra.mxu0 %v20216_v12  ;;  %v20221_v12 = vld [vmem:[%s25953_s27 + $0x1b0] sm:$0xff]  }
 0x28e   : > { %17428 = vmatprep.subr.bf16.mxu0 %v20217_v21 }
 0x290   : > { %17397 = vmatmul.mubr.msk.bf16.gmra.mrb[4].mxu0 %vm26272_vm7, %v26203_v5  ;;  %vm26275_vm7 = vnez %v26200_v16 }
 0x291   : > { %17400 = vmatprep.mubr.msk.bf16.mxu0 %vm26273_vm14, %v26210_v2  ;;  %17429 = vmatpush3.bf16.msra.mxu0 %v20217_v21  ;;  %v20222_v21 = vld [vmem:[%s25953_s27 + $0x1b8] sm:$0xff]   ;;  %vm26276_vm14 = vnez %v26205_v62 }
 0x292   : > { %17430 = vmatprep.subr.bf16.mxu0 %v20218_v30 }
 0x295   : > { %17431 = vmatpush3.bf16.msra.mxu0 %v20218_v30  ;;  %v20223_v30 = vld [vmem:[%s25953_s27 + $0x1c0] sm:$0xff]  }
 0x296   : > { %17432 = vmatprep.subr.bf16.mxu0 %v20219_v11 }
 0x298   : > { %17401 = vmatmul.mubr.msk.bf16.gmra.mrb[8].mxu0 %vm26274_vm0, %v26211_v23  ;;  %vm26277_vm0 = vnez %v26208_v27 }
 0x299   : > { %17404 = vmatprep.mubr.msk.bf16.mxu0 %vm26275_vm7, %v26215_v52  ;;  %17433 = vmatpush3.bf16.msra.mxu0 %v20219_v11  ;;  %vm26278_vm7 = vnez %v26213_v61  ;;  %v2777_v11 = vrot.slane %v22727_v63, 1 }
 0x29a   : > { %17434 = vmatprep.subr.bf16.mxu0 %v20220_v50 }
 0x29d   : > { %17435 = vmatpush3.bf16.msra.mxu0 %v20220_v50 }
 0x29e   : > { %17436 = vmatprep.subr.bf16.mxu0 %v20221_v12 }
 0x2a0   : > { %17405 = vmatmul.mubr.msk.bf16.gmra.mrb[12].mxu0 %vm26276_vm14, %v26216_v59 }
 0x2a1   : > { %17408 = vmatprep.mubr.msk.bf16.mxu0 %vm26277_vm0, %v26220_v53  ;;  %17437 = vmatpush3.bf16.msra.mxu0 %v20221_v12  ;;  %v20224_v12 = vld [vmem:[%s25953_s27 + $0x1c8] sm:$0xff]  }
 0x2a2   : > { %17438 = vmatprep.subr.bf16.mxu0 %v20222_v21 }
 0x2a5   : > { %17439 = vmatpush3.bf16.msra.mxu0 %v20222_v21  ;;  %v26281_v21 = vld [vmem:[#allocation70_spill] sm:$0xff] }
 0x2a6   : > { %17472 = vmatprep.subr.bf16.mxu0 %v20223_v30  ;;  %v26282_v9 = vrot.slane %v26281_v21, 1  ;;  %v26286_v21 = vld [vmem:[#allocation76_spill] sm:$0xff] }
 0x2a8   : > { %17409 = vmatmul.mubr.msk.bf16.gmra.mrb[16].mxu0 %vm26278_vm7, %v26224_v40 }
 0x2a9   : > { %17412 = vmatprep.mubr.msk.bf16.mxu0 %vm22619_vm11, %v26228_v56  ;;  %vm26283_vm11 = vcmask 1046528  }
 0x2aa   : > { %v2778_v61 = vsel %vm26283_vm11, %v26282_v9, %v2777_v11  ;;  %v26294_v9 = vld [vmem:[#allocation80_spill] sm:$0xff] }
 0x2b0   : > { %17413 = vmatmul.mubr.msk.bf16.gmra.mrb[20].mxu0 %vm22627_vm3, %v26232_v57  ;;  %vm26285_vm3 = vmmov %vm26283_vm11  ;;  %vm26288_vm11 = vnez %v26053_v36 }
 0x2b1   : > { %17416 = vmatprep.mubr.msk.bf16.mxu0 %vm22635_vm4, %v26236_v19  ;;  %v2779_v57 = vsel %vm26285_vm3, %v2777_v11, %v26284_v3  ;;  %vm26287_vm3 = vnez %v26037_v34  ;;  %v26302_v11 = vld [vmem:[#allocation83_spill] sm:$0xff] }
 0x2b2   : > { %v22872_v56 = vpack.c.bf16 %v2779_v57, %v2778_v61  ;;  %v20225_v61 = vld [vmem:[%s25953_s27 + $0x1d0] sm:$0xff]  }
 0x2b3   : > { %v26295_v57 = vld [vmem:[#allocation78_spill] sm:$0xff] }
 0x2b8   : > { %17417 = vmatmul.mubr.msk.bf16.gmra.mrb[24].mxu0 %vm22643_vm15, %v26240_v31 }
 0x2b9   : > { %17420 = vmatprep.mubr.msk.bf16.mxu0 %vm22651_vm12, %v26241_v28 }
 0x2c0   : > { %17421 = vmatmul.mubr.msk.bf16.gmra.mrb[28].mxu0 %vm22659_vm5, %v22872_v56 }
 0x2c1   : > { %17440 = vmatprep.mubr.msk.bf16.mxu0 %vm21987_vm8, %v22065_v46  ;;  %v20226_v46 = vld [vmem:[%s25953_s27 + $0x1d8] sm:$0xff]  }
 0x2c8   : > { %17441 = vmatmul.mubr.msk.bf16.vlgmr.msra.gmra.mrb[0].mxu0 %vm22004_vm9, %v22123_v33  ;;  %v20227_v33 = vld [vmem:[%s25953_s27 + $0x1e0] sm:$0xff]  }
 0x2c9   : > { %17444 = vmatprep.mubr.msk.bf16.mxu0 %vm22016_vm10, %v22128_v17  ;;  %17473 = vmatpush3.bf16.msra.mxu0 %v20223_v30  ;;  %v20228_v17 = vld [vmem:[%s25953_s27 + $0x1e8] sm:$0xff]   ;;  %vm26296_vm10 = vnez %v26295_v57  ;;  %v26301_v30 = vld [vmem:[#allocation82_spill] sm:$0xff] }
 0x2ca   : > { %17474 = vmatprep.subr.bf16.mxu0 %v20224_v12 }
 0x2cd   : > { %17475 = vmatpush3.bf16.msra.mxu0 %v20224_v12  ;;  %v26304_v12 = vrot.slane %v22727_v63, 7  ;;  %v20232_v63 = vld [vmem:[%s25953_s27 + $0x208] sm:$0xff]  }
 0x2ce   : > { %17476 = vmatprep.subr.bf16.mxu0 %v20225_v61 }
 0x2d0   : > { %17445 = vmatmul.mubr.msk.bf16.gmra.mrb[4].mxu0 %vm22070_vm13, %v22179_v55  ;;  %vm26289_vm13 = vnez %v26055_v49  ;;  %v20229_v55 = vld [vmem:[%s25953_s27 + $0x1f0] sm:$0xff]  }
 0x2d1   : > { %17448 = vmatprep.mubr.msk.bf16.mxu0 %vm26287_vm3, %v22184_v14  ;;  %17477 = vmatpush3.bf16.msra.mxu0 %v20225_v61  ;;  %v20230_v14 = vld [vmem:[%s25953_s27 + $0x1f8] sm:$0xff]   ;;  %vm26290_vm3 = vnez %v26068_v58 }
 0x2d2   : > { %17478 = vmatprep.subr.bf16.mxu0 %v20226_v46 }
 0x2d5   : > { %17479 = vmatpush3.bf16.msra.mxu0 %v20226_v46 }
 0x2d6   : > { %17480 = vmatprep.subr.bf16.mxu0 %v20227_v33 }
 0x2d8   : > { %17449 = vmatmul.mubr.msk.bf16.gmra.mrb[8].mxu0 %vm26288_vm11, %v22235_v25  ;;  %v26291_v25 = vld [vmem:[#allocation77_spill] sm:$0xff] }
 0x2d9   : > { %17452 = vmatprep.mubr.msk.bf16.mxu0 %vm26289_vm13, %v22240_v37  ;;  %17481 = vmatpush3.bf16.msra.mxu0 %v20227_v33  ;;  %vm26292_vm11 = vnez %v26291_v25  ;;  %v20231_v37 = vld [vmem:[%s25953_s27 + $0x200] sm:$0xff]   ;;  %vm26293_vm13 = vnez %v26084_v10  ;;  %v20240_v33 = vld [vmem:[%s26307_s16 + $0x48] sm:$0xff]  }
 0x2da   : > { %17482 = vmatprep.subr.bf16.mxu0 %v20228_v17  ;;  %v26518_v10 = vld [vmem:[#allocation36_spill] sm:$0xff] }
 0x2dd   : > { %17483 = vmatpush3.bf16.msra.mxu0 %v20228_v17  ;;  %v26308_v17 = vld [vmem:[#allocation37_spill] sm:$0xff] }
 0x2de   : > { %17484 = vmatprep.subr.bf16.mxu0 %v20229_v55 }
 0x2e0   : > { %17453 = vmatmul.mubr.msk.bf16.gmra.mrb[12].mxu0 %vm26290_vm3, %v22292_v29  ;;  %v26297_v29 = vld [vmem:[#allocation79_spill] sm:$0xff] }
 0x2e1   : > { %17456 = vmatprep.mubr.msk.bf16.mxu0 %vm26292_vm11, %v22294_v24  ;;  %17485 = vmatpush3.bf16.msra.mxu0 %v20229_v55  ;;  %vm26298_vm3 = vnez %v26297_v29  ;;  %vm26299_vm11 = vnez %v26126_v44  ;;  %v26300_v24 = vld [vmem:[#allocation84_spill] sm:$0xff]  ;;  %v26309_v55 = vld [vmem:[#allocation41_spill] sm:$0xff] }
 0x2e2   : > { %17486 = vmatprep.subr.bf16.mxu0 %v20230_v14 }
 0x2e5   : > { %17487 = vmatpush3.bf16.msra.mxu0 %v20230_v14  ;;  %v20242_v14 = vld [vmem:[%s26307_s16 + $0x58] sm:$0xff]  }
 0x2e6   : > { %17520 = vmatprep.subr.bf16.mxu0 %v20231_v37 }
 0x2e8   : > { %17457 = vmatmul.mubr.msk.bf16.gmra.mrb[16].mxu0 %vm26293_vm13, %v22355_v47  ;;  %v26303_v47 = vld [vmem:[#allocation36_spill] sm:$0xff] }
 0x2e9   : > { %17460 = vmatprep.mubr.msk.bf16.mxu0 %vm26296_vm10, %v26294_v9  ;;  %vm26305_vm10 = vcmask 1040384   ;;  %v26310_v9 = vld [vmem:[#allocation42_spill] sm:$0xff] }
 0x2ea   : > { %v3088_v61 = vsel %vm26305_vm10, %v26304_v12, %v26303_v47  ;;  %v20243_v12 = vld [vmem:[%s26307_s16 + $0x60] sm:$0xff]   ;;  %vm26316_vm10 = vnez %v26171_v43 }
 0x2eb   : > { %v14801_v46 = vpack.c.bf16 %v26303_v47, %v3088_v61  ;;  %v20234_v61 = vld [vmem:[%s25953_s27 + $0x218] sm:$0xff]  }
 0x2f0   : > { %17461 = vmatmul.mubr.msk.bf16.gmra.mrb[20].mxu0 %vm26298_vm3, %v22427_v4  ;;  %v26306_v4 = vld [vmem:[#allocation61_spill] sm:$0xff]  ;;  %vm26321_vm3 = vnez %v26197_v45 }
 0x2f1   : > { %17464 = vmatprep.mubr.msk.bf16.mxu0 %vm26299_vm11, %v22429_v38  ;;  %v20239_v38 = vld [vmem:[%s26307_s16 + $0x40] sm:$0xff]   ;;  %vm26320_vm11 = vnez %v26188_v35 }
 0x2f2   : > { %17568 = vmatprep.subr.bf16.mxu1 %v20239_v38 }
 0x2f3   : > { %17569 = vmatpush3.bf16.msra.mxu1 %v20239_v38  ;;  %v26312_v38 = vld [vmem:[#allocation44_spill] sm:$0xff] }
 0x2f4   : > { %17570 = vmatprep.subr.bf16.mxu1 %v20240_v33 }
 0x2f7   : > { %17571 = vmatpush3.bf16.msra.mxu1 %v20240_v33  ;;  %v20235_v33 = vld [vmem:[%s25953_s27 + $0x220] sm:$0xff]  }
 0x2f8   : > { %17465 = vmatmul.mubr.msk.bf16.gmra.mrb[24].mxu0 %vm26249_vm1, %v26300_v24  ;;  %v20233_v24 = vld [vmem:[%s25953_s27 + $0x210] sm:$0xff]   ;;  %vm26319_vm1 = vnez %v26185_v20 }
 0x2f9   : > { %17468 = vmatprep.mubr.msk.bf16.mxu0 %vm26250_vm2, %v22749_v22  ;;  %v20241_v22 = vld [vmem:[%s26307_s16 + $0x50] sm:$0xff]   ;;  %vm26318_vm2 = vnez %v26182_v15 }
 0x2fa   : > { %17572 = vmatprep.subr.bf16.mxu1 %v20241_v22 }
 0x2fb   : > { %17573 = vmatpush3.bf16.msra.mxu1 %v20241_v22  ;;  %v26313_v22 = vld [vmem:[#allocation48_spill] sm:$0xff] }
 0x2fc   : > { %17574 = vmatprep.subr.bf16.mxu1 %v20242_v14 }
 0x2ff   : > { %17575 = vmatpush3.bf16.msra.mxu1 %v20242_v14  ;;  %v20238_v14 = vld [vmem:[%s25953_s27 + $0x238] sm:$0xff]  }
 0x300   : > { %17469 = vmatmul.mubr.msk.bf16.gmra.mrb[28].mxu0 %vm26254_vm6, %v14801_v46  ;;  %v26311_v46 = vld [vmem:[#allocation43_spill] sm:$0xff]  ;;  %17576 = vmatprep.subr.bf16.mxu1 %v20243_v12  ;;  %vm26317_vm6 = vnez %v26180_v1 }
 0x301   : > { %17488 = vmatprep.mubr.bf16.mxu0 %v26308_v17  ;;  %v20236_v17 = vld [vmem:[%s25953_s27 + $0x228] sm:$0xff]  }
 0x303   : > { %17577 = vmatpush3.bf16.msra.mxu1 %v20243_v12 }
 0x308   : > { %17489 = vmatmul.mubr.bf16.vlgmr.msra.gmra.mrb[0].mxu0 %v26309_v55  ;;  %v20237_v55 = vld [vmem:[%s25953_s27 + $0x230] sm:$0xff]  }
 0x309   : > { %17492 = vmatprep.mubr.bf16.mxu0 %v26310_v9  ;;  %17521 = vmatpush3.bf16.msra.mxu0 %v20231_v37  ;;  %v20244_v37 = vld [vmem:[%s26307_s16 + $0x68] sm:$0xff]   ;;  %v26315_v9 = vmov 0.0|0.0  }
 0x30a   : > { %17522 = vmatprep.subr.bf16.mxu0 %v20232_v63  ;;  %17578 = vmatprep.subr.bf16.mxu1 %v20244_v37 }
 0x30b   : > { %17579 = vmatpush3.bf16.msra.mxu1 %v20244_v37 }
 0x30d   : > { %17523 = vmatpush3.bf16.msra.mxu0 %v20232_v63  ;;  %v26314_v63 = vld [vmem:[#allocation49_spill] sm:$0xff] }
 0x30e   : > { %17524 = vmatprep.subr.bf16.mxu0 %v20233_v24 }
 0x310   : > { %17493 = vmatmul.mubr.bf16.gmra.mrb[4].mxu0 %v26311_v46 }
 0x311   : > { %17496 = vmatprep.mubr.bf16.mxu0 %v26312_v38  ;;  %17525 = vmatpush3.bf16.msra.mxu0 %v20233_v24 }
 0x312   : > { %17526 = vmatprep.subr.bf16.mxu0 %v20234_v61 }
 0x315   : > { %17527 = vmatpush3.bf16.msra.mxu0 %v20234_v61 }
 0x316   : > { %17528 = vmatprep.subr.bf16.mxu0 %v20235_v33 }
 0x318   : > { %17497 = vmatmul.mubr.bf16.gmra.mrb[8].mxu0 %v26313_v22 }
 0x319   : > { %17500 = vmatprep.mubr.bf16.mxu0 %v26314_v63  ;;  %17529 = vmatpush3.bf16.msra.mxu0 %v20235_v33 }
 0x31a   : > { %17530 = vmatprep.subr.bf16.mxu0 %v20236_v17 }
 0x31d   : > { %17531 = vmatpush3.bf16.msra.mxu0 %v20236_v17 }
 0x31e   : > { %17532 = vmatprep.subr.bf16.mxu0 %v20237_v55 }
 0x320   : > { %17501 = vmatmul.mubr.bf16.gmra.mrb[12].mxu0 %v26263_v51 }
 0x321   : > { %17504 = vmatprep.mubr.bf16.mxu0 %v26264_v7  ;;  %17533 = vmatpush3.bf16.msra.mxu0 %v20237_v55 }
 0x322   : > { %17534 = vmatprep.subr.bf16.mxu0 %v20238_v14 }
 0x325   : > { %17535 = vmatpush3.bf16.msra.mxu0 %v20238_v14 }
 0x328   : > { %17505 = vmatmul.mubr.bf16.gmra.mrb[16].mxu0 %v26265_v8 }
 0x329   : > { %17508 = vmatprep.mubr.bf16.mxu0 %v26266_v48 }
 0x330   : > { %17509 = vmatmul.mubr.bf16.gmra.mrb[20].mxu0 %v26267_v6 }
 0x331   : > { %17512 = vmatprep.mubr.bf16.mxu0 %v26268_v41 }
 0x338   : > { %17513 = vmatmul.mubr.bf16.gmra.mrb[24].mxu0 %v26269_v39 }
 0x339   : > { %17516 = vmatprep.mubr.bf16.mxu0 %v22794_v18  ;;  %v26323_v18 = vld [vmem:[#allocation58_spill] sm:$0xff] }
 0x340   : > { %17517 = vmatmul.mubr.bf16.gmra.mrb[28].mxu0 %v26315_v9 }
 0x341   : > { %17536 = vmatprep.mubr.msk.bf16.mxu0 %vm26316_vm10, %v26191_v54  ;;  %vm26322_vm10 = vnez %v26200_v16  ;;  %v26325_v54 = vld [vmem:[#allocation62_spill] sm:$0xff] }
 0x348   : > { %17537 = vmatmul.mubr.msk.bf16.vlgmr.msra.gmra.mrb[0].mxu0 %vm26317_vm6, %v26202_v0  ;;  %v26326_v0 = vld [vmem:[#allocation51_spill] sm:$0xff] }
 0x349   : > { %17540 = vmatprep.mubr.msk.bf16.mxu0 %vm26318_vm2, %v26203_v5 }
 0x350   : > { %17541 = vmatmul.mubr.msk.bf16.gmra.mrb[4].mxu0 %vm26319_vm1, %v26210_v2  ;;  %v23055_v2 = vpack.c.bf16 %v26284_v3, %v26284_v3 }
 0x351   : > { %17544 = vmatprep.mubr.msk.bf16.mxu0 %vm26320_vm11, %v26211_v23  ;;  %vm26327_vm11 = vnez %v26326_v0  ;;  %v20246_v23 = vld [vmem:[%s26307_s16 + $0x78] sm:$0xff]  }
 0x352   : > { %26331 = vst [vmem:[#allocation69_spill] sm:$0xff] %v23055_v2 }
 0x358   : > { %17545 = vmatmul.mubr.msk.bf16.gmra.mrb[8].mxu0 %vm26321_vm3, %v26215_v52  ;;  %v26328_v52 = vld [vmem:[#allocation52_spill] sm:$0xff] }
 0x359   : > { %17548 = vmatprep.mubr.msk.bf16.mxu0 %vm26322_vm10, %v26216_v59  ;;  %vm26329_vm3 = vnez %v26328_v52  ;;  %v20247_v59 = vld [vmem:[%s26307_s16] sm:$0xff]  }
 0x360   : > { %17549 = vmatmul.mubr.msk.bf16.gmra.mrb[12].mxu0 %vm26276_vm14, %v26220_v53  ;;  %v23072_v53 = vld [vmem:[%s26332_s1] ss:$0 sm:$0xff]  ;;  %s24513_s1 = scalar_lea.vmem [#allocation16], %s14405_s7  ;;  %s26642_s7 = sld [smem:[#allocation107_spill]] }
 0x361   : > { %17552 = vmatprep.mubr.msk.bf16.mxu0 %vm26277_vm0, %v26224_v40 }
 0x368   : > { %17553 = vmatmul.mubr.msk.bf16.gmra.mrb[16].mxu0 %vm26278_vm7, %v26323_v18 }
 0x369   : > { %17556 = vmatprep.mubr.msk.bf16.mxu0 %vm26327_vm11, %v26325_v54  ;;  %v20248_v54 = vld [vmem:[%s26307_s16 + $0x8] sm:$0xff]  }
 0x370   : > { %17557 = vmatmul.mubr.msk.bf16.gmra.mrb[20].mxu0 %vm26329_vm3, %v26236_v19  ;;  %v20245_v19 = vld [vmem:[%s26307_s16 + $0x70] sm:$0xff]  }
 0x371   : > { %17560 = vmatprep.mubr.msk.bf16.mxu0 %vm22635_vm4, %v26240_v31  ;;  %17580 = vmatprep.subr.bf16.mxu1 %v20245_v19 }
 0x372   : > { %17581 = vmatpush3.bf16.msra.mxu1 %v20245_v19 }
 0x373   : > { %17582 = vmatprep.subr.bf16.mxu1 %v20246_v23 }
 0x376   : > { %17583 = vmatpush3.bf16.msra.mxu1 %v20246_v23 }
 0x377   : > { %17616 = vmatprep.subr.bf16.mxu1 %v20247_v59 }
 0x378   : > { %17561 = vmatmul.mubr.msk.bf16.gmra.mrb[24].mxu0 %vm22643_vm15, %v26241_v28  ;;  %vm26337_vm15 = vcmask 1046528  }
 0x379   : > { %17564 = vmatprep.mubr.msk.bf16.mxu0 %vm22651_vm12, %v22872_v56  ;;  %vm26339_vm3 = vmmov %vm26337_vm15 }
 0x37a   : > { %vm26340_vm11 = vmmov %vm26339_vm3 }
 0x380   : > { %17565 = vmatmul.mubr.msk.bf16.gmra.mrb[28].mxu0 %vm22659_vm5, %v23055_v2  ;;  %vm26335_vm5 = vcmask 1040384  }
 0x381   : > { %vm26336_vm12 = vmmov %vm26335_vm5 }
 0x382   : > { %vm26338_vm4 = vmmov %vm26335_vm5 }
 0x41b   : > { %v17538_v40 = vpop.f32.mrb[0].mxu0 }
 0x41c   : > { %v3968_v56 = vadd.f32 %v17538_v40, %v23072_v53  ;;  %v3801_v31 = vpop.f32.mrb[1].mxu0 }
 0x41d   : > { %v3966_v28 = vadd.f32 %v23072_v53, %v3801_v31  ;;  %v17539_v51 = vpop.f32.mrb[2].mxu0 }
 0x41e   : > { %v4000_v48 = vmax.f32 %v3968_v56, 0.0  ;;  %v3969_v8 = vadd.f32 %v17539_v51, %v23072_v53  ;;  %v3804_v39 = vpop.f32.mrb[3].mxu0 }
 0x41f   : > { %v23077_v7 = vmax.f32 %v3966_v28, 0.0  ;;  %v3967_v6 = vadd.f32 %v23072_v53, %v3804_v39 }
 0x420   : > { %v4001_v24 = vmax.f32 %v3969_v8, 0.0  ;;  %v4065_v12 = vrot.slane %v4000_v48, 7  ;;  %v4667_v37 = vrot.slane %v4000_v48, 1 }
 0x421   : > { %v4061_v61 = vrot.slane %v23077_v7, 7  ;;  %v3999_v46 = vmax.f32 %v3967_v6, 0.0  ;;  %v25810_v22 = vrot.slane %v23077_v7, 1 }
 0x422   : > { %v4067_v38 = vrot.slane %v4001_v24, 7  ;;  %v4669_v33 = vrot.slane %v4001_v24, 1  ;;  %v23081_v17 = vpack.c.bf16 %v4001_v24, %v4000_v48 }
 0x423   : > { %v4063_v63 = vrot.slane %v3999_v46, 7  ;;  %v4665_v55 = vrot.slane %v3999_v46, 1  ;;  %v17542_v14 = vpop.f32.mrb[4].mxu0  ;;  %v23085_v18 = vpack.c.bf16 %v3999_v46, %v23077_v7  ;;  %v4062_v19 = vsel %vm26335_vm5, %v26303_v47, %v4061_v61  ;;  %vm26345_vm5 = vmmov %vm26339_vm3 }
 0x424   : > { %26333 = vst [vmem:[#allocation75_spill] sm:$0xff] %v23081_v17  ;;  %v3972_v23 = vadd.f32 %v17542_v14, %v23072_v53  ;;  %v3817_v40 = vpop.f32.mrb[5].mxu0  ;;  %v4068_v56 = vsel %vm26336_vm12, %v4065_v12, %v4067_v38  ;;  %v4670_v31 = vsel %vm26337_vm15, %v4667_v37, %v4669_v33  ;;  %vm26343_vm15 = vmmov %vm26338_vm4 }
 0x425   : > { %26334 = vst [vmem:[#allocation35_spill] sm:$0xff] %v23085_v18  ;;  %v4064_v28 = vsel %vm26338_vm4, %v4061_v61, %v4063_v63  ;;  %v4666_v51 = vsel %vm26339_vm3, %v25810_v22, %v4665_v55  ;;  %v4668_v48 = vsel %vm26340_vm11, %v4665_v55, %v4667_v37  ;;  %v3970_v8 = vadd.f32 %v23072_v53, %v3817_v40  ;;  %v17543_v39 = vpop.f32.mrb[6].mxu0  ;;  %v20249_v37 = vld [vmem:[%s26307_s16 + $0x10] sm:$0xff]   ;;  %vm26344_vm12 = vmmov %vm26338_vm4 }
 0x426   : > { %17585 = vmatmul.mubr.bf16.vlgmr.msra.gmra.mrb[0].mxu1 %v23085_v18  ;;  %v23102_v6 = vpack.c.bf16 %v4064_v28, %v4062_v19  ;;  %v23104_v24 = vpack.c.bf16 %v4668_v48, %v4666_v51  ;;  %v4004_v46 = vmax.f32 %v3972_v23, 0.0  ;;  %v3973_v14 = vadd.f32 %v17543_v39, %v23072_v53  ;;  %v3820_v2 = vpop.f32.mrb[7].mxu0  ;;  %vm26346_vm11 = vmmov %vm26338_vm4 }
 0x427   : > { %17588 = vmatprep.mubr.bf16.mxu1 %v23081_v17  ;;  %17617 = vmatpush3.bf16.msra.mxu1 %v20247_v59  ;;  %v4002_v61 = vmax.f32 %v3970_v8, 0.0  ;;  %v3971_v22 = vadd.f32 %v23072_v53, %v3820_v2  ;;  %v4066_v55 = vsel %vm26338_vm4, %v4063_v63, %v4065_v12 }
 0x428   : > { %17618 = vmatprep.subr.bf16.mxu1 %v20248_v54  ;;  %v23113_v19 = vmax.f32 %v3973_v14, 0.0  ;;  %v23115_v40 = vpack.c.bf16 %v4068_v56, %v4066_v55  ;;  %v4073_v23 = vrot.slane %v4004_v46, 7  ;;  %v4675_v39 = vrot.slane %v4004_v46, 1  ;;  %v20250_v56 = vld [vmem:[%s26307_s16 + $0x18] sm:$0xff]  }
 0x429   : > { %v4069_v28 = vrot.slane %v4002_v61, 7  ;;  %v4671_v51 = vrot.slane %v4002_v61, 1  ;;  %v4003_v48 = vmax.f32 %v3971_v22, 0.0 }
 0x42a   : > { %v4075_v59 = vrot.slane %v23113_v19, 7  ;;  %v4677_v2 = vrot.slane %v23113_v19, 1  ;;  %v23120_v8 = vpack.c.bf16 %v23113_v19, %v4004_v46 }
 0x42b   : > { %17619 = vmatpush3.bf16.msra.mxu1 %v20248_v54  ;;  %v4071_v9 = vrot.slane %v4003_v48, 7  ;;  %v4673_v47 = vrot.slane %v4003_v48, 1  ;;  %v17546_v12 = vpop.f32.mrb[8].mxu0  ;;  %v23122_v63 = vpack.c.bf16 %v4003_v48, %v4002_v61  ;;  %v4070_v22 = vsel %vm26343_vm15, %v4067_v38, %v4069_v28  ;;  %vm26347_vm15 = vmmov %vm26339_vm3 }
 0x42c   : > { %26341 = vst [vmem:[#allocation55_spill] sm:$0xff] %v23120_v8  ;;  %17620 = vmatprep.subr.bf16.mxu1 %v20249_v37  ;;  %v3976_v14 = vadd.f32 %v17546_v12, %v23072_v53  ;;  %v3833_v55 = vpop.f32.mrb[9].mxu0  ;;  %v4076_v17 = vsel %vm26344_vm12, %v4073_v23, %v4075_v59  ;;  %v4672_v46 = vsel %vm26345_vm5, %v4669_v33, %v4671_v51  ;;  %vm26348_vm12 = vmmov %vm26339_vm3 }
 0x42d   : > { %26342 = vst [vmem:[#allocation56_spill] sm:$0xff] %v23122_v63  ;;  %v4678_v54 = vsel %vm26339_vm3, %v4675_v39, %v4677_v2  ;;  %v3974_v19 = vadd.f32 %v23072_v53, %v3833_v55  ;;  %v17547_v61 = vpop.f32.mrb[10].mxu0  ;;  %v4072_v48 = vsel %vm26346_vm11, %v4069_v28, %v4071_v9  ;;  %v4074_v18 = vsel %vm26338_vm4, %v4071_v9, %v4073_v23  ;;  %v20251_v9 = vld [vmem:[%s26307_s16 + $0x20] sm:$0xff]   ;;  %vm26352_vm5 = vmmov %vm26338_vm4 }
 0x42e   : > { %17589 = vmatmul.mubr.bf16.gmra.mrb[4].mxu1 %v23122_v63  ;;  %v23136_v60 = vpack.c.bf16 %v4672_v46, %v4670_v31  ;;  %v4008_v38 = vmax.f32 %v3976_v14, 0.0  ;;  %v3977_v12 = vadd.f32 %v17547_v61, %v23072_v53  ;;  %v3836_v5 = vpop.f32.mrb[11].mxu0  ;;  %v23140_v33 = vpack.c.bf16 %v4072_v48, %v4070_v22  ;;  %vm26353_vm3 = vmmov %vm26338_vm4 }
 0x42f   : > { %17592 = vmatprep.mubr.bf16.mxu1 %v23120_v8  ;;  %17621 = vmatpush3.bf16.msra.mxu1 %v20249_v37  ;;  %v23142_v50 = vpack.c.bf16 %v4076_v17, %v4074_v18  ;;  %v4006_v55 = vmax.f32 %v3974_v19, 0.0  ;;  %v3975_v63 = vadd.f32 %v23072_v53, %v3836_v5  ;;  %v4674_v31 = vsel %vm26347_vm15, %v4671_v51, %v4673_v47  ;;  %vm26354_vm11 = vmmov %vm26348_vm12 }
 0x430   : > { %17622 = vmatprep.subr.bf16.mxu1 %v20250_v56  ;;  %v4676_v23 = vsel %vm26348_vm12, %v4673_v47, %v4675_v39  ;;  %v23150_v28 = vmax.f32 %v3977_v12, 0.0  ;;  %v4081_v37 = vrot.slane %v4008_v38, 7  ;;  %v4683_v46 = vrot.slane %v4008_v38, 1  ;;  %v20252_v12 = vld [vmem:[%s26307_s16 + $0x28] sm:$0xff]   ;;  %vm26355_vm4 = vmmov %vm26354_vm11 }
 0x431   : > { %v23152_v14 = vpack.c.bf16 %v4676_v23, %v4674_v31  ;;  %v4077_v22 = vrot.slane %v4006_v55, 7  ;;  %v4679_v17 = vrot.slane %v4006_v55, 1  ;;  %v4007_v18 = vmax.f32 %v3975_v63, 0.0  ;;  %vm26356_vm15 = vmmov %vm26353_vm3 }
 0x432   : > { %v4083_v5 = vrot.slane %v23150_v28, 7  ;;  %v4685_v19 = vrot.slane %v23150_v28, 1  ;;  %v23157_v61 = vpack.c.bf16 %v23150_v28, %v4008_v38  ;;  %vm26357_vm12 = vmmov %vm26353_vm3 }
 0x433   : > { %26349 = vst [vmem:[#allocation59_spill] sm:$0xff] %v23152_v14  ;;  %17623 = vmatpush3.bf16.msra.mxu1 %v20250_v56  ;;  %v4079_v51 = vrot.slane %v4007_v18, 7  ;;  %v4681_v48 = vrot.slane %v4007_v18, 1  ;;  %v17550_v47 = vpop.f32.mrb[12].mxu0  ;;  %v23159_v39 = vpack.c.bf16 %v4007_v18, %v4006_v55  ;;  %v4078_v63 = vsel %vm26352_vm5, %v4075_v59, %v4077_v22  ;;  %vm26359_vm5 = vmmov %vm26355_vm4 }
 0x434   : > { %26350 = vst [vmem:[#allocation60_spill] sm:$0xff] %v23157_v61  ;;  %17624 = vmatprep.subr.bf16.mxu1 %v20251_v9  ;;  %v3980_v31 = vadd.f32 %v17550_v47, %v23072_v53  ;;  %v3849_v23 = vpop.f32.mrb[13].mxu0  ;;  %v4084_v8 = vsel %vm26353_vm3, %v4081_v37, %v4083_v5  ;;  %v4680_v38 = vsel %vm26354_vm11, %v4677_v2, %v4679_v17  ;;  %vm26360_vm3 = vmmov %vm26355_vm4 }
 0x435   : > { %26351 = vst [vmem:[#allocation64_spill] sm:$0xff] %v23159_v39  ;;  %v4686_v56 = vsel %vm26355_vm4, %v4683_v46, %v4685_v19  ;;  %v3978_v28 = vadd.f32 %v23072_v53, %v3849_v23  ;;  %v17551_v55 = vpop.f32.mrb[14].mxu0  ;;  %v4080_v18 = vsel %vm26356_vm15, %v4077_v22, %v4079_v51  ;;  %v4082_v26 = vsel %vm26357_vm12, %v4079_v51, %v4081_v37  ;;  %vm26364_vm11 = vmmov %vm26357_vm12 }
 0x436   : > { %17593 = vmatmul.mubr.bf16.gmra.mrb[8].mxu1 %v23159_v39  ;;  %v23173_v52 = vpack.c.bf16 %v4680_v38, %v4678_v54  ;;  %v4012_v59 = vmax.f32 %v3980_v31, 0.0  ;;  %v3981_v47 = vadd.f32 %v17551_v55, %v23072_v53  ;;  %v3852_v0 = vpop.f32.mrb[15].mxu0  ;;  %v23177_v2 = vpack.c.bf16 %v4080_v18, %v4078_v63  ;;  %v20253_v54 = vld [vmem:[%s26307_s16 + $0x30] sm:$0xff]   ;;  %vm26365_vm4 = vmmov %vm26364_vm11 }
 0x437   : > { %17596 = vmatprep.mubr.bf16.mxu1 %v23157_v61  ;;  %17625 = vmatpush3.bf16.msra.mxu1 %v20251_v9  ;;  %v23179_v41 = vpack.c.bf16 %v4084_v8, %v4082_v26  ;;  %v4010_v23 = vmax.f32 %v3978_v28, 0.0  ;;  %v3979_v39 = vadd.f32 %v23072_v53, %v3852_v0  ;;  %v4682_v37 = vsel %vm26359_vm5, %v4679_v17, %v4681_v48  ;;  %vm26366_vm15 = vmmov %vm26360_vm3 }
 0x438   : > { %26358 = vst [vmem:[#allocation65_spill] sm:$0xff] %v23173_v52  ;;  %17626 = vmatprep.subr.bf16.mxu1 %v20252_v12  ;;  %v4684_v22 = vsel %vm26360_vm3, %v4681_v48, %v4683_v46  ;;  %v23187_v51 = vmax.f32 %v3981_v47, 0.0  ;;  %v4089_v9 = vrot.slane %v4012_v59, 7  ;;  %v4691_v38 = vrot.slane %v4012_v59, 1  ;;  %v20254_v47 = vld [vmem:[%s26307_s16 + $0x38] sm:$0xff]   ;;  %vm26367_vm12 = vmmov %vm26360_vm3 }
 0x439   : > { %v23189_v31 = vpack.c.bf16 %v4684_v22, %v4682_v37  ;;  %v4085_v63 = vrot.slane %v4010_v23, 7  ;;  %v4687_v26 = vrot.slane %v4010_v23, 1  ;;  %v4011_v8 = vmax.f32 %v3979_v39, 0.0  ;;  %vm26368_vm5 = vmmov %vm26365_vm4 }
 0x43a   : > { %v4091_v0 = vrot.slane %v23187_v51, 7  ;;  %v4693_v28 = vrot.slane %v23187_v51, 1  ;;  %v23194_v55 = vpack.c.bf16 %v23187_v51, %v4012_v59  ;;  %vm26369_vm3 = vmmov %vm26365_vm4 }
 0x43b   : > { %26361 = vst [vmem:[#allocation72_spill] sm:$0xff] %v23189_v31  ;;  %17627 = vmatpush3.bf16.msra.mxu1 %v20252_v12  ;;  %v4087_v17 = vrot.slane %v4011_v8, 7  ;;  %v4689_v18 = vrot.slane %v4011_v8, 1  ;;  %v17554_v46 = vpop.f32.mrb[16].mxu0  ;;  %v23196_v48 = vpack.c.bf16 %v4011_v8, %v4010_v23  ;;  %v4086_v39 = vsel %vm26364_vm11, %v4083_v5, %v4085_v63  ;;  %vm26371_vm11 = vmmov %vm26367_vm12 }
 0x43c   : > { %26362 = vst [vmem:[#allocation70_spill] sm:$0xff] %v23194_v55  ;;  %17628 = vmatprep.subr.bf16.mxu1 %v20253_v54  ;;  %v3984_v37 = vadd.f32 %v17554_v46, %v23072_v53  ;;  %v3865_v22 = vpop.f32.mrb[17].mxu0  ;;  %v4092_v61 = vsel %vm26365_vm4, %v4089_v9, %v4091_v0  ;;  %v4688_v59 = vsel %vm26366_vm15, %v4685_v19, %v4687_v26  ;;  %vm26372_vm4 = vmmov %vm26371_vm11 }
 0x43d   : > { %26363 = vst [vmem:[#allocation76_spill] sm:$0xff] %v23196_v48  ;;  %v4694_v12 = vsel %vm26367_vm12, %v4691_v38, %v4693_v28  ;;  %v3982_v51 = vadd.f32 %v23072_v53, %v3865_v22  ;;  %v17555_v23 = vpop.f32.mrb[18].mxu0  ;;  %v4088_v8 = vsel %vm26368_vm5, %v4085_v63, %v4087_v17  ;;  %v4090_v27 = vsel %vm26369_vm3, %v4087_v17, %v4089_v9  ;;  %vm26376_vm15 = vmmov %vm26369_vm3 }
 0x43e   : > { %17597 = vmatmul.mubr.bf16.gmra.mrb[12].mxu1 %v23196_v48  ;;  %v23210_v62 = vpack.c.bf16 %v4688_v59, %v4686_v56  ;;  %v4016_v5 = vmax.f32 %v3984_v37, 0.0  ;;  %v3985_v46 = vadd.f32 %v17555_v23, %v23072_v53  ;;  %v3868_v16 = vpop.f32.mrb[19].mxu0  ;;  %v23214_v19 = vpack.c.bf16 %v4088_v8, %v4086_v39  ;;  %v23222_v56 = vld [vmem:[%s26307_s16 + $0x80] sm:$0xff]   ;;  %vm26377_vm12 = vmmov %vm26369_vm3 }
 0x43f   : > { %17600 = vmatprep.mubr.bf16.mxu1 %v23194_v55  ;;  %17629 = vmatpush3.bf16.msra.mxu1 %v20253_v54  ;;  %v23216_v45 = vpack.c.bf16 %v4092_v61, %v4090_v27  ;;  %v4014_v22 = vmax.f32 %v3982_v51, 0.0  ;;  %v3983_v48 = vadd.f32 %v23072_v53, %v3868_v16  ;;  %v4690_v9 = vsel %vm26371_vm11, %v4687_v26, %v4689_v18  ;;  %vm26378_vm5 = vmmov %vm26372_vm4 }
 0x440   : > { %26370 = vst [vmem:[#allocation77_spill] sm:$0xff] %v23210_v62  ;;  %17630 = vmatprep.subr.bf16.mxu1 %v20254_v47  ;;  %v4692_v63 = vsel %vm26372_vm4, %v4689_v18, %v4691_v38  ;;  %v4017_v17 = vmax.f32 %v3985_v46, 0.0  ;;  %v4097_v54 = vrot.slane %v4016_v5, 7  ;;  %v4699_v59 = vrot.slane %v4016_v5, 1  ;;  %vm26379_vm3 = vmmov %vm26372_vm4 }
 0x441   : > { %v23226_v37 = vpack.c.bf16 %v4692_v63, %v4690_v9  ;;  %v4093_v39 = vrot.slane %v4014_v22, 7  ;;  %v4695_v27 = vrot.slane %v4014_v22, 1  ;;  %v4015_v61 = vmax.f32 %v3983_v48, 0.0  ;;  %vm26380_vm11 = vmmov %vm26377_vm12 }
 0x442   : > { %v4099_v51 = vrot.slane %v4017_v17, 7  ;;  %v4701_v16 = vrot.slane %v4017_v17, 1  ;;  %v23228_v23 = vpack.c.bf16 %v4017_v17, %v4016_v5  ;;  %vm26381_vm4 = vmmov %vm26380_vm11 }
 0x443   : > { %26373 = vst [vmem:[#allocation80_spill] sm:$0xff] %v23226_v37  ;;  %17631 = vmatpush3.bf16.msra.mxu1 %v20254_v47  ;;  %v4095_v8 = vrot.slane %v4015_v61, 7  ;;  %v4697_v55 = vrot.slane %v4015_v61, 1  ;;  %v17558_v62 = vpop.f32.mrb[20].mxu0  ;;  %v23230_v31 = vpack.c.bf16 %v4015_v61, %v4014_v22  ;;  %v4094_v26 = vsel %vm26376_vm15, %v4091_v0, %v4093_v39  ;;  %vm26383_vm15 = vmmov %vm26379_vm3 }
 0x444   : > { %26374 = vst [vmem:[#allocation78_spill] sm:$0xff] %v23228_v23  ;;  %17664 = vmatprep.subr.bf16.mxu1 %v23222_v56  ;;  %v3988_v38 = vadd.f32 %v17558_v62, %v23072_v53  ;;  %v3881_v18 = vpop.f32.mrb[21].mxu0  ;;  %v4100_v48 = vsel %vm26377_vm12, %v4097_v54, %v4099_v51  ;;  %v4696_v46 = vsel %vm26378_vm5, %v4693_v28, %v4695_v27  ;;  %vm26384_vm12 = vmmov %vm26379_vm3 }
 0x445   : > { %26375 = vst [vmem:[#allocation79_spill] sm:$0xff] %v23230_v31  ;;  %v4702_v5 = vsel %vm26379_vm3, %v4699_v59, %v4701_v16  ;;  %v3986_v47 = vadd.f32 %v23072_v53, %v3881_v18  ;;  %v17559_v9 = vpop.f32.mrb[22].mxu0  ;;  %v4096_v22 = vsel %vm26380_vm11, %v4093_v39, %v4095_v8  ;;  %v4098_v0 = vsel %vm26381_vm4, %v4095_v8, %v4097_v54  ;;  %vm26388_vm5 = vmmov %vm26381_vm4 }
 0x446   : > { %17601 = vmatmul.mubr.bf16.gmra.mrb[16].mxu1 %v23230_v31  ;;  %v23242_v63 = vpack.c.bf16 %v4696_v46, %v4694_v12  ;;  %v4020_v17 = vmax.f32 %v3988_v38, 0.0  ;;  %v3989_v62 = vadd.f32 %v17559_v9, %v23072_v53  ;;  %v3884_v61 = vpop.f32.mrb[23].mxu0  ;;  %v23246_v28 = vpack.c.bf16 %v4096_v22, %v4094_v26  ;;  %vm26389_vm3 = vmmov %vm26381_vm4 }
 0x447   : > { %17604 = vmatprep.mubr.bf16.mxu1 %v23228_v23  ;;  %v23248_v37 = vpack.c.bf16 %v4100_v48, %v4098_v0  ;;  %v4018_v18 = vmax.f32 %v3986_v47, 0.0  ;;  %v3987_v35 = vadd.f32 %v23072_v53, %v3884_v61  ;;  %v4698_v31 = vsel %vm26383_vm15, %v4695_v27, %v4697_v55  ;;  %vm26390_vm11 = vmmov %vm26384_vm12 }
 0x448   : > { %26382 = vst [vmem:[#allocation84_spill] sm:$0xff] %v23242_v63  ;;  %v4700_v39 = vsel %vm26384_vm12, %v4697_v55, %v4699_v59  ;;  %v4021_v54 = vmax.f32 %v3989_v62, 0.0  ;;  %v4105_v8 = vrot.slane %v4020_v17, 7  ;;  %v4707_v63 = vrot.slane %v4020_v17, 1  ;;  %vm26391_vm4 = vmmov %vm26390_vm11 }
 0x449   : > { %v23253_v12 = vpack.c.bf16 %v4700_v39, %v4698_v31  ;;  %v4101_v38 = vrot.slane %v4018_v18, 7  ;;  %v4703_v46 = vrot.slane %v4018_v18, 1  ;;  %v4019_v9 = vmax.f32 %v3987_v35, 0.0  ;;  %vm26392_vm15 = vmmov %vm26389_vm3 }
 0x44a   : > { %v4107_v23 = vrot.slane %v4021_v54, 7  ;;  %v4709_v26 = vrot.slane %v4021_v54, 1  ;;  %v23255_v22 = vpack.c.bf16 %v4021_v54, %v4020_v17  ;;  %vm26393_vm12 = vmmov %vm26389_vm3 }
 0x44b   : > { %26385 = vst [vmem:[#allocation37_spill] sm:$0xff] %v23253_v12  ;;  %v4103_v48 = vrot.slane %v4019_v9, 7  ;;  %v4705_v47 = vrot.slane %v4019_v9, 1  ;;  %v17562_v0 = vpop.f32.mrb[24].mxu0  ;;  %v23257_v61 = vpack.c.bf16 %v4019_v9, %v4018_v18  ;;  %v4102_v27 = vsel %vm26388_vm5, %v4099_v51, %v4101_v38  ;;  %vm26395_vm5 = vmmov %vm26391_vm4 }
 0x44c   : > { %26386 = vst [vmem:[#allocation41_spill] sm:$0xff] %v23255_v22  ;;  %v3992_v55 = vadd.f32 %v17562_v0, %v23072_v53  ;;  %v3897_v31 = vpop.f32.mrb[25].mxu0  ;;  %v4108_v59 = vsel %vm26389_vm3, %v4105_v8, %v4107_v23  ;;  %v4704_v62 = vsel %vm26390_vm11, %v4701_v16, %v4703_v46  ;;  %v4710_v35 = vsel %vm26391_vm4, %v4707_v63, %v4709_v26  ;;  %vm26396_vm3 = vmmov %vm26391_vm4 }
 0x44d   : > { %26387 = vst [vmem:[#allocation42_spill] sm:$0xff] %v23257_v61  ;;  %v3990_v39 = vadd.f32 %v23072_v53, %v3897_v31  ;;  %v17563_v17 = vpop.f32.mrb[26].mxu0  ;;  %v4104_v54 = vsel %vm26392_vm15, %v4101_v38, %v4103_v48  ;;  %v4106_v18 = vsel %vm26393_vm12, %v4103_v48, %v4105_v8  ;;  %v23268_v9 = vpack.c.bf16 %v4704_v62, %v4702_v5  ;;  %vm26400_vm11 = vmmov %vm26393_vm12 }
 0x44e   : > { %17605 = vmatmul.mubr.bf16.gmra.mrb[20].mxu1 %v23257_v61  ;;  %v4024_v51 = vmax.f32 %v3992_v55, 0.0  ;;  %v3993_v0 = vadd.f32 %v17563_v17, %v23072_v53  ;;  %v3900_v12 = vpop.f32.mrb[27].mxu0  ;;  %v23272_v16 = vpack.c.bf16 %v4104_v54, %v4102_v27  ;;  %v23274_v52 = vpack.c.bf16 %v4108_v59, %v4106_v18  ;;  %vm26401_vm4 = vmmov %vm26400_vm11 }
 0x44f   : > { %26394 = vst [vmem:[#allocation43_spill] sm:$0xff] %v23268_v9  ;;  %17608 = vmatprep.mubr.bf16.mxu1 %v23255_v22  ;;  %v4022_v31 = vmax.f32 %v3990_v39, 0.0  ;;  %v3991_v20 = vadd.f32 %v23072_v53, %v3900_v12  ;;  %v4706_v61 = vsel %vm26395_vm5, %v4703_v46, %v4705_v47  ;;  %v4708_v38 = vsel %vm26396_vm3, %v4705_v47, %v4707_v63  ;;  %vm26402_vm15 = vmmov %vm26396_vm3 }
 0x450   : > { %v4025_v8 = vmax.f32 %v3993_v0, 0.0  ;;  %v23279_v5 = vpack.c.bf16 %v4708_v38, %v4706_v61  ;;  %v4113_v48 = vrot.slane %v4024_v51, 7  ;;  %v4715_v9 = vrot.slane %v4024_v51, 1  ;;  %vm26403_vm12 = vmmov %vm26396_vm3 }
 0x451   : > { %v4109_v55 = vrot.slane %v4022_v31, 7  ;;  %v4711_v62 = vrot.slane %v4022_v31, 1  ;;  %v4023_v17 = vmax.f32 %v3991_v20, 0.0  ;;  %vm26404_vm5 = vmmov %vm26401_vm4 }
 0x452   : > { %26397 = vst [vmem:[#allocation44_spill] sm:$0xff] %v23279_v5  ;;  %v4115_v22 = vrot.slane %v4025_v8, 7  ;;  %v4717_v27 = vrot.slane %v4025_v8, 1  ;;  %v23281_v54 = vpack.c.bf16 %v4025_v8, %v4024_v51  ;;  %vm26405_vm3 = vmmov %vm26401_vm4 }
 0x453   : > { %v4111_v59 = vrot.slane %v4023_v17, 7  ;;  %v4713_v39 = vrot.slane %v4023_v17, 1  ;;  %v17566_v18 = vpop.f32.mrb[28].mxu0  ;;  %v23283_v12 = vpack.c.bf16 %v4023_v17, %v4022_v31  ;;  %v4110_v46 = vsel %vm26400_vm11, %v4107_v23, %v4109_v55  ;;  %vm26406_vm11 = vmmov %vm26403_vm12 }
 0x454   : > { %26398 = vst [vmem:[#allocation48_spill] sm:$0xff] %v23281_v54  ;;  %v3996_v63 = vadd.f32 %v17566_v18, %v23072_v53  ;;  %v3913_v47 = vpop.f32.mrb[29].mxu0  ;;  %v4116_v61 = vsel %vm26401_vm4, %v4113_v48, %v4115_v22  ;;  %v4712_v0 = vsel %vm26402_vm15, %v4709_v26, %v4711_v62  ;;  %v4718_v20 = vsel %vm26403_vm12, %v4715_v9, %v4717_v27  ;;  %vm26407_vm4 = vmmov %vm26406_vm11 }
 0x455   : > { %26399 = vst [vmem:[#allocation49_spill] sm:$0xff] %v23283_v12  ;;  %v3994_v38 = vadd.f32 %v23072_v53, %v3913_v47  ;;  %v17567_v51 = vpop.f32.mrb[30].mxu0  ;;  %v4112_v8 = vsel %vm26404_vm5, %v4109_v55, %v4111_v59  ;;  %v4114_v31 = vsel %vm26405_vm3, %v4111_v59, %v4113_v48  ;;  %v23294_v17 = vpack.c.bf16 %v4712_v0, %v4710_v35  ;;  %vm26409_vm15 = vmmov %vm26405_vm3 }
 0x456   : > { %17609 = vmatmul.mubr.bf16.gmra.mrb[24].mxu1 %v23283_v12  ;;  %v4028_v23 = vmax.f32 %v3996_v63, 0.0  ;;  %v3997_v18 = vadd.f32 %v17567_v51, %v23072_v53  ;;  %v3916_v5 = vpop.f32.mrb[31].mxu0  ;;  %v23298_v26 = vpack.c.bf16 %v4112_v8, %v4110_v46  ;;  %v23300_v14 = vpack.c.bf16 %v4116_v61, %v4114_v31  ;;  %vm26410_vm12 = vmmov %vm26407_vm4 }
 0x457   : > { %17612 = vmatprep.mubr.bf16.mxu1 %v23281_v54  ;;  %v4026_v47 = vmax.f32 %v3994_v38, 0.0  ;;  %v3995_v15 = vadd.f32 %v23072_v53, %v3916_v5  ;;  %v4714_v12 = vsel %vm26406_vm11, %v4711_v62, %v4713_v39  ;;  %v4716_v55 = vsel %vm26407_vm4, %v4713_v39, %v4715_v9  ;;  %vm26411_vm5 = vmmov %vm26405_vm3 }
 0x458   : > { %v23305_v48 = vmax.f32 %v3997_v18, 0.0  ;;  %v23307_v35 = vpack.c.bf16 %v4716_v55, %v4714_v12  ;;  %v4723_v59 = vrot.slane %v4028_v23, 1  ;;  %v5062_v54 = vrot.slane %v4028_v23, 7  ;;  %vm26412_vm3 = vmmov %vm26407_vm4 }
 0x459   : > { %v4117_v63 = vrot.slane %v4026_v47, 7  ;;  %v4719_v0 = vrot.slane %v4026_v47, 1  ;;  %v4027_v51 = vmax.f32 %v3995_v15, 0.0  ;;  %vm26413_vm11 = vmmov %vm26412_vm3 }
 0x45a   : > { %26408 = vst [vmem:[#allocation58_spill] sm:$0xff] %v23305_v48  ;;  %v25868_v46 = vrot.slane %v23305_v48, 7  ;;  %v5633_v61 = vrot.slane %v23305_v48, 1  ;;  %v23312_v38 = vpack.c.bf16 %v23305_v48, %v4028_v23  ;;  %vm26414_vm4 = vmmov %vm26411_vm5  ;;  %v26459_v48 = vld [vmem:[#allocation44_spill] sm:$0xff] }
 0x45b   : > { %v4119_v53 = vrot.slane %v4027_v51, 7  ;;  %v4721_v5 = vrot.slane %v4027_v51, 1  ;;  %v23314_v62 = vpack.c.bf16 %v4027_v51, %v4026_v47  ;;  %v4118_v9 = vsel %vm26409_vm15, %v4115_v22, %v4117_v63  ;;  %vm26415_vm7 = vmmov %vm26412_vm3 }
 0x45c   : > { %v4720_v39 = vsel %vm26410_vm12, %v4717_v27, %v4719_v0  ;;  %v5065_v15 = vsel %vm26411_vm5, %v5062_v54, %v25868_v46  ;;  %v5634_v12 = vsel %vm26412_vm3, %v4723_v59, %v5633_v61  ;;  %v5635_v8 = vsel %vm26413_vm11, %v5633_v61, %v26284_v3  ;;  %vm26416_vm15 = vmmov %vm26412_vm3  ;;  %v26417_v27 = vld [vmem:[#allocation73_spill] sm:$0xff] }
 0x45d   : > { %v4120_v31 = vsel %vm26414_vm4, %v4117_v63, %v4119_v53  ;;  %v23326_v23 = vpack.c.bf16 %v4720_v39, %v4718_v20  ;;  %v4722_v18 = vsel %vm26415_vm7, %v4719_v0, %v4721_v5  ;;  %v4724_v22 = vsel %vm26416_vm15, %v4721_v5, %v4723_v59  ;;  %vm26419_vm12 = vmmov %vm26414_vm4  ;;  %v20256_v20 = vld [vmem:[%s26307_s16 + $0x88] sm:$0xff]   ;;  %v20258_v59 = vld [vmem:[%s26307_s16 + $0x98] sm:$0xff]  }
 0x45e   : > { %17613 = vmatmul.mubr.bf16.gmra.mrb[28].mxu1 %v23314_v62  ;;  %v23333_v47 = vpack.c.bf16 %v4120_v31, %v4118_v9  ;;  %v23335_v55 = vpack.c.bf16 %v4724_v22, %v4722_v18  ;;  %v5063_v51 = vsel %vm26419_vm12, %v4119_v53, %v5062_v54  ;;  %v23338_v61 = vpack.c.bf16 %v5635_v8, %v5634_v12  ;;  %v20257_v54 = vld [vmem:[%s26307_s16 + $0x90] sm:$0xff]   ;;  %v20260_v63 = vld [vmem:[%s26307_s16 + $0xa8] sm:$0xff]   ;;  %v20262_v53 = vld [vmem:[%s26307_s16 + $0xb8] sm:$0xff]  }
 0x45f   : > { %17632 = vmatprep.mubr.msk.bf16.mxu1 %vm21987_vm8, %v26417_v27  ;;  %v23340_v46 = vpack.c.bf16 %v5065_v15, %v5063_v51  ;;  %vm26422_vm7 = vnez %v26020_v42  ;;  %vm26423_vm5 = vnez %v26035_v32  ;;  %vm26424_vm3 = vnez %v26037_v34  ;;  %v20261_v0 = vld [vmem:[%s26307_s16 + $0xb0] sm:$0xff]   ;;  %v20263_v5 = vld [vmem:[%s26307_s16 + $0xc0] sm:$0xff]   ;;  %v20264_v12 = vld [vmem:[%s26307_s16 + $0xc8] sm:$0xff]  }
 0x460   : > { %26418 = vst [vmem:[#allocation62_spill] sm:$0xff] %v23333_v47  ;;  %26420 = vst [vmem:[#allocation73_spill] sm:$0xff] %v23338_v61  ;;  %vm26425_vm11 = vnez %v26053_v36  ;;  %vm26426_vm4 = vnez %v26055_v49  ;;  %vm26427_vm15 = vnez %v26068_v58  ;;  %vm26428_vm12 = vnez %v26291_v25  ;;  %v20265_v8 = vld [vmem:[%s26307_s16 + $0xd0] sm:$0xff]   ;;  %v20266_v31 = vld [vmem:[%s26307_s16 + $0xd8] sm:$0xff]  }
 0x461   : > { %26421 = vst [vmem:[#allocation88_spill] sm:$0xff] %v23340_v46  ;;  %v26434_v9 = vrot.slane %v23077_v7, 1  ;;  %v26438_v7 = vld [vmem:[#allocation85_spill] sm:$0xff]  ;;  %v26439_v18 = vld [vmem:[#allocation59_spill] sm:$0xff]  ;;  %v26440_v22 = vld [vmem:[#allocation86_spill] sm:$0xff] }
 0x462   : > { %v26441_v27 = vld [vmem:[#allocation65_spill] sm:$0xff]  ;;  %v26442_v51 = vld [vmem:[#allocation87_spill] sm:$0xff]  ;;  %v26460_v61 = vld [vmem:[#allocation52_spill] sm:$0xff] }
 0x466   : > { %17633 = vmatmul.mubr.msk.bf16.vlgmr.msra.gmra.mrb[0].mxu1 %vm22004_vm9, %v23102_v6 }
 0x467   : > { %17636 = vmatprep.mubr.msk.bf16.mxu1 %vm26422_vm7, %v23115_v40  ;;  %17665 = vmatpush3.bf16.msra.mxu1 %v23222_v56  ;;  %v20259_v56 = vld [vmem:[%s26307_s16 + $0xa0] sm:$0xff]  }
 0x468   : > { %17666 = vmatprep.subr.bf16.mxu1 %v20256_v20 }
 0x46b   : > { %17667 = vmatpush3.bf16.msra.mxu1 %v20256_v20  ;;  %v20267_v20 = vld [vmem:[%s26307_s16 + $0xe0] sm:$0xff]  }
 0x46c   : > { %17668 = vmatprep.subr.bf16.mxu1 %v20257_v54 }
 0x46e   : > { %17637 = vmatmul.mubr.msk.bf16.gmra.mrb[4].mxu1 %vm26423_vm5, %v23140_v33 }
 0x46f   : > { %17640 = vmatprep.mubr.msk.bf16.mxu1 %vm26424_vm3, %v23142_v50  ;;  %17669 = vmatpush3.bf16.msra.mxu1 %v20257_v54  ;;  %vm26433_vm3 = vnez %v26302_v11  ;;  %v20268_v54 = vld [vmem:[%s26307_s16 + $0xe8] sm:$0xff]   ;;  %v20281_v11 = vld [vmem:[%s26307_s16 + $0x150] sm:$0xff]  }
 0x470   : > { %17670 = vmatprep.subr.bf16.mxu1 %v20258_v59 }
 0x473   : > { %17671 = vmatpush3.bf16.msra.mxu1 %v20258_v59  ;;  %v26444_v59 = vld [vmem:[#allocation72_spill] sm:$0xff] }
 0x474   : > { %17672 = vmatprep.subr.bf16.mxu1 %v20259_v56 }
 0x476   : > { %17641 = vmatmul.mubr.msk.bf16.gmra.mrb[8].mxu1 %vm26425_vm11, %v23177_v2  ;;  %vm26432_vm11 = vnez %v26301_v30  ;;  %v26490_v30 = vld [vmem:[#allocation49_spill] sm:$0xff] }
 0x477   : > { %17644 = vmatprep.mubr.msk.bf16.mxu1 %vm26426_vm4, %v23179_v41  ;;  %17673 = vmatpush3.bf16.msra.mxu1 %v20259_v56  ;;  %vm26429_vm4 = vnez %v26295_v57  ;;  %v26445_v56 = vld [vmem:[#allocation33_spill] sm:$0xff] }
 0x478   : > { %17674 = vmatprep.subr.bf16.mxu1 %v20260_v63 }
 0x47b   : > { %17675 = vmatpush3.bf16.msra.mxu1 %v20260_v63  ;;  %v26447_v63 = vld [vmem:[#allocation77_spill] sm:$0xff] }
 0x47c   : > { %17676 = vmatprep.subr.bf16.mxu1 %v20261_v0 }
 0x47e   : > { %17645 = vmatmul.mubr.msk.bf16.gmra.mrb[12].mxu1 %vm26427_vm15, %v23214_v19  ;;  %vm26430_vm15 = vnez %v26297_v29 }
 0x47f   : > { %17648 = vmatprep.mubr.msk.bf16.mxu1 %vm26428_vm12, %v23216_v45  ;;  %17677 = vmatpush3.bf16.msra.mxu1 %v20261_v0  ;;  %vm26431_vm12 = vnez %v26126_v44  ;;  %v26448_v0 = vld [vmem:[#allocation45_spill] sm:$0xff] }
 0x480   : > { %17678 = vmatprep.subr.bf16.mxu1 %v20262_v53 }
 0x483   : > { %17679 = vmatpush3.bf16.msra.mxu1 %v20262_v53  ;;  %v20269_v53 = vld [vmem:[%s26307_s16 + $0xf0] sm:$0xff]  }
 0x484   : > { %17712 = vmatprep.subr.bf16.mxu1 %v20263_v5 }
 0x486   : > { %17649 = vmatmul.mubr.msk.bf16.gmra.mrb[16].mxu1 %vm26293_vm13, %v23246_v28 }
 0x487   : > { %17652 = vmatprep.mubr.msk.bf16.mxu1 %vm26429_vm4, %v23248_v37  ;;  %vm26435_vm4 = vcmask 1046528  }
 0x488   : > { %v4664_v39 = vsel %vm26435_vm4, %v26284_v3, %v26434_v9  ;;  %vm26443_vm4 = vnez %v26442_v51  ;;  %v26449_v9 = vld [vmem:[#allocation80_spill] sm:$0xff] }
 0x489   : > { %v15005_v15 = vpack.c.bf16 %v4664_v39, %v26284_v3  ;;  %v26450_v39 = vld [vmem:[#allocation46_spill] sm:$0xff]  ;;  %v26457_v3 = vld [vmem:[#allocation51_spill] sm:$0xff] }
 0x48e   : > { %17653 = vmatmul.mubr.msk.bf16.gmra.mrb[20].mxu1 %vm26430_vm15, %v23272_v16  ;;  %vm26436_vm15 = vnez %v26306_v4  ;;  %v26481_v4 = vld [vmem:[#allocation55_spill] sm:$0xff] }
 0x48f   : > { %17656 = vmatprep.mubr.msk.bf16.mxu1 %vm26431_vm12, %v23274_v52  ;;  %vm26437_vm12 = vnez %v26171_v43 }
 0x496   : > { %17657 = vmatmul.mubr.msk.bf16.gmra.mrb[24].mxu1 %vm26432_vm11, %v23298_v26 }
 0x497   : > { %17660 = vmatprep.mubr.msk.bf16.mxu1 %vm26433_vm3, %v23300_v14 }
 0x49e   : > { %17661 = vmatmul.mubr.msk.bf16.gmra.mrb[28].mxu1 %vm26436_vm15, %v23333_v47 }
 0x49f   : > { %17680 = vmatprep.mubr.msk.bf16.mxu1 %vm26437_vm12, %v15005_v15  ;;  %v26451_v15 = vld [vmem:[#allocation84_spill] sm:$0xff] }
 0x4a6   : > { %17681 = vmatmul.mubr.msk.bf16.vlgmr.msra.gmra.mrb[0].mxu1 %vm26317_vm6, %v23104_v24 }
 0x4a7   : > { %17684 = vmatprep.mubr.msk.bf16.mxu1 %vm26318_vm2, %v23136_v60  ;;  %17713 = vmatpush3.bf16.msra.mxu1 %v20263_v5  ;;  %vm26446_vm2 = vnez %v26445_v56  ;;  %v20270_v5 = vld [vmem:[%s26307_s16 + $0xf8] sm:$0xff]  }
 0x4a8   : > { %17714 = vmatprep.subr.bf16.mxu1 %v20264_v12 }
 0x4ab   : > { %17715 = vmatpush3.bf16.msra.mxu1 %v20264_v12  ;;  %v26464_v12 = vld [vmem:[#allocation54_spill] sm:$0xff] }
 0x4ac   : > { %17716 = vmatprep.subr.bf16.mxu1 %v20265_v8 }
 0x4ae   : > { %17685 = vmatmul.mubr.msk.bf16.gmra.mrb[4].mxu1 %vm26319_vm1, %v26439_v18 }
 0x4af   : > { %17688 = vmatprep.mubr.msk.bf16.mxu1 %vm26443_vm4, %v26441_v27  ;;  %17717 = vmatpush3.bf16.msra.mxu1 %v20265_v8  ;;  %v20271_v8 = vld [vmem:[%s26307_s16 + $0x100] sm:$0xff]   ;;  %vm26465_vm4 = vnez %v26464_v12 }
 0x4b0   : > { %17718 = vmatprep.subr.bf16.mxu1 %v20266_v31 }
 0x4b3   : > { %17719 = vmatpush3.bf16.msra.mxu1 %v20266_v31  ;;  %v26453_v31 = vld [vmem:[#allocation37_spill] sm:$0xff] }
 0x4b4   : > { %17720 = vmatprep.subr.bf16.mxu1 %v20267_v20 }
 0x4b6   : > { %17689 = vmatmul.mubr.msk.bf16.gmra.mrb[8].mxu1 %vm26446_vm2, %v26444_v59  ;;  %vm26458_vm2 = vnez %v26457_v3  ;;  %v6813_v3 = vld [vmem:[#allocation14 + $0x8] sm:$0xff] }
 0x4b7   : > { %17692 = vmatprep.mubr.msk.bf16.mxu1 %vm26322_vm10, %v26447_v63  ;;  %17721 = vmatpush3.bf16.msra.mxu1 %v20267_v20  ;;  %v26454_v20 = vld [vmem:[#allocation50_spill] sm:$0xff] }
 0x4b8   : > { %17722 = vmatprep.subr.bf16.mxu1 %v20268_v54  ;;  %vm26455_vm10 = vnez %v26454_v20  ;;  %v26468_v20 = vld [vmem:[#allocation63_spill] sm:$0xff]  ;;  %6898 = vmatprep.mubr.f32.mxu0 %v6813_v3  ;;  %v6820_v3 = vld [vmem:[#allocation14 + $0x40] sm:$0xff] }
 0x4bb   : > { %17723 = vmatpush3.bf16.msra.mxu1 %v20268_v54  ;;  %v26456_v54 = vld [vmem:[#allocation43_spill] sm:$0xff] }
 0x4bc   : > { %17724 = vmatprep.subr.bf16.mxu1 %v20269_v53 }
 0x4be   : > { %17693 = vmatmul.mubr.msk.bf16.gmra.mrb[12].mxu1 %vm26276_vm14, %v26449_v9  ;;  %vm26461_vm14 = vnez %v26460_v61 }
 0x4bf   : > { %17696 = vmatprep.mubr.msk.bf16.mxu1 %vm26277_vm0, %v26451_v15  ;;  %17725 = vmatpush3.bf16.msra.mxu1 %v20269_v53  ;;  %v26462_v53 = vld [vmem:[#allocation53_spill] sm:$0xff] }
 0x4c0   : > { %17726 = vmatprep.subr.bf16.mxu1 %v20270_v5  ;;  %vm26463_vm0 = vnez %v26462_v53  ;;  %v20272_v53 = vld [vmem:[%s26307_s16 + $0x108] sm:$0xff]  }
 0x4c3   : > { %17727 = vmatpush3.bf16.msra.mxu1 %v20270_v5  ;;  %v26466_v5 = vld [vmem:[#allocation57_spill] sm:$0xff] }
 0x4c4   : > { %17760 = vmatprep.subr.bf16.mxu1 %v20271_v8  ;;  %vm26467_vm1 = vnez %v26466_v5 }
 0x4c6   : > { %17697 = vmatmul.mubr.msk.bf16.gmra.mrb[16].mxu1 %vm26455_vm10, %v26453_v31  ;;  %vm26469_vm10 = vnez %v26468_v20  ;;  %v20273_v20 = vld [vmem:[%s26307_s16 + $0x110] sm:$0xff]  }
 0x4c7   : > { %17700 = vmatprep.mubr.msk.bf16.mxu1 %vm26458_vm2, %v26456_v54 }
 0x4ce   : > { %17701 = vmatmul.mubr.msk.bf16.gmra.mrb[20].mxu1 %vm26461_vm14, %v26459_v48 }
 0x4cf   : > { %17704 = vmatprep.mubr.msk.bf16.mxu1 %vm26463_vm0, %v23294_v17 }
 0x4d6   : > { %17705 = vmatmul.mubr.msk.bf16.gmra.mrb[24].mxu1 %vm26465_vm4, %v23307_v35 }
 0x4d7   : > { %17708 = vmatprep.mubr.msk.bf16.mxu1 %vm26467_vm1, %v23326_v23 }
 0x4de   : > { %17709 = vmatmul.mubr.msk.bf16.gmra.mrb[28].mxu1 %vm26469_vm10, %v23335_v55 }
 0x4df   : > { %17728 = vmatprep.mubr.msk.bf16.mxu1 %vm21987_vm8, %v23102_v6  ;;  %v20274_v6 = vld [vmem:[%s26307_s16 + $0x118] sm:$0xff]  }
 0x4e6   : > { %17729 = vmatmul.mubr.msk.bf16.vlgmr.msra.gmra.mrb[0].mxu1 %vm22004_vm9, %v23115_v40  ;;  %vm26470_vm9 = vnez %v26037_v34 }
 0x4e7   : > { %17732 = vmatprep.mubr.msk.bf16.mxu1 %vm26422_vm7, %v23140_v33  ;;  %17761 = vmatpush3.bf16.msra.mxu1 %v20271_v8  ;;  %v20275_v8 = vld [vmem:[%s26307_s16 + $0x120] sm:$0xff]   ;;  %vm26471_vm7 = vnez %v26053_v36 }
 0x4e8   : > { %17762 = vmatprep.subr.bf16.mxu1 %v20272_v53 }
 0x4eb   : > { %17763 = vmatpush3.bf16.msra.mxu1 %v20272_v53  ;;  %v20276_v53 = vld [vmem:[%s26307_s16 + $0x128] sm:$0xff]  }
 0x4ec   : > { %17764 = vmatprep.subr.bf16.mxu1 %v20273_v20 }
 0x4ee   : > { %17733 = vmatmul.mubr.msk.bf16.gmra.mrb[4].mxu1 %vm26423_vm5, %v23142_v50  ;;  %vm26472_vm5 = vnez %v26055_v49 }
 0x4ef   : > { %17736 = vmatprep.mubr.msk.bf16.mxu1 %vm26470_vm9, %v23177_v2  ;;  %17765 = vmatpush3.bf16.msra.mxu1 %v20273_v20  ;;  %v20277_v20 = vld [vmem:[%s26307_s16 + $0x130] sm:$0xff]   ;;  %vm26473_vm9 = vnez %v26068_v58 }
 0x4f0   : > { %17766 = vmatprep.subr.bf16.mxu1 %v20274_v6 }
 0x4f3   : > { %17767 = vmatpush3.bf16.msra.mxu1 %v20274_v6  ;;  %v20278_v6 = vld [vmem:[%s26307_s16 + $0x138] sm:$0xff]  }
 0x4f4   : > { %17768 = vmatprep.subr.bf16.mxu1 %v20275_v8 }
 0x4f6   : > { %17737 = vmatmul.mubr.msk.bf16.gmra.mrb[8].mxu1 %vm26471_vm7, %v23179_v41  ;;  %vm26474_vm7 = vnez %v26291_v25 }
 0x4f7   : > { %17740 = vmatprep.mubr.msk.bf16.mxu1 %vm26472_vm5, %v23214_v19  ;;  %17769 = vmatpush3.bf16.msra.mxu1 %v20275_v8  ;;  %v20279_v8 = vld [vmem:[%s26307_s16 + $0x140] sm:$0xff]   ;;  %vm26475_vm5 = vnez %v26295_v57 }
 0x4f8   : > { %17770 = vmatprep.subr.bf16.mxu1 %v20276_v53 }
 0x4fb   : > { %17771 = vmatpush3.bf16.msra.mxu1 %v20276_v53  ;;  %v26478_v53 = vld [vmem:[#allocation35_spill] sm:$0xff] }
 0x4fc   : > { %17772 = vmatprep.subr.bf16.mxu1 %v20277_v20 }
 0x4fe   : > { %17741 = vmatmul.mubr.msk.bf16.gmra.mrb[12].mxu1 %vm26473_vm9, %v23216_v45  ;;  %vm26476_vm9 = vnez %v26297_v29 }
 0x4ff   : > { %17744 = vmatprep.mubr.msk.bf16.mxu1 %vm26474_vm7, %v23246_v28  ;;  %17773 = vmatpush3.bf16.msra.mxu1 %v20277_v20  ;;  %vm26477_vm7 = vnez %v26126_v44  ;;  %v20280_v20 = vld [vmem:[%s26307_s16 + $0x148] sm:$0xff]  }
 0x500   : > { %17774 = vmatprep.subr.bf16.mxu1 %v20278_v6  ;;  %v26480_v44 = vld [vmem:[#allocation56_spill] sm:$0xff] }
 0x503   : > { %17775 = vmatpush3.bf16.msra.mxu1 %v20278_v6  ;;  %v26479_v6 = vld [vmem:[#allocation75_spill] sm:$0xff] }
 0x504   : > { %17808 = vmatprep.subr.bf16.mxu1 %v20279_v8 }
 0x506   : > { %17745 = vmatmul.mubr.msk.bf16.gmra.mrb[16].mxu1 %vm26293_vm13, %v23248_v37 }
 0x507   : > { %17748 = vmatprep.mubr.msk.bf16.mxu1 %vm26475_vm5, %v23272_v16 }
 0x50e   : > { %17749 = vmatmul.mubr.msk.bf16.gmra.mrb[20].mxu1 %vm26476_vm9, %v23274_v52 }
 0x50f   : > { %17752 = vmatprep.mubr.msk.bf16.mxu1 %vm26477_vm7, %v23298_v26 }
 0x516   : > { %17753 = vmatmul.mubr.msk.bf16.gmra.mrb[24].mxu1 %vm26432_vm11, %v23300_v14 }
 0x517   : > { %17756 = vmatprep.mubr.msk.bf16.mxu1 %vm26433_vm3, %v23333_v47  ;;  %v26491_v47 = vld [vmem:[#allocation48_spill] sm:$0xff] }
 0x51e   : > { %17757 = vmatmul.mubr.msk.bf16.gmra.mrb[28].mxu1 %vm26436_vm15, %v23340_v46  ;;  %v26482_v46 = vld [vmem:[#allocation64_spill] sm:$0xff]  ;;  %vm26492_vm15 = vnez %v26438_v7 }
 0x51f   : > { %17776 = vmatprep.mubr.bf16.mxu1 %v26478_v53  ;;  %v20282_v53 = vld [vmem:[%s26307_s16 + $0x158] sm:$0xff]  }
 0x526   : > { %17777 = vmatmul.mubr.bf16.vlgmr.msra.gmra.mrb[0].mxu1 %v26479_v6  ;;  %v26484_v6 = vld [vmem:[#allocation76_spill] sm:$0xff] }
 0x527   : > { %17780 = vmatprep.mubr.bf16.mxu1 %v26480_v44  ;;  %17809 = vmatpush3.bf16.msra.mxu1 %v20279_v8  ;;  %v20283_v8 = vld [vmem:[%s26307_s16 + $0x160] sm:$0xff]  }
 0x528   : > { %17810 = vmatprep.subr.bf16.mxu1 %v20280_v20  ;;  %v26483_v44 = vld [vmem:[#allocation60_spill] sm:$0xff] }
 0x52b   : > { %17811 = vmatpush3.bf16.msra.mxu1 %v20280_v20  ;;  %v20284_v20 = vld [vmem:[%s26307_s16 + $0x168] sm:$0xff]  }
 0x52c   : > { %17812 = vmatprep.subr.bf16.mxu1 %v20281_v11 }
 0x52e   : > { %17781 = vmatmul.mubr.bf16.gmra.mrb[4].mxu1 %v26481_v4  ;;  %v26486_v4 = vld [vmem:[#allocation79_spill] sm:$0xff] }
 0x52f   : > { %17784 = vmatprep.mubr.bf16.mxu1 %v26482_v46  ;;  %17813 = vmatpush3.bf16.msra.mxu1 %v20281_v11  ;;  %v20285_v11 = vld [vmem:[%s26307_s16 + $0x170] sm:$0xff]  }
 0x530   : > { %17814 = vmatprep.subr.bf16.mxu1 %v20282_v53  ;;  %v26485_v46 = vld [vmem:[#allocation70_spill] sm:$0xff] }
 0x533   : > { %17815 = vmatpush3.bf16.msra.mxu1 %v20282_v53  ;;  %v20286_v53 = vld [vmem:[%s26307_s16 + $0x178] sm:$0xff]  }
 0x534   : > { %17816 = vmatprep.subr.bf16.mxu1 %v20283_v8 }
 0x536   : > { %17785 = vmatmul.mubr.bf16.gmra.mrb[8].mxu1 %v26483_v44  ;;  %v26489_v44 = vld [vmem:[#allocation41_spill] sm:$0xff] }
 0x537   : > { %17788 = vmatprep.mubr.bf16.mxu1 %v26484_v6  ;;  %17817 = vmatpush3.bf16.msra.mxu1 %v20283_v8  ;;  %v20287_v8 = vld [vmem:[%s26307_s16 + $0x180] sm:$0xff]   ;;  %v26487_v6 = vld [vmem:[#allocation78_spill] sm:$0xff] }
 0x538   : > { %17818 = vmatprep.subr.bf16.mxu1 %v20284_v20 }
 0x53b   : > { %17819 = vmatpush3.bf16.msra.mxu1 %v20284_v20  ;;  %v26488_v20 = vld [vmem:[#allocation42_spill] sm:$0xff] }
 0x53c   : > { %17820 = vmatprep.subr.bf16.mxu1 %v20285_v11 }
 0x53e   : > { %17789 = vmatmul.mubr.bf16.gmra.mrb[12].mxu1 %v26485_v46 }
 0x53f   : > { %17792 = vmatprep.mubr.bf16.mxu1 %v26486_v4  ;;  %17821 = vmatpush3.bf16.msra.mxu1 %v20285_v11  ;;  %v20288_v11 = vld [vmem:[%s26307_s16 + $0x188] sm:$0xff]  }
 0x540   : > { %17822 = vmatprep.subr.bf16.mxu1 %v20286_v53 }
 0x543   : > { %17823 = vmatpush3.bf16.msra.mxu1 %v20286_v53  ;;  %v20289_v53 = vld [vmem:[%s26307_s16 + $0x190] sm:$0xff]  }
 0x544   : > { %17856 = vmatprep.subr.bf16.mxu1 %v20287_v8 }
 0x546   : > { %17793 = vmatmul.mubr.bf16.gmra.mrb[16].mxu1 %v26487_v6 }
 0x547   : > { %17796 = vmatprep.mubr.bf16.mxu1 %v26488_v20 }
 0x54e   : > { %17797 = vmatmul.mubr.bf16.gmra.mrb[20].mxu1 %v26489_v44 }
 0x54f   : > { %17800 = vmatprep.mubr.bf16.mxu1 %v26490_v30 }
 0x556   : > { %17801 = vmatmul.mubr.bf16.gmra.mrb[24].mxu1 %v26491_v47 }
 0x557   : > { %17804 = vmatprep.mubr.bf16.mxu1 %v23314_v62 }
 0x55e   : > { %17805 = vmatmul.mubr.bf16.gmra.mrb[28].mxu1 %v23312_v38 }
 0x55f   : > { %17824 = vmatprep.mubr.msk.bf16.mxu1 %vm26437_vm12, %v23104_v24  ;;  %v20290_v24 = vld [vmem:[%s26307_s16 + $0x198] sm:$0xff]   ;;  %vm26493_vm12 = vnez %v26440_v22 }
 0x566   : > { %17825 = vmatmul.mubr.msk.bf16.vlgmr.msra.gmra.mrb[0].mxu1 %vm26317_vm6, %v23136_v60  ;;  %vm26494_vm6 = vnez %v26442_v51 }
 0x567   : > { %17828 = vmatprep.mubr.msk.bf16.mxu1 %vm26492_vm15, %v26439_v18  ;;  %17857 = vmatpush3.bf16.msra.mxu1 %v20287_v8  ;;  %v20291_v8 = vld [vmem:[%s26307_s16 + $0x1a0] sm:$0xff]   ;;  %vm26495_vm15 = vnez %v26445_v56 }
 0x568   : > { %17858 = vmatprep.subr.bf16.mxu1 %v20288_v11  ;;  %v26498_v56 = vld [vmem:[#allocation47_spill] sm:$0xff] }
 0x56b   : > { %17859 = vmatpush3.bf16.msra.mxu1 %v20288_v11  ;;  %v20292_v11 = vld [vmem:[%s26307_s16 + $0x1a8] sm:$0xff]  }
 0x56c   : > { %17860 = vmatprep.subr.bf16.mxu1 %v20289_v53 }
 0x56e   : > { %17829 = vmatmul.mubr.msk.bf16.gmra.mrb[4].mxu1 %vm26493_vm12, %v26441_v27  ;;  %vm26496_vm12 = vnez %v26448_v0 }
 0x56f   : > { %17832 = vmatprep.mubr.msk.bf16.mxu1 %vm26494_vm6, %v26444_v59  ;;  %17861 = vmatpush3.bf16.msra.mxu1 %v20289_v53  ;;  %v20293_v53 = vld [vmem:[%s26307_s16 + $0x1b0] sm:$0xff]   ;;  %vm26497_vm6 = vnez %v26450_v39 }
 0x570   : > { %17862 = vmatprep.subr.bf16.mxu1 %v20290_v24 }
 0x573   : > { %17863 = vmatpush3.bf16.msra.mxu1 %v20290_v24  ;;  %v20294_v24 = vld [vmem:[%s26307_s16 + $0x1b8] sm:$0xff]  }
 0x574   : > { %17864 = vmatprep.subr.bf16.mxu1 %v20291_v8 }
 0x576   : > { %17833 = vmatmul.mubr.msk.bf16.gmra.mrb[8].mxu1 %vm26495_vm15, %v26447_v63  ;;  %vm26499_vm15 = vnez %v26498_v56 }
 0x577   : > { %17836 = vmatprep.mubr.msk.bf16.mxu1 %vm26496_vm12, %v26449_v9  ;;  %17865 = vmatpush3.bf16.msra.mxu1 %v20291_v8  ;;  %v20295_v8 = vld [vmem:[%s26307_s16 + $0x1c0] sm:$0xff]  }
 0x578   : > { %17866 = vmatprep.subr.bf16.mxu1 %v20292_v11 }
 0x57b   : > { %17867 = vmatpush3.bf16.msra.mxu1 %v20292_v11  ;;  %v26500_v11 = vld [vmem:[#allocation50_spill] sm:$0xff] }
 0x57c   : > { %17868 = vmatprep.subr.bf16.mxu1 %v20293_v53  ;;  %vm26501_vm12 = vnez %v26500_v11  ;;  %v20297_v11 = vld [vmem:[%s26307_s16 + $0x1d0] sm:$0xff]  }
 0x57e   : > { %17837 = vmatmul.mubr.msk.bf16.gmra.mrb[12].mxu1 %vm26497_vm6, %v26451_v15 }
 0x57f   : > { %17840 = vmatprep.mubr.msk.bf16.mxu1 %vm26499_vm15, %v26453_v31  ;;  %17869 = vmatpush3.bf16.msra.mxu1 %v20293_v53  ;;  %v20296_v53 = vld [vmem:[%s26307_s16 + $0x1c8] sm:$0xff]  }
 0x580   : > { %17870 = vmatprep.subr.bf16.mxu1 %v20294_v24 }
 0x583   : > { %17871 = vmatpush3.bf16.msra.mxu1 %v20294_v24  ;;  %v26503_v24 = vld [vmem:[#allocation73_spill] sm:$0xff] }
 0x584   : > { %17904 = vmatprep.subr.bf16.mxu1 %v20295_v8 }
 0x586   : > { %17841 = vmatmul.mubr.msk.bf16.gmra.mrb[16].mxu1 %vm26501_vm12, %v26456_v54 }
 0x587   : > { %17844 = vmatprep.mubr.msk.bf16.mxu1 %vm26458_vm2, %v26459_v48 }
 0x58e   : > { %17845 = vmatmul.mubr.msk.bf16.gmra.mrb[20].mxu1 %vm26461_vm14, %v23294_v17 }
 0x58f   : > { %17848 = vmatprep.mubr.msk.bf16.mxu1 %vm26463_vm0, %v23307_v35  ;;  %vm26505_vm0 = vnez %v26286_v21  ;;  %v26516_v21 = vld [vmem:[#allocation88_spill] sm:$0xff] }
 0x596   : > { %17849 = vmatmul.mubr.msk.bf16.gmra.mrb[24].mxu1 %vm26465_vm4, %v23326_v23  ;;  %vm26506_vm4 = vnez %v26020_v42  ;;  %v20299_v42 = vld [vmem:[%s26307_s16 + $0x1e0] sm:$0xff]  }
 0x597   : > { %17852 = vmatprep.mubr.msk.bf16.mxu1 %vm26467_vm1, %v23335_v55 }
 0x59e   : > { %17853 = vmatmul.mubr.msk.bf16.gmra.mrb[28].mxu1 %vm26469_vm10, %v26503_v24 }
 0x59f   : > { %17872 = vmatprep.mubr.msk.bf16.mxu1 %vm21987_vm8, %v23115_v40  ;;  %vm26507_vm8 = vnez %v26035_v32  ;;  %v20301_v32 = vld [vmem:[%s26307_s16 + $0x1f0] sm:$0xff]  }
 0x5a0   : > { %v26522_v40 = vld [vmem:[#allocation61_spill] sm:$0xff] }
 0x5a6   : > { %17873 = vmatmul.mubr.msk.bf16.vlgmr.msra.gmra.mrb[0].mxu1 %vm26505_vm0, %v23140_v33  ;;  %vm26508_vm0 = vnez %v26037_v34  ;;  %v20302_v34 = vld [vmem:[%s26307_s16 + $0x1f8] sm:$0xff]  }
 0x5a7   : > { %17876 = vmatprep.mubr.msk.bf16.mxu1 %vm26506_vm4, %v23142_v50  ;;  %17905 = vmatpush3.bf16.msra.mxu1 %v20295_v8  ;;  %v20300_v50 = vld [vmem:[%s26307_s16 + $0x1e8] sm:$0xff]   ;;  %vm26509_vm4 = vnez %v26053_v36  ;;  %v20303_v36 = vld [vmem:[%s26307_s16 + $0x200] sm:$0xff]  }
 0x5a8   : > { %17906 = vmatprep.subr.bf16.mxu1 %v20296_v53  ;;  %v26524_v33 = vld [vmem:[#allocation75_spill] sm:$0xff] }
 0x5a9   : > { %v20307_v8 = vld [vmem:[%s26307_s16 + $0x220] sm:$0xff]  }
 0x5ab   : > { %17907 = vmatpush3.bf16.msra.mxu1 %v20296_v53  ;;  %v26529_v53 = vld [vmem:[#allocation76_spill] sm:$0xff] }
 0x5ac   : > { %17908 = vmatprep.subr.bf16.mxu1 %v20297_v11 }
 0x5ae   : > { %17877 = vmatmul.mubr.msk.bf16.gmra.mrb[4].mxu1 %vm26507_vm8, %v23177_v2  ;;  %vm26510_vm8 = vnez %v26055_v49  ;;  %v26525_v2 = vld [vmem:[#allocation56_spill] sm:$0xff] }
 0x5af   : > { %17880 = vmatprep.mubr.msk.bf16.mxu1 %vm26508_vm0, %v23179_v41  ;;  %17909 = vmatpush3.bf16.msra.mxu1 %v20297_v11  ;;  %vm26511_vm0 = vnez %v26068_v58  ;;  %v26514_v58 = vld [vmem:[#allocation62_spill] sm:$0xff]  ;;  %v20308_v11 = vld [vmem:[%s26307_s16 + $0x228] sm:$0xff]  }
 0x5b0   : > { %17910 = vmatprep.subr.bf16.mxu1 %v20298_v13  ;;  %v26519_v41 = vld [vmem:[#allocation58_spill] sm:$0xff] }
 0x5b1   : > { %v26520_v57 = vrot.slane %v26519_v41, 7 }
 0x5b3   : > { %17911 = vmatpush3.bf16.msra.mxu1 %v20298_v13  ;;  %v20309_v13 = vld [vmem:[%s26307_s16 + $0x230] sm:$0xff]  }
 0x5b4   : > { %17912 = vmatprep.subr.bf16.mxu1 %v20299_v42 }
 0x5b6   : > { %17881 = vmatmul.mubr.msk.bf16.gmra.mrb[8].mxu1 %vm26509_vm4, %v23214_v19  ;;  %vm26512_vm4 = vnez %v26291_v25  ;;  %v26526_v19 = vld [vmem:[#allocation55_spill] sm:$0xff] }
 0x5b7   : > { %17884 = vmatprep.mubr.msk.bf16.mxu1 %vm26510_vm8, %v23216_v45  ;;  %17913 = vmatpush3.bf16.msra.mxu1 %v20299_v42  ;;  %v20310_v42 = vld [vmem:[%s26307_s16 + $0x238] sm:$0xff]   ;;  %vm26535_vm8 = vnez %v26442_v51 }
 0x5b8   : > { %17914 = vmatprep.subr.bf16.mxu1 %v20300_v50 }
 0x5bb   : > { %17915 = vmatpush3.bf16.msra.mxu1 %v20300_v50 }
 0x5bc   : > { %17916 = vmatprep.subr.bf16.mxu1 %v20301_v32 }
 0x5be   : > { %17885 = vmatmul.mubr.msk.bf16.gmra.mrb[12].mxu1 %vm26511_vm0, %v23246_v28  ;;  %v20306_v28 = vld [vmem:[%s26307_s16 + $0x218] sm:$0xff]  }
 0x5bf   : > { %17888 = vmatprep.mubr.msk.bf16.mxu1 %vm26512_vm4, %v23248_v37  ;;  %17917 = vmatpush3.bf16.msra.mxu1 %v20301_v32  ;;  %v20305_v37 = vld [vmem:[%s26307_s16 + $0x210] sm:$0xff]   ;;  %vm26538_vm4 = vnez %v26448_v0 }
 0x5c0   : > { %17918 = vmatprep.subr.bf16.mxu1 %v20302_v34 }
 0x5c3   : > { %17919 = vmatpush3.bf16.msra.mxu1 %v20302_v34 }
 0x5c4   : > { %17952 = vmatprep.subr.bf16.mxu1 %v20303_v36 }
 0x5c6   : > { %17889 = vmatmul.mubr.msk.bf16.gmra.mrb[16].mxu1 %vm26293_vm13, %v23272_v16  ;;  %vm26521_vm13 = vcmask 1040384   ;;  %v26527_v16 = vld [vmem:[#allocation64_spill] sm:$0xff] }
 0x5c7   : > { %17892 = vmatprep.mubr.msk.bf16.mxu1 %vm26475_vm5, %v23274_v52  ;;  %v5944_v52 = vsel %vm26521_vm13, %v26520_v57, %v26518_v10  ;;  %vm26532_vm5 = vnez %v26180_v1  ;;  %v26543_v1 = vld [vmem:[#allocation69_spill] sm:$0xff] }
 0x5c8   : > { %v15290_v29 = vpack.c.bf16 %v26518_v10, %v5944_v52 }
 0x5ce   : > { %17893 = vmatmul.mubr.msk.bf16.gmra.mrb[20].mxu1 %vm26476_vm9, %v23298_v26  ;;  %vm26523_vm9 = vnez %v26522_v40  ;;  %v26528_v26 = vld [vmem:[#allocation60_spill] sm:$0xff] }
 0x5cf   : > { %17896 = vmatprep.mubr.msk.bf16.mxu1 %vm26477_vm7, %v23300_v14  ;;  %v20304_v14 = vld [vmem:[%s26307_s16 + $0x208] sm:$0xff]   ;;  %vm26531_vm7 = vnez %v26171_v43 }
 0x5d0   : > { %v26540_v43 = vld [vmem:[#allocation53_spill] sm:$0xff] }
 0x5d1   : > { %vm26541_vm13 = vnez %v26540_v43  ;;  %v6819_v43 = vld [vmem:[#allocation14 + $0x38] sm:$0xff] }
 0x5d6   : > { %17897 = vmatmul.mubr.msk.bf16.gmra.mrb[24].mxu1 %vm26432_vm11, %v26514_v58  ;;  %vm26534_vm11 = vnez %v26440_v22 }
 0x5d7   : > { %17900 = vmatprep.mubr.msk.bf16.mxu1 %vm26433_vm3, %v26516_v21  ;;  %vm26533_vm3 = vnez %v26438_v7 }
 0x5de   : > { %17901 = vmatmul.mubr.msk.bf16.gmra.mrb[28].mxu1 %vm26523_vm9, %v15290_v29 }
 0x5df   : > { %17920 = vmatprep.mubr.bf16.mxu1 %v26524_v33 }
 0x5e6   : > { %17921 = vmatmul.mubr.bf16.vlgmr.msra.gmra.mrb[0].mxu1 %v26525_v2 }
 0x5e7   : > { %17924 = vmatprep.mubr.bf16.mxu1 %v26526_v19  ;;  %17953 = vmatpush3.bf16.msra.mxu1 %v20303_v36 }
 0x5e8   : > { %17954 = vmatprep.subr.bf16.mxu1 %v20304_v14 }
 0x5eb   : > { %17955 = vmatpush3.bf16.msra.mxu1 %v20304_v14 }
 0x5ec   : > { %17956 = vmatprep.subr.bf16.mxu1 %v20305_v37 }
 0x5ee   : > { %17925 = vmatmul.mubr.bf16.gmra.mrb[4].mxu1 %v26527_v16 }
 0x5ef   : > { %17928 = vmatprep.mubr.bf16.mxu1 %v26528_v26  ;;  %17957 = vmatpush3.bf16.msra.mxu1 %v20305_v37 }
 0x5f0   : > { %17958 = vmatprep.subr.bf16.mxu1 %v20306_v28 }
 0x5f3   : > { %17959 = vmatpush3.bf16.msra.mxu1 %v20306_v28 }
 0x5f4   : > { %17960 = vmatprep.subr.bf16.mxu1 %v20307_v8 }
 0x5f6   : > { %17929 = vmatmul.mubr.bf16.gmra.mrb[8].mxu1 %v26529_v53  ;;  %v6812_v53 = vld [vmem:[#allocation14] sm:$0xff] }
 0x5f7   : > { %17932 = vmatprep.mubr.bf16.mxu1 %v26485_v46  ;;  %17961 = vmatpush3.bf16.msra.mxu1 %v20307_v8  ;;  %v26530_v46 = vmov 0.0|0.0  }
 0x5f8   : > { %17962 = vmatprep.subr.bf16.mxu1 %v20308_v11 }
 0x5fb   : > { %17963 = vmatpush3.bf16.msra.mxu1 %v20308_v11 }
 0x5fc   : > { %17964 = vmatprep.subr.bf16.mxu1 %v20309_v13 }
 0x5fe   : > { %17933 = vmatmul.mubr.bf16.gmra.mrb[12].mxu1 %v26486_v4  ;;  %v20311_v4 = vld [vmem:[#allocation2 + $0x40] sm:$0xff]  }
 0x5ff   : > { %17936 = vmatprep.mubr.bf16.mxu1 %v26487_v6  ;;  %17965 = vmatpush3.bf16.msra.mxu1 %v20309_v13  ;;  %v6815_v13 = vld [vmem:[#allocation14 + $0x18] sm:$0xff] }
 0x600   : > { %17966 = vmatprep.subr.bf16.mxu1 %v20310_v42 }
 0x603   : > { %17967 = vmatpush3.bf16.msra.mxu1 %v20310_v42  ;;  %v6814_v42 = vld [vmem:[#allocation14 + $0x10] sm:$0xff] }
 0x604   : > { %18000 = vmatprep.subr.bf16.mxu1 %v20311_v4 }
 0x606   : > { %17937 = vmatmul.mubr.bf16.gmra.mrb[16].mxu1 %v26488_v20 }
 0x607   : > { %17940 = vmatprep.mubr.bf16.mxu1 %v26489_v44  ;;  %v26536_v44 = vld [vmem:[#allocation33_spill] sm:$0xff] }
 0x608   : > { %vm26537_vm0 = vnez %v26536_v44  ;;  %v6817_v44 = vld [vmem:[#allocation14 + $0x28] sm:$0xff] }
 0x60e   : > { %17941 = vmatmul.mubr.bf16.gmra.mrb[20].mxu1 %v26490_v30  ;;  %v6821_v30 = vld [vmem:[#allocation14 + $0x48] sm:$0xff] }
 0x60f   : > { %17944 = vmatprep.mubr.bf16.mxu1 %v26491_v47 }
 0x616   : > { %17945 = vmatmul.mubr.bf16.gmra.mrb[24].mxu1 %v23314_v62 }
 0x617   : > { %17948 = vmatprep.mubr.bf16.mxu1 %v23312_v38  ;;  %v20315_v38 = vld [vmem:[#allocation2 + $0x60] sm:$0xff]  }
 0x61e   : > { %17949 = vmatmul.mubr.bf16.gmra.mrb[28].mxu1 %v26530_v46 }
 0x61f   : > { %17968 = vmatprep.mubr.msk.bf16.mxu1 %vm26531_vm7, %v23136_v60  ;;  %v6816_v60 = vld [vmem:[#allocation14 + $0x20] sm:$0xff] }
 0x626   : > { %17969 = vmatmul.mubr.msk.bf16.vlgmr.msra.gmra.mrb[0].mxu1 %vm26532_vm5, %v26439_v18 }
 0x627   : > { %17972 = vmatprep.mubr.msk.bf16.mxu1 %vm26533_vm3, %v26441_v27  ;;  %18001 = vmatpush3.bf16.msra.mxu1 %v20311_v4  ;;  %v6823_v4 = vld [vmem:[#allocation14 + $0x58] sm:$0xff] }
 0x62e   : > { %17973 = vmatmul.mubr.msk.bf16.gmra.mrb[4].mxu1 %vm26534_vm11, %v26444_v59 }
 0x62f   : > { %17976 = vmatprep.mubr.msk.bf16.mxu1 %vm26535_vm8, %v26447_v63 }
 0x636   : > { %17977 = vmatmul.mubr.msk.bf16.gmra.mrb[8].mxu1 %vm26537_vm0, %v26449_v9 }
 0x637   : > { %17980 = vmatprep.mubr.msk.bf16.mxu1 %vm26538_vm4, %v26451_v15 }
 0x63e   : > { %17981 = vmatmul.mubr.msk.bf16.gmra.mrb[12].mxu1 %vm26497_vm6, %v26453_v31  ;;  %vm26542_vm6 = vnez %v26464_v12 }
 0x63f   : > { %17984 = vmatprep.mubr.msk.bf16.mxu1 %vm26499_vm15, %v26456_v54 }
 0x646   : > { %17985 = vmatmul.mubr.msk.bf16.gmra.mrb[16].mxu1 %vm26501_vm12, %v26459_v48  ;;  %v20313_v48 = vld [vmem:[#allocation2 + $0x50] sm:$0xff]  }
 0x647   : > { %17988 = vmatprep.mubr.msk.bf16.mxu1 %vm26458_vm2, %v23294_v17  ;;  %v20312_v17 = vld [vmem:[#allocation2 + $0x48] sm:$0xff]   ;;  %vm26547_vm2 = vcmask 1040384  }
 0x648   : > { %18002 = vmatprep.subr.bf16.mxu1 %v20312_v17  ;;  %vm26552_vm15 = vmmov %vm26547_vm2 }
 0x649   : > { %18003 = vmatpush3.bf16.msra.mxu1 %v20312_v17  ;;  %v6822_v17 = vld [vmem:[#allocation14 + $0x50] sm:$0xff]  ;;  %vm26554_vm9 = vmmov %vm26547_vm2 }
 0x64a   : > { %18004 = vmatprep.subr.bf16.mxu1 %v20313_v48  ;;  %vm26558_vm5 = vmmov %vm26547_vm2 }
 0x64b   : > { %vm26560_vm0 = vmmov %vm26547_vm2 }
 0x64d   : > { %18005 = vmatpush3.bf16.msra.mxu1 %v20313_v48  ;;  %v6825_v48 = vld [vmem:[#allocation14 + $0x68] sm:$0xff] }
 0x64e   : > { %17989 = vmatmul.mubr.msk.bf16.gmra.mrb[20].mxu1 %vm26461_vm14, %v23307_v35  ;;  %v20314_v35 = vld [vmem:[#allocation2 + $0x58] sm:$0xff]   ;;  %vm26550_vm14 = vmmov %vm26547_vm2 }
 0x64f   : > { %17992 = vmatprep.mubr.msk.bf16.mxu1 %vm26541_vm13, %v23326_v23  ;;  %18006 = vmatprep.subr.bf16.mxu1 %v20314_v35 }
 0x651   : > { %18007 = vmatpush3.bf16.msra.mxu1 %v20314_v35  ;;  %v6824_v35 = vld [vmem:[#allocation14 + $0x60] sm:$0xff] }
 0x652   : > { %18008 = vmatprep.subr.bf16.mxu1 %v20315_v38 }
 0x655   : > { %18009 = vmatpush3.bf16.msra.mxu1 %v20315_v38  ;;  %v6827_v38 = vld [vmem:[#allocation14 + $0x78] sm:$0xff] }
 0x656   : > { %17993 = vmatmul.mubr.msk.bf16.gmra.mrb[24].mxu1 %vm26542_vm6, %v23335_v55  ;;  %vm26564_vm6 = vmmov %vm26560_vm0 }
 0x657   : > { %17996 = vmatprep.mubr.msk.bf16.mxu1 %vm26467_vm1, %v26503_v24  ;;  %vm26549_vm1 = vcmask 1046528  }
 0x658   : > { %vm26553_vm12 = vmmov %vm26549_vm1 }
 0x659   : > { %vm26555_vm7 = vmmov %vm26549_vm1 }
 0x65a   : > { %vm26559_vm3 = vmmov %vm26549_vm1 }
 0x65b   : > { %vm26561_vm4 = vmmov %vm26549_vm1 }
 0x65e   : > { %17997 = vmatmul.mubr.msk.bf16.gmra.mrb[28].mxu1 %vm26469_vm10, %v26543_v1  ;;  %v6818_v1 = vld [vmem:[#allocation14 + $0x30] sm:$0xff]  ;;  %vm26551_vm10 = vmmov %vm26549_vm1 }
 0x6f9   : > { %v17970_v62 = vpop.f32.mrb[0].mxu1 }
 0x6fa   : > { %v6653_v23 = vpop.f32.mrb[1].mxu1 }
 0x6fb   : > { %v17971_v47 = vpop.f32.mrb[2].mxu1 }
 0x6fc   : > { %v19264_v55 = vpack.c.bf16 %v17971_v47, %v17970_v62  ;;  %v6656_v61 = vpop.f32.mrb[3].mxu1  ;;  %v6826_v62 = vld [vmem:[#allocation14 + $0x70] sm:$0xff] }
 0x6fd   : > { %v19260_v7 = vpack.c.bf16 %v6656_v61, %v6653_v23  ;;  %v20316_v23 = vld [vmem:[#allocation2 + $0x68] sm:$0xff]   ;;  %v20317_v47 = vld [vmem:[#allocation2 + $0x70] sm:$0xff]   ;;  %v20319_v61 = vld [vmem:[#allocation2] sm:$0xff]  }
 0x6fe   : > { %18010 = vmatprep.subr.bf16.mxu1 %v20316_v23 }
 0x6ff   : > { %18011 = vmatpush3.bf16.msra.mxu1 %v20316_v23 }
 0x700   : > { %18012 = vmatprep.subr.bf16.mxu1 %v20317_v47 }
 0x701   : > { %v17974_v18 = vpop.f32.mrb[4].mxu1 }
 0x702   : > { %v6669_v22 = vpop.f32.mrb[5].mxu1 }
 0x703   : > { %v17975_v27 = vpop.f32.mrb[6].mxu1  ;;  %18013 = vmatpush3.bf16.msra.mxu1 %v20317_v47 }
 0x704   : > { %v19272_v51 = vpack.c.bf16 %v17975_v27, %v17974_v18  ;;  %v6672_v59 = vpop.f32.mrb[7].mxu1  ;;  %v23836_v18 = vld [vmem:[%s26545_s28] ss:$0 sm:$0xff]  ;;  %s26643_s28 = sld [smem:[#allocation31_spill]] }
 0x705   : > { %v19268_v56 = vpack.c.bf16 %v6672_v59, %v6669_v22 }
 0x709   : > { %v17978_v63 = vpop.f32.mrb[8].mxu1 }
 0x70a   : > { %v6685_v0 = vpop.f32.mrb[9].mxu1  ;;  %p26645_p9 = scmp.ne.s32.totalorder %s26643_s28, 0 }
 0x70b   : > { %v17979_v9 = vpop.f32.mrb[10].mxu1 }
 0x70c   : > { %v19280_v39 = vpack.c.bf16 %v17979_v9, %v17978_v63  ;;  %v6688_v15 = vpop.f32.mrb[11].mxu1 }
 0x70d   : > { %v19276_v12 = vpack.c.bf16 %v6688_v15, %v6685_v0  ;;  %v26546_v15 = vmov 0.0  }
 0x711   : > { %v17982_v31 = vpop.f32.mrb[12].mxu1 }
 0x712   : > { %v6701_v54 = vpop.f32.mrb[13].mxu1 }
 0x713   : > { %v17983_v5 = vpop.f32.mrb[14].mxu1 }
 0x714   : > { %v19288_v6 = vpack.c.bf16 %v17983_v5, %v17982_v31  ;;  %v6704_v20 = vpop.f32.mrb[15].mxu1 }
 0x715   : > { %v19284_v24 = vpack.c.bf16 %v6704_v20, %v6701_v54 }
 0x719   : > { %v17986_v50 = vpop.f32.mrb[16].mxu1 }
 0x71a   : > { %v6717_v32 = vpop.f32.mrb[17].mxu1 }
 0x71b   : > { %v17987_v34 = vpop.f32.mrb[18].mxu1 }
 0x71c   : > { %v19262_v36 = vpack.c.bf16 %v17987_v34, %v17986_v50  ;;  %v6720_v49 = vpop.f32.mrb[19].mxu1 }
 0x71d   : > { %v19258_v58 = vpack.c.bf16 %v6720_v49, %v6717_v32 }
 0x71f   : > { %19259 = vmatprep.subr.bf16.mxu0 %v19258_v58 }
 0x720   : > { %19261 = vmatpush3.bf16.msra.mxu0 %v19260_v7 }
 0x721   : > { %v17990_v45 = vpop.f32.mrb[20].mxu1  ;;  %19263 = vmatprep.subr.bf16.mxu0 %v19262_v36 }
 0x722   : > { %v6733_v21 = vpop.f32.mrb[21].mxu1 }
 0x723   : > { %v17991_v25 = vpop.f32.mrb[22].mxu1 }
 0x724   : > { %v19270_v41 = vpack.c.bf16 %v17991_v25, %v17990_v45  ;;  %v6736_v57 = vpop.f32.mrb[23].mxu1  ;;  %19265 = vmatpush3.bf16.msra.mxu0 %v19264_v55  ;;  %v20318_v55 = vld [vmem:[#allocation2 + $0x78] sm:$0xff]  }
 0x725   : > { %v19266_v52 = vpack.c.bf16 %v6736_v57, %v6733_v21  ;;  %18014 = vmatprep.subr.bf16.mxu1 %v20318_v55  ;;  %v26548_v45 = vld [vmem:[#allocation74_spill] sm:$0xff] }
 0x726   : > { %18015 = vmatpush3.bf16.msra.mxu1 %v20318_v55 }
 0x727   : > { %19267 = vmatprep.subr.bf16.mxu0 %v19266_v52  ;;  %18024 = vmatprep.subr.bf16.mxu1 %v20319_v61 }
 0x728   : > { %19269 = vmatpush3.bf16.msra.mxu0 %v19268_v56 }
 0x729   : > { %v17994_v29 = vpop.f32.mrb[24].mxu1  ;;  %19271 = vmatprep.subr.bf16.mxu0 %v19270_v41 }
 0x72a   : > { %v6749_v40 = vpop.f32.mrb[25].mxu1 }
 0x72b   : > { %v17995_v33 = vpop.f32.mrb[26].mxu1 }
 0x72c   : > { %v19278_v14 = vpack.c.bf16 %v17995_v33, %v17994_v29  ;;  %v6752_v2 = vpop.f32.mrb[27].mxu1  ;;  %19273 = vmatpush3.bf16.msra.mxu0 %v19272_v51 }
 0x72d   : > { %v19274_v19 = vpack.c.bf16 %v6752_v2, %v6749_v40 }
 0x72f   : > { %19275 = vmatprep.subr.bf16.mxu0 %v19274_v19  ;;  %v20320_v19 = vld [vmem:[#allocation2 + $0x8] sm:$0xff]  }
 0x730   : > { %19277 = vmatpush3.bf16.msra.mxu0 %v19276_v12 }
 0x731   : > { %v17998_v37 = vpop.f32.mrb[28].mxu1  ;;  %19279 = vmatprep.subr.bf16.mxu0 %v19278_v14 }
 0x732   : > { %v6765_v28 = vpop.f32.mrb[29].mxu1 }
 0x733   : > { %v17999_v16 = vpop.f32.mrb[30].mxu1 }
 0x734   : > { %v19286_v26 = vpack.c.bf16 %v17999_v16, %v17998_v37  ;;  %v6768_v8 = vpop.f32.mrb[31].mxu1  ;;  %19281 = vmatpush3.bf16.msra.mxu0 %v19280_v39 }
 0x735   : > { %v19282_v11 = vpack.c.bf16 %v6768_v8, %v6765_v28 }
 0x737   : > { %19283 = vmatprep.subr.bf16.mxu0 %v19282_v11 }
 0x738   : > { %19285 = vmatpush3.bf16.msra.mxu0 %v19284_v24 }
 0x739   : > { %19287 = vmatprep.subr.bf16.mxu0 %v19286_v26 }
 0x73c   : > { %19289 = vmatpush3.bf16.msra.mxu0 %v19288_v6 }
 0x73f   : > { %6899 = vmatmul.mubr.f32.vlgmr.msra.gmra.mrb[32].mxu0 %v6812_v53 }
 0x740   : > { %6903 = vmatprep.mubr.f32.mxu0 %v6815_v13 }
 0x743   : > { %6904 = vmatmul.mubr.f32.gmra.mrb[34].mxu0 %v6814_v42  ;;  %v26572_v42 = vld [vmem:[#allocation68_spill] sm:$0xff] }
 0x744   : > { %6908 = vmatprep.mubr.f32.mxu0 %v6817_v44 }
 0x747   : > { %6909 = vmatmul.mubr.f32.gmra.mrb[36].mxu0 %v6816_v60  ;;  %v20321_v60 = vld [vmem:[#allocation2 + $0x10] sm:$0xff]  }
 0x748   : > { %6913 = vmatprep.mubr.f32.mxu0 %v6819_v43 }
 0x74b   : > { %6914 = vmatmul.mubr.f32.gmra.mrb[38].mxu0 %v6818_v1 }
 0x74c   : > { %6918 = vmatprep.mubr.f32.mxu0 %v6821_v30 }
 0x74f   : > { %6919 = vmatmul.mubr.f32.gmra.mrb[40].mxu0 %v6820_v3  ;;  %v20334_v3 = vld [vmem:[#allocation2 + $0xb8] sm:$0xff]  }
 0x750   : > { %6923 = vmatprep.mubr.f32.mxu0 %v6823_v4 }
 0x753   : > { %6924 = vmatmul.mubr.f32.gmra.mrb[42].mxu0 %v6822_v17 }
 0x754   : > { %6928 = vmatprep.mubr.f32.mxu0 %v6825_v48 }
 0x757   : > { %6929 = vmatmul.mubr.f32.gmra.mrb[44].mxu0 %v6824_v35 }
 0x758   : > { %6933 = vmatprep.mubr.f32.mxu0 %v6827_v38 }
 0x75b   : > { %6934 = vmatmul.mubr.f32.gmra.mrb[46].mxu0 %v6826_v62 }
 0x812   : > { %v16523_v7 = vpop.f32.mrb[32].mxu0 }
 0x813   : > { %v16524_v22 = vpop.f32.mrb[33].mxu0 }
 0x814   : > { %v16525_v27 = vadd.f32 %v16524_v22, %v16523_v7 }
 0x816   : > { %v6901_v51 = vadd.f32 %v16525_v27, %v23836_v18  ;;  %v16526_v59 = vpop.f32.mrb[34].mxu0 }
 0x817   : > { %v16527_v56 = vpop.f32.mrb[35].mxu0 }
 0x818   : > { %v23845_v63 = vmax.f32 %v6901_v51, 0.0  ;;  %v16528_v0 = vadd.f32 %v16527_v56, %v16526_v59  ;;  %v26556_v59 = vld [vmem:[#allocation34_spill] sm:$0xff] }
 0x819   : > { %v6956_v56 = vand.u32 7, %v26556_v59 }
 0x81a   : > { %6947 = vst [vmem:[%s23843_s11] sm:$0xff] %v23845_v63  ;;  %v6906_v9 = vadd.f32 %v16528_v0, %v23836_v18  ;;  %v16529_v39 = vpop.f32.mrb[36].mxu0  ;;  %v7028_v12 = vpack.c.bf16 %v23845_v63, %v26546_v15  ;;  %v6979_v54 = vrot.slane %v23845_v63, 7  ;;  %v7284_v5 = vrot.slane %v23845_v63, 1  ;;  %v26557_v0 = vld [vmem:[#allocation66_spill] sm:$0xff] }
 0x81b   : > { %v16530_v31 = vpop.f32.mrb[37].mxu0  ;;  %vm6964_vm11 = vcmp.ge.s32.totalorder %v6956_v56, 1 }
 0x81c   : > { %v23854_v6 = vmax.f32 %v6906_v9, 0.0  ;;  %v16531_v20 = vadd.f32 %v16530_v31, %v16529_v39  ;;  %18016 = vmatprep.mubr.bf16.mxu1 %v7028_v12  ;;  %v23865_v58 = vsel %vm26547_vm2, %v26518_v10, %v6979_v54  ;;  %v23869_v21 = vsel %vm26549_vm1, %v26548_v45, %v7284_v5  ;;  %vm26565_vm2 = vmmov %vm26549_vm1 }
 0x81d   : > { %v6957_v9 = vand.u32 7, %v26557_v0 }
 0x81e   : > { %6948 = vst [vmem:[%s23843_s11 + $0x8] sm:$0xff] %v23854_v6  ;;  %v6981_v24 = vrot.slane %v23854_v6, 7  ;;  %v6911_v50 = vadd.f32 %v16531_v20, %v23836_v18  ;;  %v16532_v32 = vpop.f32.mrb[38].mxu0  ;;  %v7286_v34 = vrot.slane %v23854_v6, 1  ;;  %v7611_v36 = vpack.c.bf16 %v23854_v6, %v23845_v63 }
 0x81f   : > { %v16533_v49 = vpop.f32.mrb[39].mxu0  ;;  %vm6965_vm8 = vcmp.ge.s32.totalorder %v6957_v9, 1 }
 0x820   : > { %v23871_v25 = vmax.f32 %v6911_v50, 0.0  ;;  %v16534_v41 = vadd.f32 %v16533_v49, %v16532_v32  ;;  %v23874_v57 = vsel %vm26550_vm14, %v6979_v54, %v6981_v24  ;;  %v23877_v52 = vsel %vm26551_vm10, %v7284_v5, %v7286_v34  ;;  %v20323_v50 = vld [vmem:[#allocation2 + $0x20] sm:$0xff]   ;;  %vm23985_vm13 = vmpackc.low %vm6965_vm8, %vm6964_vm11 }
 0x821   : > { %v15426_v29 = vpack.c.bf16 %v23877_v52, %v23869_v21  ;;  %v15446_v40 = vpack.c.bf16 %v23874_v57, %v23865_v58  ;;  %vm26566_vm14 = vmmov %vm26560_vm0  ;;  %v20457_v21 = vld [vmem:[#allocation7 + $0x48] sm:$0xff]  }
 0x822   : > { %6949 = vst [vmem:[%s23843_s11 + $0x10] sm:$0xff] %v23871_v25  ;;  %v6983_v33 = vrot.slane %v23871_v25, 7  ;;  %v7288_v14 = vrot.slane %v23871_v25, 1  ;;  %v23889_v2 = vpack.c.bf16 %v23871_v25, %v23854_v6  ;;  %v6916_v37 = vadd.f32 %v16534_v41, %v23836_v18  ;;  %v16535_v28 = vpop.f32.mrb[40].mxu0  ;;  %vm26567_vm10 = vmmov %vm26549_vm1  ;;  %v20327_v41 = vld [vmem:[#allocation2 + $0x80] sm:$0xff]  }
 0x823   : > { %v16536_v16 = vpop.f32.mrb[41].mxu0 }
 0x824   : > { %18017 = vmatmul.mubr.bf16.vlgmr.msra.gmra.mrb[32].mxu1 %v23889_v2  ;;  %v23893_v26 = vmax.f32 %v6916_v37, 0.0  ;;  %v16537_v8 = vadd.f32 %v16536_v16, %v16535_v28  ;;  %v23896_v11 = vsel %vm26552_vm15, %v6981_v24, %v6983_v33  ;;  %v23899_v53 = vsel %vm26553_vm12, %v7286_v34, %v7288_v14  ;;  %vm26568_vm15 = vmmov %vm26560_vm0 }
 0x825   : > { %18025 = vmatpush3.bf16.msra.mxu1 %v20319_v61  ;;  %v23903_v13 = vpack.c.bf16 %v23896_v11, %v23874_v57  ;;  %v20322_v61 = vld [vmem:[#allocation2 + $0x18] sm:$0xff]   ;;  %v20345_v57 = vld [vmem:[#allocation2 + $0x110] sm:$0xff]  }
 0x826   : > { %18026 = vmatprep.subr.bf16.mxu1 %v20320_v19  ;;  %6950 = vst [vmem:[%s23843_s11 + $0x18] sm:$0xff] %v23893_v26  ;;  %v7290_v44 = vrot.slane %v23893_v26, 1  ;;  %v6921_v43 = vadd.f32 %v16537_v8, %v23836_v18  ;;  %v16538_v1 = vpop.f32.mrb[42].mxu0  ;;  %v6985_v30 = vrot.slane %v23893_v26, 7  ;;  %v26589_v63 = vpack.c.bf16 %v23893_v26, %v23871_v25 }
 0x827   : > { %v16539_v4 = vpop.f32.mrb[43].mxu0  ;;  %v26592_v25 = vpack.c.bf16 %v23899_v53, %v23877_v52  ;;  %v20387_v52 = vld [vmem:[#allocation5 + $0x60] sm:$0xff]  }
 0x828   : > { %v23914_v17 = vmax.f32 %v6921_v43, 0.0  ;;  %v16540_v48 = vadd.f32 %v16539_v4, %v16538_v1  ;;  %v23917_v35 = vsel %vm26554_vm9, %v6983_v33, %v6985_v30  ;;  %v23920_v38 = vsel %vm26555_vm7, %v7288_v14, %v7290_v44  ;;  %v20441_v43 = vld [vmem:[#allocation5 + $0x1d0] sm:$0xff]  }
 0x829   : > { %18027 = vmatpush3.bf16.msra.mxu1 %v20320_v19  ;;  %v15449_v62 = vpack.c.bf16 %v23917_v35, %v23896_v11  ;;  %v23926_v23 = vpack.c.bf16 %v23920_v38, %v23899_v53  ;;  %v20347_v11 = vld [vmem:[#allocation2 + $0x120] sm:$0xff]   ;;  %v20358_v53 = vld [vmem:[#allocation2 + $0x178] sm:$0xff]  }
 0x82a   : > { %18028 = vmatprep.subr.bf16.mxu1 %v20321_v60  ;;  %6951 = vst [vmem:[%s23843_s11 + $0x20] sm:$0xff] %v23914_v17  ;;  %v6926_v47 = vadd.f32 %v16540_v48, %v23836_v18  ;;  %v16541_v55 = vpop.f32.mrb[44].mxu0  ;;  %v23933_v7 = vpack.c.bf16 %v23914_v17, %v23893_v26  ;;  %v6987_v22 = vrot.slane %v23914_v17, 7  ;;  %v7292_v27 = vrot.slane %v23914_v17, 1  ;;  %v20355_v26 = vld [vmem:[#allocation2 + $0x160] sm:$0xff]  }
 0x82b   : > { %v16542_v51 = vpop.f32.mrb[45].mxu0  ;;  %v15406_v48 = vpack.c.bf16 %v23865_v58, %v26518_v10  ;;  %v20344_v58 = vld [vmem:[#allocation2 + $0x108] sm:$0xff]  }
 0x82c   : > { %v23939_v39 = vmax.f32 %v6926_v47, 0.0  ;;  %v16543_v12 = vadd.f32 %v16542_v51, %v16541_v55  ;;  %18020 = vmatprep.mubr.bf16.mxu1 %v23933_v7  ;;  %v23943_v31 = vsel %vm26558_vm5, %v6985_v30, %v6987_v22  ;;  %v23946_v54 = vsel %vm26559_vm3, %v7290_v44, %v7292_v27  ;;  %v20324_v44 = vld [vmem:[#allocation2 + $0x28] sm:$0xff]  }
 0x82d   : > { %18029 = vmatpush3.bf16.msra.mxu1 %v20321_v60  ;;  %v23950_v5 = vpack.c.bf16 %v23943_v31, %v23917_v35  ;;  %v20348_v35 = vld [vmem:[#allocation2 + $0x128] sm:$0xff]  }
 0x82e   : > { %6952 = vst [vmem:[%s23843_s11 + $0x28] sm:$0xff] %v23939_v39  ;;  %18030 = vmatprep.subr.bf16.mxu1 %v20322_v61  ;;  %v6931_v24 = vadd.f32 %v16543_v12, %v23836_v18  ;;  %v16544_v32 = vpop.f32.mrb[46].mxu0  ;;  %v6989_v34 = vrot.slane %v23939_v39, 7  ;;  %v7294_v49 = vrot.slane %v23939_v39, 1  ;;  %v26590_v6 = vpack.c.bf16 %v23939_v39, %v23914_v17  ;;  %v20385_v17 = vld [vmem:[#allocation5 + $0x50] sm:$0xff]  }
 0x82f   : > { %v16545_v33 = vpop.f32.mrb[47].mxu0 }
 0x830   : > { %v23965_v14 = vmax.f32 %v6931_v24, 0.0  ;;  %v16546_v19 = vadd.f32 %v16545_v33, %v16544_v32  ;;  %v23968_v37 = vsel %vm26560_vm0, %v6987_v22, %v6989_v34  ;;  %v23971_v28 = vsel %vm26561_vm4, %v7292_v27, %v7294_v49  ;;  %v20325_v27 = vld [vmem:[#allocation2 + $0x30] sm:$0xff]  }
 0x831   : > { %18031 = vmatpush3.bf16.msra.mxu1 %v20322_v61  ;;  %v23975_v16 = vpack.c.bf16 %v23971_v28, %v23946_v54  ;;  %v15452_v8 = vpack.c.bf16 %v23968_v37, %v23943_v31  ;;  %v6961_v24 = vand.u32 7, %v26572_v42  ;;  %vm7275_vm4 = vcmp.le.s32.totalorder %v6956_v56, 6  ;;  %v20331_v56 = vld [vmem:[#allocation2 + $0xa0] sm:$0xff]   ;;  %v20350_v31 = vld [vmem:[#allocation2 + $0x138] sm:$0xff]  }
 0x832   : > { %6953 = vst [vmem:[%s23843_s11 + $0x30] sm:$0xff] %v23965_v14  ;;  %18032 = vmatprep.subr.bf16.mxu1 %v20323_v50  ;;  %v23983_v60 = vpack.c.bf16 %v23965_v14, %v23939_v39  ;;  %v6936_v1 = vadd.f32 %v16546_v19, %v23836_v18  ;;  %v6991_v30 = vrot.slane %v23965_v14, 7  ;;  %v7296_v4 = vrot.slane %v23965_v14, 1  ;;  %v20356_v39 = vld [vmem:[#allocation2 + $0x168] sm:$0xff]  }
 0x833   : > { %vm6969_vm5 = vcmp.ge.s32.totalorder %v6961_v24, 1 }
 0x834   : > { %18021 = vmatmul.mubr.bf16.gmra.mrb[36].mxu1 %v23983_v60  ;;  %v23995_v47 = vmax.f32 %v6936_v1, 0.0  ;;  %v23998_v55 = vsel %vm26564_vm6, %v6989_v34, %v6991_v30  ;;  %v24001_v61 = vsel %vm26565_vm2, %v7294_v49, %v7296_v4  ;;  %vm7276_vm6 = vcmp.le.s32.totalorder %v6957_v9, 6  ;;  %v20332_v9 = vld [vmem:[#allocation2 + $0xa8] sm:$0xff]  }
 0x835   : > { %18033 = vmatpush3.bf16.msra.mxu1 %v20323_v50  ;;  %18040 = vmatprep.mubr.msk.bf16.mxu1 %vm23985_vm13, %v15406_v48  ;;  %v24007_v18 = vpack.c.bf16 %v23998_v55, %v23968_v37  ;;  %v26569_v48 = vld [vmem:[#allocation38_spill] sm:$0xff]  ;;  %v20351_v37 = vld [vmem:[#allocation2 + $0x140] sm:$0xff]  }
 0x836   : > { %18034 = vmatprep.subr.bf16.mxu1 %v20324_v44  ;;  %6954 = vst [vmem:[%s23843_s11 + $0x38] sm:$0xff] %v23995_v47  ;;  %v7298_v51 = vrot.slane %v23995_v47, 1  ;;  %v7458_v12 = vrot.slane %v23995_v47, 7 }
 0x838   : > { %v24018_v50 = vsel %vm26549_vm1, %v7296_v4, %v7298_v51  ;;  %v24021_v32 = vsel %vm26566_vm14, %v6991_v30, %v7458_v12  ;;  %v24025_v34 = vsel %vm26567_vm10, %v7298_v51, %v26548_v45  ;;  %v24029_v49 = vsel %vm26568_vm15, %v7458_v12, %v26518_v10  ;;  %v20326_v4 = vld [vmem:[#allocation2 + $0x38] sm:$0xff]   ;;  %vm24069_vm1 = vmpackc.low %vm7276_vm6, %vm7275_vm4  ;;  %v20443_v30 = vld [vmem:[#allocation5 + $0x1e0] sm:$0xff]  }
 0x839   : > { %18035 = vmatpush3.bf16.msra.mxu1 %v20324_v44  ;;  %v24033_v33 = vpack.c.bf16 %v24018_v50, %v24001_v61  ;;  %v15455_v19 = vpack.c.bf16 %v24021_v32, %v23998_v55  ;;  %v6958_v51 = vand.u32 7, %v26569_v48  ;;  %v26570_v12 = vld [vmem:[#allocation67_spill] sm:$0xff]  ;;  %vm26598_vm4 = vcmask 1040384   ;;  %v20444_v48 = vld [vmem:[#allocation5 + $0x1e8] sm:$0xff]  }
 0x83a   : > { %18036 = vmatprep.subr.bf16.mxu1 %v20325_v27  ;;  %v6959_v22 = vand.u32 7, %v26570_v12  ;;  %v26571_v44 = vld [vmem:[#allocation39_spill] sm:$0xff]  ;;  %v20328_v12 = vld [vmem:[#allocation2 + $0x88] sm:$0xff]   ;;  %vm26599_vm6 = vcmask 1046528  }
 0x83b   : > { %v6960_v20 = vand.u32 7, %v26571_v44  ;;  %vm6966_vm12 = vcmp.ge.s32.totalorder %v6958_v51, 1  ;;  %v26577_v44 = vld [vmem:[#allocation40_spill] sm:$0xff]  ;;  %vm7277_vm14 = vcmp.le.s32.totalorder %v6958_v51, 6  ;;  %v20341_v51 = vld [vmem:[#allocation2 + $0xf0] sm:$0xff]   ;;  %v20354_v55 = vld [vmem:[#allocation2 + $0x158] sm:$0xff]  }
 0x83c   : > { %vm6967_vm9 = vcmp.ge.s32.totalorder %v6959_v22, 1  ;;  %v6962_v42 = vand.u32 7, %v26577_v44  ;;  %vm7278_vm10 = vcmp.le.s32.totalorder %v6959_v22, 6  ;;  %v20338_v22 = vld [vmem:[#allocation2 + $0xd8] sm:$0xff]   ;;  %v20448_v44 = vld [vmem:[#allocation5 + $0x208] sm:$0xff]  }
 0x83d   : > { %18037 = vmatpush3.bf16.msra.mxu1 %v20325_v27  ;;  %vm6968_vm7 = vcmp.ge.s32.totalorder %v6960_v20, 1  ;;  %vm24045_vm3 = vmpackc.low %vm6967_vm9, %vm6966_vm12  ;;  %v26578_v27 = vld [vmem:[#allocation71_spill] sm:$0xff]  ;;  %vm7279_vm15 = vcmp.le.s32.totalorder %v6960_v20, 6  ;;  %vm7280_vm12 = vcmp.le.s32.totalorder %v6961_v24, 6 }
 0x83e   : > { %18038 = vmatprep.subr.bf16.mxu1 %v20326_v4  ;;  %vm24049_vm11 = vmpackc.low %vm6969_vm5, %vm6968_vm7  ;;  %v6963_v1 = vand.u32 7, %v26578_v27  ;;  %vm6970_vm8 = vcmp.ge.s32.totalorder %v6962_v42, 1  ;;  %vm7281_vm5 = vcmp.le.s32.totalorder %v6962_v42, 6  ;;  %v20339_v24 = vld [vmem:[#allocation2 + $0xe0] sm:$0xff]   ;;  %v20342_v42 = vld [vmem:[#allocation2 + $0xf8] sm:$0xff]  }
 0x83f   : > { %vm24081_vm9 = vmpackc.low %vm7278_vm10, %vm7277_vm14  ;;  %v20463_v20 = vld [vmem:[#allocation7 + $0x60] sm:$0xff]  }
 0x840   : > { %vm6971_vm0 = vcmp.ge.s32.totalorder %v6963_v1, 1  ;;  %vm24085_vm7 = vmpackc.low %vm7280_vm12, %vm7279_vm15 }
 0x841   : > { %18039 = vmatpush3.bf16.msra.mxu1 %v20326_v4  ;;  %v20329_v4 = vld [vmem:[#allocation2 + $0x90] sm:$0xff]   ;;  %vm24065_vm2 = vmpackc.low %vm6971_vm0, %vm6970_vm8  ;;  %vm7282_vm8 = vcmp.le.s32.totalorder %v6963_v1, 6  ;;  %v20340_v1 = vld [vmem:[#allocation2 + $0xe8] sm:$0xff]  }
 0x842   : > { %18048 = vmatprep.subr.bf16.mxu1 %v20327_v41  ;;  %vm24095_vm0 = vmpackc.low %vm7282_vm8, %vm7281_vm5 }
 0x843   : > { %vm26600_vm14 = vmmov %vm26598_vm4 }
 0x844   : > { %18041 = vmatmul.mubr.msk.bf16.vlgmr.msra.gmra.mrb[32].mxu1 %vm24045_vm3, %v23903_v13  ;;  %vm26601_vm10 = vmmov %vm26598_vm4 }
 0x845   : > { %18044 = vmatprep.mubr.msk.bf16.mxu1 %vm24049_vm11, %v23950_v5  ;;  %18049 = vmatpush3.bf16.msra.mxu1 %v20327_v41  ;;  %v20330_v41 = vld [vmem:[#allocation2 + $0x98] sm:$0xff]   ;;  %vm26602_vm15 = vmmov %vm26598_vm4 }
 0x846   : > { %18050 = vmatprep.subr.bf16.mxu1 %v20328_v12  ;;  %vm26603_vm12 = vmmov %vm26599_vm6 }
 0x847   : > { %vm26604_vm5 = vmmov %vm26599_vm6 }
 0x848   : > { %vm26605_vm8 = vmmov %vm26604_vm5 }
 0x849   : > { %18051 = vmatpush3.bf16.msra.mxu1 %v20328_v12  ;;  %v20333_v12 = vld [vmem:[#allocation2 + $0xb0] sm:$0xff]  }
 0x84a   : > { %18052 = vmatprep.subr.bf16.mxu1 %v20329_v4 }
 0x84c   : > { %18045 = vmatmul.mubr.msk.bf16.gmra.mrb[36].mxu1 %vm24065_vm2, %v24007_v18 }
 0x84d   : > { %18053 = vmatpush3.bf16.msra.mxu1 %v20329_v4  ;;  %18064 = vmatprep.mubr.msk.bf16.mxu1 %vm24069_vm1, %v15426_v29  ;;  %v20335_v4 = vld [vmem:[#allocation2 + $0xc0] sm:$0xff]   ;;  %v20459_v29 = vld [vmem:[#allocation7 + $0x50] sm:$0xff]  }
 0x84e   : > { %18054 = vmatprep.subr.bf16.mxu1 %v20330_v41 }
 0x851   : > { %18055 = vmatpush3.bf16.msra.mxu1 %v20330_v41  ;;  %v20336_v41 = vld [vmem:[#allocation2 + $0xc8] sm:$0xff]  }
 0x852   : > { %18056 = vmatprep.subr.bf16.mxu1 %v20331_v56 }
 0x855   : > { %18057 = vmatpush3.bf16.msra.mxu1 %v20331_v56  ;;  %v20343_v56 = vld [vmem:[#allocation2 + $0x100] sm:$0xff]  }
 0x856   : > { %18058 = vmatprep.subr.bf16.mxu1 %v20332_v9 }
 0x859   : > { %18059 = vmatpush3.bf16.msra.mxu1 %v20332_v9  ;;  %v20383_v9 = vld [vmem:[#allocation5 + $0x40] sm:$0xff]  }
 0x85a   : > { %18060 = vmatprep.subr.bf16.mxu1 %v20333_v12  ;;  %18216 = vmatprep.subr.bf16.mxu0 %v20383_v9 }
 0x85b   : > { %18217 = vmatpush3.bf16.msra.mxu0 %v20383_v9 }
 0x85d   : > { %18061 = vmatpush3.bf16.msra.mxu1 %v20333_v12  ;;  %v20384_v12 = vld [vmem:[#allocation5 + $0x48] sm:$0xff]  }
 0x85e   : > { %18062 = vmatprep.subr.bf16.mxu1 %v20334_v3  ;;  %18218 = vmatprep.subr.bf16.mxu0 %v20384_v12 }
 0x85f   : > { %18219 = vmatpush3.bf16.msra.mxu0 %v20384_v12 }
 0x860   : > { %18220 = vmatprep.subr.bf16.mxu0 %v20385_v17 }
 0x861   : > { %18063 = vmatpush3.bf16.msra.mxu1 %v20334_v3  ;;  %v20337_v3 = vld [vmem:[#allocation2 + $0xd0] sm:$0xff]  }
 0x862   : > { %18072 = vmatprep.subr.bf16.mxu1 %v20335_v4 }
 0x863   : > { %18221 = vmatpush3.bf16.msra.mxu0 %v20385_v17 }
 0x864   : > { %18065 = vmatmul.mubr.msk.bf16.vlgmr.msra.gmra.mrb[32].mxu1 %vm24081_vm9, %v23926_v23 }
 0x865   : > { %18068 = vmatprep.mubr.msk.bf16.mxu1 %vm24085_vm7, %v23975_v16  ;;  %18073 = vmatpush3.bf16.msra.mxu1 %v20335_v4  ;;  %v20357_v4 = vld [vmem:[#allocation2 + $0x170] sm:$0xff]  }
 0x866   : > { %18074 = vmatprep.subr.bf16.mxu1 %v20336_v41 }
 0x869   : > { %18075 = vmatpush3.bf16.msra.mxu1 %v20336_v41  ;;  %v20388_v41 = vld [vmem:[#allocation5 + $0x68] sm:$0xff]  }
 0x86a   : > { %18076 = vmatprep.subr.bf16.mxu1 %v20337_v3 }
 0x86c   : > { %18069 = vmatmul.mubr.msk.bf16.gmra.mrb[36].mxu1 %vm24095_vm0, %v24033_v33 }
 0x86d   : > { %18077 = vmatpush3.bf16.msra.mxu1 %v20337_v3  ;;  %18088 = vmatprep.mubr.msk.bf16.mxu1 %vm23985_vm13, %v15446_v40  ;;  %v20346_v40 = vld [vmem:[#allocation2 + $0x118] sm:$0xff]   ;;  %v20359_v3 = vld [vmem:[#allocation2 + $0x180] sm:$0xff]  }
 0x86e   : > { %18078 = vmatprep.subr.bf16.mxu1 %v20338_v22 }
 0x871   : > { %18079 = vmatpush3.bf16.msra.mxu1 %v20338_v22  ;;  %v20360_v22 = vld [vmem:[#allocation2 + $0x188] sm:$0xff]  }
 0x872   : > { %18080 = vmatprep.subr.bf16.mxu1 %v20339_v24 }
 0x875   : > { %18081 = vmatpush3.bf16.msra.mxu1 %v20339_v24  ;;  %v26593_v24 = vpack.c.bf16 %v23946_v54, %v23920_v38  ;;  %v20363_v38 = vld [vmem:[#allocation2 + $0x1a0] sm:$0xff]   ;;  %v20364_v54 = vld [vmem:[#allocation2 + $0x1a8] sm:$0xff]  }
 0x876   : > { %18082 = vmatprep.subr.bf16.mxu1 %v20340_v1 }
 0x879   : > { %18083 = vmatpush3.bf16.msra.mxu1 %v20340_v1  ;;  %v26594_v1 = vpack.c.bf16 %v24001_v61, %v23971_v28  ;;  %v20365_v28 = vld [vmem:[#allocation2 + $0x1b0] sm:$0xff]   ;;  %v20366_v61 = vld [vmem:[#allocation2 + $0x1b8] sm:$0xff]  }
 0x87a   : > { %18084 = vmatprep.subr.bf16.mxu1 %v20341_v51 }
 0x87d   : > { %18085 = vmatpush3.bf16.msra.mxu1 %v20341_v51  ;;  %v20361_v51 = vld [vmem:[#allocation2 + $0x190] sm:$0xff]  }
 0x87e   : > { %18086 = vmatprep.subr.bf16.mxu1 %v20342_v42 }
 0x881   : > { %18087 = vmatpush3.bf16.msra.mxu1 %v20342_v42  ;;  %v20362_v42 = vld [vmem:[#allocation2 + $0x198] sm:$0xff]  }
 0x882   : > { %18096 = vmatprep.subr.bf16.mxu1 %v20343_v56 }
 0x884   : > { %18089 = vmatmul.mubr.msk.bf16.vlgmr.msra.gmra.mrb[32].mxu1 %vm24045_vm3, %v15449_v62  ;;  %v20349_v62 = vld [vmem:[#allocation2 + $0x130] sm:$0xff]  }
 0x885   : > { %18092 = vmatprep.mubr.msk.bf16.mxu1 %vm24049_vm11, %v15452_v8  ;;  %18097 = vmatpush3.bf16.msra.mxu1 %v20343_v56  ;;  %v20352_v8 = vld [vmem:[#allocation2 + $0x148] sm:$0xff]   ;;  %v26595_v56 = vpack.c.bf16 %v24025_v34, %v24018_v50  ;;  %v20367_v50 = vld [vmem:[#allocation2 + $0x1c0] sm:$0xff]  }
 0x886   : > { %18098 = vmatprep.subr.bf16.mxu1 %v20344_v58 }
 0x889   : > { %18099 = vmatpush3.bf16.msra.mxu1 %v20344_v58  ;;  %v20368_v58 = vld [vmem:[#allocation2 + $0x1c8] sm:$0xff]  }
 0x88a   : > { %18100 = vmatprep.subr.bf16.mxu1 %v20345_v57 }
 0x88c   : > { %18093 = vmatmul.mubr.msk.bf16.gmra.mrb[36].mxu1 %vm24065_vm2, %v15455_v19  ;;  %v26591_v19 = vpack.c.bf16 %v23995_v47, %v23965_v14  ;;  %v20386_v14 = vld [vmem:[#allocation5 + $0x58] sm:$0xff]  }
 0x88d   : > { %18101 = vmatpush3.bf16.msra.mxu1 %v20345_v57  ;;  %18112 = vmatprep.mubr.bf16.mxu1 %v7611_v36  ;;  %v20353_v36 = vld [vmem:[#allocation2 + $0x150] sm:$0xff]   ;;  %v20370_v57 = vld [vmem:[#allocation2 + $0x1d8] sm:$0xff]  }
 0x88e   : > { %18102 = vmatprep.subr.bf16.mxu1 %v20346_v40  ;;  %18222 = vmatprep.subr.bf16.mxu0 %v20386_v14 }
 0x88f   : > { %18223 = vmatpush3.bf16.msra.mxu0 %v20386_v14 }
 0x890   : > { %18224 = vmatprep.subr.bf16.mxu0 %v20387_v52 }
 0x891   : > { %18103 = vmatpush3.bf16.msra.mxu1 %v20346_v40  ;;  %v26596_v40 = vpack.c.bf16 %v24029_v49, %v24021_v32  ;;  %v20375_v32 = vld [vmem:[#allocation2 + $0x200] sm:$0xff]   ;;  %v20376_v49 = vld [vmem:[#allocation2 + $0x208] sm:$0xff]  }
 0x892   : > { %18104 = vmatprep.subr.bf16.mxu1 %v20347_v11 }
 0x893   : > { %18225 = vmatpush3.bf16.msra.mxu0 %v20387_v52 }
 0x894   : > { %18226 = vmatprep.subr.bf16.mxu0 %v20388_v41 }
 0x895   : > { %18105 = vmatpush3.bf16.msra.mxu1 %v20347_v11  ;;  %v20373_v11 = vld [vmem:[#allocation2 + $0x1f0] sm:$0xff]  }
 0x896   : > { %18106 = vmatprep.subr.bf16.mxu1 %v20348_v35 }
 0x897   : > { %18227 = vmatpush3.bf16.msra.mxu0 %v20388_v41 }
 0x899   : > { %18107 = vmatpush3.bf16.msra.mxu1 %v20348_v35  ;;  %v20374_v35 = vld [vmem:[#allocation2 + $0x1f8] sm:$0xff]  }
 0x89a   : > { %18108 = vmatprep.subr.bf16.mxu1 %v20349_v62 }
 0x89d   : > { %18109 = vmatpush3.bf16.msra.mxu1 %v20349_v62  ;;  %v8057_v62 = vpack.c.bf16 %v26546_v15, %v23995_v47  ;;  %v20389_v47 = vld [vmem:[#allocation5 + $0x70] sm:$0xff]  }
 0x89e   : > { %18110 = vmatprep.subr.bf16.mxu1 %v20350_v31  ;;  %18228 = vmatprep.subr.bf16.mxu0 %v20389_v47 }
 0x89f   : > { %18229 = vmatpush3.bf16.msra.mxu0 %v20389_v47 }
 0x8a1   : > { %18111 = vmatpush3.bf16.msra.mxu1 %v20350_v31  ;;  %v20378_v31 = vld [vmem:[#allocation2 + $0x218] sm:$0xff]  }
 0x8a2   : > { %18120 = vmatprep.subr.bf16.mxu1 %v20351_v37 }
 0x8a4   : > { %18113 = vmatmul.mubr.bf16.vlgmr.msra.gmra.mrb[32].mxu1 %v26589_v63  ;;  %v20390_v63 = vld [vmem:[#allocation5 + $0x78] sm:$0xff]  }
 0x8a5   : > { %18116 = vmatprep.mubr.bf16.mxu1 %v26590_v6  ;;  %18121 = vmatpush3.bf16.msra.mxu1 %v20351_v37  ;;  %v20379_v37 = vld [vmem:[#allocation2 + $0x220] sm:$0xff]  }
 0x8a6   : > { %18122 = vmatprep.subr.bf16.mxu1 %v20352_v8  ;;  %18230 = vmatprep.subr.bf16.mxu0 %v20390_v63  ;;  %v20391_v6 = vld [vmem:[#allocation5] sm:$0xff]  }
 0x8a7   : > { %18231 = vmatpush3.bf16.msra.mxu0 %v20390_v63 }
 0x8a8   : > { %18240 = vmatprep.subr.bf16.mxu0 %v20391_v6 }
 0x8a9   : > { %18123 = vmatpush3.bf16.msra.mxu1 %v20352_v8  ;;  %v20382_v8 = vld [vmem:[#allocation2 + $0x238] sm:$0xff]  }
 0x8aa   : > { %18124 = vmatprep.subr.bf16.mxu1 %v20353_v36 }
 0x8ac   : > { %18117 = vmatmul.mubr.bf16.gmra.mrb[36].mxu1 %v26591_v19 }
 0x8ad   : > { %18125 = vmatpush3.bf16.msra.mxu1 %v20353_v36  ;;  %18136 = vmatprep.mubr.msk.bf16.mxu1 %vm24069_vm1, %v26592_v25 }
 0x8ae   : > { %18126 = vmatprep.subr.bf16.mxu1 %v20354_v55 }
 0x8b1   : > { %18127 = vmatpush3.bf16.msra.mxu1 %v20354_v55 }
 0x8b2   : > { %18128 = vmatprep.subr.bf16.mxu1 %v20355_v26 }
 0x8b5   : > { %18129 = vmatpush3.bf16.msra.mxu1 %v20355_v26 }
 0x8b6   : > { %18130 = vmatprep.subr.bf16.mxu1 %v20356_v39 }
 0x8b9   : > { %18131 = vmatpush3.bf16.msra.mxu1 %v20356_v39 }
 0x8ba   : > { %18132 = vmatprep.subr.bf16.mxu1 %v20357_v4 }
 0x8bd   : > { %18133 = vmatpush3.bf16.msra.mxu1 %v20357_v4 }
 0x8be   : > { %18134 = vmatprep.subr.bf16.mxu1 %v20358_v53 }
 0x8c1   : > { %18135 = vmatpush3.bf16.msra.mxu1 %v20358_v53 }
 0x8c2   : > { %18144 = vmatprep.subr.bf16.mxu1 %v20359_v3 }
 0x8c4   : > { %18137 = vmatmul.mubr.msk.bf16.vlgmr.msra.gmra.mrb[32].mxu1 %vm24081_vm9, %v26593_v24 }
 0x8c5   : > { %18140 = vmatprep.mubr.msk.bf16.mxu1 %vm24085_vm7, %v26594_v1  ;;  %18145 = vmatpush3.bf16.msra.mxu1 %v20359_v3 }
 0x8c6   : > { %18146 = vmatprep.subr.bf16.mxu1 %v20360_v22 }
 0x8c9   : > { %18147 = vmatpush3.bf16.msra.mxu1 %v20360_v22 }
 0x8ca   : > { %18148 = vmatprep.subr.bf16.mxu1 %v20361_v51 }
 0x8cc   : > { %18141 = vmatmul.mubr.msk.bf16.gmra.mrb[36].mxu1 %vm24095_vm0, %v26595_v56 }
 0x8cd   : > { %18149 = vmatpush3.bf16.msra.mxu1 %v20361_v51  ;;  %18160 = vmatprep.mubr.msk.bf16.mxu1 %vm23985_vm13, %v23903_v13  ;;  %v20369_v13 = vld [vmem:[#allocation2 + $0x1d0] sm:$0xff]  }
 0x8ce   : > { %18150 = vmatprep.subr.bf16.mxu1 %v20362_v42 }
 0x8d1   : > { %18151 = vmatpush3.bf16.msra.mxu1 %v20362_v42 }
 0x8d2   : > { %18152 = vmatprep.subr.bf16.mxu1 %v20363_v38 }
 0x8d5   : > { %18153 = vmatpush3.bf16.msra.mxu1 %v20363_v38 }
 0x8d6   : > { %18154 = vmatprep.subr.bf16.mxu1 %v20364_v54 }
 0x8d9   : > { %18155 = vmatpush3.bf16.msra.mxu1 %v20364_v54  ;;  %v20392_v54 = vld [vmem:[#allocation5 + $0x8] sm:$0xff]  }
 0x8da   : > { %18156 = vmatprep.subr.bf16.mxu1 %v20365_v28 }
 0x8dd   : > { %18157 = vmatpush3.bf16.msra.mxu1 %v20365_v28 }
 0x8de   : > { %18158 = vmatprep.subr.bf16.mxu1 %v20366_v61 }
 0x8e1   : > { %18159 = vmatpush3.bf16.msra.mxu1 %v20366_v61 }
 0x8e2   : > { %18168 = vmatprep.subr.bf16.mxu1 %v20367_v50 }
 0x8e4   : > { %18161 = vmatmul.mubr.msk.bf16.vlgmr.msra.gmra.mrb[32].mxu1 %vm24045_vm3, %v23950_v5  ;;  %v20371_v5 = vld [vmem:[#allocation2 + $0x1e0] sm:$0xff]  }
 0x8e5   : > { %18164 = vmatprep.mubr.msk.bf16.mxu1 %vm24049_vm11, %v24007_v18  ;;  %18169 = vmatpush3.bf16.msra.mxu1 %v20367_v50  ;;  %v20372_v18 = vld [vmem:[#allocation2 + $0x1e8] sm:$0xff]  }
 0x8e6   : > { %18170 = vmatprep.subr.bf16.mxu1 %v20368_v58 }
 0x8e9   : > { %18171 = vmatpush3.bf16.msra.mxu1 %v20368_v58 }
 0x8ea   : > { %18172 = vmatprep.subr.bf16.mxu1 %v20369_v13 }
 0x8ec   : > { %18165 = vmatmul.mubr.msk.bf16.gmra.mrb[36].mxu1 %vm24065_vm2, %v26596_v40 }
 0x8ed   : > { %18173 = vmatpush3.bf16.msra.mxu1 %v20369_v13  ;;  %18184 = vmatprep.mubr.bf16.mxu1 %v23889_v2  ;;  %v20377_v2 = vld [vmem:[#allocation2 + $0x210] sm:$0xff]  }
 0x8ee   : > { %18174 = vmatprep.subr.bf16.mxu1 %v20370_v57 }
 0x8f1   : > { %18175 = vmatpush3.bf16.msra.mxu1 %v20370_v57 }
 0x8f2   : > { %18176 = vmatprep.subr.bf16.mxu1 %v20371_v5 }
 0x8f5   : > { %18177 = vmatpush3.bf16.msra.mxu1 %v20371_v5 }
 0x8f6   : > { %18178 = vmatprep.subr.bf16.mxu1 %v20372_v18 }
 0x8f9   : > { %18179 = vmatpush3.bf16.msra.mxu1 %v20372_v18 }
 0x8fa   : > { %18180 = vmatprep.subr.bf16.mxu1 %v20373_v11 }
 0x8fd   : > { %18181 = vmatpush3.bf16.msra.mxu1 %v20373_v11 }
 0x8fe   : > { %18182 = vmatprep.subr.bf16.mxu1 %v20374_v35 }
 0x901   : > { %18183 = vmatpush3.bf16.msra.mxu1 %v20374_v35 }
 0x902   : > { %18192 = vmatprep.subr.bf16.mxu1 %v20375_v32 }
 0x904   : > { %18185 = vmatmul.mubr.bf16.vlgmr.msra.gmra.mrb[32].mxu1 %v23933_v7  ;;  %v20380_v7 = vld [vmem:[#allocation2 + $0x228] sm:$0xff]  }
 0x905   : > { %18188 = vmatprep.mubr.bf16.mxu1 %v23983_v60  ;;  %18193 = vmatpush3.bf16.msra.mxu1 %v20375_v32  ;;  %v20381_v60 = vld [vmem:[#allocation2 + $0x230] sm:$0xff]  }
 0x906   : > { %18194 = vmatprep.subr.bf16.mxu1 %v20376_v49 }
 0x909   : > { %18195 = vmatpush3.bf16.msra.mxu1 %v20376_v49 }
 0x90a   : > { %18196 = vmatprep.subr.bf16.mxu1 %v20377_v2 }
 0x90c   : > { %18189 = vmatmul.mubr.bf16.gmra.mrb[36].mxu1 %v8057_v62 }
 0x90d   : > { %18197 = vmatpush3.bf16.msra.mxu1 %v20377_v2  ;;  %18208 = vmatprep.mubr.msk.bf16.mxu1 %vm24069_vm1, %v23926_v23  ;;  %v15531_v23 = vpack.c.bf16 %v26548_v45, %v24025_v34 }
 0x90e   : > { %18198 = vmatprep.subr.bf16.mxu1 %v20378_v31 }
 0x911   : > { %18199 = vmatpush3.bf16.msra.mxu1 %v20378_v31 }
 0x912   : > { %18200 = vmatprep.subr.bf16.mxu1 %v20379_v37 }
 0x915   : > { %18201 = vmatpush3.bf16.msra.mxu1 %v20379_v37 }
 0x916   : > { %18202 = vmatprep.subr.bf16.mxu1 %v20380_v7 }
 0x919   : > { %18203 = vmatpush3.bf16.msra.mxu1 %v20380_v7 }
 0x91a   : > { %18204 = vmatprep.subr.bf16.mxu1 %v20381_v60 }
 0x91d   : > { %18205 = vmatpush3.bf16.msra.mxu1 %v20381_v60  ;;  %v20393_v60 = vld [vmem:[#allocation5 + $0x10] sm:$0xff]  }
 0x91e   : > { %18206 = vmatprep.subr.bf16.mxu1 %v20382_v8 }
 0x921   : > { %18207 = vmatpush3.bf16.msra.mxu1 %v20382_v8 }
 0x922   : > { %18451 = vmatprep.subr.bf16.mxu1 %v26546_v15 }
 0x924   : > { %18209 = vmatmul.mubr.msk.bf16.vlgmr.msra.gmra.mrb[32].mxu1 %vm24081_vm9, %v23975_v16  ;;  %v15533_v16 = vld [vmem:[%s26597_s13] ss:$0 sm:$0xff] }
 0x925   : > { %18212 = vmatprep.mubr.msk.bf16.mxu1 %vm24085_vm7, %v24033_v33 }
 0x92c   : > { %18213 = vmatmul.mubr.msk.bf16.gmra.mrb[36].mxu1 %vm24095_vm0, %v15531_v23 }
 0x9f7   : > { %v18210_v36 = vpop.f32.mrb[32].mxu1 }
 0x9f8   : > { %v8354_v33 = vadd.f32 %v18210_v36, %v15533_v16  ;;  %v8307_v55 = vpop.f32.mrb[33].mxu1 }
 0x9f9   : > { %v8352_v19 = vadd.f32 %v15533_v16, %v8307_v55  ;;  %v18211_v34 = vpop.f32.mrb[34].mxu1 }
 0x9fa   : > { %v24190_v9 = vmax.f32 %v8354_v33, 0.0  ;;  %v8355_v12 = vadd.f32 %v18211_v34, %v15533_v16  ;;  %v8310_v25 = vpop.f32.mrb[35].mxu1 }
 0x9fb   : > { %v24192_v26 = vmax.f32 %v8352_v19, 0.0  ;;  %v8353_v17 = vadd.f32 %v15533_v16, %v8310_v25 }
 0x9fc   : > { %v8380_v39 = vrot.slane %v24190_v9, 7  ;;  %v24195_v14 = vmax.f32 %v8355_v12, 0.0  ;;  %v8676_v4 = vrot.slane %v24190_v9, 1 }
 0x9fd   : > { %v8376_v52 = vrot.slane %v24192_v26, 7  ;;  %v24199_v53 = vmax.f32 %v8353_v17, 0.0  ;;  %v8424_v41 = vpack.c.bf16 %v24192_v26, %v26546_v15  ;;  %v8672_v3 = vrot.slane %v24192_v26, 1 }
 0x9fe   : > { %v8382_v22 = vrot.slane %v24195_v14, 7  ;;  %v8678_v24 = vrot.slane %v24195_v14, 1  ;;  %v9000_v1 = vpack.c.bf16 %v24195_v14, %v24190_v9 }
 0x9ff   : > { %v8378_v51 = vrot.slane %v24199_v53, 7  ;;  %v24211_v42 = vpack.c.bf16 %v24190_v9, %v24199_v53  ;;  %v8674_v56 = vrot.slane %v24199_v53, 1  ;;  %v18214_v38 = vpop.f32.mrb[36].mxu1  ;;  %18232 = vmatprep.mubr.bf16.mxu0 %v8424_v41  ;;  %v24216_v28 = vsel %vm26598_vm4, %v26518_v10, %v8376_v52  ;;  %v20394_v41 = vld [vmem:[#allocation5 + $0x18] sm:$0xff]   ;;  %v20427_v9 = vld [vmem:[#allocation5 + $0x160] sm:$0xff]  }
 0xa00   : > { %v24219_v61 = vsel %vm26599_vm6, %v8676_v4, %v8678_v24  ;;  %v8358_v50 = vadd.f32 %v18214_v38, %v15533_v16  ;;  %v8323_v58 = vpop.f32.mrb[37].mxu1  ;;  %v15551_v13 = vpack.c.bf16 %v24216_v28, %v26518_v10  ;;  %v24224_v57 = vsel %vm26600_vm14, %v8380_v39, %v8382_v22  ;;  %vm26606_vm6 = vmmov %vm26604_vm5 }
 0xa01   : > { %v24227_v40 = vsel %vm26601_vm10, %v8376_v52, %v8378_v51  ;;  %v24230_v5 = vsel %vm26602_vm15, %v8378_v51, %v8380_v39  ;;  %v24233_v18 = vsel %vm26603_vm12, %v8674_v56, %v8676_v4  ;;  %v8356_v11 = vadd.f32 %v15533_v16, %v8323_v58  ;;  %v18215_v35 = vpop.f32.mrb[38].mxu1  ;;  %18233 = vmatmul.mubr.bf16.vlgmr.msra.gmra.mrb[48].mxu0 %v24211_v42  ;;  %vm26607_vm14 = vmmov %vm26604_vm5 }
 0xa02   : > { %v24238_v32 = vpack.c.bf16 %v24230_v5, %v24227_v40  ;;  %v24242_v49 = vpack.c.bf16 %v24219_v61, %v24233_v18  ;;  %v24244_v2 = vmax.f32 %v8358_v50, 0.0  ;;  %v8359_v62 = vadd.f32 %v18215_v35, %v15533_v16  ;;  %18241 = vmatpush3.bf16.msra.mxu0 %v20391_v6  ;;  %v8326_v31 = vpop.f32.mrb[39].mxu1  ;;  %vm26608_vm10 = vmmov %vm26598_vm4 }
 0xa03   : > { %v24246_v37 = vmax.f32 %v8356_v11, 0.0  ;;  %v8357_v7 = vadd.f32 %v15533_v16, %v8326_v31  ;;  %18242 = vmatprep.subr.bf16.mxu0 %v20392_v54  ;;  %v15594_v8 = vpack.c.bf16 %v24224_v57, %v24230_v5  ;;  %v24252_v23 = vsel %vm26604_vm5, %v26548_v45, %v8672_v3  ;;  %vm26609_vm15 = vmmov %vm26598_vm4  ;;  %v20395_v31 = vld [vmem:[#allocation5 + $0x20] sm:$0xff]   ;;  %v20420_v5 = vld [vmem:[#allocation5 + $0x128] sm:$0xff]  }
 0xa04   : > { %v8388_v47 = vrot.slane %v24244_v2, 7  ;;  %v8684_v63 = vrot.slane %v24244_v2, 1  ;;  %v24256_v36 = vmax.f32 %v8359_v62, 0.0  ;;  %v24259_v6 = vsel %vm26605_vm8, %v8672_v3, %v8674_v56  ;;  %vm26610_vm12 = vmmov %vm26598_vm4 }
 0xa05   : > { %v8384_v16 = vrot.slane %v24246_v37, 7  ;;  %v8680_v33 = vrot.slane %v24246_v37, 1  ;;  %v24263_v55 = vmax.f32 %v8357_v7, 0.0  ;;  %v24267_v19 = vpack.c.bf16 %v24246_v37, %v24195_v14  ;;  %vm26611_vm8 = vmmov %vm26604_vm5  ;;  %v20428_v14 = vld [vmem:[#allocation5 + $0x168] sm:$0xff]  }
 0xa06   : > { %v8686_v34 = vrot.slane %v24256_v36, 1  ;;  %v8846_v12 = vrot.slane %v24256_v36, 7  ;;  %18243 = vmatpush3.bf16.msra.mxu0 %v20392_v54  ;;  %v15571_v25 = vpack.c.bf16 %v24259_v6, %v24252_v23  ;;  %v15591_v17 = vpack.c.bf16 %v24227_v40, %v24216_v28  ;;  %v20416_v28 = vld [vmem:[#allocation5 + $0x108] sm:$0xff]   ;;  %v20417_v40 = vld [vmem:[#allocation5 + $0x110] sm:$0xff]  }
 0xa07   : > { %v8386_v39 = vrot.slane %v24263_v55, 7  ;;  %v8682_v4 = vrot.slane %v24263_v55, 1  ;;  %18236 = vmatprep.mubr.bf16.mxu0 %v24267_v19  ;;  %18244 = vmatprep.subr.bf16.mxu0 %v20393_v60  ;;  %v24280_v52 = vpack.c.bf16 %v24244_v2, %v24263_v55  ;;  %v24283_v3 = vsel %vm26598_vm4, %v8382_v22, %v8384_v16  ;;  %vm26612_vm4 = vmmov %vm26604_vm5 }
 0xa08   : > { %v24287_v51 = vpack.c.bf16 %v24283_v3, %v24224_v57  ;;  %v24290_v56 = vsel %vm26606_vm6, %v8678_v24, %v8680_v33  ;;  %v24293_v38 = vsel %vm26607_vm14, %v8684_v63, %v8686_v34  ;;  %v24296_v54 = vsel %vm26608_vm10, %v8388_v47, %v8846_v12  ;;  %vm26613_vm6 = vmmov %vm26608_vm10  ;;  %v20419_v57 = vld [vmem:[#allocation5 + $0x120] sm:$0xff]  }
 0xa09   : > { %18237 = vmatmul.mubr.bf16.gmra.mrb[52].mxu0 %v24280_v52  ;;  %v24300_v50 = vsel %vm26609_vm15, %v8384_v16, %v8386_v39  ;;  %v24303_v22 = vsel %vm26610_vm12, %v8386_v39, %v8388_v47  ;;  %v24306_v58 = vsel %vm26604_vm5, %v8680_v33, %v8682_v4  ;;  %v24321_v62 = vsel %vm26611_vm8, %v8682_v4, %v8684_v63  ;;  %v20396_v16 = vld [vmem:[#allocation5 + $0x28] sm:$0xff]   ;;  %v20397_v33 = vld [vmem:[#allocation5 + $0x30] sm:$0xff]   ;;  %v20399_v47 = vld [vmem:[#allocation5 + $0x80] sm:$0xff]  }
 0xa0a   : > { %18245 = vmatpush3.bf16.msra.mxu0 %v20393_v60  ;;  %18256 = vmatprep.mubr.msk.bf16.mxu0 %vm23985_vm13, %v15551_v13  ;;  %v24314_v11 = vpack.c.bf16 %v24303_v22, %v24300_v50  ;;  %v24318_v35 = vpack.c.bf16 %v24306_v58, %v24290_v56  ;;  %v24325_v7 = vpack.c.bf16 %v24293_v38, %v24321_v62  ;;  %vm26626_vm14 = vmmov %vm26613_vm6 }
 0xa0b   : > { %18246 = vmatprep.subr.bf16.mxu0 %v20394_v41  ;;  %v15597_v13 = vpack.c.bf16 %v24300_v50, %v24283_v3  ;;  %v15600_v60 = vpack.c.bf16 %v24296_v54, %v24303_v22  ;;  %v8999_v23 = vpack.c.bf16 %v24199_v53, %v24192_v26  ;;  %v24343_v39 = vsel %vm26612_vm4, %v8686_v34, %v26548_v45  ;;  %v20398_v34 = vld [vmem:[#allocation5 + $0x38] sm:$0xff]   ;;  %v20423_v50 = vld [vmem:[#allocation5 + $0x140] sm:$0xff]   ;;  %v20424_v22 = vld [vmem:[#allocation5 + $0x148] sm:$0xff]  }
 0xa0c   : > { %v24347_v4 = vsel %vm26613_vm6, %v8846_v12, %v26518_v10  ;;  %v15628_v24 = vpack.c.bf16 %v24343_v39, %v24293_v38  ;;  %v20400_v12 = vld [vmem:[#allocation5 + $0x88] sm:$0xff]   ;;  %v20422_v3 = vld [vmem:[#allocation5 + $0x138] sm:$0xff]   ;;  %v26614_v26 = vpack.c.bf16 %v24263_v55, %v24246_v37  ;;  %v20425_v53 = vld [vmem:[#allocation5 + $0x150] sm:$0xff]   ;;  %v26618_v55 = vpack.c.bf16 %v24321_v62, %v24306_v58 }
 0xa0d   : > { %v15648_v63 = vpack.c.bf16 %v24347_v4, %v24296_v54  ;;  %v20430_v37 = vld [vmem:[#allocation5 + $0x178] sm:$0xff]   ;;  %v20437_v58 = vld [vmem:[#allocation5 + $0x1b0] sm:$0xff]   ;;  %v20439_v38 = vld [vmem:[#allocation5 + $0x1c0] sm:$0xff]   ;;  %v15676_v27 = vpack.c.bf16 %v26548_v45, %v24343_v39 }
 0xa0e   : > { %18247 = vmatpush3.bf16.msra.mxu0 %v20394_v41  ;;  %v20401_v41 = vld [vmem:[#allocation5 + $0x90] sm:$0xff]   ;;  %v20438_v62 = vld [vmem:[#allocation5 + $0x1b8] sm:$0xff]   ;;  %v20447_v54 = vld [vmem:[#allocation5 + $0x200] sm:$0xff]  }
 0xa0f   : > { %18248 = vmatprep.subr.bf16.mxu0 %v20395_v31  ;;  %v20450_v4 = vld [vmem:[#allocation5 + $0x218] sm:$0xff]   ;;  %vm26627_vm10 = vmmov %vm26613_vm6 }
 0xa10   : > { %vm26628_vm15 = vmmov %vm26612_vm4 }
 0xa11   : > { %vm26629_vm12 = vmmov %vm26612_vm4 }
 0xa12   : > { %18249 = vmatpush3.bf16.msra.mxu0 %v20395_v31  ;;  %v20402_v31 = vld [vmem:[#allocation5 + $0x98] sm:$0xff]  }
 0xa13   : > { %18250 = vmatprep.subr.bf16.mxu0 %v20396_v16 }
 0xa16   : > { %18251 = vmatpush3.bf16.msra.mxu0 %v20396_v16  ;;  %v20403_v16 = vld [vmem:[#allocation5 + $0xa0] sm:$0xff]  }
 0xa17   : > { %18252 = vmatprep.subr.bf16.mxu0 %v20397_v33 }
 0xa1a   : > { %18253 = vmatpush3.bf16.msra.mxu0 %v20397_v33  ;;  %v20404_v33 = vld [vmem:[#allocation5 + $0xa8] sm:$0xff]  }
 0xa1b   : > { %18254 = vmatprep.subr.bf16.mxu0 %v20398_v34 }
 0xa1e   : > { %18255 = vmatpush3.bf16.msra.mxu0 %v20398_v34  ;;  %v20406_v34 = vld [vmem:[#allocation5 + $0xb8] sm:$0xff]  }
 0xa1f   : > { %18264 = vmatprep.subr.bf16.mxu0 %v20399_v47 }
 0xa21   : > { %18257 = vmatmul.mubr.msk.bf16.vlgmr.msra.gmra.mrb[48].mxu0 %vm24045_vm3, %v24238_v32 }
 0xa22   : > { %18260 = vmatprep.mubr.msk.bf16.mxu0 %vm24049_vm11, %v24287_v51  ;;  %18265 = vmatpush3.bf16.msra.mxu0 %v20399_v47  ;;  %v20405_v47 = vld [vmem:[#allocation5 + $0xb0] sm:$0xff]  }
 0xa23   : > { %18266 = vmatprep.subr.bf16.mxu0 %v20400_v12 }
 0xa26   : > { %18267 = vmatpush3.bf16.msra.mxu0 %v20400_v12  ;;  %v20407_v12 = vld [vmem:[#allocation5 + $0xc0] sm:$0xff]  }
 0xa27   : > { %18268 = vmatprep.subr.bf16.mxu0 %v20401_v41 }
 0xa29   : > { %18261 = vmatmul.mubr.msk.bf16.gmra.mrb[52].mxu0 %vm24065_vm2, %v24314_v11 }
 0xa2a   : > { %18269 = vmatpush3.bf16.msra.mxu0 %v20401_v41  ;;  %18280 = vmatprep.mubr.msk.bf16.mxu0 %vm24069_vm1, %v15571_v25  ;;  %v20408_v41 = vld [vmem:[#allocation5 + $0xc8] sm:$0xff]   ;;  %v20409_v25 = vld [vmem:[#allocation5 + $0xd0] sm:$0xff]  }
 0xa2b   : > { %18270 = vmatprep.subr.bf16.mxu0 %v20402_v31 }
 0xa2e   : > { %18271 = vmatpush3.bf16.msra.mxu0 %v20402_v31  ;;  %v20410_v31 = vld [vmem:[#allocation5 + $0xd8] sm:$0xff]  }
 0xa2f   : > { %18272 = vmatprep.subr.bf16.mxu0 %v20403_v16 }
 0xa32   : > { %18273 = vmatpush3.bf16.msra.mxu0 %v20403_v16  ;;  %v20411_v16 = vld [vmem:[#allocation5 + $0xe0] sm:$0xff]  }
 0xa33   : > { %18274 = vmatprep.subr.bf16.mxu0 %v20404_v33 }
 0xa36   : > { %18275 = vmatpush3.bf16.msra.mxu0 %v20404_v33  ;;  %v20412_v33 = vld [vmem:[#allocation5 + $0xe8] sm:$0xff]  }
 0xa37   : > { %18276 = vmatprep.subr.bf16.mxu0 %v20405_v47 }
 0xa3a   : > { %18277 = vmatpush3.bf16.msra.mxu0 %v20405_v47  ;;  %v20413_v47 = vld [vmem:[#allocation5 + $0xf0] sm:$0xff]  }
 0xa3b   : > { %18278 = vmatprep.subr.bf16.mxu0 %v20406_v34 }
 0xa3e   : > { %18279 = vmatpush3.bf16.msra.mxu0 %v20406_v34  ;;  %v20414_v34 = vld [vmem:[#allocation5 + $0xf8] sm:$0xff]  }
 0xa3f   : > { %18288 = vmatprep.subr.bf16.mxu0 %v20407_v12 }
 0xa41   : > { %18281 = vmatmul.mubr.msk.bf16.vlgmr.msra.gmra.mrb[48].mxu0 %vm24081_vm9, %v24242_v49 }
 0xa42   : > { %18284 = vmatprep.mubr.msk.bf16.mxu0 %vm24085_vm7, %v24318_v35  ;;  %18289 = vmatpush3.bf16.msra.mxu0 %v20407_v12  ;;  %v20415_v12 = vld [vmem:[#allocation5 + $0x100] sm:$0xff]  }
 0xa43   : > { %18290 = vmatprep.subr.bf16.mxu0 %v20408_v41 }
 0xa46   : > { %18291 = vmatpush3.bf16.msra.mxu0 %v20408_v41  ;;  %v20433_v41 = vld [vmem:[#allocation5 + $0x190] sm:$0xff]  }
 0xa47   : > { %18292 = vmatprep.subr.bf16.mxu0 %v20409_v25 }
 0xa49   : > { %18285 = vmatmul.mubr.msk.bf16.gmra.mrb[52].mxu0 %vm24095_vm0, %v24325_v7 }
 0xa4a   : > { %18293 = vmatpush3.bf16.msra.mxu0 %v20409_v25  ;;  %18304 = vmatprep.mubr.msk.bf16.mxu0 %vm23985_vm13, %v15591_v17  ;;  %v20418_v17 = vld [vmem:[#allocation5 + $0x118] sm:$0xff]  }
 0xa4b   : > { %18294 = vmatprep.subr.bf16.mxu0 %v20410_v31  ;;  %v20434_v25 = vld [vmem:[#allocation5 + $0x198] sm:$0xff]  }
 0xa4e   : > { %18295 = vmatpush3.bf16.msra.mxu0 %v20410_v31  ;;  %v20451_v31 = vld [vmem:[#allocation5 + $0x220] sm:$0xff]  }
 0xa4f   : > { %18296 = vmatprep.subr.bf16.mxu0 %v20411_v16 }
 0xa52   : > { %18297 = vmatpush3.bf16.msra.mxu0 %v20411_v16  ;;  %v20454_v16 = vld [vmem:[#allocation5 + $0x238] sm:$0xff]  }
 0xa53   : > { %18298 = vmatprep.subr.bf16.mxu0 %v20412_v33 }
 0xa56   : > { %18299 = vmatpush3.bf16.msra.mxu0 %v20412_v33 }
 0xa57   : > { %18300 = vmatprep.subr.bf16.mxu0 %v20413_v47 }
 0xa5a   : > { %18301 = vmatpush3.bf16.msra.mxu0 %v20413_v47 }
 0xa5b   : > { %18302 = vmatprep.subr.bf16.mxu0 %v20414_v34 }
 0xa5e   : > { %18303 = vmatpush3.bf16.msra.mxu0 %v20414_v34 }
 0xa5f   : > { %18312 = vmatprep.subr.bf16.mxu0 %v20415_v12 }
 0xa61   : > { %18305 = vmatmul.mubr.msk.bf16.vlgmr.msra.gmra.mrb[48].mxu0 %vm24045_vm3, %v15594_v8  ;;  %v20421_v8 = vld [vmem:[#allocation5 + $0x130] sm:$0xff]  }
 0xa62   : > { %18308 = vmatprep.mubr.msk.bf16.mxu0 %vm24049_vm11, %v15597_v13  ;;  %18313 = vmatpush3.bf16.msra.mxu0 %v20415_v12  ;;  %v20426_v13 = vld [vmem:[#allocation5 + $0x158] sm:$0xff]  }
 0xa63   : > { %18314 = vmatprep.subr.bf16.mxu0 %v20416_v28 }
 0xa66   : > { %18315 = vmatpush3.bf16.msra.mxu0 %v20416_v28 }
 0xa67   : > { %18316 = vmatprep.subr.bf16.mxu0 %v20417_v40 }
 0xa69   : > { %18309 = vmatmul.mubr.msk.bf16.gmra.mrb[52].mxu0 %vm24065_vm2, %v15600_v60  ;;  %v26615_v60 = vpack.c.bf16 %v24256_v36, %v24244_v2  ;;  %v20431_v2 = vld [vmem:[#allocation5 + $0x180] sm:$0xff]  }
 0xa6a   : > { %18317 = vmatpush3.bf16.msra.mxu0 %v20417_v40  ;;  %18328 = vmatprep.mubr.bf16.mxu0 %v8999_v23  ;;  %v26616_v23 = vpack.c.bf16 %v24233_v18, %v24259_v6  ;;  %v20432_v18 = vld [vmem:[#allocation5 + $0x188] sm:$0xff]   ;;  %v26617_v6 = vpack.c.bf16 %v24290_v56, %v24219_v61  ;;  %v20435_v61 = vld [vmem:[#allocation5 + $0x1a0] sm:$0xff]  }
 0xa6b   : > { %18318 = vmatprep.subr.bf16.mxu0 %v20418_v17  ;;  %v20436_v56 = vld [vmem:[#allocation5 + $0x1a8] sm:$0xff]  }
 0xa6e   : > { %18319 = vmatpush3.bf16.msra.mxu0 %v20418_v17 }
 0xa6f   : > { %18320 = vmatprep.subr.bf16.mxu0 %v20419_v57 }
 0xa72   : > { %18321 = vmatpush3.bf16.msra.mxu0 %v20419_v57 }
 0xa73   : > { %18322 = vmatprep.subr.bf16.mxu0 %v20420_v5 }
 0xa76   : > { %18323 = vmatpush3.bf16.msra.mxu0 %v20420_v5 }
 0xa77   : > { %18324 = vmatprep.subr.bf16.mxu0 %v20421_v8 }
 0xa7a   : > { %18325 = vmatpush3.bf16.msra.mxu0 %v20421_v8 }
 0xa7b   : > { %18326 = vmatprep.subr.bf16.mxu0 %v20422_v3 }
 0xa7e   : > { %18327 = vmatpush3.bf16.msra.mxu0 %v20422_v3 }
 0xa7f   : > { %18336 = vmatprep.subr.bf16.mxu0 %v20423_v50 }
 0xa81   : > { %18329 = vmatmul.mubr.bf16.vlgmr.msra.gmra.mrb[48].mxu0 %v9000_v1  ;;  %v20429_v1 = vld [vmem:[#allocation5 + $0x170] sm:$0xff]  }
 0xa82   : > { %18332 = vmatprep.mubr.bf16.mxu0 %v26614_v26  ;;  %18337 = vmatpush3.bf16.msra.mxu0 %v20423_v50  ;;  %v9734_v50 = vld [vmem:[%s25606_s22 + $0x8] sm:$0xff] }
 0xa83   : > { %18338 = vmatprep.subr.bf16.mxu0 %v20424_v22  ;;  %v20458_v26 = vld [vmem:[#allocation7 + $0x8] sm:$0xff]  }
 0xa86   : > { %18339 = vmatpush3.bf16.msra.mxu0 %v20424_v22  ;;  %v20456_v22 = vld [vmem:[#allocation7] sm:$0xff]  }
 0xa87   : > { %18340 = vmatprep.subr.bf16.mxu0 %v20425_v53 }
 0xa89   : > { %18333 = vmatmul.mubr.bf16.gmra.mrb[52].mxu0 %v26615_v60  ;;  %v20464_v60 = vld [vmem:[#allocation7 + $0x20] sm:$0xff]  }
 0xa8a   : > { %18341 = vmatpush3.bf16.msra.mxu0 %v20425_v53  ;;  %18352 = vmatprep.mubr.msk.bf16.mxu0 %vm24069_vm1, %v26616_v23  ;;  %v20460_v53 = vld [vmem:[#allocation7 + $0x10] sm:$0xff]   ;;  %v20466_v23 = vld [vmem:[#allocation7 + $0x28] sm:$0xff]  }
 0xa8b   : > { %18342 = vmatprep.subr.bf16.mxu0 %v20426_v13 }
 0xa8e   : > { %18343 = vmatpush3.bf16.msra.mxu0 %v20426_v13  ;;  %v20462_v13 = vld [vmem:[#allocation7 + $0x18] sm:$0xff]  }
 0xa8f   : > { %18344 = vmatprep.subr.bf16.mxu0 %v20427_v9 }
 0xa92   : > { %18345 = vmatpush3.bf16.msra.mxu0 %v20427_v9  ;;  %v20467_v9 = vld [vmem:[#allocation7 + $0x70] sm:$0xff]  }
 0xa93   : > { %18346 = vmatprep.subr.bf16.mxu0 %v20428_v14 }
 0xa96   : > { %18347 = vmatpush3.bf16.msra.mxu0 %v20428_v14  ;;  %v20468_v14 = vld [vmem:[#allocation7 + $0x30] sm:$0xff]  }
 0xa97   : > { %18348 = vmatprep.subr.bf16.mxu0 %v20429_v1 }
 0xa9a   : > { %18349 = vmatpush3.bf16.msra.mxu0 %v20429_v1  ;;  %v20469_v1 = vld [vmem:[#allocation7 + $0x78] sm:$0xff]  }
 0xa9b   : > { %18350 = vmatprep.subr.bf16.mxu0 %v20430_v37 }
 0xa9e   : > { %18351 = vmatpush3.bf16.msra.mxu0 %v20430_v37  ;;  %v20470_v37 = vld [vmem:[#allocation7 + $0x38] sm:$0xff]  }
 0xa9f   : > { %18360 = vmatprep.subr.bf16.mxu0 %v20431_v2 }
 0xaa1   : > { %18353 = vmatmul.mubr.msk.bf16.vlgmr.msra.gmra.mrb[48].mxu0 %vm24081_vm9, %v26617_v6 }
 0xaa2   : > { %18356 = vmatprep.mubr.msk.bf16.mxu0 %vm24085_vm7, %v26618_v55  ;;  %18361 = vmatpush3.bf16.msra.mxu0 %v20431_v2  ;;  %v15678_v2 = vld [vmem:[%s26619_s14] ss:$0 sm:$0xff]  ;;  %v9829_v55 = vand.u32 3, %v26557_v0  ;;  %v20489_v0 = vld [vmem:[#allocation7 + $0x108] sm:$0xff]  }
 0xaa3   : > { %18362 = vmatprep.subr.bf16.mxu0 %v20432_v18 }
 0xaa4   : > { %vm10066_vm8 = vcmp.le.s32.totalorder %v9829_v55, 2 }
 0xaa6   : > { %18363 = vmatpush3.bf16.msra.mxu0 %v20432_v18  ;;  %v9828_v18 = vand.u32 3, %v26556_v59 }
 0xaa7   : > { %18364 = vmatprep.subr.bf16.mxu0 %v20433_v41 }
 0xaa8   : > { %vm10065_vm5 = vcmp.le.s32.totalorder %v9828_v18, 2 }
 0xaa9   : > { %18357 = vmatmul.mubr.msk.bf16.gmra.mrb[52].mxu0 %vm24095_vm0, %v15628_v24  ;;  %v20440_v24 = vld [vmem:[#allocation5 + $0x1c8] sm:$0xff]   ;;  %vm24598_vm4 = vmpackc.low %vm10066_vm8, %vm10065_vm5 }
 0xaaa   : > { %18365 = vmatpush3.bf16.msra.mxu0 %v20433_v41  ;;  %18376 = vmatprep.mubr.msk.bf16.mxu0 %vm23985_vm13, %v24238_v32  ;;  %v20442_v32 = vld [vmem:[#allocation5 + $0x1d8] sm:$0xff]   ;;  %vm9741_vm13 = vcmask 523264  }
 0xaab   : > { %18366 = vmatprep.subr.bf16.mxu0 %v20434_v25 }
 0xaae   : > { %18367 = vmatpush3.bf16.msra.mxu0 %v20434_v25 }
 0xaaf   : > { %18368 = vmatprep.subr.bf16.mxu0 %v20435_v61 }
 0xab2   : > { %18369 = vmatpush3.bf16.msra.mxu0 %v20435_v61 }
 0xab3   : > { %18370 = vmatprep.subr.bf16.mxu0 %v20436_v56 }
 0xab6   : > { %18371 = vmatpush3.bf16.msra.mxu0 %v20436_v56 }
 0xab7   : > { %18372 = vmatprep.subr.bf16.mxu0 %v20437_v58 }
 0xaba   : > { %18373 = vmatpush3.bf16.msra.mxu0 %v20437_v58  ;;  %v20493_v58 = vld [vmem:[#allocation7 + $0x118] sm:$0xff]  }
 0xabb   : > { %18374 = vmatprep.subr.bf16.mxu0 %v20438_v62 }
 0xabe   : > { %18375 = vmatpush3.bf16.msra.mxu0 %v20438_v62  ;;  %v24502_v62 = vrot.slane %v26546_v15, 3 }
 0xabf   : > { %18384 = vmatprep.subr.bf16.mxu0 %v20439_v38 }
 0xac1   : > { %18377 = vmatmul.mubr.msk.bf16.vlgmr.msra.gmra.mrb[48].mxu0 %vm24045_vm3, %v24287_v51  ;;  %v20445_v51 = vld [vmem:[#allocation5 + $0x1f0] sm:$0xff]   ;;  %vm21099_vm3 = vmmov 0  }
 0xac2   : > { %18380 = vmatprep.mubr.msk.bf16.mxu0 %vm24049_vm11, %v24314_v11  ;;  %18385 = vmatpush3.bf16.msra.mxu0 %v20439_v38  ;;  %v20446_v11 = vld [vmem:[#allocation5 + $0x1f8] sm:$0xff]   ;;  %vm9882_vm11 = vcmask 1045504  }
 0xac3   : > { %18386 = vmatprep.subr.bf16.mxu0 %v20440_v24  ;;  %18467 = vmatprep.mubr.msk.bf16.mxu1 %vm21099_vm3, %v26546_v15 }
 0xac6   : > { %18387 = vmatpush3.bf16.msra.mxu0 %v20440_v24  ;;  %v20495_v24 = vld [vmem:[#allocation7 + $0x120] sm:$0xff]  }
 0xac7   : > { %18388 = vmatprep.subr.bf16.mxu0 %v20441_v43 }
 0xac9   : > { %18381 = vmatmul.mubr.msk.bf16.gmra.mrb[52].mxu0 %vm24065_vm2, %v15648_v63  ;;  %v9445_v63 = vpack.c.bf16 %v26546_v15, %v24256_v36  ;;  %v20455_v36 = vld [vmem:[#allocation7 + $0x40] sm:$0xff]   ;;  %vm24497_vm2 = vcmp.ge.s32.totalorder %v9828_v18, 1  ;;  %v20490_v18 = vld [vmem:[#allocation7 + $0x148] sm:$0xff]  }
 0xaca   : > { %18389 = vmatpush3.bf16.msra.mxu0 %v20441_v43  ;;  %18400 = vmatprep.mubr.bf16.mxu0 %v24211_v42  ;;  %v20449_v42 = vld [vmem:[#allocation5 + $0x210] sm:$0xff]   ;;  %v24511_v43 = vrot.slane %v26546_v15, 5 }
 0xacb   : > { %18390 = vmatprep.subr.bf16.mxu0 %v20442_v32  ;;  %18452 = vmatpush3.bf16.msra.mxu1 %v20455_v36  ;;  %v20471_v36 = vld [vmem:[#allocation7 + $0x80] sm:$0xff]  }
 0xacc   : > { %18453 = vmatprep.subr.bf16.mxu1 %v26546_v15 }
 0xace   : > { %18391 = vmatpush3.bf16.msra.mxu0 %v20442_v32 }
 0xacf   : > { %18392 = vmatprep.subr.bf16.mxu0 %v20443_v30  ;;  %18454 = vmatpush3.bf16.msra.mxu1 %v20457_v21  ;;  %v20472_v21 = vld [vmem:[#allocation7 + $0xc0] sm:$0xff]  }
 0xad0   : > { %18455 = vmatprep.subr.bf16.mxu1 %v26546_v15 }
 0xad2   : > { %18393 = vmatpush3.bf16.msra.mxu0 %v20443_v30 }
 0xad3   : > { %18394 = vmatprep.subr.bf16.mxu0 %v20444_v48  ;;  %18456 = vmatpush3.bf16.msra.mxu1 %v20459_v29 }
 0xad4   : > { %18457 = vmatprep.subr.bf16.mxu1 %v26546_v15 }
 0xad6   : > { %18395 = vmatpush3.bf16.msra.mxu0 %v20444_v48 }
 0xad7   : > { %18396 = vmatprep.subr.bf16.mxu0 %v20445_v51 }
 0xada   : > { %18397 = vmatpush3.bf16.msra.mxu0 %v20445_v51 }
 0xadb   : > { %18398 = vmatprep.subr.bf16.mxu0 %v20446_v11 }
 0xade   : > { %18399 = vmatpush3.bf16.msra.mxu0 %v20446_v11 }
 0xadf   : > { %18408 = vmatprep.subr.bf16.mxu0 %v20447_v54 }
 0xae1   : > { %18401 = vmatmul.mubr.bf16.vlgmr.msra.gmra.mrb[48].mxu0 %v24267_v19  ;;  %v20452_v19 = vld [vmem:[#allocation5 + $0x228] sm:$0xff]  }
 0xae2   : > { %18404 = vmatprep.mubr.bf16.mxu0 %v24280_v52  ;;  %18409 = vmatpush3.bf16.msra.mxu0 %v20447_v54  ;;  %v20453_v52 = vld [vmem:[#allocation5 + $0x230] sm:$0xff]  }
 0xae3   : > { %18410 = vmatprep.subr.bf16.mxu0 %v20448_v44 }
 0xae6   : > { %18411 = vmatpush3.bf16.msra.mxu0 %v20448_v44 }
 0xae7   : > { %18412 = vmatprep.subr.bf16.mxu0 %v20449_v42 }
 0xae9   : > { %18405 = vmatmul.mubr.bf16.gmra.mrb[52].mxu0 %v9445_v63 }
 0xaea   : > { %18413 = vmatpush3.bf16.msra.mxu0 %v20449_v42  ;;  %18424 = vmatprep.mubr.msk.bf16.mxu0 %vm24069_vm1, %v24242_v49  ;;  %v9733_v49 = vld [vmem:[%s25606_s22] sm:$0xff]  ;;  %vm9834_vm1 = vcmask 1044480  }
 0xaeb   : > { %18414 = vmatprep.subr.bf16.mxu0 %v20450_v4 }
 0xaee   : > { %18415 = vmatpush3.bf16.msra.mxu0 %v20450_v4 }
 0xaef   : > { %18416 = vmatprep.subr.bf16.mxu0 %v20451_v31 }
 0xaf2   : > { %18417 = vmatpush3.bf16.msra.mxu0 %v20451_v31 }
 0xaf3   : > { %18418 = vmatprep.subr.bf16.mxu0 %v20452_v19 }
 0xaf6   : > { %18419 = vmatpush3.bf16.msra.mxu0 %v20452_v19 }
 0xaf7   : > { %18420 = vmatprep.subr.bf16.mxu0 %v20453_v52 }
 0xafa   : > { %18421 = vmatpush3.bf16.msra.mxu0 %v20453_v52 }
 0xafb   : > { %18422 = vmatprep.subr.bf16.mxu0 %v20454_v16 }
 0xafe   : > { %18423 = vmatpush3.bf16.msra.mxu0 %v20454_v16 }
 0xb01   : > { %18425 = vmatmul.mubr.msk.bf16.vlgmr.msra.gmra.mrb[48].mxu0 %vm24081_vm9, %v24318_v35  ;;  %v20461_v35 = vld [vmem:[#allocation7 + $0x58] sm:$0xff]   ;;  %vm24506_vm9 = vcmp.ge.s32.totalorder %v9829_v55, 1  ;;  %v20491_v55 = vld [vmem:[#allocation7 + $0x110] sm:$0xff]  }
 0xb02   : > { %18428 = vmatprep.mubr.msk.bf16.mxu0 %vm24085_vm7, %v24325_v7  ;;  %18458 = vmatpush3.bf16.msra.mxu1 %v20461_v35  ;;  %v20465_v7 = vld [vmem:[#allocation7 + $0x68] sm:$0xff]   ;;  %vm10067_vm7 = vcmask 1042432  }
 0xb03   : > { %18459 = vmatprep.subr.bf16.mxu1 %v26546_v15 }
 0xb06   : > { %18460 = vmatpush3.bf16.msra.mxu1 %v20463_v20 }
 0xb07   : > { %18461 = vmatprep.subr.bf16.mxu1 %v26546_v15 }
 0xb09   : > { %18429 = vmatmul.mubr.msk.bf16.gmra.mrb[52].mxu0 %vm24095_vm0, %v15676_v27  ;;  %vm24529_vm0 = vmpackc.low %vm24506_vm9, %vm24497_vm2 }
 0xb0a   : > { %18448 = vmatprep.mubr.msk.f32.mxu0 %vm9741_vm13, %v9733_v49  ;;  %18462 = vmatpush3.bf16.msra.mxu1 %v20465_v7  ;;  %vm26634_vm2 = vmmov %vm26629_vm12  ;;  %v20588_v49 = vld [vmem:[#allocation8 + $0x1e8] sm:$0xff]  }
 0xb0b   : > { %18463 = vmatprep.subr.bf16.mxu1 %v26546_v15  ;;  %vm26635_vm9 = vmmov %vm26634_vm2 }
 0xb0e   : > { %18464 = vmatpush3.bf16.msra.mxu1 %v20467_v9  ;;  %v20481_v9 = vld [vmem:[#allocation7 + $0xa8] sm:$0xff]  }
 0xb0f   : > { %18465 = vmatprep.subr.bf16.mxu1 %v26546_v15 }
 0xb12   : > { %18466 = vmatpush3.bf16.msra.mxu1 %v20469_v1  ;;  %v20483_v1 = vld [vmem:[#allocation7 + $0xb0] sm:$0xff]  }
 0xb13   : > { %18491 = vmatprep.subr.bf16.mxu1 %v26546_v15 }
 0xbd4   : > { %v18426_v39 = vpop.f32.mrb[48].mxu0 }
 0xbd5   : > { %v9694_v33 = vpop.f32.mrb[49].mxu0 }
 0xbd6   : > { %v18427_v47 = vpop.f32.mrb[50].mxu0 }
 0xbd7   : > { %v19294_v34 = vpack.c.bf16 %v18427_v47, %v18426_v39  ;;  %v9697_v12 = vpop.f32.mrb[51].mxu0 }
 0xbd8   : > { %v19290_v28 = vpack.c.bf16 %v9697_v12, %v9694_v33 }
 0xbda   : > { %19291 = vmatprep.subr.bf16.mxu0 %v19290_v28 }
 0xbdb   : > { %19293 = vmatpush3.bf16.msra.mxu0 %v19290_v28 }
 0xbdc   : > { %v18430_v40 = vpop.f32.mrb[52].mxu0  ;;  %19295 = vmatprep.subr.bf16.mxu0 %v19294_v34 }
 0xbdd   : > { %v9710_v17 = vpop.f32.mrb[53].mxu0 }
 0xbde   : > { %v18431_v57 = vpop.f32.mrb[54].mxu0 }
 0xbdf   : > { %v19302_v5 = vpack.c.bf16 %v18431_v57, %v18430_v40  ;;  %v9713_v8 = vpop.f32.mrb[55].mxu0  ;;  %19297 = vmatpush3.bf16.msra.mxu0 %v19294_v34  ;;  %v20473_v57 = vld [vmem:[#allocation7 + $0x88] sm:$0xff]  }
 0xbe0   : > { %v19298_v3 = vpack.c.bf16 %v9713_v8, %v9710_v17 }
 0xbe2   : > { %19299 = vmatprep.subr.bf16.mxu0 %v19298_v3 }
 0xbe3   : > { %19301 = vmatpush3.bf16.msra.mxu0 %v19298_v3 }
 0xbe4   : > { %19303 = vmatprep.subr.bf16.mxu0 %v19302_v5 }
 0xbe7   : > { %19305 = vmatpush3.bf16.msra.mxu0 %v19302_v5  ;;  %v20474_v5 = vld [vmem:[#allocation7 + $0xc8] sm:$0xff]  }
 0xbe8   : > { %18471 = vmatprep.subr.bf16.mxu0 %v26546_v15 }
 0xbea   : > { %18449 = vmatmul.mubr.msk.f32.vlgmr.msra.gmra.mrb[56].mxu0 %vm9741_vm13, %v9734_v50  ;;  %vm26633_vm13 = vmmov %vm26613_vm6 }
 0xbeb   : > { %18472 = vmatpush3.bf16.msra.mxu0 %v20456_v22  ;;  %18487 = vmatprep.mubr.msk.bf16.mxu0 %vm21099_vm3, %v26546_v15  ;;  %v20475_v22 = vld [vmem:[#allocation7 + $0x90] sm:$0xff]  }
 0xbec   : > { %18473 = vmatprep.subr.bf16.mxu0 %v26546_v15 }
 0xbef   : > { %18474 = vmatpush3.bf16.msra.mxu0 %v20458_v26  ;;  %v20476_v26 = vld [vmem:[#allocation7 + $0xd0] sm:$0xff]  }
 0xbf0   : > { %18475 = vmatprep.subr.bf16.mxu0 %v26546_v15 }
 0xbf3   : > { %18476 = vmatpush3.bf16.msra.mxu0 %v20460_v53  ;;  %v20477_v53 = vld [vmem:[#allocation7 + $0x98] sm:$0xff]  }
 0xbf4   : > { %18477 = vmatprep.subr.bf16.mxu0 %v26546_v15 }
 0xbf7   : > { %18478 = vmatpush3.bf16.msra.mxu0 %v20462_v13  ;;  %v20478_v13 = vld [vmem:[#allocation7 + $0xd8] sm:$0xff]  }
 0xbf8   : > { %18479 = vmatprep.subr.bf16.mxu0 %v26546_v15 }
 0xbfb   : > { %18480 = vmatpush3.bf16.msra.mxu0 %v20464_v60  ;;  %v20479_v60 = vld [vmem:[#allocation7 + $0xa0] sm:$0xff]  }
 0xbfc   : > { %18481 = vmatprep.subr.bf16.mxu0 %v26546_v15 }
 0xbff   : > { %18482 = vmatpush3.bf16.msra.mxu0 %v20466_v23  ;;  %v20480_v23 = vld [vmem:[#allocation7 + $0xe0] sm:$0xff]  }
 0xc00   : > { %18483 = vmatprep.subr.bf16.mxu0 %v26546_v15 }
 0xc03   : > { %18484 = vmatpush3.bf16.msra.mxu0 %v20468_v14  ;;  %v20482_v14 = vld [vmem:[#allocation7 + $0xe8] sm:$0xff]  }
 0xc04   : > { %18485 = vmatprep.subr.bf16.mxu0 %v26546_v15 }
 0xc07   : > { %18486 = vmatpush3.bf16.msra.mxu0 %v20470_v37  ;;  %v20484_v37 = vld [vmem:[#allocation7 + $0xf0] sm:$0xff]  }
 0xc08   : > { %18511 = vmatprep.subr.bf16.mxu0 %v26546_v15 }
 0xcbd   : > { %v18450_v6 = vpop.f32.mrb[56].mxu0 }
 0xcbe   : > { %v9820_v41 = vadd.f32 %v18450_v6, %v15678_v2  ;;  %v9814_v25 = vpop.f32.mrb[57].mxu0  ;;  %v20486_v6 = vld [vmem:[#allocation7 + $0xf8] sm:$0xff]  }
 0xcbf   : > { %v9815_v61 = vadd.f32 %v15678_v2, %v9814_v25  ;;  %v20485_v2 = vld [vmem:[#allocation7 + $0xb8] sm:$0xff]   ;;  %v20487_v25 = vld [vmem:[#allocation7 + $0x100] sm:$0xff]  }
 0xcc0   : > { %v9824_v56 = vmax.f32 %v9820_v41, 0.0  ;;  %v24872_v41 = vld [vmem:[#allocation10 + $0x198] sm:$0xff]  }
 0xcc1   : > { %v9823_v38 = vmax.f32 %v9815_v61, 0.0  ;;  %v20488_v61 = vld [vmem:[#allocation7 + $0x140] sm:$0xff]  }
 0xcc2   : > { %v9862_v32 = vpack.c.bf16 %v9824_v56, %v9824_v56  ;;  %v9838_v30 = vrot.slane %v9824_v56, 3  ;;  %v10071_v48 = vrot.slane %v9824_v56, 5  ;;  %v10188_v51 = vrot.slane %v9824_v56, 7  ;;  %9826 = vst [vmem:[%s24513_s1 + $0x8] sm:$0xff] %v9824_v56 }
 0xcc3   : > { %v9861_v11 = vpack.c.bf16 %v9823_v38, %v26546_v15  ;;  %v9836_v54 = vrot.slane %v9823_v38, 3  ;;  %v10069_v44 = vrot.slane %v9823_v38, 5  ;;  %v10186_v42 = vrot.slane %v9823_v38, 7  ;;  %9825 = vst [vmem:[%s24513_s1] sm:$0xff] %v9823_v38 }
 0xcc4   : > { %v9884_v63 = vrot.slane %v9862_v32, 2  ;;  %v24518_v4 = vpack.c.bf16 %v9824_v56, %v9823_v38  ;;  %v10412_v31 = vrot.slane %v9823_v38, 1  ;;  %v10413_v19 = vrot.slane %v9824_v56, 1  ;;  %v20492_v56 = vld [vmem:[#allocation7 + $0x150] sm:$0xff]   ;;  %v20494_v38 = vld [vmem:[#allocation7 + $0x158] sm:$0xff]   ;;  %v20496_v32 = vld [vmem:[#allocation7 + $0x160] sm:$0xff]  }
 0xcc5   : > { %v9883_v52 = vrot.slane %v9861_v11, 2  ;;  %v9837_v16 = vsel %vm9834_vm1, %v24502_v62, %v9836_v54  ;;  %v24523_v27 = vsel %vm9834_vm1, %v9836_v54, %v9838_v30  ;;  %v24535_v29 = vsel %vm10067_vm7, %v24511_v43, %v10069_v44  ;;  %v20500_v11 = vld [vmem:[#allocation7 + $0x170] sm:$0xff]   ;;  %v20501_v54 = vld [vmem:[#allocation7 + $0x138] sm:$0xff]  }
 0xcc6   : > { %v15698_v35 = vpack.c.bf16 %v24523_v27, %v9837_v16  ;;  %v24539_v20 = vsel %vm10067_vm7, %v10069_v44, %v10071_v48  ;;  %v24543_v7 = vsel %vm26626_vm14, %v26518_v10, %v10186_v42  ;;  %v24546_v39 = vsel %vm26627_vm10, %v10186_v42, %v10188_v51  ;;  %v20499_v51 = vld [vmem:[#allocation7 + $0x130] sm:$0xff]   ;;  %v20502_v44 = vld [vmem:[#allocation7 + $0x178] sm:$0xff]   ;;  %v20503_v42 = vld [vmem:[#allocation7 + $0x180] sm:$0xff]  }
 0xcc7   : > { %v9885_v33 = vsel %vm9882_vm11, %v9883_v52, %v9884_v63  ;;  %v15709_v47 = vpack.c.bf16 %v24539_v20, %v24535_v29  ;;  %v15720_v34 = vpack.c.bf16 %v24546_v39, %v24543_v7  ;;  %v24554_v12 = vsel %vm26628_vm15, %v10412_v31, %v10413_v19  ;;  %v20504_v63 = vld [vmem:[#allocation7 + $0x1c0] sm:$0xff]   ;;  %v20505_v31 = vld [vmem:[#allocation7 + $0x188] sm:$0xff]   ;;  %v20507_v52 = vld [vmem:[#allocation7 + $0x190] sm:$0xff]  }
 0xcc8   : > { %18468 = vmatmul.mubr.bf16.vlgmr.msra.gmra.mrb[40].mxu1 %v9885_v33  ;;  %18488 = vmatmul.mubr.msk.bf16.vlgmr.msra.gmra.mrb[60].mxu0 %vm24529_vm0, %v15698_v35  ;;  %v24560_v28 = vsel %vm26629_vm12, %v10413_v19, %v26548_v45  ;;  %v24564_v40 = vsel %vm9834_vm1, %v9838_v30, %v24502_v62  ;;  %v24568_v17 = vsel %vm10067_vm7, %v10071_v48, %v24511_v43  ;;  %v20497_v30 = vld [vmem:[#allocation7 + $0x128] sm:$0xff]   ;;  %v20508_v16 = vld [vmem:[#allocation7 + $0x1d0] sm:$0xff]   ;;  %v20511_v29 = vld [vmem:[#allocation7 + $0x1a0] sm:$0xff]  }
 0xcc9   : > { %18492 = vmatpush3.bf16.msra.mxu1 %v20471_v36  ;;  %18512 = vmatpush3.bf16.msra.mxu0 %v20472_v21  ;;  %v15739_v8 = vpack.c.bf16 %v24560_v28, %v24554_v12  ;;  %v15750_v3 = vpack.c.bf16 %v24564_v40, %v24523_v27  ;;  %v15769_v50 = vpack.c.bf16 %v24568_v17, %v24539_v20  ;;  %v20498_v48 = vld [vmem:[#allocation7 + $0x168] sm:$0xff]   ;;  %v20509_v36 = vld [vmem:[#allocation7 + $0x198] sm:$0xff]   ;;  %v20512_v35 = vld [vmem:[#allocation7 + $0x1e0] sm:$0xff]   ;;  %v10661_v28 = vrot.slane %v24518_v4, 2 }
 0xcca   : > { %18493 = vmatprep.subr.bf16.mxu1 %v26546_v15  ;;  %18513 = vmatprep.subr.bf16.mxu0 %v26546_v15  ;;  %v20506_v19 = vld [vmem:[#allocation7 + $0x1c8] sm:$0xff]   ;;  %v20510_v21 = vld [vmem:[#allocation7 + $0x1d8] sm:$0xff]   ;;  %v20515_v33 = vld [vmem:[#allocation7 + $0x1b0] sm:$0xff]  }
 0xccb   : > { %18507 = vmatprep.mubr.msk.bf16.mxu1 %vm21099_vm3, %v26546_v15  ;;  %18527 = vmatprep.mubr.msk.bf16.mxu0 %vm21099_vm3, %v26546_v15  ;;  %v20513_v7 = vld [vmem:[#allocation7 + $0x1a8] sm:$0xff]   ;;  %v20518_v12 = vld [vmem:[#allocation7 + $0x1f8] sm:$0xff]   ;;  %v20523_v40 = vld [vmem:[#allocation7 + $0x220] sm:$0xff]  }
 0xccc   : > { %v20514_v39 = vld [vmem:[#allocation7 + $0x1e8] sm:$0xff]   ;;  %v20522_v27 = vld [vmem:[#allocation7 + $0x218] sm:$0xff]   ;;  %v20531_v20 = vld [vmem:[#allocation8 + $0x60] sm:$0xff]  }
 0xccd   : > { %18494 = vmatpush3.bf16.msra.mxu1 %v20473_v57  ;;  %18514 = vmatpush3.bf16.msra.mxu0 %v20474_v5  ;;  %v24660_v57 = vrot.slane %v26530_v46, 2  ;;  %v20519_v5 = vld [vmem:[#allocation7 + $0x200] sm:$0xff]  }
 0xcce   : > { %18495 = vmatprep.subr.bf16.mxu1 %v26546_v15  ;;  %18515 = vmatprep.subr.bf16.mxu0 %v26546_v15 }
 0xcd1   : > { %18496 = vmatpush3.bf16.msra.mxu1 %v20475_v22  ;;  %18516 = vmatpush3.bf16.msra.mxu0 %v20476_v26  ;;  %v20521_v22 = vld [vmem:[#allocation7 + $0x210] sm:$0xff]  }
 0xcd2   : > { %18497 = vmatprep.subr.bf16.mxu1 %v26546_v15  ;;  %18517 = vmatprep.subr.bf16.mxu0 %v26546_v15  ;;  %v20525_v26 = vld [vmem:[#allocation7 + $0x230] sm:$0xff]  }
 0xcd5   : > { %18498 = vmatpush3.bf16.msra.mxu1 %v20477_v53  ;;  %18518 = vmatpush3.bf16.msra.mxu0 %v20478_v13  ;;  %v20526_v53 = vld [vmem:[#allocation7 + $0x238] sm:$0xff]   ;;  %v20527_v13 = vld [vmem:[#allocation8 + $0x40] sm:$0xff]  }
 0xcd6   : > { %18499 = vmatprep.subr.bf16.mxu1 %v26546_v15  ;;  %18519 = vmatprep.subr.bf16.mxu0 %v26546_v15 }
 0xcd9   : > { %18500 = vmatpush3.bf16.msra.mxu1 %v20479_v60  ;;  %18520 = vmatpush3.bf16.msra.mxu0 %v20480_v23  ;;  %v20528_v60 = vld [vmem:[#allocation8 + $0x48] sm:$0xff]   ;;  %v20529_v23 = vld [vmem:[#allocation8 + $0x50] sm:$0xff]  }
 0xcda   : > { %18501 = vmatprep.subr.bf16.mxu1 %v26546_v15  ;;  %18521 = vmatprep.subr.bf16.mxu0 %v26546_v15 }
 0xcdd   : > { %18502 = vmatpush3.bf16.msra.mxu1 %v20481_v9  ;;  %18522 = vmatpush3.bf16.msra.mxu0 %v20482_v14 }
 0xcde   : > { %18503 = vmatprep.subr.bf16.mxu1 %v26546_v15  ;;  %18523 = vmatprep.subr.bf16.mxu0 %v26546_v15 }
 0xce1   : > { %18504 = vmatpush3.bf16.msra.mxu1 %v20483_v1  ;;  %18524 = vmatpush3.bf16.msra.mxu0 %v20484_v37 }
 0xce2   : > { %18505 = vmatprep.subr.bf16.mxu1 %v26546_v15  ;;  %18525 = vmatprep.subr.bf16.mxu0 %v26546_v15 }
 0xce5   : > { %18506 = vmatpush3.bf16.msra.mxu1 %v20485_v2  ;;  %18526 = vmatpush3.bf16.msra.mxu0 %v20486_v6 }
 0xce6   : > { %18531 = vmatprep.subr.bf16.mxu1 %v26546_v15  ;;  %18551 = vmatprep.subr.bf16.mxu0 %v26546_v15 }
 0xce8   : > { %18508 = vmatmul.mubr.msk.bf16.vlgmr.msra.gmra.mrb[44].mxu1 %vm24598_vm4, %v15709_v47  ;;  %18528 = vmatmul.mubr.msk.bf16.vlgmr.msra.gmra.mrb[64].mxu0 %vm24529_vm0, %v15720_v34  ;;  %v20516_v47 = vld [vmem:[#allocation7 + $0x1f0] sm:$0xff]   ;;  %v20517_v34 = vld [vmem:[#allocation7 + $0x1b8] sm:$0xff]  }
 0xce9   : > { %18532 = vmatpush3.bf16.msra.mxu1 %v20487_v25  ;;  %18552 = vmatpush3.bf16.msra.mxu0 %v20488_v61 }
 0xcea   : > { %18533 = vmatprep.subr.bf16.mxu1 %v26546_v15  ;;  %18553 = vmatprep.subr.bf16.mxu0 %v26546_v15 }
 0xceb   : > { %18547 = vmatprep.mubr.msk.bf16.mxu1 %vm21099_vm3, %v26546_v15  ;;  %18567 = vmatprep.mubr.msk.bf16.mxu0 %vm21099_vm3, %v26546_v15 }
 0xced   : > { %18534 = vmatpush3.bf16.msra.mxu1 %v20489_v0  ;;  %18554 = vmatpush3.bf16.msra.mxu0 %v20490_v18  ;;  %v20532_v0 = vld [vmem:[#allocation8 + $0x68] sm:$0xff]   ;;  %v20533_v18 = vld [vmem:[#allocation8 + $0x70] sm:$0xff]  }
 0xcee   : > { %18535 = vmatprep.subr.bf16.mxu1 %v26546_v15  ;;  %18555 = vmatprep.subr.bf16.mxu0 %v26546_v15 }
 0xcf1   : > { %18536 = vmatpush3.bf16.msra.mxu1 %v20491_v55  ;;  %18556 = vmatpush3.bf16.msra.mxu0 %v20492_v56  ;;  %v20534_v55 = vld [vmem:[#allocation8 + $0x78] sm:$0xff]  }
 0xcf2   : > { %18537 = vmatprep.subr.bf16.mxu1 %v26546_v15  ;;  %18557 = vmatprep.subr.bf16.mxu0 %v26546_v15 }
 0xcf5   : > { %18538 = vmatpush3.bf16.msra.mxu1 %v20493_v58  ;;  %18558 = vmatpush3.bf16.msra.mxu0 %v20494_v38 }
 0xcf6   : > { %18539 = vmatprep.subr.bf16.mxu1 %v26546_v15  ;;  %18559 = vmatprep.subr.bf16.mxu0 %v26546_v15 }
 0xcf9   : > { %18540 = vmatpush3.bf16.msra.mxu1 %v20495_v24  ;;  %18560 = vmatpush3.bf16.msra.mxu0 %v20496_v32 }
 0xcfa   : > { %18541 = vmatprep.subr.bf16.mxu1 %v26546_v15  ;;  %18561 = vmatprep.subr.bf16.mxu0 %v26546_v15 }
 0xcfd   : > { %18542 = vmatpush3.bf16.msra.mxu1 %v20497_v30  ;;  %18562 = vmatpush3.bf16.msra.mxu0 %v20498_v48 }
 0xcfe   : > { %18543 = vmatprep.subr.bf16.mxu1 %v26546_v15  ;;  %18563 = vmatprep.subr.bf16.mxu0 %v26546_v15 }
 0xd01   : > { %18544 = vmatpush3.bf16.msra.mxu1 %v20499_v51  ;;  %18564 = vmatpush3.bf16.msra.mxu0 %v20500_v11 }
 0xd02   : > { %18545 = vmatprep.subr.bf16.mxu1 %v26546_v15  ;;  %18565 = vmatprep.subr.bf16.mxu0 %v26546_v15 }
 0xd05   : > { %18546 = vmatpush3.bf16.msra.mxu1 %v20501_v54  ;;  %18566 = vmatpush3.bf16.msra.mxu0 %v20502_v44 }
 0xd06   : > { %18571 = vmatprep.subr.bf16.mxu1 %v26546_v15  ;;  %18591 = vmatprep.subr.bf16.mxu0 %v26546_v15 }
 0xd08   : > { %18548 = vmatmul.mubr.bf16.vlgmr.msra.gmra.mrb[48].mxu1 %v24518_v4  ;;  %18568 = vmatmul.mubr.msk.bf16.vlgmr.msra.gmra.mrb[68].mxu0 %vm24598_vm4, %v15739_v8  ;;  %v10663_v8 = vsel %vm9882_vm11, %v10661_v28, %v24660_v57  ;;  %v20520_v4 = vld [vmem:[#allocation7 + $0x208] sm:$0xff]  }
 0xd09   : > { %18572 = vmatpush3.bf16.msra.mxu1 %v20503_v42  ;;  %18592 = vmatpush3.bf16.msra.mxu0 %v20504_v63 }
 0xd0a   : > { %18573 = vmatprep.subr.bf16.mxu1 %v26546_v15  ;;  %18593 = vmatprep.subr.bf16.mxu0 %v26546_v15 }
 0xd0b   : > { %18587 = vmatprep.mubr.msk.bf16.mxu1 %vm21099_vm3, %v26546_v15  ;;  %18607 = vmatprep.mubr.msk.bf16.mxu0 %vm21099_vm3, %v26546_v15 }
 0xd0d   : > { %18574 = vmatpush3.bf16.msra.mxu1 %v20505_v31  ;;  %18594 = vmatpush3.bf16.msra.mxu0 %v20506_v19 }
 0xd0e   : > { %18575 = vmatprep.subr.bf16.mxu1 %v26546_v15  ;;  %18595 = vmatprep.subr.bf16.mxu0 %v26546_v15 }
 0xd11   : > { %18576 = vmatpush3.bf16.msra.mxu1 %v20507_v52  ;;  %18596 = vmatpush3.bf16.msra.mxu0 %v20508_v16 }
 0xd12   : > { %18577 = vmatprep.subr.bf16.mxu1 %v26546_v15  ;;  %18597 = vmatprep.subr.bf16.mxu0 %v26546_v15 }
 0xd15   : > { %18578 = vmatpush3.bf16.msra.mxu1 %v20509_v36  ;;  %18598 = vmatpush3.bf16.msra.mxu0 %v20510_v21 }
 0xd16   : > { %18579 = vmatprep.subr.bf16.mxu1 %v26546_v15  ;;  %18599 = vmatprep.subr.bf16.mxu0 %v26546_v15 }
 0xd19   : > { %18580 = vmatpush3.bf16.msra.mxu1 %v20511_v29  ;;  %18600 = vmatpush3.bf16.msra.mxu0 %v20512_v35 }
 0xd1a   : > { %18581 = vmatprep.subr.bf16.mxu1 %v26546_v15  ;;  %18601 = vmatprep.subr.bf16.mxu0 %v26546_v15 }
 0xd1d   : > { %18582 = vmatpush3.bf16.msra.mxu1 %v20513_v7  ;;  %18602 = vmatpush3.bf16.msra.mxu0 %v20514_v39 }
 0xd1e   : > { %18583 = vmatprep.subr.bf16.mxu1 %v26546_v15  ;;  %18603 = vmatprep.subr.bf16.mxu0 %v26546_v15 }
 0xd21   : > { %18584 = vmatpush3.bf16.msra.mxu1 %v20515_v33  ;;  %18604 = vmatpush3.bf16.msra.mxu0 %v20516_v47 }
 0xd22   : > { %18585 = vmatprep.subr.bf16.mxu1 %v26546_v15  ;;  %18605 = vmatprep.subr.bf16.mxu0 %v26546_v15 }
 0xd25   : > { %18586 = vmatpush3.bf16.msra.mxu1 %v20517_v34  ;;  %18606 = vmatpush3.bf16.msra.mxu0 %v20518_v12 }
 0xd26   : > { %18611 = vmatprep.subr.bf16.mxu1 %v26546_v15  ;;  %18631 = vmatprep.subr.bf16.mxu0 %v26546_v15 }
 0xd28   : > { %18588 = vmatmul.mubr.msk.bf16.vlgmr.msra.gmra.mrb[52].mxu1 %vm24529_vm0, %v15750_v3  ;;  %18608 = vmatmul.mubr.bf16.vlgmr.msra.gmra.mrb[72].mxu0 %v10663_v8  ;;  %v20524_v3 = vld [vmem:[#allocation7 + $0x228] sm:$0xff]  }
 0xd29   : > { %18612 = vmatpush3.bf16.msra.mxu1 %v20519_v5  ;;  %18627 = vmatprep.mubr.msk.bf16.mxu1 %vm21099_vm3, %v26546_v15 }
 0xd2a   : > { %18613 = vmatprep.subr.bf16.mxu1 %v26546_v15  ;;  %18647 = vmatprep.mubr.msk.bf16.mxu0 %vm21099_vm3, %v26546_v15 }
 0xd2b   : > { %18632 = vmatpush3.bf16.msra.mxu0 %v20527_v13 }
 0xd2c   : > { %18633 = vmatprep.subr.bf16.mxu0 %v26546_v15 }
 0xd2d   : > { %18614 = vmatpush3.bf16.msra.mxu1 %v20520_v4 }
 0xd2e   : > { %18615 = vmatprep.subr.bf16.mxu1 %v26546_v15 }
 0xd2f   : > { %18634 = vmatpush3.bf16.msra.mxu0 %v20528_v60 }
 0xd30   : > { %18635 = vmatprep.subr.bf16.mxu0 %v26546_v15 }
 0xd31   : > { %18616 = vmatpush3.bf16.msra.mxu1 %v20521_v22 }
 0xd32   : > { %18617 = vmatprep.subr.bf16.mxu1 %v26546_v15 }
 0xd33   : > { %18636 = vmatpush3.bf16.msra.mxu0 %v20529_v23 }
 0xd34   : > { %18637 = vmatprep.subr.bf16.mxu0 %v26546_v15 }
 0xd35   : > { %18618 = vmatpush3.bf16.msra.mxu1 %v20522_v27 }
 0xd36   : > { %18619 = vmatprep.subr.bf16.mxu1 %v26546_v15 }
 0xd39   : > { %18620 = vmatpush3.bf16.msra.mxu1 %v20523_v40 }
 0xd3a   : > { %18621 = vmatprep.subr.bf16.mxu1 %v26546_v15 }
 0xd3d   : > { %18622 = vmatpush3.bf16.msra.mxu1 %v20524_v3 }
 0xd3e   : > { %18623 = vmatprep.subr.bf16.mxu1 %v26546_v15 }
 0xd41   : > { %18624 = vmatpush3.bf16.msra.mxu1 %v20525_v26 }
 0xd42   : > { %18625 = vmatprep.subr.bf16.mxu1 %v26546_v15 }
 0xd45   : > { %18626 = vmatpush3.bf16.msra.mxu1 %v20526_v53  ;;  %v15771_v53 = vld [vmem:[%s26632_s15] ss:$0 sm:$0xff] }
 0xd46   : > { %19306 = vmatprep.subr.bf16.mxu1 %v26530_v46  ;;  %v20530_v46 = vld [vmem:[#allocation8 + $0x58] sm:$0xff]  }
 0xd47   : > { %18638 = vmatpush3.bf16.msra.mxu0 %v20530_v46 }
 0xd48   : > { %18628 = vmatmul.mubr.msk.bf16.vlgmr.msra.gmra.mrb[56].mxu1 %vm24598_vm4, %v15769_v50  ;;  %18639 = vmatprep.subr.bf16.mxu0 %v26546_v15 }
 0xd49   : > { %18815 = vmatprep.mubr.msk.f32.mxu1 %vm21099_vm3, %v26546_v15 }
 0xd4b   : > { %18640 = vmatpush3.bf16.msra.mxu0 %v20531_v20 }
 0xd4c   : > { %18641 = vmatprep.subr.bf16.mxu0 %v26546_v15 }
 0xd4f   : > { %18642 = vmatpush3.bf16.msra.mxu0 %v20532_v0 }
 0xd50   : > { %18643 = vmatprep.subr.bf16.mxu0 %v26546_v15 }
 0xd53   : > { %18644 = vmatpush3.bf16.msra.mxu0 %v20533_v18 }
 0xd54   : > { %18645 = vmatprep.subr.bf16.mxu0 %v26546_v15 }
 0xd57   : > { %18646 = vmatpush3.bf16.msra.mxu0 %v20534_v55 }
 0xd58   : > { %18651 = vmatprep.subr.bf16.mxu0 %v26546_v15 }
 0xd9b   : > { %v9969_v17 = vpop.f32.mrb[40].mxu1  ;;  %v10058_v50 = vpop.f32.mrb[60].mxu0 }
 0xd9c   : > { %v10059_v9 = vadd.f32 %v10058_v50, %v9969_v17  ;;  %v18469_v14 = vpop.f32.mrb[41].mxu1  ;;  %v18489_v1 = vpop.f32.mrb[61].mxu0 }
 0xd9d   : > { %v9972_v37 = vpop.f32.mrb[42].mxu1  ;;  %v10061_v2 = vpop.f32.mrb[62].mxu0 }
 0xd9e   : > { %v10062_v6 = vadd.f32 %v10061_v2, %v9972_v37  ;;  %v18470_v25 = vpop.f32.mrb[43].mxu1  ;;  %v18490_v61 = vpop.f32.mrb[63].mxu0 }
 0xdbb   : > { %v10177_v56 = vpop.f32.mrb[44].mxu1  ;;  %v10294_v58 = vpop.f32.mrb[64].mxu0 }
 0xdbc   : > { %v10184_v38 = vadd.f32 %v10177_v56, %v10059_v9  ;;  %v18509_v24 = vpop.f32.mrb[45].mxu1  ;;  %v18529_v32 = vpop.f32.mrb[65].mxu0 }
 0xdbd   : > { %v10180_v30 = vpop.f32.mrb[46].mxu1  ;;  %v10297_v48 = vpop.f32.mrb[66].mxu0 }
 0xdbe   : > { %v10301_v51 = vadd.f32 %v10294_v58, %v10184_v38  ;;  %v10185_v11 = vadd.f32 %v10180_v30, %v10062_v6  ;;  %v18510_v54 = vpop.f32.mrb[47].mxu1  ;;  %v18530_v44 = vpop.f32.mrb[67].mxu0 }
 0xdc0   : > { %v10302_v42 = vadd.f32 %v10297_v48, %v10185_v11  ;;  %v20535_v48 = vld [vmem:[#allocation8] sm:$0xff]  }
 0xddb   : > { %v10403_v63 = vpop.f32.mrb[48].mxu1  ;;  %v10520_v31 = vpop.f32.mrb[68].mxu0 }
 0xddc   : > { %v10410_v19 = vadd.f32 %v10403_v63, %v10301_v51  ;;  %v18549_v52 = vpop.f32.mrb[49].mxu1  ;;  %v18569_v16 = vpop.f32.mrb[69].mxu0 }
 0xddd   : > { %v10406_v36 = vpop.f32.mrb[50].mxu1  ;;  %v10523_v21 = vpop.f32.mrb[70].mxu0 }
 0xdde   : > { %v10527_v29 = vadd.f32 %v10520_v31, %v10410_v19  ;;  %v10411_v35 = vadd.f32 %v10406_v36, %v10302_v42  ;;  %v18550_v7 = vpop.f32.mrb[51].mxu1  ;;  %v18570_v39 = vpop.f32.mrb[71].mxu0 }
 0xddf   : > { %v20539_v39 = vld [vmem:[#allocation8 + $0x20] sm:$0xff]  }
 0xde0   : > { %v10528_v33 = vadd.f32 %v10523_v21, %v10411_v35 }
 0xdfb   : > { %v10633_v47 = vpop.f32.mrb[52].mxu1  ;;  %v10747_v34 = vpop.f32.mrb[72].mxu0 }
 0xdfc   : > { %v10640_v12 = vadd.f32 %v10633_v47, %v10527_v29  ;;  %v18589_v28 = vpop.f32.mrb[53].mxu1  ;;  %v18609_v5 = vpop.f32.mrb[73].mxu0  ;;  %v20536_v29 = vld [vmem:[#allocation8 + $0x8] sm:$0xff]   ;;  %v20541_v47 = vld [vmem:[#allocation8 + $0x30] sm:$0xff]  }
 0xdfd   : > { %v10636_v8 = vpop.f32.mrb[54].mxu1  ;;  %v10750_v4 = vpop.f32.mrb[74].mxu0  ;;  %v20544_v28 = vld [vmem:[#allocation8 + $0x88] sm:$0xff]   ;;  %v20545_v5 = vld [vmem:[#allocation8 + $0x90] sm:$0xff]  }
 0xdfe   : > { %v10754_v22 = vadd.f32 %v10747_v34, %v10640_v12  ;;  %v10641_v27 = vadd.f32 %v10636_v8, %v10528_v33  ;;  %v18590_v40 = vpop.f32.mrb[55].mxu1  ;;  %v18610_v3 = vpop.f32.mrb[75].mxu0  ;;  %v20540_v33 = vld [vmem:[#allocation8 + $0x28] sm:$0xff]   ;;  %v20542_v34 = vld [vmem:[#allocation8 + $0x38] sm:$0xff]   ;;  %v20543_v12 = vld [vmem:[#allocation8 + $0x80] sm:$0xff]  }
 0xdff   : > { %v20546_v8 = vld [vmem:[#allocation8 + $0x98] sm:$0xff]   ;;  %v20551_v3 = vld [vmem:[#allocation8 + $0xc0] sm:$0xff]  }
 0xe00   : > { %v10755_v26 = vadd.f32 %v10750_v4, %v10641_v27  ;;  %v20547_v4 = vld [vmem:[#allocation8 + $0xa0] sm:$0xff]   ;;  %v20549_v27 = vld [vmem:[#allocation8 + $0xb0] sm:$0xff]   ;;  %v20550_v40 = vld [vmem:[#allocation8 + $0xb8] sm:$0xff]  }
 0xe1b   : > { %v10860_v13 = vpop.f32.mrb[56].mxu1 }
 0xe1c   : > { %v10867_v60 = vadd.f32 %v10860_v13, %v10754_v22  ;;  %v18629_v23 = vpop.f32.mrb[57].mxu1  ;;  %v20548_v22 = vld [vmem:[#allocation8 + $0xa8] sm:$0xff]   ;;  %v20554_v13 = vld [vmem:[#allocation8 + $0xd8] sm:$0xff]  }
 0xe1d   : > { %v10863_v46 = vpop.f32.mrb[58].mxu1  ;;  %v20556_v23 = vld [vmem:[#allocation8 + $0xe8] sm:$0xff]  }
 0xe1e   : > { %v10875_v20 = vadd.f32 %v15771_v53, %v10867_v60  ;;  %v10868_v17 = vadd.f32 %v10863_v46, %v10755_v26  ;;  %v18630_v50 = vpop.f32.mrb[59].mxu1  ;;  %v20552_v26 = vld [vmem:[#allocation8 + $0xc8] sm:$0xff]   ;;  %v20555_v60 = vld [vmem:[#allocation8 + $0xe0] sm:$0xff]   ;;  %v20557_v46 = vld [vmem:[#allocation8 + $0xf0] sm:$0xff]  }
 0xe1f   : > { %v20560_v50 = vld [vmem:[#allocation8 + $0x108] sm:$0xff]  }
 0xe20   : > { %v10877_v9 = vmax.f32 %v10875_v20, 0.0  ;;  %v10876_v14 = vadd.f32 %v15771_v53, %v10868_v17  ;;  %v20553_v53 = vld [vmem:[#allocation8 + $0xd0] sm:$0xff]   ;;  %v20558_v20 = vld [vmem:[#allocation8 + $0xf8] sm:$0xff]   ;;  %v20559_v17 = vld [vmem:[#allocation8 + $0x100] sm:$0xff]  }
 0xe22   : > { %v10878_v1 = vmax.f32 %v10876_v14, 0.0  ;;  %v10907_v37 = vpack.c.bf16 %v10877_v9, %v26546_v15  ;;  %v10882_v2 = vrot.slane %v10877_v9, 3  ;;  %v11110_v6 = vrot.slane %v10877_v9, 5  ;;  %v20562_v14 = vld [vmem:[#allocation8 + $0x118] sm:$0xff]  }
 0xe23   : > { %v11227_v25 = vrot.slane %v10877_v9, 7  ;;  %v11453_v61 = vrot.slane %v10877_v9, 1 }
 0xe24   : > { %v10908_v0 = vpack.c.bf16 %v10878_v1, %v10878_v1  ;;  %v10928_v18 = vrot.slane %v10907_v37, 2  ;;  %v10883_v55 = vsel %vm9834_vm1, %v24502_v62, %v10882_v2  ;;  %v10884_v56 = vrot.slane %v10878_v1, 3  ;;  %v20564_v37 = vld [vmem:[#allocation8 + $0x128] sm:$0xff]  }
 0xe25   : > { %v24706_v58 = vsel %vm10067_vm7, %v24511_v43, %v11110_v6  ;;  %v11112_v38 = vrot.slane %v10878_v1, 5  ;;  %v24710_v24 = vsel %vm26613_vm6, %v26518_v10, %v11227_v25  ;;  %v11229_v32 = vrot.slane %v10878_v1, 7 }
 0xe26   : > { %v10929_v30 = vrot.slane %v10908_v0, 2  ;;  %v24713_v51 = vsel %vm9834_vm1, %v10882_v2, %v10884_v56  ;;  %v24715_v11 = vpack.c.bf16 %v10878_v1, %v10877_v9  ;;  %v11454_v54 = vrot.slane %v10878_v1, 1  ;;  %v20561_v9 = vld [vmem:[#allocation8 + $0x110] sm:$0xff]   ;;  %v20563_v1 = vld [vmem:[#allocation8 + $0x120] sm:$0xff]  }
 0xe27   : > { %v15789_v44 = vpack.c.bf16 %v24713_v51, %v10883_v55  ;;  %v24719_v42 = vsel %vm10067_vm7, %v11110_v6, %v11112_v38  ;;  %v24722_v63 = vsel %vm26633_vm13, %v11227_v25, %v11229_v32  ;;  %v24726_v10 = vsel %vm9834_vm1, %v10884_v56, %v24502_v62  ;;  %v20565_v2 = vld [vmem:[#allocation8 + $0x130] sm:$0xff]   ;;  %v20566_v6 = vld [vmem:[#allocation8 + $0x138] sm:$0xff]   ;;  %v20567_v25 = vld [vmem:[#allocation8 + $0x140] sm:$0xff]  }
 0xe28   : > { %v10930_v31 = vsel %vm9882_vm11, %v10928_v18, %v10929_v30  ;;  %v15800_v19 = vpack.c.bf16 %v24719_v42, %v24706_v58  ;;  %v15811_v52 = vpack.c.bf16 %v24722_v63, %v24710_v24  ;;  %v24734_v16 = vsel %vm26634_vm2, %v11453_v61, %v11454_v54  ;;  %v20568_v61 = vld [vmem:[#allocation8 + $0x148] sm:$0xff]   ;;  %v20569_v0 = vld [vmem:[#allocation8 + $0x150] sm:$0xff]   ;;  %v20570_v18 = vld [vmem:[#allocation8 + $0x158] sm:$0xff]  }
 0xe29   : > { %18648 = vmatmul.mubr.bf16.vlgmr.msra.gmra.mrb[76].mxu0 %v10930_v31  ;;  %v24738_v36 = vsel %vm26635_vm9, %v11454_v54, %v26548_v45  ;;  %v15841_v62 = vpack.c.bf16 %v24726_v10, %v24713_v51  ;;  %v24744_v21 = vsel %vm10067_vm7, %v11112_v38, %v24511_v43  ;;  %v20537_v45 = vld [vmem:[#allocation8 + $0x10] sm:$0xff]   ;;  %v20538_v43 = vld [vmem:[#allocation8 + $0x18] sm:$0xff]   ;;  %v20571_v55 = vld [vmem:[#allocation8 + $0x160] sm:$0xff]  }
 0xe2a   : > { %18652 = vmatpush3.bf16.msra.mxu0 %v20535_v48  ;;  %18667 = vmatprep.mubr.msk.bf16.mxu0 %vm21099_vm3, %v26546_v15  ;;  %v15830_v35 = vpack.c.bf16 %v24738_v36, %v24734_v16  ;;  %v15860_v7 = vpack.c.bf16 %v24744_v21, %v24719_v42  ;;  %v20572_v56 = vld [vmem:[#allocation8 + $0x168] sm:$0xff]   ;;  %v20573_v58 = vld [vmem:[#allocation8 + $0x170] sm:$0xff]   ;;  %v20574_v38 = vld [vmem:[#allocation8 + $0x178] sm:$0xff]  }
 0xe2b   : > { %18653 = vmatprep.subr.bf16.mxu0 %v26546_v15  ;;  %v20575_v24 = vld [vmem:[#allocation8 + $0x180] sm:$0xff]   ;;  %v20576_v32 = vld [vmem:[#allocation8 + $0x188] sm:$0xff]   ;;  %v20577_v30 = vld [vmem:[#allocation8 + $0x190] sm:$0xff]  }
 0xe2c   : > { %v20578_v48 = vld [vmem:[#allocation8 + $0x198] sm:$0xff]   ;;  %v20579_v54 = vld [vmem:[#allocation8 + $0x1a0] sm:$0xff]   ;;  %v20581_v63 = vld [vmem:[#allocation8 + $0x1b0] sm:$0xff]  }
 0xe2d   : > { %v20582_v31 = vld [vmem:[#allocation8 + $0x1b8] sm:$0xff]   ;;  %v20585_v16 = vld [vmem:[#allocation8 + $0x1d0] sm:$0xff]   ;;  %v20587_v51 = vld [vmem:[#allocation8 + $0x1e0] sm:$0xff]  }
 0xe2e   : > { %18654 = vmatpush3.bf16.msra.mxu0 %v20536_v29  ;;  %v20586_v36 = vld [vmem:[#allocation8 + $0x1d8] sm:$0xff]   ;;  %v20589_v10 = vld [vmem:[#allocation8 + $0x1f0] sm:$0xff]   ;;  %v11701_v29 = vrot.slane %v24715_v11, 2  ;;  %v24876_v42 = vld [vmem:[#allocation10 + $0x1a0] sm:$0xff]  }
 0xe2f   : > { %18655 = vmatprep.subr.bf16.mxu0 %v26546_v15  ;;  %v24880_v21 = vld [vmem:[#allocation10 + $0x1a8] sm:$0xff]   ;;  %vm26638_vm1 = vmmov %vm26613_vm6 }
 0xe32   : > { %18656 = vmatpush3.bf16.msra.mxu0 %v20537_v45  ;;  %v11702_v45 = vsel %vm9882_vm11, %v11701_v29, %v24660_v57  ;;  %v20596_v57 = vld [vmem:[#allocation8 + $0x228] sm:$0xff]   ;;  %vm11915_vm11 = vcmask 130048   ;;  %v25018_v29 = vld [vmem:[#allocation10 + $0x118] sm:$0xff]  }
 0xe33   : > { %18657 = vmatprep.subr.bf16.mxu0 %v26546_v15 }
 0xe36   : > { %18658 = vmatpush3.bf16.msra.mxu0 %v20538_v43  ;;  %v20592_v43 = vld [vmem:[#allocation8 + $0x208] sm:$0xff]  }
 0xe37   : > { %18659 = vmatprep.subr.bf16.mxu0 %v26546_v15 }
 0xe3a   : > { %18660 = vmatpush3.bf16.msra.mxu0 %v20539_v39  ;;  %v20593_v39 = vld [vmem:[#allocation8 + $0x210] sm:$0xff]  }
 0xe3b   : > { %18661 = vmatprep.subr.bf16.mxu0 %v26546_v15 }
 0xe3e   : > { %18662 = vmatpush3.bf16.msra.mxu0 %v20540_v33  ;;  %v20595_v33 = vld [vmem:[#allocation8 + $0x220] sm:$0xff]  }
 0xe3f   : > { %18663 = vmatprep.subr.bf16.mxu0 %v26546_v15 }
 0xe42   : > { %18664 = vmatpush3.bf16.msra.mxu0 %v20541_v47  ;;  %v20597_v47 = vld [vmem:[#allocation8 + $0x230] sm:$0xff]  }
 0xe43   : > { %18665 = vmatprep.subr.bf16.mxu0 %v26546_v15 }
 0xe46   : > { %18666 = vmatpush3.bf16.msra.mxu0 %v20542_v34  ;;  %v20598_v34 = vld [vmem:[#allocation8 + $0x238] sm:$0xff]  }
 0xe47   : > { %18671 = vmatprep.subr.bf16.mxu0 %v26546_v15 }
 0xe49   : > { %18668 = vmatmul.mubr.msk.bf16.vlgmr.msra.gmra.mrb[76].mxu0 %vm24529_vm0, %v15789_v44  ;;  %v20580_v44 = vld [vmem:[#allocation8 + $0x1a8] sm:$0xff]  }
 0xe4a   : > { %18672 = vmatpush3.bf16.msra.mxu0 %v20543_v12  ;;  %18687 = vmatprep.mubr.msk.bf16.mxu0 %vm21099_vm3, %v26546_v15  ;;  %v24860_v12 = vld [vmem:[#allocation10 + $0x180] sm:$0xff]  }
 0xe4b   : > { %18673 = vmatprep.subr.bf16.mxu0 %v26546_v15 }
 0xe4e   : > { %18674 = vmatpush3.bf16.msra.mxu0 %v20544_v28  ;;  %v24864_v28 = vld [vmem:[#allocation10 + $0x188] sm:$0xff]  }
 0xe4f   : > { %18675 = vmatprep.subr.bf16.mxu0 %v26546_v15 }
 0xe52   : > { %18676 = vmatpush3.bf16.msra.mxu0 %v20545_v5  ;;  %v24868_v5 = vld [vmem:[#allocation10 + $0x190] sm:$0xff]  }
 0xe53   : > { %18677 = vmatprep.subr.bf16.mxu0 %v26546_v15 }
 0xe56   : > { %18678 = vmatpush3.bf16.msra.mxu0 %v20546_v8 }
 0xe57   : > { %18679 = vmatprep.subr.bf16.mxu0 %v26546_v15 }
 0xe5a   : > { %18680 = vmatpush3.bf16.msra.mxu0 %v20547_v4 }
 0xe5b   : > { %18681 = vmatprep.subr.bf16.mxu0 %v26546_v15 }
 0xe5e   : > { %18682 = vmatpush3.bf16.msra.mxu0 %v20548_v22 }
 0xe5f   : > { %18683 = vmatprep.subr.bf16.mxu0 %v26546_v15 }
 0xe62   : > { %18684 = vmatpush3.bf16.msra.mxu0 %v20549_v27 }
 0xe63   : > { %18685 = vmatprep.subr.bf16.mxu0 %v26546_v15 }
 0xe66   : > { %18686 = vmatpush3.bf16.msra.mxu0 %v20550_v40  ;;  %v11908_v40 = vld [vmem:[%s25607_s23] sm:$0xf] }
 0xe67   : > { %18691 = vmatprep.subr.bf16.mxu0 %v26546_v15 }
 0xe69   : > { %18688 = vmatmul.mubr.msk.bf16.vlgmr.msra.gmra.mrb[76].mxu0 %vm24598_vm4, %v15800_v19  ;;  %v20583_v19 = vld [vmem:[#allocation8 + $0x1c0] sm:$0xff]  }
 0xe6a   : > { %18692 = vmatpush3.bf16.msra.mxu0 %v20551_v3  ;;  %18707 = vmatprep.mubr.msk.bf16.mxu0 %vm21099_vm3, %v26546_v15  ;;  %v24887_v3 = vld [vmem:[#allocation10 + $0x40] sm:$0xff]  }
 0xe6b   : > { %18693 = vmatprep.subr.bf16.mxu0 %v26546_v15 }
 0xe6e   : > { %18694 = vmatpush3.bf16.msra.mxu0 %v20552_v26  ;;  %v24891_v26 = vld [vmem:[#allocation10 + $0x48] sm:$0xff]  }
 0xe6f   : > { %18695 = vmatprep.subr.bf16.mxu0 %v26546_v15 }
 0xe72   : > { %18696 = vmatpush3.bf16.msra.mxu0 %v20553_v53  ;;  %v24897_v53 = vld [vmem:[#allocation10 + $0x50] sm:$0xff]  }
 0xe73   : > { %18697 = vmatprep.subr.bf16.mxu0 %v26546_v15 }
 0xe76   : > { %18698 = vmatpush3.bf16.msra.mxu0 %v20554_v13  ;;  %v24901_v13 = vld [vmem:[#allocation10 + $0x58] sm:$0xff]  }
 0xe77   : > { %18699 = vmatprep.subr.bf16.mxu0 %v26546_v15 }
 0xe7a   : > { %18700 = vmatpush3.bf16.msra.mxu0 %v20555_v60  ;;  %v24905_v60 = vld [vmem:[#allocation10 + $0x60] sm:$0xff]  }
 0xe7b   : > { %18701 = vmatprep.subr.bf16.mxu0 %v26546_v15 }
 0xe7e   : > { %18702 = vmatpush3.bf16.msra.mxu0 %v20556_v23  ;;  %v24909_v23 = vld [vmem:[#allocation10 + $0x68] sm:$0xff]  }
 0xe7f   : > { %18703 = vmatprep.subr.bf16.mxu0 %v26546_v15 }
 0xe82   : > { %18704 = vmatpush3.bf16.msra.mxu0 %v20557_v46  ;;  %v24914_v46 = vld [vmem:[#allocation10 + $0x70] sm:$0xff]  }
 0xe83   : > { %18705 = vmatprep.subr.bf16.mxu0 %v26546_v15 }
 0xe86   : > { %18706 = vmatpush3.bf16.msra.mxu0 %v20558_v20  ;;  %v24916_v20 = vld [vmem:[#allocation10 + $0x1b0] sm:$0xff]  }
 0xe87   : > { %18711 = vmatprep.subr.bf16.mxu0 %v26546_v15 }
 0xe89   : > { %18708 = vmatmul.mubr.msk.bf16.vlgmr.msra.gmra.mrb[76].mxu0 %vm24529_vm0, %v15811_v52  ;;  %v20584_v52 = vld [vmem:[#allocation8 + $0x1c8] sm:$0xff]  }
 0xe8a   : > { %18712 = vmatpush3.bf16.msra.mxu0 %v20559_v17  ;;  %18727 = vmatprep.mubr.msk.bf16.mxu0 %vm21099_vm3, %v26546_v15  ;;  %v24920_v17 = vld [vmem:[#allocation10 + $0x78] sm:$0xff]  }
 0xe8b   : > { %18713 = vmatprep.subr.bf16.mxu0 %v26546_v15 }
 0xe8e   : > { %18714 = vmatpush3.bf16.msra.mxu0 %v20560_v50  ;;  %v24922_v50 = vld [vmem:[#allocation10 + $0x1b8] sm:$0xff]  }
 0xe8f   : > { %18715 = vmatprep.subr.bf16.mxu0 %v26546_v15 }
 0xe92   : > { %18716 = vmatpush3.bf16.msra.mxu0 %v20561_v9  ;;  %v15862_v9 = vld [vmem:[%s26636_s19] ss:$0 sm:$0xff]  ;;  %s26641_s19 = sld [smem:[#allocation111_spill]] }
 0xe93   : > { %18717 = vmatprep.subr.bf16.mxu0 %v26546_v15 }
 0xe96   : > { %18718 = vmatpush3.bf16.msra.mxu0 %v20562_v14 }
 0xe97   : > { %18719 = vmatprep.subr.bf16.mxu0 %v26546_v15 }
 0xe98   : > { %s993_s9 = scalar_lea.vmem %s26641_s19, %s21520_s26  ;;  %s25501_s19 = scalar_lea.hbm %s26644_s4, %s16058_s29 }
 0xe9a   : > { %18720 = vmatpush3.bf16.msra.mxu0 %v20563_v1 }
 0xe9b   : > { %18721 = vmatprep.subr.bf16.mxu0 %v26546_v15 }
 0xe9e   : > { %18722 = vmatpush3.bf16.msra.mxu0 %v20564_v37 }
 0xe9f   : > { %18723 = vmatprep.subr.bf16.mxu0 %v26546_v15 }
 0xea2   : > { %18724 = vmatpush3.bf16.msra.mxu0 %v20565_v2 }
 0xea3   : > { %18725 = vmatprep.subr.bf16.mxu0 %v26546_v15 }
 0xea6   : > { %18726 = vmatpush3.bf16.msra.mxu0 %v20566_v6 }
 0xea7   : > { %18731 = vmatprep.subr.bf16.mxu0 %v26546_v15 }
 0xea9   : > { %18728 = vmatmul.mubr.bf16.vlgmr.msra.gmra.mrb[76].mxu0 %v24715_v11  ;;  %v20594_v11 = vld [vmem:[#allocation8 + $0x218] sm:$0xff]  }
 0xeaa   : > { %18732 = vmatpush3.bf16.msra.mxu0 %v20567_v25  ;;  %18747 = vmatprep.mubr.msk.bf16.mxu0 %vm21099_vm3, %v26546_v15  ;;  %v24939_v25 = vld [vmem:[#allocation10] sm:$0xff]  }
 0xeab   : > { %18733 = vmatprep.subr.bf16.mxu0 %v26546_v15 }
 0xeae   : > { %18734 = vmatpush3.bf16.msra.mxu0 %v20568_v61  ;;  %v20616_v61 = vld [vmem:[#allocation10 + $0x200] sm:$0xff]  }
 0xeaf   : > { %18735 = vmatprep.subr.bf16.mxu0 %v26546_v15 }
 0xeb2   : > { %18736 = vmatpush3.bf16.msra.mxu0 %v20569_v0 }
 0xeb3   : > { %18737 = vmatprep.subr.bf16.mxu0 %v26546_v15 }
 0xeb6   : > { %18738 = vmatpush3.bf16.msra.mxu0 %v20570_v18  ;;  %v24947_v18 = vld [vmem:[#allocation10 + $0x8] sm:$0xff]  }
 0xeb7   : > { %18739 = vmatprep.subr.bf16.mxu0 %v26546_v15 }
 0xeba   : > { %18740 = vmatpush3.bf16.msra.mxu0 %v20571_v55  ;;  %v20618_v55 = vld [vmem:[#allocation10 + $0x208] sm:$0xff]  }
 0xebb   : > { %18741 = vmatprep.subr.bf16.mxu0 %v26546_v15 }
 0xebe   : > { %18742 = vmatpush3.bf16.msra.mxu0 %v20572_v56  ;;  %v24956_v56 = vld [vmem:[#allocation10 + $0x10] sm:$0xff]  }
 0xebf   : > { %18743 = vmatprep.subr.bf16.mxu0 %v26546_v15 }
 0xec2   : > { %18744 = vmatpush3.bf16.msra.mxu0 %v20573_v58  ;;  %v20620_v58 = vld [vmem:[#allocation10 + $0x210] sm:$0xff]  }
 0xec3   : > { %18745 = vmatprep.subr.bf16.mxu0 %v26546_v15 }
 0xec6   : > { %18746 = vmatpush3.bf16.msra.mxu0 %v20574_v38  ;;  %v24961_v38 = vld [vmem:[#allocation10 + $0x18] sm:$0xff]  }
 0xec7   : > { %18751 = vmatprep.subr.bf16.mxu0 %v26546_v15 }
 0xec9   : > { %18748 = vmatmul.mubr.msk.bf16.vlgmr.msra.gmra.mrb[76].mxu0 %vm24598_vm4, %v15830_v35  ;;  %v20591_v35 = vld [vmem:[#allocation8 + $0x200] sm:$0xff]  }
 0xeca   : > { %18752 = vmatpush3.bf16.msra.mxu0 %v20575_v24  ;;  %18767 = vmatprep.mubr.msk.bf16.mxu0 %vm21099_vm3, %v26546_v15  ;;  %v20622_v24 = vld [vmem:[#allocation10 + $0x218] sm:$0xff]  }
 0xecb   : > { %18753 = vmatprep.subr.bf16.mxu0 %v26546_v15 }
 0xece   : > { %18754 = vmatpush3.bf16.msra.mxu0 %v20576_v32  ;;  %v24966_v32 = vld [vmem:[#allocation10 + $0x20] sm:$0xff]  }
 0xecf   : > { %18755 = vmatprep.subr.bf16.mxu0 %v26546_v15 }
 0xed2   : > { %18756 = vmatpush3.bf16.msra.mxu0 %v20577_v30  ;;  %v20624_v30 = vld [vmem:[#allocation10 + $0x220] sm:$0xff]  }
 0xed3   : > { %18757 = vmatprep.subr.bf16.mxu0 %v26546_v15 }
 0xed6   : > { %18758 = vmatpush3.bf16.msra.mxu0 %v20578_v48  ;;  %v24971_v48 = vld [vmem:[#allocation10 + $0x28] sm:$0xff]  }
 0xed7   : > { %18759 = vmatprep.subr.bf16.mxu0 %v26546_v15 }
 0xeda   : > { %18760 = vmatpush3.bf16.msra.mxu0 %v20579_v54  ;;  %v20626_v54 = vld [vmem:[#allocation10 + $0x228] sm:$0xff]  }
 0xedb   : > { %18761 = vmatprep.subr.bf16.mxu0 %v26546_v15 }
 0xede   : > { %18762 = vmatpush3.bf16.msra.mxu0 %v20580_v44  ;;  %v24976_v44 = vld [vmem:[#allocation10 + $0x30] sm:$0xff]  }
 0xedf   : > { %18763 = vmatprep.subr.bf16.mxu0 %v26546_v15 }
 0xee2   : > { %18764 = vmatpush3.bf16.msra.mxu0 %v20581_v63  ;;  %v20628_v63 = vld [vmem:[#allocation10 + $0x230] sm:$0xff]  }
 0xee3   : > { %18765 = vmatprep.subr.bf16.mxu0 %v26546_v15 }
 0xee6   : > { %18766 = vmatpush3.bf16.msra.mxu0 %v20582_v31  ;;  %v24981_v31 = vld [vmem:[#allocation10 + $0x38] sm:$0xff]  }
 0xee7   : > { %18771 = vmatprep.subr.bf16.mxu0 %v26546_v15 }
 0xee9   : > { %18768 = vmatmul.mubr.msk.bf16.vlgmr.msra.gmra.mrb[76].mxu0 %vm24529_vm0, %v15841_v62  ;;  %v20590_v62 = vld [vmem:[#allocation8 + $0x1f8] sm:$0xff]   ;;  %vm13244_vm0 = vcmask 1041408  }
 0xeea   : > { %18772 = vmatpush3.bf16.msra.mxu0 %v20583_v19  ;;  %18787 = vmatprep.mubr.msk.bf16.mxu0 %vm21099_vm3, %v26546_v15  ;;  %v20630_v19 = vld [vmem:[#allocation10 + $0x238] sm:$0xff]  }
 0xeeb   : > { %18773 = vmatprep.subr.bf16.mxu0 %v26546_v15 }
 0xeee   : > { %18774 = vmatpush3.bf16.msra.mxu0 %v20584_v52  ;;  %v24986_v52 = vld [vmem:[#allocation10 + $0x80] sm:$0xff]  }
 0xeef   : > { %18775 = vmatprep.subr.bf16.mxu0 %v26546_v15 }
 0xef2   : > { %18776 = vmatpush3.bf16.msra.mxu0 %v20585_v16  ;;  %v24988_v16 = vld [vmem:[#allocation10 + $0x100] sm:$0xff]  }
 0xef3   : > { %18777 = vmatprep.subr.bf16.mxu0 %v26546_v15 }
 0xef6   : > { %18778 = vmatpush3.bf16.msra.mxu0 %v20586_v36  ;;  %v24996_v36 = vld [vmem:[#allocation10 + $0x88] sm:$0xff]  }
 0xef7   : > { %18779 = vmatprep.subr.bf16.mxu0 %v26546_v15 }
 0xefa   : > { %18780 = vmatpush3.bf16.msra.mxu0 %v20587_v51  ;;  %v24998_v51 = vld [vmem:[#allocation10 + $0x108] sm:$0xff]  }
 0xefb   : > { %18781 = vmatprep.subr.bf16.mxu0 %v26546_v15 }
 0xefe   : > { %18782 = vmatpush3.bf16.msra.mxu0 %v20588_v49  ;;  %v25008_v49 = vld [vmem:[#allocation10 + $0x90] sm:$0xff]  }
 0xeff   : > { %18783 = vmatprep.subr.bf16.mxu0 %v26546_v15 }
 0xf02   : > { %18784 = vmatpush3.bf16.msra.mxu0 %v20589_v10  ;;  %v25010_v10 = vld [vmem:[#allocation10 + $0x110] sm:$0xff]  }
 0xf03   : > { %18785 = vmatprep.subr.bf16.mxu0 %v26546_v15 }
 0xf06   : > { %18786 = vmatpush3.bf16.msra.mxu0 %v20590_v62  ;;  %v25016_v62 = vld [vmem:[#allocation10 + $0x98] sm:$0xff]  }
 0xf07   : > { %18791 = vmatprep.subr.bf16.mxu0 %v26546_v15 }
 0xf09   : > { %18788 = vmatmul.mubr.bf16.vlgmr.msra.gmra.mrb[76].mxu0 %v11702_v45  ;;  %v25026_v45 = vld [vmem:[#allocation10 + $0x120] sm:$0xff]  }
 0xf0a   : > { %18792 = vmatpush3.bf16.msra.mxu0 %v20591_v35  ;;  %18807 = vmatprep.mubr.msk.bf16.mxu0 %vm21099_vm3, %v26546_v15  ;;  %v25024_v35 = vld [vmem:[#allocation10 + $0xa0] sm:$0xff]  }
 0xf0b   : > { %18793 = vmatprep.subr.bf16.mxu0 %v26546_v15 }
 0xf0e   : > { %18794 = vmatpush3.bf16.msra.mxu0 %v20592_v43  ;;  %v25032_v43 = vld [vmem:[#allocation10 + $0xa8] sm:$0xff]  }
 0xf0f   : > { %18795 = vmatprep.subr.bf16.mxu0 %v26546_v15 }
 0xf12   : > { %18796 = vmatpush3.bf16.msra.mxu0 %v20593_v39  ;;  %v25034_v39 = vld [vmem:[#allocation10 + $0x128] sm:$0xff]  }
 0xf13   : > { %18797 = vmatprep.subr.bf16.mxu0 %v26546_v15 }
 0xf16   : > { %18798 = vmatpush3.bf16.msra.mxu0 %v20594_v11  ;;  %v25040_v11 = vld [vmem:[#allocation10 + $0xb0] sm:$0xff]  }
 0xf17   : > { %18799 = vmatprep.subr.bf16.mxu0 %v26546_v15 }
 0xf1a   : > { %18800 = vmatpush3.bf16.msra.mxu0 %v20595_v33  ;;  %v25042_v33 = vld [vmem:[#allocation10 + $0x130] sm:$0xff]  }
 0xf1b   : > { %18801 = vmatprep.subr.bf16.mxu0 %v26546_v15 }
 0xf1e   : > { %18802 = vmatpush3.bf16.msra.mxu0 %v20596_v57  ;;  %v25048_v57 = vld [vmem:[#allocation10 + $0xb8] sm:$0xff]  }
 0xf1f   : > { %18803 = vmatprep.subr.bf16.mxu0 %v26546_v15 }
 0xf22   : > { %18804 = vmatpush3.bf16.msra.mxu0 %v20597_v47  ;;  %v25050_v47 = vld [vmem:[#allocation10 + $0x138] sm:$0xff]  }
 0xf23   : > { %18805 = vmatprep.subr.bf16.mxu0 %v26546_v15 }
 0xf26   : > { %18806 = vmatpush3.bf16.msra.mxu0 %v20598_v34  ;;  %v20647_v34 = vld [vmem:[#allocation10 + $0xc0] sm:$0xff]  }
 0xf27   : > { %19058 = vmatprep.subr.bf16.mxu0 %v26546_v15 }
 0xf29   : > { %18808 = vmatmul.mubr.msk.bf16.vlgmr.msra.gmra.mrb[76].mxu0 %vm24598_vm4, %v15860_v7 }
 0xf2a   : > { %19074 = vmatprep.mubr.msk.bf16.mxu0 %vm21099_vm3, %v26546_v15  ;;  %19059 = vmatpush3.bf16.msra.mxu0 %v24860_v12 }
 0xf2b   : > { %19060 = vmatprep.subr.bf16.mxu0 %v26546_v15 }
 0xf2e   : > { %19061 = vmatpush3.bf16.msra.mxu0 %v24864_v28 }
 0xf2f   : > { %19062 = vmatprep.subr.bf16.mxu0 %v26546_v15 }
 0xf32   : > { %19063 = vmatpush3.bf16.msra.mxu0 %v24868_v5 }
 0xf33   : > { %19064 = vmatprep.subr.bf16.mxu0 %v26546_v15 }
 0xf36   : > { %19065 = vmatpush3.bf16.msra.mxu0 %v24872_v41 }
 0xf37   : > { %19066 = vmatprep.subr.bf16.mxu0 %v26546_v15 }
 0xf3a   : > { %19067 = vmatpush3.bf16.msra.mxu0 %v24876_v42 }
 0xf3b   : > { %19068 = vmatprep.subr.bf16.mxu0 %v26546_v15 }
 0xf3e   : > { %19069 = vmatpush3.bf16.msra.mxu0 %v24880_v21 }
 0xf3f   : > { %19070 = vmatprep.subr.bf16.mxu0 %v26546_v15 }
 0xf42   : > { %19071 = vmatpush3.bf16.msra.mxu0 %v24916_v20 }
 0xf43   : > { %19072 = vmatprep.subr.bf16.mxu0 %v26546_v15 }
 0xf46   : > { %19073 = vmatpush3.bf16.msra.mxu0 %v24922_v50 }
 0xf47   : > { %19078 = vmatprep.subr.bf16.mxu0 %v26546_v15 }
 0xffc   : > { %v11899_v7 = vpop.f32.mrb[76].mxu0 }
 0xffd   : > { %v18809_v8 = vpop.f32.mrb[77].mxu0 }
 0xffe   : > { %v11902_v4 = vpop.f32.mrb[78].mxu0  ;;  %v20648_v8 = vld [vmem:[#allocation10 + $0xc8] sm:$0xff]  }
 0xfff   : > { %v19307_v22 = vpack.c.bf16 %v11902_v4, %v11899_v7  ;;  %v18810_v27 = vpop.f32.mrb[79].mxu0  ;;  %v20649_v4 = vld [vmem:[#allocation10 + $0xd0] sm:$0xff]  }
0x1000   : > { %v20651_v27 = vld [vmem:[#allocation10 + $0xe0] sm:$0xff]  }
0x1001   : > { %19308 = vmatpush3.bf16.msra.mxu1 %v19307_v22  ;;  %v20650_v22 = vld [vmem:[#allocation10 + $0xd8] sm:$0xff]  }
0x1002   : > { %18818 = vmatprep.subr.bf16.mxu1 %v26546_v15 }
0x1004   : > { %18816 = vmatmul.mubr.msk.f32.vlgmr.msra.gmra.mrb[60].mxu1 %vm11915_vm11, %v11908_v40  ;;  %v20652_v40 = vld [vmem:[#allocation10 + $0xe8] sm:$0xff]  }
0x1005   : > { %18819 = vmatpush3.bf16.msra.mxu1 %v24887_v3  ;;  %18834 = vmatprep.mubr.msk.bf16.mxu1 %vm21099_vm3, %v26546_v15 }
0x1006   : > { %18820 = vmatprep.subr.bf16.mxu1 %v26546_v15 }
0x1009   : > { %18821 = vmatpush3.bf16.msra.mxu1 %v24891_v26 }
0x100a   : > { %18822 = vmatprep.subr.bf16.mxu1 %v26546_v15 }
0x100d   : > { %18823 = vmatpush3.bf16.msra.mxu1 %v24897_v53 }
0x100e   : > { %18824 = vmatprep.subr.bf16.mxu1 %v26546_v15 }
0x1011   : > { %18825 = vmatpush3.bf16.msra.mxu1 %v24901_v13 }
0x1012   : > { %18826 = vmatprep.subr.bf16.mxu1 %v26546_v15 }
0x1015   : > { %18827 = vmatpush3.bf16.msra.mxu1 %v24905_v60 }
0x1016   : > { %18828 = vmatprep.subr.bf16.mxu1 %v26546_v15 }
0x1019   : > { %18829 = vmatpush3.bf16.msra.mxu1 %v24909_v23 }
0x101a   : > { %18830 = vmatprep.subr.bf16.mxu1 %v26546_v15 }
0x101d   : > { %18831 = vmatpush3.bf16.msra.mxu1 %v24914_v46 }
0x101e   : > { %18832 = vmatprep.subr.bf16.mxu1 %v26546_v15 }
0x1021   : > { %18833 = vmatpush3.bf16.msra.mxu1 %v24920_v17 }
0x1022   : > { %18838 = vmatprep.subr.bf16.mxu1 %v26546_v15 }
0x10d7   : > { %v11985_v14 = vpop.f32.mrb[60].mxu1 }
0x10d8   : > { %v11986_v1 = vadd.f32 %v15862_v9, %v11985_v14  ;;  %v18817_v37 = vpop.f32.mrb[61].mxu1  ;;  %v20653_v9 = vld [vmem:[#allocation10 + $0xf0] sm:$0xff]   ;;  %v20654_v14 = vld [vmem:[#allocation10 + $0xf8] sm:$0xff]  }
0x10d9   : > { %v20655_v37 = vld [vmem:[#allocation10 + $0x140] sm:$0xff]  }
0x10da   : > { %v11989_v2 = vmax.f32 %v11986_v1, 0.0 }
0x10dc   : > { %11990 = vst [vmem:[%s24934_s30] sm:$0xf] %v11989_v2  ;;  %v24937_v6 = vpack.c.bf16 %v11989_v2, %v11989_v2  ;;  %v20656_v2 = vld [vmem:[#allocation10 + $0x148] sm:$0xff]  }
0x10de   : > { %v24942_v0 = vshrl.u32 %v24937_v6, 16  ;;  %v25057_v7 = vrot.slane %v24937_v6, 1 }
0x10e0   : > { %18835 = vmatmul.mubr.bf16.vlgmr.msra.gmra.mrb[64].mxu1 %v24942_v0  ;;  %19075 = vmatmul.mubr.bf16.vlgmr.msra.gmra.mrb[80].mxu0 %v24942_v0  ;;  %v25090_v1 = vrot.slane %v24942_v0, 1 }
0x10e1   : > { %18839 = vmatpush3.bf16.msra.mxu1 %v24939_v25  ;;  %19079 = vmatpush3.bf16.msra.mxu0 %v20616_v61  ;;  %v20657_v61 = vld [vmem:[#allocation10 + $0x150] sm:$0xff]  }
0x10e2   : > { %18840 = vmatprep.subr.bf16.mxu1 %v26546_v15  ;;  %19080 = vmatprep.subr.bf16.mxu0 %v26546_v15 }
0x10e3   : > { %18854 = vmatprep.mubr.msk.bf16.mxu1 %vm21099_vm3, %v26546_v15  ;;  %19094 = vmatprep.mubr.msk.bf16.mxu0 %vm21099_vm3, %v26546_v15 }
0x10e5   : > { %18841 = vmatpush3.bf16.msra.mxu1 %v24947_v18  ;;  %19081 = vmatpush3.bf16.msra.mxu0 %v20618_v55  ;;  %v20658_v55 = vld [vmem:[#allocation10 + $0x158] sm:$0xff]  }
0x10e6   : > { %18842 = vmatprep.subr.bf16.mxu1 %v26546_v15  ;;  %19082 = vmatprep.subr.bf16.mxu0 %v26546_v15 }
0x10e9   : > { %18843 = vmatpush3.bf16.msra.mxu1 %v24956_v56  ;;  %19083 = vmatpush3.bf16.msra.mxu0 %v20620_v58  ;;  %v20659_v58 = vld [vmem:[#allocation10 + $0x160] sm:$0xff]  }
0x10ea   : > { %18844 = vmatprep.subr.bf16.mxu1 %v26546_v15  ;;  %19084 = vmatprep.subr.bf16.mxu0 %v26546_v15 }
0x10ed   : > { %18845 = vmatpush3.bf16.msra.mxu1 %v24961_v38  ;;  %19085 = vmatpush3.bf16.msra.mxu0 %v20622_v24  ;;  %v20660_v24 = vld [vmem:[#allocation10 + $0x168] sm:$0xff]  }
0x10ee   : > { %18846 = vmatprep.subr.bf16.mxu1 %v26546_v15  ;;  %19086 = vmatprep.subr.bf16.mxu0 %v26546_v15 }
0x10f1   : > { %18847 = vmatpush3.bf16.msra.mxu1 %v24966_v32  ;;  %19087 = vmatpush3.bf16.msra.mxu0 %v20624_v30  ;;  %v20661_v30 = vld [vmem:[#allocation10 + $0x170] sm:$0xff]  }
0x10f2   : > { %18848 = vmatprep.subr.bf16.mxu1 %v26546_v15  ;;  %19088 = vmatprep.subr.bf16.mxu0 %v26546_v15 }
0x10f5   : > { %18849 = vmatpush3.bf16.msra.mxu1 %v24971_v48  ;;  %19089 = vmatpush3.bf16.msra.mxu0 %v20626_v54  ;;  %v20662_v54 = vld [vmem:[#allocation10 + $0x178] sm:$0xff]  }
0x10f6   : > { %18850 = vmatprep.subr.bf16.mxu1 %v26546_v15  ;;  %19090 = vmatprep.subr.bf16.mxu0 %v26546_v15 }
0x10f9   : > { %18851 = vmatpush3.bf16.msra.mxu1 %v24976_v44  ;;  %19091 = vmatpush3.bf16.msra.mxu0 %v20628_v63  ;;  %v20663_v63 = vld [vmem:[#allocation10 + $0x1c0] sm:$0xff]  }
0x10fa   : > { %18852 = vmatprep.subr.bf16.mxu1 %v26546_v15  ;;  %19092 = vmatprep.subr.bf16.mxu0 %v26546_v15 }
0x10fd   : > { %18853 = vmatpush3.bf16.msra.mxu1 %v24981_v31  ;;  %19093 = vmatpush3.bf16.msra.mxu0 %v20630_v19  ;;  %v20664_v19 = vld [vmem:[#allocation10 + $0x1c8] sm:$0xff]  }
0x10fe   : > { %18858 = vmatprep.subr.bf16.mxu1 %v26546_v15  ;;  %19098 = vmatprep.subr.bf16.mxu0 %v26546_v15 }
0x1100   : > { %18855 = vmatmul.mubr.bf16.vlgmr.msra.gmra.mrb[64].mxu1 %v24937_v6  ;;  %19095 = vmatmul.mubr.bf16.vlgmr.msra.gmra.mrb[80].mxu0 %v24937_v6 }
0x1101   : > { %18859 = vmatpush3.bf16.msra.mxu1 %v24986_v52  ;;  %19099 = vmatpush3.bf16.msra.mxu0 %v24988_v16 }
0x1102   : > { %18860 = vmatprep.subr.bf16.mxu1 %v26546_v15  ;;  %19100 = vmatprep.subr.bf16.mxu0 %v26546_v15 }
0x1103   : > { %18874 = vmatprep.mubr.msk.bf16.mxu1 %vm21099_vm3, %v26546_v15  ;;  %19114 = vmatprep.mubr.msk.bf16.mxu0 %vm21099_vm3, %v26546_v15 }
0x1105   : > { %18861 = vmatpush3.bf16.msra.mxu1 %v24996_v36  ;;  %19101 = vmatpush3.bf16.msra.mxu0 %v24998_v51 }
0x1106   : > { %18862 = vmatprep.subr.bf16.mxu1 %v26546_v15  ;;  %19102 = vmatprep.subr.bf16.mxu0 %v26546_v15 }
0x1109   : > { %18863 = vmatpush3.bf16.msra.mxu1 %v25008_v49  ;;  %19103 = vmatpush3.bf16.msra.mxu0 %v25010_v10 }
0x110a   : > { %18864 = vmatprep.subr.bf16.mxu1 %v26546_v15  ;;  %19104 = vmatprep.subr.bf16.mxu0 %v26546_v15 }
0x110d   : > { %18865 = vmatpush3.bf16.msra.mxu1 %v25016_v62  ;;  %19105 = vmatpush3.bf16.msra.mxu0 %v25018_v29 }
0x110e   : > { %18866 = vmatprep.subr.bf16.mxu1 %v26546_v15  ;;  %19106 = vmatprep.subr.bf16.mxu0 %v26546_v15 }
0x1111   : > { %18867 = vmatpush3.bf16.msra.mxu1 %v25024_v35  ;;  %19107 = vmatpush3.bf16.msra.mxu0 %v25026_v45 }
0x1112   : > { %18868 = vmatprep.subr.bf16.mxu1 %v26546_v15  ;;  %19108 = vmatprep.subr.bf16.mxu0 %v26546_v15 }
0x1115   : > { %18869 = vmatpush3.bf16.msra.mxu1 %v25032_v43  ;;  %19109 = vmatpush3.bf16.msra.mxu0 %v25034_v39 }
0x1116   : > { %18870 = vmatprep.subr.bf16.mxu1 %v26546_v15  ;;  %19110 = vmatprep.subr.bf16.mxu0 %v26546_v15 }
0x1119   : > { %18871 = vmatpush3.bf16.msra.mxu1 %v25040_v11  ;;  %19111 = vmatpush3.bf16.msra.mxu0 %v25042_v33 }
0x111a   : > { %18872 = vmatprep.subr.bf16.mxu1 %v26546_v15  ;;  %19112 = vmatprep.subr.bf16.mxu0 %v26546_v15 }
0x111d   : > { %18873 = vmatpush3.bf16.msra.mxu1 %v25048_v57  ;;  %19113 = vmatpush3.bf16.msra.mxu0 %v25050_v47 }
0x111e   : > { %18878 = vmatprep.subr.bf16.mxu1 %v26546_v15  ;;  %19118 = vmatprep.subr.bf16.mxu0 %v26546_v15 }
0x1120   : > { %18875 = vmatmul.mubr.bf16.vlgmr.msra.gmra.mrb[64].mxu1 %v25057_v7  ;;  %19115 = vmatmul.mubr.bf16.vlgmr.msra.gmra.mrb[80].mxu0 %v25057_v7 }
0x1121   : > { %18879 = vmatpush3.bf16.msra.mxu1 %v20647_v34  ;;  %19119 = vmatpush3.bf16.msra.mxu0 %v24939_v25 }
0x1122   : > { %18880 = vmatprep.subr.bf16.mxu1 %v26546_v15  ;;  %19120 = vmatprep.subr.bf16.mxu0 %v26546_v15 }
0x1123   : > { %18894 = vmatprep.mubr.msk.bf16.mxu1 %vm21099_vm3, %v26546_v15  ;;  %19134 = vmatprep.mubr.msk.bf16.mxu0 %vm21099_vm3, %v26546_v15 }
0x1125   : > { %18881 = vmatpush3.bf16.msra.mxu1 %v20648_v8  ;;  %19121 = vmatpush3.bf16.msra.mxu0 %v24947_v18 }
0x1126   : > { %18882 = vmatprep.subr.bf16.mxu1 %v26546_v15  ;;  %19122 = vmatprep.subr.bf16.mxu0 %v26546_v15 }
0x1129   : > { %18883 = vmatpush3.bf16.msra.mxu1 %v20649_v4  ;;  %19123 = vmatpush3.bf16.msra.mxu0 %v24956_v56 }
0x112a   : > { %18884 = vmatprep.subr.bf16.mxu1 %v26546_v15  ;;  %19124 = vmatprep.subr.bf16.mxu0 %v26546_v15 }
0x112d   : > { %18885 = vmatpush3.bf16.msra.mxu1 %v20650_v22  ;;  %19125 = vmatpush3.bf16.msra.mxu0 %v24961_v38 }
0x112e   : > { %18886 = vmatprep.subr.bf16.mxu1 %v26546_v15  ;;  %19126 = vmatprep.subr.bf16.mxu0 %v26546_v15 }
0x1131   : > { %18887 = vmatpush3.bf16.msra.mxu1 %v20651_v27  ;;  %19127 = vmatpush3.bf16.msra.mxu0 %v24966_v32  ;;  %v20687_v27 = vld [vmem:[%s26637_s10 + $0xc0] sm:$0xff]  }
0x1132   : > { %18888 = vmatprep.subr.bf16.mxu1 %v26546_v15  ;;  %19128 = vmatprep.subr.bf16.mxu0 %v26546_v15 }
0x1135   : > { %18889 = vmatpush3.bf16.msra.mxu1 %v20652_v40  ;;  %19129 = vmatpush3.bf16.msra.mxu0 %v24971_v48 }
0x1136   : > { %18890 = vmatprep.subr.bf16.mxu1 %v26546_v15  ;;  %19130 = vmatprep.subr.bf16.mxu0 %v26546_v15 }
0x1139   : > { %18891 = vmatpush3.bf16.msra.mxu1 %v20653_v9  ;;  %19131 = vmatpush3.bf16.msra.mxu0 %v24976_v44  ;;  %v20688_v9 = vld [vmem:[%s26637_s10 + $0x80] sm:$0xff]  }
0x113a   : > { %18892 = vmatprep.subr.bf16.mxu1 %v26546_v15  ;;  %19132 = vmatprep.subr.bf16.mxu0 %v26546_v15 }
0x113d   : > { %18893 = vmatpush3.bf16.msra.mxu1 %v20654_v14  ;;  %19133 = vmatpush3.bf16.msra.mxu0 %v24981_v31 }
0x113e   : > { %18898 = vmatprep.subr.bf16.mxu1 %v26546_v15  ;;  %19158 = vmatprep.subr.bf16.mxu0 %v26546_v15 }
0x1140   : > { %18895 = vmatmul.mubr.bf16.vlgmr.msra.gmra.mrb[64].mxu1 %v25090_v1  ;;  %19135 = vmatmul.mubr.bf16.vlgmr.msra.gmra.mrb[80].mxu0 %v25090_v1 }
0x1141   : > { %18899 = vmatpush3.bf16.msra.mxu1 %v24939_v25  ;;  %18914 = vmatprep.mubr.msk.bf16.mxu1 %vm21099_vm3, %v26546_v15 }
0x1142   : > { %18900 = vmatprep.subr.bf16.mxu1 %v26546_v15  ;;  %19174 = vmatprep.mubr.msk.bf16.mxu0 %vm21099_vm3, %v26546_v15 }
0x1145   : > { %18901 = vmatpush3.bf16.msra.mxu1 %v24947_v18 }
0x1146   : > { %18902 = vmatprep.subr.bf16.mxu1 %v26546_v15 }
0x1149   : > { %18903 = vmatpush3.bf16.msra.mxu1 %v24956_v56 }
0x114a   : > { %18904 = vmatprep.subr.bf16.mxu1 %v26546_v15 }
0x114d   : > { %18905 = vmatpush3.bf16.msra.mxu1 %v24961_v38 }
0x114e   : > { %18906 = vmatprep.subr.bf16.mxu1 %v26546_v15 }
0x1151   : > { %18907 = vmatpush3.bf16.msra.mxu1 %v24966_v32 }
0x1152   : > { %18908 = vmatprep.subr.bf16.mxu1 %v26546_v15 }
0x1155   : > { %18909 = vmatpush3.bf16.msra.mxu1 %v24971_v48 }
0x1156   : > { %18910 = vmatprep.subr.bf16.mxu1 %v26546_v15 }
0x1159   : > { %18911 = vmatpush3.bf16.msra.mxu1 %v24976_v44 }
0x115a   : > { %18912 = vmatprep.subr.bf16.mxu1 %v26546_v15 }
0x115d   : > { %18913 = vmatpush3.bf16.msra.mxu1 %v24981_v31 }
0x115e   : > { %18918 = vmatprep.subr.bf16.mxu1 %v26546_v15 }
0x1160   : > { %18915 = vmatmul.mubr.bf16.vlgmr.msra.gmra.mrb[68].mxu1 %v24942_v0 }
0x1161   : > { %18919 = vmatpush3.bf16.msra.mxu1 %v24988_v16  ;;  %18934 = vmatprep.mubr.msk.bf16.mxu1 %vm21099_vm3, %v26546_v15  ;;  %v20666_v16 = vld [vmem:[#allocation10 + $0x1d8] sm:$0xff]  }
0x1162   : > { %18920 = vmatprep.subr.bf16.mxu1 %v26546_v15 }
0x1165   : > { %18921 = vmatpush3.bf16.msra.mxu1 %v24998_v51  ;;  %v20668_v51 = vld [vmem:[#allocation10 + $0x1e8] sm:$0xff]  }
0x1166   : > { %18922 = vmatprep.subr.bf16.mxu1 %v26546_v15 }
0x1169   : > { %18923 = vmatpush3.bf16.msra.mxu1 %v25010_v10  ;;  %v20670_v10 = vld [vmem:[#allocation10 + $0x1f8] sm:$0xff]  }
0x116a   : > { %18924 = vmatprep.subr.bf16.mxu1 %v26546_v15 }
0x116d   : > { %18925 = vmatpush3.bf16.msra.mxu1 %v25018_v29  ;;  %v20684_v29 = vld [vmem:[%s26637_s10 + $0x70] sm:$0xff]  }
0x116e   : > { %18926 = vmatprep.subr.bf16.mxu1 %v26546_v15 }
0x1171   : > { %18927 = vmatpush3.bf16.msra.mxu1 %v25026_v45  ;;  %v20686_v45 = vld [vmem:[%s26637_s10 + $0x78] sm:$0xff]  }
0x1172   : > { %18928 = vmatprep.subr.bf16.mxu1 %v26546_v15 }
0x1175   : > { %18929 = vmatpush3.bf16.msra.mxu1 %v25034_v39 }
0x1176   : > { %18930 = vmatprep.subr.bf16.mxu1 %v26546_v15 }
0x1179   : > { %18931 = vmatpush3.bf16.msra.mxu1 %v25042_v33 }
0x117a   : > { %18932 = vmatprep.subr.bf16.mxu1 %v26546_v15 }
0x117d   : > { %18933 = vmatpush3.bf16.msra.mxu1 %v25050_v47 }
0x117e   : > { %18938 = vmatprep.subr.bf16.mxu1 %v26546_v15 }
0x1180   : > { %18935 = vmatmul.mubr.bf16.vlgmr.msra.gmra.mrb[68].mxu1 %v24937_v6 }
0x1181   : > { %18939 = vmatpush3.bf16.msra.mxu1 %v20655_v37  ;;  %18954 = vmatprep.mubr.msk.bf16.mxu1 %vm21099_vm3, %v26546_v15  ;;  %v20690_v37 = vld [vmem:[%s26637_s10 + $0x88] sm:$0xff]  }
0x1182   : > { %18940 = vmatprep.subr.bf16.mxu1 %v26546_v15 }
0x1185   : > { %18941 = vmatpush3.bf16.msra.mxu1 %v20656_v2  ;;  %v20691_v2 = vld [vmem:[%s26637_s10 + $0xd0] sm:$0xff]  }
0x1186   : > { %18942 = vmatprep.subr.bf16.mxu1 %v26546_v15 }
0x1189   : > { %18943 = vmatpush3.bf16.msra.mxu1 %v20657_v61  ;;  %v20692_v61 = vld [vmem:[%s26637_s10 + $0x90] sm:$0xff]  }
0x118a   : > { %18944 = vmatprep.subr.bf16.mxu1 %v26546_v15 }
0x118d   : > { %18945 = vmatpush3.bf16.msra.mxu1 %v20658_v55  ;;  %v20693_v55 = vld [vmem:[%s26637_s10 + $0xd8] sm:$0xff]  }
0x118e   : > { %18946 = vmatprep.subr.bf16.mxu1 %v26546_v15 }
0x1191   : > { %18947 = vmatpush3.bf16.msra.mxu1 %v20659_v58  ;;  %v20694_v58 = vld [vmem:[%s26637_s10 + $0x98] sm:$0xff]  }
0x1192   : > { %18948 = vmatprep.subr.bf16.mxu1 %v26546_v15 }
0x1195   : > { %18949 = vmatpush3.bf16.msra.mxu1 %v20660_v24  ;;  %v20695_v24 = vld [vmem:[%s26637_s10 + $0xe0] sm:$0xff]  }
0x1196   : > { %18950 = vmatprep.subr.bf16.mxu1 %v26546_v15 }
0x1199   : > { %18951 = vmatpush3.bf16.msra.mxu1 %v20661_v30  ;;  %v20696_v30 = vld [vmem:[%s26637_s10 + $0xa0] sm:$0xff]  }
0x119a   : > { %18952 = vmatprep.subr.bf16.mxu1 %v26546_v15 }
0x119d   : > { %18953 = vmatpush3.bf16.msra.mxu1 %v20662_v54  ;;  %v20697_v54 = vld [vmem:[%s26637_s10 + $0xe8] sm:$0xff]  }
0x119e   : > { %18958 = vmatprep.subr.bf16.mxu1 %v26546_v15 }
0x11a0   : > { %18955 = vmatmul.mubr.bf16.vlgmr.msra.gmra.mrb[68].mxu1 %v25057_v7 }
0x11a1   : > { %18959 = vmatpush3.bf16.msra.mxu1 %v24986_v52  ;;  %18974 = vmatprep.mubr.msk.bf16.mxu1 %vm21099_vm3, %v26546_v15  ;;  %v20665_v52 = vld [vmem:[#allocation10 + $0x1d0] sm:$0xff]  }
0x11a2   : > { %18960 = vmatprep.subr.bf16.mxu1 %v26546_v15 }
0x11a5   : > { %18961 = vmatpush3.bf16.msra.mxu1 %v24996_v36  ;;  %v20667_v36 = vld [vmem:[#allocation10 + $0x1e0] sm:$0xff]  }
0x11a6   : > { %18962 = vmatprep.subr.bf16.mxu1 %v26546_v15 }
0x11a9   : > { %18963 = vmatpush3.bf16.msra.mxu1 %v25008_v49  ;;  %v20669_v49 = vld [vmem:[#allocation10 + $0x1f0] sm:$0xff]  }
0x11aa   : > { %18964 = vmatprep.subr.bf16.mxu1 %v26546_v15 }
0x11ad   : > { %18965 = vmatpush3.bf16.msra.mxu1 %v25016_v62  ;;  %v20683_v62 = vld [vmem:[%s26637_s10 + $0x30] sm:$0xff]  }
0x11ae   : > { %18966 = vmatprep.subr.bf16.mxu1 %v26546_v15 }
0x11b1   : > { %18967 = vmatpush3.bf16.msra.mxu1 %v25024_v35  ;;  %v20685_v35 = vld [vmem:[%s26637_s10 + $0x38] sm:$0xff]  }
0x11b2   : > { %18968 = vmatprep.subr.bf16.mxu1 %v26546_v15 }
0x11b5   : > { %18969 = vmatpush3.bf16.msra.mxu1 %v25032_v43 }
0x11b6   : > { %18970 = vmatprep.subr.bf16.mxu1 %v26546_v15 }
0x11b9   : > { %18971 = vmatpush3.bf16.msra.mxu1 %v25040_v11 }
0x11ba   : > { %18972 = vmatprep.subr.bf16.mxu1 %v26546_v15 }
0x11bd   : > { %18973 = vmatpush3.bf16.msra.mxu1 %v25048_v57  ;;  %v15936_v57 = vld [vmem:[#allocation11] ss:$0 sm:$0xff] }
0x11be   : > { %18978 = vmatprep.subr.bf16.mxu1 %v26546_v15 }
0x11c0   : > { %18975 = vmatmul.mubr.bf16.vlgmr.msra.gmra.mrb[68].mxu1 %v25090_v1 }
0x11c1   : > { %18979 = vmatpush3.bf16.msra.mxu1 %v20663_v63  ;;  %18994 = vmatprep.mubr.msk.bf16.mxu1 %vm21099_vm3, %v26546_v15  ;;  %v20698_v63 = vld [vmem:[%s26637_s10 + $0xa8] sm:$0xff]  }
0x11c2   : > { %18980 = vmatprep.subr.bf16.mxu1 %v26546_v15 }
0x11c5   : > { %18981 = vmatpush3.bf16.msra.mxu1 %v20664_v19  ;;  %v20699_v19 = vld [vmem:[%s26637_s10 + $0xf0] sm:$0xff]  }
0x11c6   : > { %18982 = vmatprep.subr.bf16.mxu1 %v26546_v15 }
0x11c9   : > { %18983 = vmatpush3.bf16.msra.mxu1 %v20665_v52  ;;  %v20700_v52 = vld [vmem:[%s26637_s10 + $0xb0] sm:$0xff]  }
0x11ca   : > { %18984 = vmatprep.subr.bf16.mxu1 %v26546_v15 }
0x11cd   : > { %18985 = vmatpush3.bf16.msra.mxu1 %v20666_v16  ;;  %v20701_v16 = vld [vmem:[%s26637_s10 + $0xf8] sm:$0xff]  }
0x11ce   : > { %18986 = vmatprep.subr.bf16.mxu1 %v26546_v15 }
0x11d1   : > { %18987 = vmatpush3.bf16.msra.mxu1 %v20667_v36  ;;  %v20702_v36 = vld [vmem:[%s26637_s10 + $0xb8] sm:$0xff]  }
0x11d2   : > { %18988 = vmatprep.subr.bf16.mxu1 %v26546_v15 }
0x11d5   : > { %18989 = vmatpush3.bf16.msra.mxu1 %v20668_v51 }
0x11d6   : > { %18990 = vmatprep.subr.bf16.mxu1 %v26546_v15 }
0x11d9   : > { %18991 = vmatpush3.bf16.msra.mxu1 %v20669_v49 }
0x11da   : > { %18992 = vmatprep.subr.bf16.mxu1 %v26546_v15 }
0x11dd   : > { %18993 = vmatpush3.bf16.msra.mxu1 %v20670_v10  ;;  %v20703_v10 = vld [vmem:[%s26639_s2] sm:$0xff]  }
0x11de   : > { %18998 = vmatprep.subr.bf16.mxu1 %v26546_v15 }
0x11e0   : > { %18995 = vmatmul.mubr.bf16.vlgmr.msra.gmra.mrb[72].mxu1 %v24942_v0  ;;  %v20675_v0 = vld [vmem:[%s26637_s10 + $0x10] sm:$0xff]  }
0x11e1   : > { %18999 = vmatpush3.bf16.msra.mxu1 %v24860_v12  ;;  %19014 = vmatprep.mubr.msk.bf16.mxu1 %vm21099_vm3, %v26546_v15 }
0x11e2   : > { %19000 = vmatprep.subr.bf16.mxu1 %v26546_v15 }
0x11e5   : > { %19001 = vmatpush3.bf16.msra.mxu1 %v24864_v28 }
0x11e6   : > { %19002 = vmatprep.subr.bf16.mxu1 %v26546_v15 }
0x11e9   : > { %19003 = vmatpush3.bf16.msra.mxu1 %v24868_v5 }
0x11ea   : > { %19004 = vmatprep.subr.bf16.mxu1 %v26546_v15 }
0x11ed   : > { %19005 = vmatpush3.bf16.msra.mxu1 %v24872_v41 }
0x11ee   : > { %19006 = vmatprep.subr.bf16.mxu1 %v26546_v15 }
0x11f1   : > { %19007 = vmatpush3.bf16.msra.mxu1 %v24876_v42 }
0x11f2   : > { %19008 = vmatprep.subr.bf16.mxu1 %v26546_v15 }
0x11f5   : > { %19009 = vmatpush3.bf16.msra.mxu1 %v24880_v21 }
0x11f6   : > { %19010 = vmatprep.subr.bf16.mxu1 %v26546_v15 }
0x11f9   : > { %19011 = vmatpush3.bf16.msra.mxu1 %v24916_v20 }
0x11fa   : > { %19012 = vmatprep.subr.bf16.mxu1 %v26546_v15 }
0x11fd   : > { %19013 = vmatpush3.bf16.msra.mxu1 %v24922_v50 }
0x11fe   : > { %19018 = vmatprep.subr.bf16.mxu1 %v26546_v15 }
0x1200   : > { %19015 = vmatmul.mubr.bf16.vlgmr.msra.gmra.mrb[72].mxu1 %v24937_v6  ;;  %v20671_v6 = vld [vmem:[%s26637_s10] sm:$0xff]  }
0x1201   : > { %19019 = vmatpush3.bf16.msra.mxu1 %v24939_v25  ;;  %19034 = vmatprep.mubr.msk.bf16.mxu1 %vm21099_vm3, %v26546_v15  ;;  %v20673_v25 = vld [vmem:[%s26637_s10 + $0x8] sm:$0xff]  }
0x1202   : > { %19020 = vmatprep.subr.bf16.mxu1 %v26546_v15  ;;  %19159 = vmatpush3.bf16.msra.mxu0 %v20671_v6  ;;  %v20713_v6 = vld [vmem:[%s26640_s25 + $0x4] ss:$12 sps:$4 sm:$0xff]  }
0x1203   : > { %19160 = vmatprep.subr.bf16.mxu0 %v26546_v15 }
0x1205   : > { %19021 = vmatpush3.bf16.msra.mxu1 %v24947_v18  ;;  %v20677_v18 = vld [vmem:[%s26637_s10 + $0x18] sm:$0xff]  }
0x1206   : > { %19022 = vmatprep.subr.bf16.mxu1 %v26546_v15  ;;  %19161 = vmatpush3.bf16.msra.mxu0 %v20673_v25  ;;  %v20717_v25 = vld [vmem:[%s26640_s25 + $0x1c] ss:$12 sps:$4 sm:$0xff]  }
0x1207   : > { %19162 = vmatprep.subr.bf16.mxu0 %v26546_v15 }
0x1209   : > { %19023 = vmatpush3.bf16.msra.mxu1 %v24956_v56  ;;  %v20679_v56 = vld [vmem:[%s26637_s10 + $0x20] sm:$0xff]  }
0x120a   : > { %19024 = vmatprep.subr.bf16.mxu1 %v26546_v15  ;;  %19163 = vmatpush3.bf16.msra.mxu0 %v20675_v0  ;;  %v20715_v0 = vld [vmem:[%s26640_s25 + $0x18] ss:$12 sps:$4 sm:$0xff]  }
0x120b   : > { %19164 = vmatprep.subr.bf16.mxu0 %v26546_v15 }
0x120d   : > { %19025 = vmatpush3.bf16.msra.mxu1 %v24961_v38 }
0x120e   : > { %19026 = vmatprep.subr.bf16.mxu1 %v26546_v15  ;;  %19165 = vmatpush3.bf16.msra.mxu0 %v20677_v18  ;;  %v20721_v18 = vld [vmem:[%s26640_s25 + $0x34] ss:$12 sps:$4 sm:$0xff]  }
0x120f   : > { %19166 = vmatprep.subr.bf16.mxu0 %v26546_v15 }
0x1211   : > { %19027 = vmatpush3.bf16.msra.mxu1 %v24966_v32 }
0x1212   : > { %19028 = vmatprep.subr.bf16.mxu1 %v26546_v15  ;;  %19167 = vmatpush3.bf16.msra.mxu0 %v20679_v56  ;;  %v20719_v56 = vld [vmem:[%s26640_s25 + $0x30] ss:$12 sps:$4 sm:$0xff]  }
0x1213   : > { %v25208_v12 = vpop.f32.mrb[64].mxu1  ;;  %v25210_v28 = vpop.f32.mrb[80].mxu0  ;;  %19168 = vmatprep.subr.bf16.mxu0 %v26546_v15 }
0x1214   : > { %v18896_v5 = vpop.f32.mrb[65].mxu1  ;;  %v19136_v41 = vpop.f32.mrb[81].mxu0  ;;  %v13241_v33 = vrot.slane %v25210_v28, 5  ;;  %v20705_v28 = vld [vmem:[%s26639_s2 + $0x10] sm:$0xff]  }
0x1215   : > { %v12419_v42 = vpop.f32.mrb[66].mxu1  ;;  %19029 = vmatpush3.bf16.msra.mxu1 %v24971_v48  ;;  %v13230_v21 = vpop.f32.mrb[82].mxu0  ;;  %v20706_v5 = vld [vmem:[%s26639_s2 + $0x18] sm:$0xff]   ;;  %v20707_v41 = vld [vmem:[%s26639_s2 + $0x20] sm:$0xff]  }
0x1216   : > { %v18897_v20 = vpop.f32.mrb[67].mxu1  ;;  %v19137_v50 = vpop.f32.mrb[83].mxu0  ;;  %19030 = vmatprep.subr.bf16.mxu1 %v26546_v15  ;;  %v20708_v42 = vld [vmem:[%s26639_s2 + $0x28] sm:$0xff]   ;;  %v20709_v21 = vld [vmem:[%s26639_s2 + $0x30] sm:$0xff]  }
0x1217   : > { %v20710_v20 = vld [vmem:[%s26639_s2 + $0x38] sm:$0xff]   ;;  %v20711_v50 = vld [vmem:[%s26640_s25] ss:$12 sps:$4 sm:$0xff]  }
0x1219   : > { %19031 = vmatpush3.bf16.msra.mxu1 %v24976_v44 }
0x121a   : > { %19032 = vmatprep.subr.bf16.mxu1 %v26546_v15 }
0x121d   : > { %19033 = vmatpush3.bf16.msra.mxu1 %v24981_v31  ;;  %v20682_v31 = vld [vmem:[%s26637_s10 + $0x68] sm:$0xff]  }
0x121e   : > { %19038 = vmatprep.subr.bf16.mxu1 %v26546_v15 }
0x1220   : > { %19035 = vmatmul.mubr.bf16.vlgmr.msra.gmra.mrb[72].mxu1 %v25057_v7 }
0x1221   : > { %19039 = vmatpush3.bf16.msra.mxu1 %v24887_v3  ;;  %19054 = vmatprep.mubr.msk.bf16.mxu1 %vm21099_vm3, %v26546_v15  ;;  %v20681_v3 = vld [vmem:[%s26637_s10 + $0x28] sm:$0xff]  }
0x1222   : > { %19040 = vmatprep.subr.bf16.mxu1 %v26546_v15  ;;  %19169 = vmatpush3.bf16.msra.mxu0 %v20681_v3  ;;  %v20725_v3 = vld [vmem:[%s26640_s25 + $0x4c] ss:$12 sps:$4 sm:$0xff]  }
0x1223   : > { %19170 = vmatprep.subr.bf16.mxu0 %v26546_v15 }
0x1225   : > { %19041 = vmatpush3.bf16.msra.mxu1 %v24891_v26  ;;  %v20672_v26 = vld [vmem:[%s26637_s10 + $0x40] sm:$0xff]  }
0x1226   : > { %19042 = vmatprep.subr.bf16.mxu1 %v26546_v15  ;;  %19171 = vmatpush3.bf16.msra.mxu0 %v20683_v62 }
0x1227   : > { %19172 = vmatprep.subr.bf16.mxu0 %v26546_v15 }
0x1229   : > { %19043 = vmatpush3.bf16.msra.mxu1 %v24897_v53  ;;  %v20674_v53 = vld [vmem:[%s26637_s10 + $0x48] sm:$0xff]  }
0x122a   : > { %19044 = vmatprep.subr.bf16.mxu1 %v26546_v15  ;;  %19173 = vmatpush3.bf16.msra.mxu0 %v20685_v35 }
0x122b   : > { %19198 = vmatprep.subr.bf16.mxu0 %v26546_v15 }
0x122d   : > { %19045 = vmatpush3.bf16.msra.mxu1 %v24901_v13  ;;  %v20676_v13 = vld [vmem:[%s26637_s10 + $0x50] sm:$0xff]  }
0x122e   : > { %19046 = vmatprep.subr.bf16.mxu1 %v26546_v15 }
0x1231   : > { %19047 = vmatpush3.bf16.msra.mxu1 %v24905_v60  ;;  %v20678_v60 = vld [vmem:[%s26637_s10 + $0x58] sm:$0xff]  }
0x1232   : > { %19048 = vmatprep.subr.bf16.mxu1 %v26546_v15 }
0x1235   : > { %19049 = vmatpush3.bf16.msra.mxu1 %v24909_v23  ;;  %v20680_v23 = vld [vmem:[%s26637_s10 + $0x60] sm:$0xff]  }
0x1236   : > { %19050 = vmatprep.subr.bf16.mxu1 %v26546_v15 }
0x1239   : > { %19051 = vmatpush3.bf16.msra.mxu1 %v24914_v46 }
0x123a   : > { %19052 = vmatprep.subr.bf16.mxu1 %v26546_v15 }
0x123d   : > { %19053 = vmatpush3.bf16.msra.mxu1 %v24920_v17 }
0x123e   : > { %19138 = vmatprep.subr.bf16.mxu1 %v26546_v15 }
0x1240   : > { %19055 = vmatmul.mubr.bf16.vlgmr.msra.gmra.mrb[72].mxu1 %v25090_v1  ;;  %v20689_v1 = vld [vmem:[%s26637_s10 + $0xc8] sm:$0xff]  }
0x1241   : > { %19139 = vmatpush3.bf16.msra.mxu1 %v20672_v26  ;;  %19154 = vmatprep.mubr.msk.bf16.mxu1 %vm21099_vm3, %v26546_v15  ;;  %v20723_v26 = vld [vmem:[%s26640_s25 + $0x48] ss:$12 sps:$4 sm:$0xff]  }
0x1242   : > { %19140 = vmatprep.subr.bf16.mxu1 %v26546_v15 }
0x1245   : > { %19141 = vmatpush3.bf16.msra.mxu1 %v20674_v53  ;;  %v20729_v53 = vld [vmem:[%s26640_s25 + $0x64] ss:$12 sps:$4 sm:$0xff]  }
0x1246   : > { %19142 = vmatprep.subr.bf16.mxu1 %v26546_v15 }
0x1249   : > { %19143 = vmatpush3.bf16.msra.mxu1 %v20676_v13  ;;  %v20727_v13 = vld [vmem:[%s26640_s25 + $0x60] ss:$12 sps:$4 sm:$0xff]  }
0x124a   : > { %19144 = vmatprep.subr.bf16.mxu1 %v26546_v15 }
0x124d   : > { %19145 = vmatpush3.bf16.msra.mxu1 %v20678_v60  ;;  %v20733_v60 = vld [vmem:[%s26640_s25 + $0x7c] ss:$12 sps:$4 sm:$0xff]  }
0x124e   : > { %19146 = vmatprep.subr.bf16.mxu1 %v26546_v15 }
0x1251   : > { %19147 = vmatpush3.bf16.msra.mxu1 %v20680_v23  ;;  %v20731_v23 = vld [vmem:[%s26640_s25 + $0x78] ss:$12 sps:$4 sm:$0xff]  }
0x1252   : > { %19148 = vmatprep.subr.bf16.mxu1 %v26546_v15 }
0x1255   : > { %19149 = vmatpush3.bf16.msra.mxu1 %v20682_v31 }
0x1256   : > { %19150 = vmatprep.subr.bf16.mxu1 %v26546_v15 }
0x1259   : > { %19151 = vmatpush3.bf16.msra.mxu1 %v20684_v29 }
0x125a   : > { %19152 = vmatprep.subr.bf16.mxu1 %v26546_v15 }
0x125d   : > { %19153 = vmatpush3.bf16.msra.mxu1 %v20686_v45 }
0x125e   : > { %19178 = vmatprep.subr.bf16.mxu1 %v26546_v15 }
0x1293   : > { %v12708_v46 = vpop.f32.mrb[68].mxu1 }
0x1294   : > { %v13235_v17 = vrot.slane %v12708_v46, 7  ;;  %v18976_v38 = vpop.f32.mrb[69].mxu1  ;;  %v20737_v46 = vld [vmem:[%s26640_s25 + $0x94] ss:$12 sps:$4 sm:$0xff]  }
0x1295   : > { %v12711_v32 = vpop.f32.mrb[70].mxu1 }
0x1296   : > { %v13243_v48 = vsel %vm26638_vm1, %v25208_v12, %v13235_v17  ;;  %v18977_v44 = vpop.f32.mrb[71].mxu1  ;;  %v20704_v12 = vld [vmem:[%s26639_s2 + $0x8] sm:$0xff]   ;;  %v20735_v17 = vld [vmem:[%s26640_s25 + $0x90] ss:$12 sps:$4 sm:$0xff]  }
0x1313   : > { %v13000_v43 = vpop.f32.mrb[72].mxu1 }
0x1314   : > { %v13238_v39 = vrot.slane %v13000_v43, 6  ;;  %v19056_v11 = vpop.f32.mrb[73].mxu1 }
0x1315   : > { %v13003_v47 = vpop.f32.mrb[74].mxu1 }
0x1316   : > { %v13245_v34 = vsel %vm13244_vm0, %v13243_v48, %v13238_v39  ;;  %v19057_v7 = vpop.f32.mrb[75].mxu1 }
0x1317   : > { %v13246_v8 = vsel %vm10067_vm7, %v13245_v34, %v13241_v33  ;;  %v13255_v7 = vld [vmem:[#allocation13] sm:$0x1] }
0x1318   : > { %v13253_v4 = vadd.f32 %v15936_v57, %v13246_v8 }
0x131a   : > { %v13254_v22 = vmax.f32 %v13253_v4, 0.0 }
0x131c   : > { %v13256_v40 = vpack.c.bf16 %v13254_v22, %v13254_v22 }
0x131e   : > { %19175 = vmatmul.mubr.bf16.vlgmr.msra.gmra.mrb[84].mxu0 %v13256_v40  ;;  %v13291_v14 = vshrl.u32 %v13256_v40, 16  ;;  %v13488_v49 = vrot.slane %v13256_v40, 1 }
0x131f   : > { %19199 = vmatpush3.bf16.msra.mxu0 %v20687_v27  ;;  %19214 = vmatprep.mubr.msk.bf16.mxu0 %vm21099_vm3, %v26546_v15 }
0x1320   : > { %19155 = vmatmul.mubr.bf16.vlgmr.msra.gmra.mrb[76].mxu1 %v13291_v14  ;;  %19200 = vmatprep.subr.bf16.mxu0 %v26546_v15  ;;  %v13596_v51 = vrot.slane %v13291_v14, 1 }
0x1321   : > { %19179 = vmatpush3.bf16.msra.mxu1 %v20688_v9  ;;  %19194 = vmatprep.mubr.msk.bf16.mxu1 %vm21099_vm3, %v26546_v15  ;;  %v20714_v9 = vld [vmem:[%s26640_s25 + $0x8] ss:$12 sps:$4 sm:$0xff]  }
0x1322   : > { %19180 = vmatprep.subr.bf16.mxu1 %v26546_v15 }
0x1323   : > { %19201 = vmatpush3.bf16.msra.mxu0 %v20689_v1  ;;  %v20718_v1 = vld [vmem:[%s26640_s25 + $0x20] ss:$12 sps:$4 sm:$0xff]  }
0x1324   : > { %19202 = vmatprep.subr.bf16.mxu0 %v26546_v15 }
0x1325   : > { %19181 = vmatpush3.bf16.msra.mxu1 %v20690_v37  ;;  %v20722_v37 = vld [vmem:[%s26640_s25 + $0x38] ss:$12 sps:$4 sm:$0xff]  }
0x1326   : > { %19182 = vmatprep.subr.bf16.mxu1 %v26546_v15 }
0x1327   : > { %19203 = vmatpush3.bf16.msra.mxu0 %v20691_v2  ;;  %v20726_v2 = vld [vmem:[%s26640_s25 + $0x50] ss:$12 sps:$4 sm:$0xff]  }
0x1328   : > { %19204 = vmatprep.subr.bf16.mxu0 %v26546_v15 }
0x1329   : > { %19183 = vmatpush3.bf16.msra.mxu1 %v20692_v61  ;;  %v20730_v61 = vld [vmem:[%s26640_s25 + $0x68] ss:$12 sps:$4 sm:$0xff]  }
0x132a   : > { %19184 = vmatprep.subr.bf16.mxu1 %v26546_v15 }
0x132b   : > { %19205 = vmatpush3.bf16.msra.mxu0 %v20693_v55  ;;  %v20734_v55 = vld [vmem:[%s26640_s25 + $0x80] ss:$12 sps:$4 sm:$0xff]  }
0x132c   : > { %19206 = vmatprep.subr.bf16.mxu0 %v26546_v15 }
0x132d   : > { %19185 = vmatpush3.bf16.msra.mxu1 %v20694_v58  ;;  %v20738_v58 = vld [vmem:[%s26640_s25 + $0x98] ss:$12 sps:$4 sm:$0xff]  }
0x132e   : > { %19186 = vmatprep.subr.bf16.mxu1 %v26546_v15 }
0x132f   : > { %19207 = vmatpush3.bf16.msra.mxu0 %v20695_v24  ;;  %v20739_v24 = vld [vmem:[%s26640_s25 + $0xa8] ss:$12 sps:$4 sm:$0xff]  }
0x1330   : > { %19208 = vmatprep.subr.bf16.mxu0 %v26546_v15 }
0x1331   : > { %19187 = vmatpush3.bf16.msra.mxu1 %v20696_v30  ;;  %v20741_v30 = vld [vmem:[%s26640_s25 + $0xac] ss:$12 sps:$4 sm:$0xff]  }
0x1332   : > { %19188 = vmatprep.subr.bf16.mxu1 %v26546_v15 }
0x1333   : > { %19209 = vmatpush3.bf16.msra.mxu0 %v20697_v54  ;;  %v20742_v54 = vld [vmem:[%s26640_s25 + $0xb0] ss:$12 sps:$4 sm:$0xff]  }
0x1334   : > { %19210 = vmatprep.subr.bf16.mxu0 %v26546_v15 }
0x1335   : > { %19189 = vmatpush3.bf16.msra.mxu1 %v20698_v63  ;;  %v21100_v63 = vmov 0  }
0x1336   : > { %19190 = vmatprep.subr.bf16.mxu1 %v26546_v15 }
0x1337   : > { %19211 = vmatpush3.bf16.msra.mxu0 %v20699_v19  ;;  %v13690_v19 = vld [vmem:[%s26642_s7] sm:$0x1]  ;;  %s21101_s7 = smov [#allocation16]  }
0x1338   : > { %19212 = vmatprep.subr.bf16.mxu0 %v26546_v15  ;;  %s20972_s0 = sshll.u32 %s21101_s7, 4  ;;  %s20973_s0 = int_to_ptr.vmem [resolvable:$false] %s20972_s0 }
0x1339   : > { %19191 = vmatpush3.bf16.msra.mxu1 %v20700_v52  ;;  %s20974_s2 = scalar_lea.vmem %s20973_s0, 512 }
0x133a   : > { %19192 = vmatprep.subr.bf16.mxu1 %v26546_v15 }
0x133b   : > { %19213 = vmatpush3.bf16.msra.mxu0 %v20701_v16 }
0x133c   : > { %13975 = vmatprep.subr.bf16.mxu0 %v20713_v6 }
0x133d   : > { %19193 = vmatpush3.bf16.msra.mxu1 %v20702_v36 }
0x133e   : > { %19215 = vmatmul.mubr.bf16.vlgmr.msra.gmra.mrb[88].mxu0 %v13596_v51  ;;  %19218 = vmatprep.subr.bf16.mxu1 %v26546_v15 }
0x133f   : > { %13976 = vmatpush1.bf16.msra.mxu0 %v20711_v50  ;;  %14007 = vmatprep.mubr.bf16.mxu0 %v21100_v63 }
0x1340   : > { %19195 = vmatmul.mubr.bf16.vlgmr.msra.gmra.mrb[80].mxu1 %v13488_v49  ;;  %13977 = vmatprep.subr.bf16.mxu0 %v20717_v25 }
0x1341   : > { %19234 = vmatprep.mubr.msk.bf16.mxu1 %vm21099_vm3, %v26546_v15  ;;  %19219 = vmatpush3.bf16.msra.mxu1 %v20703_v10 }
0x1342   : > { %19220 = vmatprep.subr.bf16.mxu1 %v26546_v15 }
0x1343   : > { %13978 = vmatpush1.bf16.msra.mxu0 %v20715_v0 }
0x1344   : > { %13979 = vmatprep.subr.bf16.mxu0 %v20721_v18 }
0x1345   : > { %19221 = vmatpush3.bf16.msra.mxu1 %v20704_v12 }
0x1346   : > { %19222 = vmatprep.subr.bf16.mxu1 %v26546_v15 }
0x1347   : > { %13980 = vmatpush1.bf16.msra.mxu0 %v20719_v56 }
0x1348   : > { %13981 = vmatprep.subr.bf16.mxu0 %v20725_v3 }
0x1349   : > { %19223 = vmatpush3.bf16.msra.mxu1 %v20705_v28 }
0x134a   : > { %19224 = vmatprep.subr.bf16.mxu1 %v26546_v15 }
0x134b   : > { %13982 = vmatpush1.bf16.msra.mxu0 %v20723_v26 }
0x134c   : > { %13983 = vmatprep.subr.bf16.mxu0 %v20729_v53 }
0x134d   : > { %19225 = vmatpush3.bf16.msra.mxu1 %v20706_v5 }
0x134e   : > { %19226 = vmatprep.subr.bf16.mxu1 %v26546_v15 }
0x134f   : > { %13984 = vmatpush1.bf16.msra.mxu0 %v20727_v13 }
0x1350   : > { %13985 = vmatprep.subr.bf16.mxu0 %v20733_v60 }
0x1351   : > { %19227 = vmatpush3.bf16.msra.mxu1 %v20707_v41 }
0x1352   : > { %19228 = vmatprep.subr.bf16.mxu1 %v26546_v15 }
0x1353   : > { %13986 = vmatpush1.bf16.msra.mxu0 %v20731_v23 }
0x1354   : > { %13987 = vmatprep.subr.bf16.mxu0 %v20737_v46 }
0x1355   : > { %19229 = vmatpush3.bf16.msra.mxu1 %v20708_v42 }
0x1356   : > { %19230 = vmatprep.subr.bf16.mxu1 %v26546_v15 }
0x1357   : > { %13988 = vmatpush1.bf16.msra.mxu0 %v20735_v17 }
0x1358   : > { %13989 = vmatprep.subr.bf16.mxu0 %v20741_v30 }
0x1359   : > { %19231 = vmatpush3.bf16.msra.mxu1 %v20709_v21 }
0x135a   : > { %19232 = vmatprep.subr.bf16.mxu1 %v26546_v15 }
0x135b   : > { %13990 = vmatpush1.bf16.msra.mxu0 %v20739_v24 }
0x135d   : > { %19233 = vmatpush3.bf16.msra.mxu1 %v20710_v20 }
0x135e   : > { %19238 = vmatprep.subr.bf16.mxu1 %v26546_v15 }
0x13f1   : > { %v13464_v38 = vpop.f32.mrb[84].mxu0 }
0x13f2   : > { %v19176_v32 = vpop.f32.mrb[85].mxu0 }
0x13f3   : > { %v13376_v48 = vpop.f32.mrb[76].mxu1  ;;  %v13467_v44 = vpop.f32.mrb[86].mxu0 }
0x13f4   : > { %v13465_v31 = vadd.f32 %v13464_v38, %v13376_v48  ;;  %v19156_v62 = vpop.f32.mrb[77].mxu1  ;;  %v19177_v29 = vpop.f32.mrb[87].mxu0 }
0x13f5   : > { %v13379_v35 = vpop.f32.mrb[78].mxu1 }
0x13f6   : > { %v19157_v45 = vpop.f32.mrb[79].mxu1 }
0x1411   : > { %v13680_v43 = vpop.f32.mrb[88].mxu0 }
0x1412   : > { %v19216_v39 = vpop.f32.mrb[89].mxu0 }
0x1413   : > { %v13572_v11 = vpop.f32.mrb[80].mxu1  ;;  %v13683_v33 = vpop.f32.mrb[90].mxu0 }
0x1414   : > { %v13578_v57 = vadd.f32 %v13572_v11, %v13465_v31  ;;  %v19196_v47 = vpop.f32.mrb[81].mxu1  ;;  %v19217_v34 = vpop.f32.mrb[91].mxu0 }
0x1415   : > { %v13575_v8 = vpop.f32.mrb[82].mxu1 }
0x1416   : > { %v13686_v4 = vadd.f32 %v13680_v43, %v13578_v57  ;;  %v19197_v22 = vpop.f32.mrb[83].mxu1 }
0x1418   : > { %v13687_v27 = vadd.f32 %v13686_v4, %v13255_v7 }
0x141a   : > { %v13688_v40 = vmax.f32 %v13687_v27, 0.0 }
0x141c   : > { %13689 = vst [vmem:[%s993_s9] sm:$0x1] %v13688_v40  ;;  %v13691_v14 = vpack.c.bf16 %v13688_v40, %v13688_v40  ;;  %s14125_s9 = sshll.u32 %s24513_s1, 4  ;;  %s25504_s9 = int_to_ptr.vmem [resolvable:$true] %s14125_s9 }
0x141d   : > { %s20968_s17 = scalar_lea.vmem %s25504_s9, 256  ;;  %p20975_p0 = scmp.lt.s32.totalorder %s25504_s9, %s20973_s0 }
0x141e   : > { %19235 = vmatmul.mubr.bf16.vlgmr.msra.gmra.mrb[84].mxu1 %v13691_v14  ;;  %p20969_p6 = scmp.ne.s32.totalorder %s25504_s9, %s20968_s17  ;;  %p20976_p2 = scmp.lt.s32.totalorder %s20974_s2, %s20968_s17 }
0x141f   : > { %19239 = vmatpush3.bf16.msra.mxu1 %v20714_v9  ;;  %19254 = vmatprep.mubr.msk.bf16.mxu1 %vm21099_vm3, %v26546_v15 }
0x1420   : > { %19240 = vmatprep.subr.bf16.mxu1 %v26546_v15  ;;  %p20970_p5 = pnand %p20969_p6, %p26645_p9  ;;  %p20977_p3 = por %p20976_p2, %p20975_p0 }
0x1422   : > { %p20971_p10 = pneg %p20970_p5 }
0x1423   : > { %19241 = vmatpush3.bf16.msra.mxu1 %v20718_v1 }
0x1424   : > { %19242 = vmatprep.subr.bf16.mxu1 %v26546_v15  ;;  %p20978_p4 = pnand %p20977_p3, %p20971_p10 }
0x1427   : > { %19243 = vmatpush3.bf16.msra.mxu1 %v20722_v37 }
0x1428   : > { %19244 = vmatprep.subr.bf16.mxu1 %v26546_v15 }
0x142b   : > { %19245 = vmatpush3.bf16.msra.mxu1 %v20726_v2 }
0x142c   : > { %19246 = vmatprep.subr.bf16.mxu1 %v26546_v15 }
0x142f   : > { %19247 = vmatpush3.bf16.msra.mxu1 %v20730_v61 }
0x1430   : > { %19248 = vmatprep.subr.bf16.mxu1 %v26546_v15 }
0x1433   : > { %19249 = vmatpush3.bf16.msra.mxu1 %v20734_v55 }
0x1434   : > { %19250 = vmatprep.subr.bf16.mxu1 %v26546_v15 }
0x1437   : > { %19251 = vmatpush3.bf16.msra.mxu1 %v20738_v58 }
0x1438   : > { %19252 = vmatprep.subr.bf16.mxu1 %v26546_v15 }
0x143b   : > { %19253 = vmatpush3.bf16.msra.mxu1 %v20742_v54 }
0x14f1   : > { %v13790_v52 = vpop.f32.mrb[84].mxu1 }
0x14f2   : > { %v13791_v16 = vadd.f32 %v13790_v52, %v13690_v19  ;;  %v19236_v36 = vpop.f32.mrb[85].mxu1 }
0x14f3   : > { %v13793_v51 = vpop.f32.mrb[86].mxu1 }
0x14f4   : > { %v13796_v49 = vmax.f32 %v13791_v16, 0.0  ;;  %v19237_v10 = vpop.f32.mrb[87].mxu1 }
0x14f6   : > { %v13798_v12 = vpack.c.bf16 %v13796_v49, %v13796_v49 }
0x14f8   : > { %14008 = vmatmul.mubr.bf16.vlgmr.msra.gmra.mrb[92].mxu0 %v13798_v12  ;;  %19255 = vmatmul.mubr.bf16.vlgmr.msra.gmra.mrb[88].mxu1 %v13798_v12 }
0x14f9   : > { %20981 = shalt.err (!%p20978_p4)
}
0x14fa   : > { %s20982_s1 = scalar_lea.hbm %s25501_s19, 256  ;;  %s20986_s11 = scalar_lea.hbm %s26644_s4, 512 }
0x14fb   : > { %p20983_p12 = scmp.ne.s32.totalorder %s25501_s19, %s20982_s1  ;;  %p20987_p11 = scmp.lt.u32.totalorder %s25501_s19, %s26644_s4 }
0x14fc   : > { %p20988_p13 = scmp.lt.u32.totalorder %s20986_s11, %s20982_s1  ;;  %p20990_p6 = scmp.lt.u32.totalorder %s20982_s1, %s25501_s19 }
0x14fd   : > { %p20984_p7 = pnand %p20983_p12, %p26645_p9 }
0x14fe   : > { %p20989_p1 = por %p20988_p13, %p20987_p11 }
0x14ff   : > { %p20985_p8 = pneg %p20984_p7 }
0x1500   : > { %p20991_p5 = por %p20990_p6, %p20989_p1 }
0x1502   : > { %p20992_p10 = pnand %p20991_p5, %p20985_p8 }
0x1504   : > { %20995 = shalt.err (!%p20992_p10)
}
0x1505   : > { %s21102_s2 = smov 128   ;;  %s21103_s17 = smov 8  }
0x1506   : > { %20062 = dma.vmem_to_hbm [thread:$0]  (%p26645_p9), %s25504_s9, 256, %s25501_s19, %s14097_s12, %s21102_s2, %s21102_s2, %s21103_s17  }
0x1507   : > { %s16053_s29 = sshll.u32 %s21272_s3, 6  ;;  %s14141_s8 = sshll.u32 %s24934_s30, 4  ;;  %s14142_s8 = int_to_ptr.vmem [resolvable:$true] %s14141_s8 }
0x1508   : > { %s26646_s7 = sld [smem:[#allocation110_spill]]  ;;  %s14102_s4 = scalar_lea.sflag [#allocation18], %s24487_s6 }
0x1509   : > { %s20996_s10 = scalar_lea.vmem %s14142_s8, 64  ;;  %s21104_s13 = smov [#allocation17]  }
0x150a   : > { %p20997_p0 = scmp.ne.s32.totalorder %s14142_s8, %s20996_s10  ;;  %s21000_s14 = sshll.u32 %s21104_s13, 4  ;;  %s21001_s14 = int_to_ptr.vmem [resolvable:$false] %s21000_s14 }
0x150b   : > { %s21002_s15 = scalar_lea.vmem %s21001_s14, 128  ;;  %p21003_p4 = scmp.lt.s32.totalorder %s14142_s8, %s21001_s14 }
0x150c   : > { %p20998_p2 = pnand %p20997_p0, %p26645_p9  ;;  %p21004_p12 = scmp.lt.s32.totalorder %s21002_s15, %s20996_s10 }
0x150e   : > { %s25535_s0 = scalar_lea.hbm %s26646_s7, %s16053_s29  ;;  %p20999_p3 = pneg %p20998_p2 }
0x150f   : > { %p21005_p7 = por %p21004_p12, %p21003_p4 }
0x1511   : > { %p21006_p8 = pnand %p21005_p7, %p20999_p3 }
0x1513   : > { %21009 = shalt.err (!%p21006_p8)
}
0x1514   : > { %s21010_s3 = scalar_lea.hbm %s25535_s0, 64  ;;  %s21014_s13 = scalar_lea.hbm %s26646_s7, 128 }
0x1515   : > { %p21011_p11 = scmp.ne.s32.totalorder %s25535_s0, %s21010_s3  ;;  %p21015_p6 = scmp.lt.u32.totalorder %s25535_s0, %s26646_s7 }
0x1516   : > { %p21016_p5 = scmp.lt.u32.totalorder %s21014_s13, %s21010_s3  ;;  %p21018_p0 = scmp.lt.u32.totalorder %s21010_s3, %s25535_s0 }
0x1517   : > { %p21012_p13 = pnand %p21011_p11, %p26645_p9 }
0x1518   : > { %p21017_p10 = por %p21016_p5, %p21015_p6 }
0x1519   : > { %p21013_p1 = pneg %p21012_p13 }
0x151a   : > { %p21019_p2 = por %p21018_p0, %p21017_p10 }
0x151c   : > { %p21020_p3 = pnand %p21019_p2, %p21013_p1 }
0x151e   : > { %21023 = shalt.err (!%p21020_p3)
}
0x151f   : > { %20063 = dma.vmem_to_hbm [thread:$0]  (%p26645_p9), %s14142_s8, 64, %s25535_s0, %s14102_s4   ;;  %v13962_v15 = vsub.s32 0, %v26556_v59  ;;  %v13970_v28 = vsub.s32 2, %v26556_v59  ;;  %v13966_v41 = vsub.s32 1, %v26556_v59  ;;  %v21105_v42 = vmov 1966171168  }
0x1520   : > { %s26647_s9 = sld [smem:[#allocation108_spill]]  ;;  %v14064_v21 = vunpack.c.l.s4 %v21105_v42  ;;  %s20029_s28 = smul.u32 3, %s21520_s26  ;;  %v26649_v45 = vlaneseq }
0x1521   : > { %s26648_s2 = sld [smem:[#allocation112_spill]] }
0x1522   : > { %v14065_v18 = vunpack.c.0.s8 %v14064_v21  ;;  %vm14088_vm3 = vcmp.lt.s32.totalorder %v26649_v45, 384 }
0x1524   : > { %v14068_v48 = vsub.s32 %v14065_v18, %v26556_v59 }
0x1526   : > { %v13797_v5 = vld [vmem:[%s26647_s9] sm:$0x7] }
0x1527   : > { %v13963_v20 = vrot.slane %v13797_v5, %v13962_v15  ;;  %v13971_v50 = vrot.slane %v13797_v5, %v13970_v28  ;;  %v13967_v6 = vrot.slane %v13797_v5, %v13966_v41  ;;  %s997_s17 = scalar_lea.vmem %s26648_s2, %s20029_s28 }
0x15cb   : > { %v14009_v25 = vpop.f32.mrb[92].mxu0  ;;  %v14050_v0 = vpop.f32.mrb[88].mxu1 }
0x15cc   : > { %v14010_v56 = vadd.f32 %v14009_v25, %v13963_v20  ;;  %v14051_v3 = vadd.f32 %v14050_v0, %v13971_v50  ;;  %v14011_v26 = vpop.f32.mrb[93].mxu0  ;;  %v19256_v53 = vpop.f32.mrb[89].mxu1 }
0x15cd   : > { %v14012_v13 = vadd.f32 %v14011_v26, %v13967_v6  ;;  %v14013_v60 = vpop.f32.mrb[94].mxu0  ;;  %v14053_v23 = vpop.f32.mrb[90].mxu1 }
0x15ce   : > { %v14056_v46 = vmax.f32 %v14010_v56, 0.0  ;;  %v14014_v17 = vpop.f32.mrb[95].mxu0  ;;  %v19257_v38 = vpop.f32.mrb[91].mxu1  ;;  %v14058_v32 = vmax.f32 %v14051_v3, 0.0 }
0x15cf   : > { %v14057_v44 = vmax.f32 %v14012_v13, 0.0 }
0x15d0   : > { %v14076_v62 = vrot.slane %v14058_v32, %v14068_v48 }
0x15d1   : > { %v14062_v31 = vcombine.low %v14056_v46, %v14057_v44 }
0x15d3   : > { %v14069_v29 = vrot.slane %v14062_v31, %v14068_v48 }
0x15d5   : > { %v14077_v35 = vcombine.low %v14069_v29, %v14076_v62 }
0x15d7   : > { %v14084_v43 = vrot.slane %v14077_v35, %v14068_v48 }
0x15d9   : > { %14090 = vst.msk [vmem:[%s997_s17] sm:$0x7] %vm14088_vm3, %v14084_v43 }
0x15da PF: > { %s26650_s29 = sld [smem:[#allocation28_spill]]  ;;  %s26651_s8 = sld [smem:[#allocation26_spill]] }
0x15db   : > { %s26652_s11 = sld [smem:[#allocation32_spill]] }
0x15e0   : > { %p20114_p9 = scmp.ge.s32.totalorder %s26650_s29, 2  ;;  %s14167_s1 = sand.u32 1, %s26651_s8  }
0x15e1   : > { %p26653_p4 = scmp.ne.s32.totalorder %s26652_s11, 0  ;;  %s14168_s26 = scalar_lea.sflag [#allocation4], %s14167_s1 }
0x15e3   : > { %p20092_p12 = pnand %p20114_p9, %p26653_p4 }
0x15e5   : > { %21061 = dma.done.wait (!%p20092_p12), %s14168_s26, 256  }
0x15e6   : > { %21063 = vsyncadd (!%p20092_p12), %s14168_s26, 4294967040  ;;  %s14177_s0 = scalar_lea.sflag [#allocation18], %s14167_s1 }
0x15e7   : > { %21065 = dma.done.wait (!%p20092_p12), %s14177_s0, 64  }
0x15e8   : > { %21067 = vsyncadd (!%p20092_p12), %s14177_s0, 4294967232  ;;  %s26654_s30 = sld [smem:[#allocation29_spill]]  ;;  %s26655_s3 = sld [smem:[#allocation27_spill]] }
0x15e9   : > { %s26656_s9 = sld [smem:[#allocation30_spill]]  ;;  %s26657_s8 = smov %s21074_s5 }
0x15ee   : > { %p47_p7 = scmp.ge.s32.totalorder %s26654_s30, 4   ;;  %s26658_s5 = smov %s26655_s3 }
0x15f0   :  { %49 = sbr.rel (!%p47_p7) target bundleno = 35 (0x23), region = 296 }
0x15f7   :  { %14195 = vsyncpa [#allocation3], 1 }
0x15f8   :  { %14197 = vsyncpa [#allocation3 + $0x1], 1 }
0x15f9   :  { %14198 = vsyncpa [#allocation6], 1 }
0x15fa   :  { %14199 = vsyncpa [#allocation9], 1 }
0x15fb   :  { %14200 = vsyncpa [#allocation12], 1 }
0x15fc   :  { %14201 = vsyncpa [#allocation15], 1 }
0x15fd   :  { %14202 = vsyncpa [#allocation4], 1 }
0x15fe   :  { %14204 = vsyncpa [#allocation4 + $0x1], 1 }
0x15ff   :  { %14205 = vsyncpa [#allocation18], 1 }
0x1600   :  { %14207 = vsyncpa [#allocation18 + $0x1], 1 }

</bundles_post_ra>
